<compile_context>
chip_gen: v7x
topology: tpu7x:2x2x1
jax: 0.10.0
libtpu: 0.0.40
codegen_flags: <defaults>
</compile_context>

<pallas_src>
import math

import numpy as np
import jax
import jax.numpy as jnp
from jax import lax
from jax.experimental import pallas as pl
from jax.experimental.pallas import tpu as pltpu

# ----------------------------- small config --------------------------------
B = 2
AUDIO_LEN = 330
CONV_FEATURES_SMALL = [(32, 10, 5), (32, 3, 2), (32, 2, 2)]
D_MODEL = 32
NUM_HEADS = 2
NUM_LAYERS = 1
D_FF = 4 * D_MODEL
FINAL_DIM = 16
NUM_VQ_VARS = 8
NUM_VQ_GROUPS = 2
VAR_DIM = FINAL_DIM // NUM_VQ_GROUPS
CONV_POS_KERNEL = 128
CONV_POS_GROUPS = 16
GIN = D_MODEL // CONV_POS_GROUPS
TIMESTEP_MASKING = 0.65
TIMESTEP_MASK_LEN = 10
LN_EPS = 1e-5
GN_EPS = 1e-5
PDROP = 0.1

C0, K0, S0 = CONV_FEATURES_SMALL[0]
C1, K1, S1 = CONV_FEATURES_SMALL[1]
C2, K2, S2 = CONV_FEATURES_SMALL[2]

NBLK = AUDIO_LEN // S0                      # 66 audio blocks of S0 samples
K0_BLOCKS = K0 // S0                        # 2 (kernel spans 2 blocks)
T1 = (AUDIO_LEN - K0) // S0 + 1             # 65
T2 = (T1 - K1) // S1 + 1                    # 32
T_OUT = (T2 - K2) // S2 + 1                 # 16
T1P = ((T1 + 7) // 8) * 8                   # 72 (sublane-aligned padding)
BT1P = B * T1P
BT2 = B * T2
BT = B * T_OUT
TD = T_OUT * D_MODEL                        # 512
DH = D_MODEL // NUM_HEADS
ATT_SCALE = 1.0 / math.sqrt(DH)


# ----------------------------- in-kernel helpers ----------------------------
def _erf(x):
    # Abramowitz & Stegun 7.1.26 (max abs err ~1.5e-7); avoids relying on a
    # native erf lowering.  Uses only exp / mul / add / div / where.
    a1, a2, a3, a4, a5 = (0.254829592, -0.284496736, 1.421413741,
                          -1.453152027, 1.061405429)
    p = 0.3275911
    ax = jnp.abs(x)
    t = 1.0 / (1.0 + p * ax)
    poly = ((((a5 * t + a4) * t + a3) * t + a2) * t + a1) * t
    y = 1.0 - poly * jnp.exp(-ax * ax)
    return jnp.where(x >= 0, y, -y)


def _gelu(x):
    # exact (erf based) GELU, matching torch.nn.GELU default
    return 0.5 * x * (1.0 + _erf(x * 0.7071067811865476))


def _ln(x, g, b, eps=LN_EPS):
    mu = jnp.mean(x, axis=-1, keepdims=True)
    var = jnp.mean((x - mu) ** 2, axis=-1, keepdims=True)
    return (x - mu) * lax.rsqrt(var + eps) * g + b


# ----------------------------- the fused kernel -----------------------------
def _fused_kernel(
    # frontend
    blocks_ref, w1_ref, gng_ref, gnb_ref, sel2_ref, w2_ref, sel3_ref, w3_ref,
    lng_ref, lnb_ref, wi_ref, bi_ref, memb_ref, mvec_ref,
    # positional conv
    posw_ref, posb_ref,
    # encoder
    eg_ref, eb_ref, wqkv_ref, bqkv_ref, wo_ref, bo_ref,
    l1g_ref, l1b_ref, wff1_ref, bff1_ref, wff2_ref, bff2_ref,
    l2g_ref, l2b_ref, wf_ref, bf_ref, attnb_ref, perm_ref,
    # quantizer
    sely_ref, wvq_ref, bvq_ref, cop_ref, bq_ref,
    # outputs
    xo_ref, yq_ref, ppl_ref,
    # scratch
    h1_s, rows_s,
):
    f32 = jnp.float32

    # ---- conv1 (k=10, s=5) + GroupNorm(C,C) + GELU, per batch -------------
    # Pad rows (per-batch 65 -> 72) are zeroed so the 0/1 selection matmuls
    # below stay NaN-free.
    h1_s[...] = jnp.zeros_like(h1_s)
    for b in range(B):
        acc1 = None
        for u in range(K0_BLOCKS):
            pa = blocks_ref[b * NBLK + u: b * NBLK + u + T1, :]        # (T1,S0)
            w1u = w1_ref[u * S0:(u + 1) * S0, :]                       # (S0,C0)
            term = jnp.dot(pa, w1u, preferred_element_type=f32)
            acc1 = term if acc1 is None else acc1 + term               # (T1,C0)
        mu = jnp.mean(acc1, axis=0, keepdims=True)
        var = jnp.mean((acc1 - mu) ** 2, axis=0, keepdims=True)
        h1n = (acc1 - mu) * lax.rsqrt(var + GN_EPS) * gng_ref[...] + gnb_ref[...]
        h1_s[b * T1P: b * T1P + T1, :] = _gelu(h1n)
    h1 = h1_s[...]                                                     # (BT1P,C0)

    # ---- conv2 (k=3, s=2), batch folded: 1 selection dot + k weight dots ---
    p2 = jnp.dot(sel2_ref[...], h1, preferred_element_type=f32)        # (K1*BT2,C0)
    h2 = None
    for j in range(K1):
        t = jnp.dot(p2[j * BT2:(j + 1) * BT2, :], w2_ref[j],
                    preferred_element_type=f32)                        # (BT2,C1)
        h2 = t if h2 is None else h2 + t
    h2 = _gelu(h2)

    # ---- conv3 (k=2, s=2) ---------------------------------------------------
    p3 = jnp.dot(sel3_ref[...], h2, preferred_element_type=f32)        # (K2*BT,C1)
    h3 = None
    for j in range(K2):
        t = jnp.dot(p3[j * BT:(j + 1) * BT, :], w3_ref[j],
                    preferred_element_type=f32)                        # (BT,C2)
        h3 = t if h3 is None else h3 + t
    h3 = _gelu(h3)                                                     # rows (t,b)

    # ---- front LayerNorm (unmasked features), proj_to_input, mask blend ----
    feat = _ln(h3, lng_ref[...], lnb_ref[...])                         # (BT,C2)
    proj = jnp.dot(feat, wi_ref[...], preferred_element_type=f32) + bi_ref[...]
    m = mvec_ref[...]                                                  # (BT,1)
    masked = proj * (1.0 - m) + memb_ref[...] * m                      # (BT,D)

    # ---- grouped positional conv as a dense (T*D, T*D) operator ------------
    # Operator rows for input timestep t are consumed as aligned row blocks;
    # bf16 operands on the MXU, f32 accumulation.
    rows_s[...] = masked                    # stage for per-timestep row reads
    acc = jnp.zeros((B, TD), f32) + posb_ref[...]
    for t in range(T_OUT):
        acc = acc + jnp.dot(
            rows_s[t * B:(t + 1) * B, :].astype(jnp.bfloat16),
            posw_ref[t * D_MODEL:(t + 1) * D_MODEL, :],
            preferred_element_type=f32)                                # (B,TD)
    pos = _gelu(acc)
    for t in range(T_OUT):                  # un-flatten back to (t,b) rows
        rows_s[t * B:(t + 1) * B, :] = pos[:, t * D_MODEL:(t + 1) * D_MODEL]
    x_conv = rows_s[...]                                               # (BT,D)

    # ---- transformer encoder (post-LN), batch folded, fused QKV ------------
    h = _ln(masked + x_conv, eg_ref[...], eb_ref[...])
    ab = attnb_ref[...]                     # 0 within batch, -1e9 across
    for layer in range(NUM_LAYERS):
        qkv = jnp.dot(h, wqkv_ref[layer],
                      preferred_element_type=f32) + bqkv_ref[layer]    # (BT,3D)
        attn = bo_ref[layer]
        for hd in range(NUM_HEADS):
            q = qkv[:, hd * DH:(hd + 1) * DH]
            k = qkv[:, D_MODEL + hd * DH: D_MODEL + (hd + 1) * DH]
            v = qkv[:, 2 * D_MODEL + hd * DH: 2 * D_MODEL + (hd + 1) * DH]
            s = lax.dot_general(q, k, (((1,), (1,)), ((), ())),
                                preferred_element_type=f32) * ATT_SCALE + ab
            mx = jnp.max(s, axis=-1, keepdims=True)
            e = jnp.exp(s - mx)
            pr = e * pl.reciprocal(jnp.sum(e, axis=-1, keepdims=True),
                                   approx=True)
            o_h = jnp.dot(pr, v, preferred_element_type=f32)           # (BT,DH)
            attn = attn + jnp.dot(o_h, wo_ref[layer * NUM_HEADS + hd],
                                  preferred_element_type=f32)
        h = _ln(h + attn, l1g_ref[layer], l1b_ref[layer])
        ff = _gelu(jnp.dot(h, wff1_ref[layer],
                           preferred_element_type=f32) + bff1_ref[layer])
        ff = jnp.dot(ff, wff2_ref[layer],
                     preferred_element_type=f32) + bff2_ref[layer]
        h = _ln(h + ff, l2g_ref[layer], l2b_ref[layer])

    # ---- final_proj; permute rows from (t,b) back to (b,t) ------------------
    xo = jnp.dot(h, wf_ref[...], preferred_element_type=f32) + bf_ref[...]
    xo_ref[...] = jnp.dot(perm_ref[...], xo, preferred_element_type=f32)

    # ---- quantizer (eval / hard argmax) + project_q -------------------------
    y = jnp.dot(sely_ref[...], feat, preferred_element_type=f32)       # (NY,C2)
    logits = jnp.dot(y, wvq_ref[...],
                     preferred_element_type=f32) + bvq_ref[...]        # (NY,G*V)
    n = logits.shape[0]
    iota_v = lax.broadcasted_iota(jnp.int32, (n, NUM_VQ_VARS), 1)
    iota_full = lax.broadcasted_iota(
        jnp.int32, (n, NUM_VQ_GROUPS * NUM_VQ_VARS), 1)
    probs_sum = jnp.zeros((1, NUM_VQ_VARS), f32)
    target = jnp.zeros((n, NUM_VQ_GROUPS * NUM_VQ_VARS), jnp.int32)
    for g in range(NUM_VQ_GROUPS):
        lg = logits[:, g * NUM_VQ_VARS:(g + 1) * NUM_VQ_VARS]          # (NY,V)
        mg = jnp.max(lg, axis=-1, keepdims=True)
        e = jnp.exp(lg - mg)
        pr = e * pl.reciprocal(jnp.sum(e, axis=-1, keepdims=True), approx=True)
        probs_sum = probs_sum + jnp.sum(pr, axis=0, keepdims=True)
        # tie-safe first-argmax index of this group
        kg = jnp.min(jnp.where(lg >= mg, iota_v, NUM_VQ_VARS),
                     axis=-1, keepdims=True)                           # (NY,1)
        in_g = jnp.logical_and(iota_full >= g * NUM_VQ_VARS,
                               iota_full < (g + 1) * NUM_VQ_VARS)
        target = jnp.where(in_g, kg + g * NUM_VQ_VARS, target)
    onehot = (iota_full == target).astype(f32)                         # (NY,G*V)
    yq_ref[...] = jnp.dot(onehot, cop_ref[...],
                          preferred_element_type=f32) + bq_ref[...]
    avg = probs_sum * (1.0 / float(n * NUM_VQ_GROUPS))
    ent = jnp.sum(avg * jnp.log(avg + 1e-7), axis=-1, keepdims=True)   # (1,1)
    ppl_ref[...] = jnp.exp(-ent)


# ----------------------------- masking (host-side, like reference) ----------
def create_mask(shape, p_start=0.65, mask_length=10):
    bsz, input_length = shape
    mask = np.full((bsz, input_length), False)
    num_mask = int(p_start * input_length / float(mask_length) + np.random.rand())
    if num_mask == 0:
        return mask
    mask_idcs = []
    for _ in range(bsz):
        sz = input_length
        lengths = np.full(num_mask, mask_length)
        min_len = min(lengths)
        if sz - min_len <= num_mask:
            min_len = sz - num_mask - 1
        mask_idc = np.random.choice(sz - min_len, num_mask, replace=False)
        mask_idc = np.asarray([mask_idc[j] + offset
                               for j in range(len(mask_idc))
                               for offset in range(lengths[j])])
        mask_idcs.append(np.unique(mask_idc[mask_idc < sz]))
    ls = [len(m) for m in mask_idcs]
    min_len = min(ls)
    for i, mask_idc in enumerate(mask_idcs):
        if len(mask_idc) > min_len:
            mask_idc = np.random.choice(mask_idc, min_len, replace=False)
        mask[i, mask_idc] = True
    return mask


# ----------------------------- host-side parameter / operand build ----------
def build_inputs(key, time_mask_np):
    ks = iter(jax.random.split(key, 32))

    def nrm(shape, std):
        return jax.random.normal(next(ks), shape, jnp.float32) * std

    # conv feature extractor weights (torch layout (out, in, k) -> right-mult)
    w1_t = nrm((C0, 1, K0), math.sqrt(2.0 / (1 * K0)))
    w1 = jnp.transpose(w1_t[:, 0, :])                                   # (K0,C0)
    gng = jnp.ones((1, C0), jnp.float32)
    gnb = jnp.zeros((1, C0), jnp.float32)
    w2_t = nrm((C1, C0, K1), math.sqrt(2.0 / (C0 * K1)))
    w2 = jnp.stack([w2_t[:, :, j].T for j in range(K1)])                # (K1,C0,C1)
    w3_t = nrm((C2, C1, K2), math.sqrt(2.0 / (C1 * K2)))
    w3 = jnp.stack([w3_t[:, :, j].T for j in range(K2)])                # (K2,C1,C2)

    # 0/1 selection matrices implementing the strided convs on the MXU,
    # batch folded into rows (conv2 rows (b,t2); conv3 rows (t,b)).
    sel2 = np.zeros((K1 * BT2, BT1P), np.float32)
    for j in range(K1):
        for b in range(B):
            for t in range(T2):
                sel2[j * BT2 + b * T2 + t, b * T1P + S1 * t + j] = 1.0
    sel3 = np.zeros((K2 * BT, BT2), np.float32)
    for j in range(K2):
        for b in range(B):
            for t in range(T_OUT):
                sel3[j * BT + t * B + b, b * T2 + S2 * t + j] = 1.0

    lng = jnp.ones((1, C2), jnp.float32)
    lnb = jnp.zeros((1, C2), jnp.float32)
    wi = nrm((C2, D_MODEL), 0.02)
    bi = jnp.zeros((1, D_MODEL), jnp.float32)
    memb = jax.random.uniform(next(ks), (1, D_MODEL), jnp.float32)

    # time mask as an f32 column vector in (t,b) row order
    mvec = np.zeros((BT, 1), np.float32)
    for b in range(B):
        for t in range(T_OUT):
            mvec[t * B + b, 0] = 1.0 if time_mask_np[b, t] else 0.0

    # dense block-Toeplitz positional-conv operator (interleaved (t,d) layout)
    Kp = CONV_POS_KERNEL
    std = math.sqrt(4 * (1.0 - PDROP) / (Kp * D_MODEL))
    w_pos = np.asarray(nrm((D_MODEL, GIN, Kp), std))
    start_pad = Kp // 2 - 1 if Kp % 2 == 0 else Kp // 2
    posw = np.zeros((TD, TD), np.float32)
    for t_out in range(T_OUT):
        for s_in in range(T_OUT):
            j = start_pad + s_in - t_out
            if 0 <= j < Kp:
                for g in range(CONV_POS_GROUPS):
                    blk = w_pos[g * GIN:(g + 1) * GIN, :, j]             # (out,in)
                    posw[s_in * D_MODEL + g * GIN: s_in * D_MODEL + (g + 1) * GIN,
                         t_out * D_MODEL + g * GIN: t_out * D_MODEL + (g + 1) * GIN] = blk.T
    posw = jnp.asarray(posw, jnp.bfloat16)        # largest buffer -> bf16 MXU operand
    posb = jnp.zeros((1, TD), jnp.float32)

    # transformer encoder
    eg = jnp.ones((1, D_MODEL), jnp.float32)
    eb = jnp.zeros((1, D_MODEL), jnp.float32)
    wqkv_l, bqkv_l, wo_l, bo_l = [], [], [], []
    l1g_l, l1b_l, l2g_l, l2b_l = [], [], [], []
    wff1_l, bff1_l, wff2_l, bff2_l = [], [], [], []
    for _ in range(NUM_LAYERS):
        wq = nrm((D_MODEL, D_MODEL), 0.02)
        wk = nrm((D_MODEL, D_MODEL), 0.02)
        wv = nrm((D_MODEL, D_MODEL), 0.02)
        wo = nrm((D_MODEL, D_MODEL), 0.02)
        wqkv_l.append(jnp.concatenate([wq, wk, wv], axis=1))             # (D,3D)
        bqkv_l.append(jnp.zeros((1, 3 * D_MODEL), jnp.float32))
        for hd in range(NUM_HEADS):
            wo_l.append(wo[hd * DH:(hd + 1) * DH, :])                    # (DH,D)
        bo_l.append(jnp.zeros((1, D_MODEL), jnp.float32))
        l1g_l.append(jnp.ones((1, D_MODEL), jnp.float32))
        l1b_l.append(jnp.zeros((1, D_MODEL), jnp.float32))
        l2g_l.append(jnp.ones((1, D_MODEL), jnp.float32))
        l2b_l.append(jnp.zeros((1, D_MODEL), jnp.float32))
        wff1_l.append(nrm((D_MODEL, D_FF), 0.02))
        bff1_l.append(jnp.zeros((1, D_FF), jnp.float32))
        wff2_l.append(nrm((D_FF, D_MODEL), 0.02))
        bff2_l.append(jnp.zeros((1, D_MODEL), jnp.float32))
    wqkv = jnp.stack(wqkv_l)
    bqkv = jnp.stack(bqkv_l)
    wo_s = jnp.stack(wo_l)
    bo = jnp.stack(bo_l)
    l1g, l1b = jnp.stack(l1g_l), jnp.stack(l1b_l)
    l2g, l2b = jnp.stack(l2g_l), jnp.stack(l2b_l)
    wff1, bff1 = jnp.stack(wff1_l), jnp.stack(bff1_l)
    wff2, bff2 = jnp.stack(wff2_l), jnp.stack(bff2_l)
    wf = nrm((D_MODEL, FINAL_DIM), 0.02)
    bf = jnp.zeros((1, FINAL_DIM), jnp.float32)

    # additive attention bias blocking cross-batch attention (rows (t,b))
    attnb = np.full((BT, BT), -1e9, np.float32)
    for i in range(BT):
        for jj in range(BT):
            if i % B == jj % B:
                attnb[i, jj] = 0.0
    # row permutation (t,b) -> (b,t) for the final output
    perm = np.zeros((BT, BT), np.float32)
    for b in range(B):
        for t in range(T_OUT):
            perm[b * T_OUT + t, t * B + b] = 1.0

    # masked-timestep gather for the quantizer path (0/1 selection matrix)
    idxs = [np.nonzero(time_mask_np[b])[0] for b in range(B)]
    ty = len(idxs[0])
    assert all(len(ix) == ty for ix in idxs)
    sely = np.zeros((B * ty, BT), np.float32)
    for b in range(B):
        for i, t in enumerate(idxs[b]):
            sely[b * ty + i, int(t) * B + b] = 1.0

    # quantizer weights; codebook @ project_q folded into one operator
    wvq = jax.random.normal(next(ks), (C2, NUM_VQ_GROUPS * NUM_VQ_VARS),
                            jnp.float32)                                 # std 1
    bvq = jnp.zeros((1, NUM_VQ_GROUPS * NUM_VQ_VARS), jnp.float32)
    vq_vars = np.asarray(jax.random.uniform(
        next(ks), (NUM_VQ_GROUPS, NUM_VQ_VARS, VAR_DIM), jnp.float32))
    wq_proj = np.asarray(nrm((FINAL_DIM, FINAL_DIM), 0.02))
    cop = np.zeros((NUM_VQ_GROUPS * NUM_VQ_VARS, FINAL_DIM), np.float32)
    for g in range(NUM_VQ_GROUPS):
        cop[g * NUM_VQ_VARS:(g + 1) * NUM_VQ_VARS, :] = (
            vq_vars[g] @ wq_proj[g * VAR_DIM:(g + 1) * VAR_DIM, :])
    bq = jnp.zeros((1, FINAL_DIM), jnp.float32)

    inputs = (w1, gng, gnb, jnp.asarray(sel2), w2, jnp.asarray(sel3), w3,
              lng, lnb, wi, bi, memb, jnp.asarray(mvec),
              posw, posb, eg, eb, wqkv, bqkv, wo_s, bo,
              l1g, l1b, wff1, bff1, wff2, bff2, l2g, l2b, wf, bf,
              jnp.asarray(attnb), jnp.asarray(perm), jnp.asarray(sely),
              wvq, bvq, jnp.asarray(cop), bq)
    return inputs, ty


# ----------------------------- wrapper ---------------------------------------
def wav2vec2_forward(x_audio, inputs, ny):
    blocks = x_audio.reshape(B * NBLK, S0)          # free bitcast reshape
    xo, yq, ppl = pl.pallas_call(
        _fused_kernel,
        out_shape=(jax.ShapeDtypeStruct((BT, FINAL_DIM), jnp.float32),
                   jax.ShapeDtypeStruct((ny, FINAL_DIM), jnp.float32),
                   jax.ShapeDtypeStruct((1, 1), jnp.float32)),
        scratch_shapes=[pltpu.VMEM((BT1P, C0), jnp.float32),
                        pltpu.VMEM((BT, D_MODEL), jnp.float32)],
    )(blocks, *inputs)
    x_out = xo.reshape(B, T_OUT, FINAL_DIM)         # free reshapes
    y_out = yq.reshape(B, ny // B, FINAL_DIM)
    return x_out, y_out, ppl[0, 0]
    # TODO(synk): on v7x a grid=(B,) with dimension_semantics=("parallel",)
    # could shard batches across the two TensorCores; skipped here since the
    # single-kernel, batch-folded form targets single-TC v5e/v6e as well.


# ----------------------------- main ------------------------------------------
if __name__ == "__main__":
    np.random.seed(0)
    key = jax.random.PRNGKey(0)
    kx, kp = jax.random.split(key)

    x_audio = jax.random.normal(kx, (B, AUDIO_LEN), jnp.float32)
    time_mask = create_mask((B, T_OUT), p_start=TIMESTEP_MASKING,
                            mask_length=TIMESTEP_MASK_LEN)
    inputs, ty = build_inputs(kp, time_mask)
    ny = B * ty

    @jax.jit
    def fwd(x, ins):
        return wav2vec2_forward(x, ins, ny)

    x_out, y_out, vq_probs = fwd(x_audio, inputs)
    jax.block_until_ready((x_out, y_out, vq_probs))

    tm = jnp.asarray(time_mask)                     # returned like the reference
    assert x_out.shape == (B, T_OUT, FINAL_DIM)
    assert y_out.shape == (B, ty, FINAL_DIM)
    assert vq_probs.shape == ()
    print("KERNEL_OK")
</pallas_src>

<mosaic_0001>
module attributes {stable_mosaic.version = 11 : i64} {
  func.func @_fused_kernel(%arg0: memref<132x5xf32, #tpu.memory_space<vmem>>, %arg1: memref<10x32xf32, #tpu.memory_space<vmem>>, %arg2: memref<1x32xf32, #tpu.memory_space<vmem>>, %arg3: memref<1x32xf32, #tpu.memory_space<vmem>>, %arg4: memref<192x144xf32, #tpu.memory_space<vmem>>, %arg5: memref<3x32x32xf32, #tpu.memory_space<vmem>>, %arg6: memref<64x64xf32, #tpu.memory_space<vmem>>, %arg7: memref<2x32x32xf32, #tpu.memory_space<vmem>>, %arg8: memref<1x32xf32, #tpu.memory_space<vmem>>, %arg9: memref<1x32xf32, #tpu.memory_space<vmem>>, %arg10: memref<32x32xf32, #tpu.memory_space<vmem>>, %arg11: memref<1x32xf32, #tpu.memory_space<vmem>>, %arg12: memref<1x32xf32, #tpu.memory_space<vmem>>, %arg13: memref<32x1xf32, #tpu.memory_space<vmem>>, %arg14: memref<512x512xbf16, #tpu.memory_space<vmem>>, %arg15: memref<1x512xf32, #tpu.memory_space<vmem>>, %arg16: memref<1x32xf32, #tpu.memory_space<vmem>>, %arg17: memref<1x32xf32, #tpu.memory_space<vmem>>, %arg18: memref<1x32x96xf32, #tpu.memory_space<vmem>>, %arg19: memref<1x1x96xf32, #tpu.memory_space<vmem>>, %arg20: memref<2x16x32xf32, #tpu.memory_space<vmem>>, %arg21: memref<1x1x32xf32, #tpu.memory_space<vmem>>, %arg22: memref<1x1x32xf32, #tpu.memory_space<vmem>>, %arg23: memref<1x1x32xf32, #tpu.memory_space<vmem>>, %arg24: memref<1x32x128xf32, #tpu.memory_space<vmem>>, %arg25: memref<1x1x128xf32, #tpu.memory_space<vmem>>, %arg26: memref<1x128x32xf32, #tpu.memory_space<vmem>>, %arg27: memref<1x1x32xf32, #tpu.memory_space<vmem>>, %arg28: memref<1x1x32xf32, #tpu.memory_space<vmem>>, %arg29: memref<1x1x32xf32, #tpu.memory_space<vmem>>, %arg30: memref<32x16xf32, #tpu.memory_space<vmem>>, %arg31: memref<1x16xf32, #tpu.memory_space<vmem>>, %arg32: memref<32x32xf32, #tpu.memory_space<vmem>>, %arg33: memref<32x32xf32, #tpu.memory_space<vmem>>, %arg34: memref<20x32xf32, #tpu.memory_space<vmem>>, %arg35: memref<32x16xf32, #tpu.memory_space<vmem>>, %arg36: memref<1x16xf32, #tpu.memory_space<vmem>>, %arg37: memref<16x16xf32, #tpu.memory_space<vmem>>, %arg38: memref<1x16xf32, #tpu.memory_space<vmem>>, %arg39: memref<32x16xf32, #tpu.memory_space<vmem>>, %arg40: memref<20x16xf32, #tpu.memory_space<vmem>>, %arg41: memref<1x1xf32, #tpu.memory_space<vmem>>, %arg42: memref<144x32xf32, #tpu.memory_space<vmem>>, %arg43: memref<32x32xf32, #tpu.memory_space<vmem>>) attributes {dimension_semantics = [], scalar_prefetch = 0 : i64, scratch_operands = 2 : i64, tpu.core_type = #tpu.core_type<tc>} {
    %cst = arith.constant 0.000000e+00 : f32
    %0 = vector.broadcast %cst : f32 to vector<144x32xf32>
    %c0 = arith.constant 0 : index
    %c0_0 = arith.constant 0 : index
    %1 = vector.load %arg42[%c0, %c0_0] : memref<144x32xf32, #tpu.memory_space<vmem>>, vector<144x32xf32>
    tpu.vector_store %arg42[%c0, %c0_0], %0 {strides = array<i32>} : memref<144x32xf32, #tpu.memory_space<vmem>>, vector<144x32xf32>,
    %c0_1 = arith.constant 0 : index
    %c0_2 = arith.constant 0 : index
    %2 = vector.load %arg0[%c0_1, %c0_2] : memref<132x5xf32, #tpu.memory_space<vmem>>, vector<65x5xf32>
    %c0_3 = arith.constant 0 : index
    %c0_4 = arith.constant 0 : index
    %3 = vector.load %arg1[%c0_3, %c0_4] : memref<10x32xf32, #tpu.memory_space<vmem>>, vector<5x32xf32>
    %cst_5 = arith.constant dense<0.000000e+00> : vector<65x32xf32>
    %4 = tpu.matmul %2, %3, %cst_5 {dimension_numbers = #tpu.dot_dimension_numbers<[1], [0], [0], [1], [0, 0, 1, 1], [], []>} : vector<65x5xf32>, vector<5x32xf32>, vector<65x32xf32> -> vector<65x32xf32>
    %c1 = arith.constant 1 : index
    %c0_6 = arith.constant 0 : index
    %5 = vector.load %arg0[%c1, %c0_6] : memref<132x5xf32, #tpu.memory_space<vmem>>, vector<65x5xf32>
    %c5 = arith.constant 5 : index
    %c0_7 = arith.constant 0 : index
    %6 = vector.load %arg1[%c5, %c0_7] : memref<10x32xf32, #tpu.memory_space<vmem>>, vector<5x32xf32>
    %cst_8 = arith.constant dense<0.000000e+00> : vector<65x32xf32>
    %7 = tpu.matmul %5, %6, %cst_8 {dimension_numbers = #tpu.dot_dimension_numbers<[1], [0], [0], [1], [0, 0, 1, 1], [], []>} : vector<65x5xf32>, vector<5x32xf32>, vector<65x32xf32> -> vector<65x32xf32>
    %8 = arith.addf %4, %7 : vector<65x32xf32>
    %cst_9 = arith.constant dense<0.000000e+00> : vector<32xf32>
    %9 = vector.multi_reduction <add>, %8, %cst_9 [0] : vector<65x32xf32> to vector<32xf32>
    %10 = vector.shape_cast %9 : vector<32xf32> to vector<1x32xf32>
    %cst_10 = arith.constant 6.500000e+01 : f32
    %11 = vector.broadcast %cst_10 : f32 to vector<1x32xf32>
    %12 = arith.divf %10, %11 : vector<1x32xf32>
    %13 = vector.broadcast %12 : vector<1x32xf32> to vector<65x32xf32>
    %14 = arith.subf %8, %13 : vector<65x32xf32>
    %15 = arith.mulf %14, %14 : vector<65x32xf32>
    %cst_11 = arith.constant dense<0.000000e+00> : vector<32xf32>
    %16 = vector.multi_reduction <add>, %15, %cst_11 [0] : vector<65x32xf32> to vector<32xf32>
    %17 = vector.shape_cast %16 : vector<32xf32> to vector<1x32xf32>
    %cst_12 = arith.constant 6.500000e+01 : f32
    %18 = vector.broadcast %cst_12 : f32 to vector<1x32xf32>
    %19 = arith.divf %17, %18 : vector<1x32xf32>
    %20 = vector.broadcast %12 : vector<1x32xf32> to vector<65x32xf32>
    %21 = arith.subf %8, %20 : vector<65x32xf32>
    %cst_13 = arith.constant 9.99999974E-6 : f32
    %22 = vector.broadcast %cst_13 : f32 to vector<1x32xf32>
    %23 = arith.addf %19, %22 : vector<1x32xf32>
    %24 = math.rsqrt %23 : vector<1x32xf32>
    %25 = vector.broadcast %24 : vector<1x32xf32> to vector<65x32xf32>
    %26 = arith.mulf %21, %25 : vector<65x32xf32>
    %c0_14 = arith.constant 0 : index
    %c0_15 = arith.constant 0 : index
    %27 = vector.load %arg2[%c0_14, %c0_15] : memref<1x32xf32, #tpu.memory_space<vmem>>, vector<1x32xf32>
    %28 = vector.broadcast %27 : vector<1x32xf32> to vector<65x32xf32>
    %29 = arith.mulf %26, %28 : vector<65x32xf32>
    %c0_16 = arith.constant 0 : index
    %c0_17 = arith.constant 0 : index
    %30 = vector.load %arg3[%c0_16, %c0_17] : memref<1x32xf32, #tpu.memory_space<vmem>>, vector<1x32xf32>
    %31 = vector.broadcast %30 : vector<1x32xf32> to vector<65x32xf32>
    %32 = arith.addf %29, %31 : vector<65x32xf32>
    %cst_18 = arith.constant 5.000000e-01 : f32
    %33 = vector.broadcast %cst_18 : f32 to vector<65x32xf32>
    %34 = arith.mulf %33, %32 : vector<65x32xf32>
    %cst_19 = arith.constant 0.707106769 : f32
    %35 = vector.broadcast %cst_19 : f32 to vector<65x32xf32>
    %36 = arith.mulf %32, %35 : vector<65x32xf32>
    %37 = math.absf %36 : vector<65x32xf32>
    %cst_20 = arith.constant 0.327591091 : f32
    %38 = vector.broadcast %cst_20 : f32 to vector<65x32xf32>
    %39 = arith.mulf %38, %37 : vector<65x32xf32>
    %cst_21 = arith.constant 1.000000e+00 : f32
    %40 = vector.broadcast %cst_21 : f32 to vector<65x32xf32>
    %41 = arith.addf %40, %39 : vector<65x32xf32>
    %cst_22 = arith.constant 1.000000e+00 : f32
    %42 = vector.broadcast %cst_22 : f32 to vector<65x32xf32>
    %43 = arith.divf %42, %41 : vector<65x32xf32>
    %cst_23 = arith.constant 1.06140542 : f32
    %44 = vector.broadcast %cst_23 : f32 to vector<65x32xf32>
    %45 = arith.mulf %44, %43 : vector<65x32xf32>
    %cst_24 = arith.constant -1.45315206 : f32
    %46 = vector.broadcast %cst_24 : f32 to vector<65x32xf32>
    %47 = arith.addf %45, %46 : vector<65x32xf32>
    %48 = arith.mulf %47, %43 : vector<65x32xf32>
    %cst_25 = arith.constant 1.42141378 : f32
    %49 = vector.broadcast %cst_25 : f32 to vector<65x32xf32>
    %50 = arith.addf %48, %49 : vector<65x32xf32>
    %51 = arith.mulf %50, %43 : vector<65x32xf32>
    %cst_26 = arith.constant -0.284496725 : f32
    %52 = vector.broadcast %cst_26 : f32 to vector<65x32xf32>
    %53 = arith.addf %51, %52 : vector<65x32xf32>
    %54 = arith.mulf %53, %43 : vector<65x32xf32>
    %cst_27 = arith.constant 0.254829586 : f32
    %55 = vector.broadcast %cst_27 : f32 to vector<65x32xf32>
    %56 = arith.addf %54, %55 : vector<65x32xf32>
    %57 = arith.mulf %56, %43 : vector<65x32xf32>
    %cst_28 = arith.constant 0.000000e+00 : f32
    %58 = vector.broadcast %cst_28 : f32 to vector<65x32xf32>
    %59 = arith.subf %58, %37 : vector<65x32xf32>
    %60 = arith.mulf %59, %37 : vector<65x32xf32>
    %61 = math.exp %60 : vector<65x32xf32>
    %62 = arith.mulf %57, %61 : vector<65x32xf32>
    %cst_29 = arith.constant 1.000000e+00 : f32
    %63 = vector.broadcast %cst_29 : f32 to vector<65x32xf32>
    %64 = arith.subf %63, %62 : vector<65x32xf32>
    %cst_30 = arith.constant 0.000000e+00 : f32
    %65 = vector.broadcast %cst_30 : f32 to vector<65x32xf32>
    %66 = arith.cmpf oge, %36, %65 : vector<65x32xf32>
    %cst_31 = arith.constant 0.000000e+00 : f32
    %67 = vector.broadcast %cst_31 : f32 to vector<65x32xf32>
    %68 = arith.subf %67, %64 : vector<65x32xf32>
    %69 = arith.select %66, %64, %68 : vector<65x32xi1>, vector<65x32xf32>
    %cst_32 = arith.constant 1.000000e+00 : f32
    %70 = vector.broadcast %cst_32 : f32 to vector<65x32xf32>
    %71 = arith.addf %70, %69 : vector<65x32xf32>
    %72 = arith.mulf %34, %71 : vector<65x32xf32>
    %c0_33 = arith.constant 0 : index
    %c0_34 = arith.constant 0 : index
    %73 = vector.load %arg42[%c0_33, %c0_34] : memref<144x32xf32, #tpu.memory_space<vmem>>, vector<65x32xf32>
    tpu.vector_store %arg42[%c0_33, %c0_34], %72 {strides = array<i32>} : memref<144x32xf32, #tpu.memory_space<vmem>>, vector<65x32xf32>,
    %c66 = arith.constant 66 : index
    %c0_35 = arith.constant 0 : index
    %74 = vector.load %arg0[%c66, %c0_35] : memref<132x5xf32, #tpu.memory_space<vmem>>, vector<65x5xf32>
    %c0_36 = arith.constant 0 : index
    %c0_37 = arith.constant 0 : index
    %75 = vector.load %arg1[%c0_36, %c0_37] : memref<10x32xf32, #tpu.memory_space<vmem>>, vector<5x32xf32>
    %cst_38 = arith.constant dense<0.000000e+00> : vector<65x32xf32>
    %76 = tpu.matmul %74, %75, %cst_38 {dimension_numbers = #tpu.dot_dimension_numbers<[1], [0], [0], [1], [0, 0, 1, 1], [], []>} : vector<65x5xf32>, vector<5x32xf32>, vector<65x32xf32> -> vector<65x32xf32>
    %c67 = arith.constant 67 : index
    %c0_39 = arith.constant 0 : index
    %77 = vector.load %arg0[%c67, %c0_39] : memref<132x5xf32, #tpu.memory_space<vmem>>, vector<65x5xf32>
    %c5_40 = arith.constant 5 : index
    %c0_41 = arith.constant 0 : index
    %78 = vector.load %arg1[%c5_40, %c0_41] : memref<10x32xf32, #tpu.memory_space<vmem>>, vector<5x32xf32>
    %cst_42 = arith.constant dense<0.000000e+00> : vector<65x32xf32>
    %79 = tpu.matmul %77, %78, %cst_42 {dimension_numbers = #tpu.dot_dimension_numbers<[1], [0], [0], [1], [0, 0, 1, 1], [], []>} : vector<65x5xf32>, vector<5x32xf32>, vector<65x32xf32> -> vector<65x32xf32>
    %80 = arith.addf %76, %79 : vector<65x32xf32>
    %cst_43 = arith.constant dense<0.000000e+00> : vector<32xf32>
    %81 = vector.multi_reduction <add>, %80, %cst_43 [0] : vector<65x32xf32> to vector<32xf32>
    %82 = vector.shape_cast %81 : vector<32xf32> to vector<1x32xf32>
    %cst_44 = arith.constant 6.500000e+01 : f32
    %83 = vector.broadcast %cst_44 : f32 to vector<1x32xf32>
    %84 = arith.divf %82, %83 : vector<1x32xf32>
    %85 = vector.broadcast %84 : vector<1x32xf32> to vector<65x32xf32>
    %86 = arith.subf %80, %85 : vector<65x32xf32>
    %87 = arith.mulf %86, %86 : vector<65x32xf32>
    %cst_45 = arith.constant dense<0.000000e+00> : vector<32xf32>
    %88 = vector.multi_reduction <add>, %87, %cst_45 [0] : vector<65x32xf32> to vector<32xf32>
    %89 = vector.shape_cast %88 : vector<32xf32> to vector<1x32xf32>
    %cst_46 = arith.constant 6.500000e+01 : f32
    %90 = vector.broadcast %cst_46 : f32 to vector<1x32xf32>
    %91 = arith.divf %89, %90 : vector<1x32xf32>
    %92 = vector.broadcast %84 : vector<1x32xf32> to vector<65x32xf32>
    %93 = arith.subf %80, %92 : vector<65x32xf32>
    %cst_47 = arith.constant 9.99999974E-6 : f32
    %94 = vector.broadcast %cst_47 : f32 to vector<1x32xf32>
    %95 = arith.addf %91, %94 : vector<1x32xf32>
    %96 = math.rsqrt %95 : vector<1x32xf32>
    %97 = vector.broadcast %96 : vector<1x32xf32> to vector<65x32xf32>
    %98 = arith.mulf %93, %97 : vector<65x32xf32>
    %c0_48 = arith.constant 0 : index
    %c0_49 = arith.constant 0 : index
    %99 = vector.load %arg2[%c0_48, %c0_49] : memref<1x32xf32, #tpu.memory_space<vmem>>, vector<1x32xf32>
    %100 = vector.broadcast %99 : vector<1x32xf32> to vector<65x32xf32>
    %101 = arith.mulf %98, %100 : vector<65x32xf32>
    %c0_50 = arith.constant 0 : index
    %c0_51 = arith.constant 0 : index
    %102 = vector.load %arg3[%c0_50, %c0_51] : memref<1x32xf32, #tpu.memory_space<vmem>>, vector<1x32xf32>
    %103 = vector.broadcast %102 : vector<1x32xf32> to vector<65x32xf32>
    %104 = arith.addf %101, %103 : vector<65x32xf32>
    %cst_52 = arith.constant 5.000000e-01 : f32
    %105 = vector.broadcast %cst_52 : f32 to vector<65x32xf32>
    %106 = arith.mulf %105, %104 : vector<65x32xf32>
    %cst_53 = arith.constant 0.707106769 : f32
    %107 = vector.broadcast %cst_53 : f32 to vector<65x32xf32>
    %108 = arith.mulf %104, %107 : vector<65x32xf32>
    %109 = math.absf %108 : vector<65x32xf32>
    %cst_54 = arith.constant 0.327591091 : f32
    %110 = vector.broadcast %cst_54 : f32 to vector<65x32xf32>
    %111 = arith.mulf %110, %109 : vector<65x32xf32>
    %cst_55 = arith.constant 1.000000e+00 : f32
    %112 = vector.broadcast %cst_55 : f32 to vector<65x32xf32>
    %113 = arith.addf %112, %111 : vector<65x32xf32>
    %cst_56 = arith.constant 1.000000e+00 : f32
    %114 = vector.broadcast %cst_56 : f32 to vector<65x32xf32>
    %115 = arith.divf %114, %113 : vector<65x32xf32>
    %cst_57 = arith.constant 1.06140542 : f32
    %116 = vector.broadcast %cst_57 : f32 to vector<65x32xf32>
    %117 = arith.mulf %116, %115 : vector<65x32xf32>
    %cst_58 = arith.constant -1.45315206 : f32
    %118 = vector.broadcast %cst_58 : f32 to vector<65x32xf32>
    %119 = arith.addf %117, %118 : vector<65x32xf32>
    %120 = arith.mulf %119, %115 : vector<65x32xf32>
    %cst_59 = arith.constant 1.42141378 : f32
    %121 = vector.broadcast %cst_59 : f32 to vector<65x32xf32>
    %122 = arith.addf %120, %121 : vector<65x32xf32>
    %123 = arith.mulf %122, %115 : vector<65x32xf32>
    %cst_60 = arith.constant -0.284496725 : f32
    %124 = vector.broadcast %cst_60 : f32 to vector<65x32xf32>
    %125 = arith.addf %123, %124 : vector<65x32xf32>
    %126 = arith.mulf %125, %115 : vector<65x32xf32>
    %cst_61 = arith.constant 0.254829586 : f32
    %127 = vector.broadcast %cst_61 : f32 to vector<65x32xf32>
    %128 = arith.addf %126, %127 : vector<65x32xf32>
    %129 = arith.mulf %128, %115 : vector<65x32xf32>
    %cst_62 = arith.constant 0.000000e+00 : f32
    %130 = vector.broadcast %cst_62 : f32 to vector<65x32xf32>
    %131 = arith.subf %130, %109 : vector<65x32xf32>
    %132 = arith.mulf %131, %109 : vector<65x32xf32>
    %133 = math.exp %132 : vector<65x32xf32>
    %134 = arith.mulf %129, %133 : vector<65x32xf32>
    %cst_63 = arith.constant 1.000000e+00 : f32
    %135 = vector.broadcast %cst_63 : f32 to vector<65x32xf32>
    %136 = arith.subf %135, %134 : vector<65x32xf32>
    %cst_64 = arith.constant 0.000000e+00 : f32
    %137 = vector.broadcast %cst_64 : f32 to vector<65x32xf32>
    %138 = arith.cmpf oge, %108, %137 : vector<65x32xf32>
    %cst_65 = arith.constant 0.000000e+00 : f32
    %139 = vector.broadcast %cst_65 : f32 to vector<65x32xf32>
    %140 = arith.subf %139, %136 : vector<65x32xf32>
    %141 = arith.select %138, %136, %140 : vector<65x32xi1>, vector<65x32xf32>
    %cst_66 = arith.constant 1.000000e+00 : f32
    %142 = vector.broadcast %cst_66 : f32 to vector<65x32xf32>
    %143 = arith.addf %142, %141 : vector<65x32xf32>
    %144 = arith.mulf %106, %143 : vector<65x32xf32>
    %c72 = arith.constant 72 : index
    %c0_67 = arith.constant 0 : index
    %145 = vector.load %arg42[%c72, %c0_67] : memref<144x32xf32, #tpu.memory_space<vmem>>, vector<65x32xf32>
    tpu.vector_store %arg42[%c72, %c0_67], %144 {strides = array<i32>} : memref<144x32xf32, #tpu.memory_space<vmem>>, vector<65x32xf32>,
    %c0_68 = arith.constant 0 : index
    %c0_69 = arith.constant 0 : index
    %146 = vector.load %arg42[%c0_68, %c0_69] : memref<144x32xf32, #tpu.memory_space<vmem>>, vector<144x32xf32>
    %c0_70 = arith.constant 0 : index
    %c0_71 = arith.constant 0 : index
    %147 = vector.load %arg4[%c0_70, %c0_71] : memref<192x144xf32, #tpu.memory_space<vmem>>, vector<192x144xf32>
    %cst_72 = arith.constant dense<0.000000e+00> : vector<192x32xf32>
    %148 = tpu.matmul %147, %146, %cst_72 {dimension_numbers = #tpu.dot_dimension_numbers<[1], [0], [0], [1], [0, 0, 1, 1], [], []>} : vector<192x144xf32>, vector<144x32xf32>, vector<192x32xf32> -> vector<192x32xf32>
    %149 = vector.extract_strided_slice %148 {offsets = [0, 0], sizes = [64, 32], strides = [1, 1]} : vector<192x32xf32> to vector<64x32xf32>
    %c0_73 = arith.constant 0 : index
    %c0_74 = arith.constant 0 : index
    %c0_75 = arith.constant 0 : index
    %150 = vector.load %arg5[%c0_73, %c0_74, %c0_75] : memref<3x32x32xf32, #tpu.memory_space<vmem>>, vector<1x32x32xf32>
    %151 = vector.shape_cast %150 : vector<1x32x32xf32> to vector<32x32xf32>
    %cst_76 = arith.constant dense<0.000000e+00> : vector<64x32xf32>
    %152 = tpu.matmul %149, %151, %cst_76 {dimension_numbers = #tpu.dot_dimension_numbers<[1], [0], [0], [1], [0, 0, 1, 1], [], []>} : vector<64x32xf32>, vector<32x32xf32>, vector<64x32xf32> -> vector<64x32xf32>
    %153 = vector.extract_strided_slice %148 {offsets = [64, 0], sizes = [64, 32], strides = [1, 1]} : vector<192x32xf32> to vector<64x32xf32>
    %c1_77 = arith.constant 1 : index
    %c0_78 = arith.constant 0 : index
    %c0_79 = arith.constant 0 : index
    %154 = vector.load %arg5[%c1_77, %c0_78, %c0_79] : memref<3x32x32xf32, #tpu.memory_space<vmem>>, vector<1x32x32xf32>
    %155 = vector.shape_cast %154 : vector<1x32x32xf32> to vector<32x32xf32>
    %cst_80 = arith.constant dense<0.000000e+00> : vector<64x32xf32>
    %156 = tpu.matmul %153, %155, %cst_80 {dimension_numbers = #tpu.dot_dimension_numbers<[1], [0], [0], [1], [0, 0, 1, 1], [], []>} : vector<64x32xf32>, vector<32x32xf32>, vector<64x32xf32> -> vector<64x32xf32>
    %157 = arith.addf %152, %156 : vector<64x32xf32>
    %158 = vector.extract_strided_slice %148 {offsets = [128, 0], sizes = [64, 32], strides = [1, 1]} : vector<192x32xf32> to vector<64x32xf32>
    %c2 = arith.constant 2 : index
    %c0_81 = arith.constant 0 : index
    %c0_82 = arith.constant 0 : index
    %159 = vector.load %arg5[%c2, %c0_81, %c0_82] : memref<3x32x32xf32, #tpu.memory_space<vmem>>, vector<1x32x32xf32>
    %160 = vector.shape_cast %159 : vector<1x32x32xf32> to vector<32x32xf32>
    %cst_83 = arith.constant dense<0.000000e+00> : vector<64x32xf32>
    %161 = tpu.matmul %158, %160, %cst_83 {dimension_numbers = #tpu.dot_dimension_numbers<[1], [0], [0], [1], [0, 0, 1, 1], [], []>} : vector<64x32xf32>, vector<32x32xf32>, vector<64x32xf32> -> vector<64x32xf32>
    %162 = arith.addf %157, %161 : vector<64x32xf32>
    %cst_84 = arith.constant 5.000000e-01 : f32
    %163 = vector.broadcast %cst_84 : f32 to vector<64x32xf32>
    %164 = arith.mulf %163, %162 : vector<64x32xf32>
    %cst_85 = arith.constant 0.707106769 : f32
    %165 = vector.broadcast %cst_85 : f32 to vector<64x32xf32>
    %166 = arith.mulf %162, %165 : vector<64x32xf32>
    %167 = math.absf %166 : vector<64x32xf32>
    %cst_86 = arith.constant 0.327591091 : f32
    %168 = vector.broadcast %cst_86 : f32 to vector<64x32xf32>
    %169 = arith.mulf %168, %167 : vector<64x32xf32>
    %cst_87 = arith.constant 1.000000e+00 : f32
    %170 = vector.broadcast %cst_87 : f32 to vector<64x32xf32>
    %171 = arith.addf %170, %169 : vector<64x32xf32>
    %cst_88 = arith.constant 1.000000e+00 : f32
    %172 = vector.broadcast %cst_88 : f32 to vector<64x32xf32>
    %173 = arith.divf %172, %171 : vector<64x32xf32>
    %cst_89 = arith.constant 1.06140542 : f32
    %174 = vector.broadcast %cst_89 : f32 to vector<64x32xf32>
    %175 = arith.mulf %174, %173 : vector<64x32xf32>
    %cst_90 = arith.constant -1.45315206 : f32
    %176 = vector.broadcast %cst_90 : f32 to vector<64x32xf32>
    %177 = arith.addf %175, %176 : vector<64x32xf32>
    %178 = arith.mulf %177, %173 : vector<64x32xf32>
    %cst_91 = arith.constant 1.42141378 : f32
    %179 = vector.broadcast %cst_91 : f32 to vector<64x32xf32>
    %180 = arith.addf %178, %179 : vector<64x32xf32>
    %181 = arith.mulf %180, %173 : vector<64x32xf32>
    %cst_92 = arith.constant -0.284496725 : f32
    %182 = vector.broadcast %cst_92 : f32 to vector<64x32xf32>
    %183 = arith.addf %181, %182 : vector<64x32xf32>
    %184 = arith.mulf %183, %173 : vector<64x32xf32>
    %cst_93 = arith.constant 0.254829586 : f32
    %185 = vector.broadcast %cst_93 : f32 to vector<64x32xf32>
    %186 = arith.addf %184, %185 : vector<64x32xf32>
    %187 = arith.mulf %186, %173 : vector<64x32xf32>
    %cst_94 = arith.constant 0.000000e+00 : f32
    %188 = vector.broadcast %cst_94 : f32 to vector<64x32xf32>
    %189 = arith.subf %188, %167 : vector<64x32xf32>
    %190 = arith.mulf %189, %167 : vector<64x32xf32>
    %191 = math.exp %190 : vector<64x32xf32>
    %192 = arith.mulf %187, %191 : vector<64x32xf32>
    %cst_95 = arith.constant 1.000000e+00 : f32
    %193 = vector.broadcast %cst_95 : f32 to vector<64x32xf32>
    %194 = arith.subf %193, %192 : vector<64x32xf32>
    %cst_96 = arith.constant 0.000000e+00 : f32
    %195 = vector.broadcast %cst_96 : f32 to vector<64x32xf32>
    %196 = arith.cmpf oge, %166, %195 : vector<64x32xf32>
    %cst_97 = arith.constant 0.000000e+00 : f32
    %197 = vector.broadcast %cst_97 : f32 to vector<64x32xf32>
    %198 = arith.subf %197, %194 : vector<64x32xf32>
    %199 = arith.select %196, %194, %198 : vector<64x32xi1>, vector<64x32xf32>
    %cst_98 = arith.constant 1.000000e+00 : f32
    %200 = vector.broadcast %cst_98 : f32 to vector<64x32xf32>
    %201 = arith.addf %200, %199 : vector<64x32xf32>
    %202 = arith.mulf %164, %201 : vector<64x32xf32>
    %c0_99 = arith.constant 0 : index
    %c0_100 = arith.constant 0 : index
    %203 = vector.load %arg6[%c0_99, %c0_100] : memref<64x64xf32, #tpu.memory_space<vmem>>, vector<64x64xf32>
    %cst_101 = arith.constant dense<0.000000e+00> : vector<64x32xf32>
    %204 = tpu.matmul %203, %202, %cst_101 {dimension_numbers = #tpu.dot_dimension_numbers<[1], [0], [0], [1], [0, 0, 1, 1], [], []>} : vector<64x64xf32>, vector<64x32xf32>, vector<64x32xf32> -> vector<64x32xf32>
    %205 = vector.extract_strided_slice %204 {offsets = [0, 0], sizes = [32, 32], strides = [1, 1]} : vector<64x32xf32> to vector<32x32xf32>
    %c0_102 = arith.constant 0 : index
    %c0_103 = arith.constant 0 : index
    %c0_104 = arith.constant 0 : index
    %206 = vector.load %arg7[%c0_102, %c0_103, %c0_104] : memref<2x32x32xf32, #tpu.memory_space<vmem>>, vector<1x32x32xf32>
    %207 = vector.shape_cast %206 : vector<1x32x32xf32> to vector<32x32xf32>
    %cst_105 = arith.constant dense<0.000000e+00> : vector<32x32xf32>
    %208 = tpu.matmul %205, %207, %cst_105 {dimension_numbers = #tpu.dot_dimension_numbers<[1], [0], [0], [1], [0, 0, 1, 1], [], []>} : vector<32x32xf32>, vector<32x32xf32>, vector<32x32xf32> -> vector<32x32xf32>
    %209 = vector.extract_strided_slice %204 {offsets = [32, 0], sizes = [32, 32], strides = [1, 1]} : vector<64x32xf32> to vector<32x32xf32>
    %c1_106 = arith.constant 1 : index
    %c0_107 = arith.constant 0 : index
    %c0_108 = arith.constant 0 : index
    %210 = vector.load %arg7[%c1_106, %c0_107, %c0_108] : memref<2x32x32xf32, #tpu.memory_space<vmem>>, vector<1x32x32xf32>
    %211 = vector.shape_cast %210 : vector<1x32x32xf32> to vector<32x32xf32>
    %cst_109 = arith.constant dense<0.000000e+00> : vector<32x32xf32>
    %212 = tpu.matmul %209, %211, %cst_109 {dimension_numbers = #tpu.dot_dimension_numbers<[1], [0], [0], [1], [0, 0, 1, 1], [], []>} : vector<32x32xf32>, vector<32x32xf32>, vector<32x32xf32> -> vector<32x32xf32>
    %213 = arith.addf %208, %212 : vector<32x32xf32>
    %cst_110 = arith.constant 5.000000e-01 : f32
    %214 = vector.broadcast %cst_110 : f32 to vector<32x32xf32>
    %215 = arith.mulf %214, %213 : vector<32x32xf32>
    %cst_111 = arith.constant 0.707106769 : f32
    %216 = vector.broadcast %cst_111 : f32 to vector<32x32xf32>
    %217 = arith.mulf %213, %216 : vector<32x32xf32>
    %218 = math.absf %217 : vector<32x32xf32>
    %cst_112 = arith.constant 0.327591091 : f32
    %219 = vector.broadcast %cst_112 : f32 to vector<32x32xf32>
    %220 = arith.mulf %219, %218 : vector<32x32xf32>
    %cst_113 = arith.constant 1.000000e+00 : f32
    %221 = vector.broadcast %cst_113 : f32 to vector<32x32xf32>
    %222 = arith.addf %221, %220 : vector<32x32xf32>
    %cst_114 = arith.constant 1.000000e+00 : f32
    %223 = vector.broadcast %cst_114 : f32 to vector<32x32xf32>
    %224 = arith.divf %223, %222 : vector<32x32xf32>
    %cst_115 = arith.constant 1.06140542 : f32
    %225 = vector.broadcast %cst_115 : f32 to vector<32x32xf32>
    %226 = arith.mulf %225, %224 : vector<32x32xf32>
    %cst_116 = arith.constant -1.45315206 : f32
    %227 = vector.broadcast %cst_116 : f32 to vector<32x32xf32>
    %228 = arith.addf %226, %227 : vector<32x32xf32>
    %229 = arith.mulf %228, %224 : vector<32x32xf32>
    %cst_117 = arith.constant 1.42141378 : f32
    %230 = vector.broadcast %cst_117 : f32 to vector<32x32xf32>
    %231 = arith.addf %229, %230 : vector<32x32xf32>
    %232 = arith.mulf %231, %224 : vector<32x32xf32>
    %cst_118 = arith.constant -0.284496725 : f32
    %233 = vector.broadcast %cst_118 : f32 to vector<32x32xf32>
    %234 = arith.addf %232, %233 : vector<32x32xf32>
    %235 = arith.mulf %234, %224 : vector<32x32xf32>
    %cst_119 = arith.constant 0.254829586 : f32
    %236 = vector.broadcast %cst_119 : f32 to vector<32x32xf32>
    %237 = arith.addf %235, %236 : vector<32x32xf32>
    %238 = arith.mulf %237, %224 : vector<32x32xf32>
    %cst_120 = arith.constant 0.000000e+00 : f32
    %239 = vector.broadcast %cst_120 : f32 to vector<32x32xf32>
    %240 = arith.subf %239, %218 : vector<32x32xf32>
    %241 = arith.mulf %240, %218 : vector<32x32xf32>
    %242 = math.exp %241 : vector<32x32xf32>
    %243 = arith.mulf %238, %242 : vector<32x32xf32>
    %cst_121 = arith.constant 1.000000e+00 : f32
    %244 = vector.broadcast %cst_121 : f32 to vector<32x32xf32>
    %245 = arith.subf %244, %243 : vector<32x32xf32>
    %cst_122 = arith.constant 0.000000e+00 : f32
    %246 = vector.broadcast %cst_122 : f32 to vector<32x32xf32>
    %247 = arith.cmpf oge, %217, %246 : vector<32x32xf32>
    %cst_123 = arith.constant 0.000000e+00 : f32
    %248 = vector.broadcast %cst_123 : f32 to vector<32x32xf32>
    %249 = arith.subf %248, %245 : vector<32x32xf32>
    %250 = arith.select %247, %245, %249 : vector<32x32xi1>, vector<32x32xf32>
    %cst_124 = arith.constant 1.000000e+00 : f32
    %251 = vector.broadcast %cst_124 : f32 to vector<32x32xf32>
    %252 = arith.addf %251, %250 : vector<32x32xf32>
    %253 = arith.mulf %215, %252 : vector<32x32xf32>
    %c0_125 = arith.constant 0 : index
    %c0_126 = arith.constant 0 : index
    %254 = vector.load %arg8[%c0_125, %c0_126] : memref<1x32xf32, #tpu.memory_space<vmem>>, vector<1x32xf32>
    %c0_127 = arith.constant 0 : index
    %c0_128 = arith.constant 0 : index
    %255 = vector.load %arg9[%c0_127, %c0_128] : memref<1x32xf32, #tpu.memory_space<vmem>>, vector<1x32xf32>
    %cst_129 = arith.constant dense<0.000000e+00> : vector<32xf32>
    %256 = vector.multi_reduction <add>, %253, %cst_129 [1] : vector<32x32xf32> to vector<32xf32>
    %257 = vector.shape_cast %256 : vector<32xf32> to vector<32x1xf32>
    %cst_130 = arith.constant 3.200000e+01 : f32
    %258 = vector.broadcast %cst_130 : f32 to vector<32x1xf32>
    %259 = arith.divf %257, %258 : vector<32x1xf32>
    %260 = vector.broadcast %259 : vector<32x1xf32> to vector<32x32xf32>
    %261 = arith.subf %253, %260 : vector<32x32xf32>
    %262 = arith.mulf %261, %261 : vector<32x32xf32>
    %cst_131 = arith.constant dense<0.000000e+00> : vector<32xf32>
    %263 = vector.multi_reduction <add>, %262, %cst_131 [1] : vector<32x32xf32> to vector<32xf32>
    %264 = vector.shape_cast %263 : vector<32xf32> to vector<32x1xf32>
    %cst_132 = arith.constant 3.200000e+01 : f32
    %265 = vector.broadcast %cst_132 : f32 to vector<32x1xf32>
    %266 = arith.divf %264, %265 : vector<32x1xf32>
    %267 = vector.broadcast %259 : vector<32x1xf32> to vector<32x32xf32>
    %268 = arith.subf %253, %267 : vector<32x32xf32>
    %cst_133 = arith.constant 9.99999974E-6 : f32
    %269 = vector.broadcast %cst_133 : f32 to vector<32x1xf32>
    %270 = arith.addf %266, %269 : vector<32x1xf32>
    %271 = math.rsqrt %270 : vector<32x1xf32>
    %272 = vector.broadcast %271 : vector<32x1xf32> to vector<32x32xf32>
    %273 = arith.mulf %268, %272 : vector<32x32xf32>
    %274 = vector.broadcast %254 : vector<1x32xf32> to vector<32x32xf32>
    %275 = arith.mulf %273, %274 : vector<32x32xf32>
    %276 = vector.broadcast %255 : vector<1x32xf32> to vector<32x32xf32>
    %277 = arith.addf %275, %276 : vector<32x32xf32>
    %c0_134 = arith.constant 0 : index
    %c0_135 = arith.constant 0 : index
    %278 = vector.load %arg10[%c0_134, %c0_135] : memref<32x32xf32, #tpu.memory_space<vmem>>, vector<32x32xf32>
    %cst_136 = arith.constant dense<0.000000e+00> : vector<32x32xf32>
    %279 = tpu.matmul %277, %278, %cst_136 {dimension_numbers = #tpu.dot_dimension_numbers<[1], [0], [0], [1], [0, 0, 1, 1], [], []>} : vector<32x32xf32>, vector<32x32xf32>, vector<32x32xf32> -> vector<32x32xf32>
    %c0_137 = arith.constant 0 : index
    %c0_138 = arith.constant 0 : index
    %280 = vector.load %arg11[%c0_137, %c0_138] : memref<1x32xf32, #tpu.memory_space<vmem>>, vector<1x32xf32>
    %281 = vector.broadcast %280 : vector<1x32xf32> to vector<32x32xf32>
    %282 = arith.addf %279, %281 : vector<32x32xf32>
    %c0_139 = arith.constant 0 : index
    %c0_140 = arith.constant 0 : index
    %283 = vector.load %arg13[%c0_139, %c0_140] : memref<32x1xf32, #tpu.memory_space<vmem>>, vector<32x1xf32>
    %cst_141 = arith.constant 1.000000e+00 : f32
    %284 = vector.broadcast %cst_141 : f32 to vector<32x1xf32>
    %285 = arith.subf %284, %283 : vector<32x1xf32>
    %286 = vector.broadcast %285 : vector<32x1xf32> to vector<32x32xf32>
    %287 = arith.mulf %282, %286 : vector<32x32xf32>
    %c0_142 = arith.constant 0 : index
    %c0_143 = arith.constant 0 : index
    %288 = vector.load %arg12[%c0_142, %c0_143] : memref<1x32xf32, #tpu.memory_space<vmem>>, vector<1x32xf32>
    %289 = vector.broadcast %288 : vector<1x32xf32> to vector<32x32xf32>
    %290 = vector.broadcast %283 : vector<32x1xf32> to vector<32x32xf32>
    %291 = arith.mulf %289, %290 : vector<32x32xf32>
    %292 = arith.addf %287, %291 : vector<32x32xf32>
    %c0_144 = arith.constant 0 : index
    %c0_145 = arith.constant 0 : index
    %293 = vector.load %arg43[%c0_144, %c0_145] : memref<32x32xf32, #tpu.memory_space<vmem>>, vector<32x32xf32>
    tpu.vector_store %arg43[%c0_144, %c0_145], %292 {strides = array<i32>} : memref<32x32xf32, #tpu.memory_space<vmem>>, vector<32x32xf32>,
    %cst_146 = arith.constant 0.000000e+00 : f32
    %294 = vector.broadcast %cst_146 : f32 to vector<2x512xf32>
    %c0_147 = arith.constant 0 : index
    %c0_148 = arith.constant 0 : index
    %295 = vector.load %arg15[%c0_147, %c0_148] : memref<1x512xf32, #tpu.memory_space<vmem>>, vector<1x512xf32>
    %296 = vector.broadcast %295 : vector<1x512xf32> to vector<2x512xf32>
    %297 = arith.addf %294, %296 : vector<2x512xf32>
    %c0_149 = arith.constant 0 : index
    %c0_150 = arith.constant 0 : index
    %298 = vector.load %arg43[%c0_149, %c0_150] : memref<32x32xf32, #tpu.memory_space<vmem>>, vector<2x32xf32>
    %299 = arith.truncf %298 : vector<2x32xf32> to vector<2x32xbf16>
    %c0_151 = arith.constant 0 : index
    %c0_152 = arith.constant 0 : index
    %300 = vector.load %arg14[%c0_151, %c0_152] : memref<512x512xbf16, #tpu.memory_space<vmem>>, vector<32x512xbf16>
    %cst_153 = arith.constant dense<0.000000e+00> : vector<2x512xf32>
    %301 = tpu.matmul %299, %300, %cst_153 {dimension_numbers = #tpu.dot_dimension_numbers<[1], [0], [0], [1], [0, 0, 1, 1], [], []>} : vector<2x32xbf16>, vector<32x512xbf16>, vector<2x512xf32> -> vector<2x512xf32>
    %302 = arith.addf %297, %301 : vector<2x512xf32>
    %c2_154 = arith.constant 2 : index
    %c0_155 = arith.constant 0 : index
    %303 = vector.load %arg43[%c2_154, %c0_155] : memref<32x32xf32, #tpu.memory_space<vmem>>, vector<2x32xf32>
    %304 = arith.truncf %303 : vector<2x32xf32> to vector<2x32xbf16>
    %c32 = arith.constant 32 : index
    %c0_156 = arith.constant 0 : index
    %305 = vector.load %arg14[%c32, %c0_156] : memref<512x512xbf16, #tpu.memory_space<vmem>>, vector<32x512xbf16>
    %cst_157 = arith.constant dense<0.000000e+00> : vector<2x512xf32>
    %306 = tpu.matmul %304, %305, %cst_157 {dimension_numbers = #tpu.dot_dimension_numbers<[1], [0], [0], [1], [0, 0, 1, 1], [], []>} : vector<2x32xbf16>, vector<32x512xbf16>, vector<2x512xf32> -> vector<2x512xf32>
    %307 = arith.addf %302, %306 : vector<2x512xf32>
    %c4 = arith.constant 4 : index
    %c0_158 = arith.constant 0 : index
    %308 = vector.load %arg43[%c4, %c0_158] : memref<32x32xf32, #tpu.memory_space<vmem>>, vector<2x32xf32>
    %309 = arith.truncf %308 : vector<2x32xf32> to vector<2x32xbf16>
    %c64 = arith.constant 64 : index
    %c0_159 = arith.constant 0 : index
    %310 = vector.load %arg14[%c64, %c0_159] : memref<512x512xbf16, #tpu.memory_space<vmem>>, vector<32x512xbf16>
    %cst_160 = arith.constant dense<0.000000e+00> : vector<2x512xf32>
    %311 = tpu.matmul %309, %310, %cst_160 {dimension_numbers = #tpu.dot_dimension_numbers<[1], [0], [0], [1], [0, 0, 1, 1], [], []>} : vector<2x32xbf16>, vector<32x512xbf16>, vector<2x512xf32> -> vector<2x512xf32>
    %312 = arith.addf %307, %311 : vector<2x512xf32>
    %c6 = arith.constant 6 : index
    %c0_161 = arith.constant 0 : index
    %313 = vector.load %arg43[%c6, %c0_161] : memref<32x32xf32, #tpu.memory_space<vmem>>, vector<2x32xf32>
    %314 = arith.truncf %313 : vector<2x32xf32> to vector<2x32xbf16>
    %c96 = arith.constant 96 : index
    %c0_162 = arith.constant 0 : index
    %315 = vector.load %arg14[%c96, %c0_162] : memref<512x512xbf16, #tpu.memory_space<vmem>>, vector<32x512xbf16>
    %cst_163 = arith.constant dense<0.000000e+00> : vector<2x512xf32>
    %316 = tpu.matmul %314, %315, %cst_163 {dimension_numbers = #tpu.dot_dimension_numbers<[1], [0], [0], [1], [0, 0, 1, 1], [], []>} : vector<2x32xbf16>, vector<32x512xbf16>, vector<2x512xf32> -> vector<2x512xf32>
    %317 = arith.addf %312, %316 : vector<2x512xf32>
    %c8 = arith.constant 8 : index
    %c0_164 = arith.constant 0 : index
    %318 = vector.load %arg43[%c8, %c0_164] : memref<32x32xf32, #tpu.memory_space<vmem>>, vector<2x32xf32>
    %319 = arith.truncf %318 : vector<2x32xf32> to vector<2x32xbf16>
    %c128 = arith.constant 128 : index
    %c0_165 = arith.constant 0 : index
    %320 = vector.load %arg14[%c128, %c0_165] : memref<512x512xbf16, #tpu.memory_space<vmem>>, vector<32x512xbf16>
    %cst_166 = arith.constant dense<0.000000e+00> : vector<2x512xf32>
    %321 = tpu.matmul %319, %320, %cst_166 {dimension_numbers = #tpu.dot_dimension_numbers<[1], [0], [0], [1], [0, 0, 1, 1], [], []>} : vector<2x32xbf16>, vector<32x512xbf16>, vector<2x512xf32> -> vector<2x512xf32>
    %322 = arith.addf %317, %321 : vector<2x512xf32>
    %c10 = arith.constant 10 : index
    %c0_167 = arith.constant 0 : index
    %323 = vector.load %arg43[%c10, %c0_167] : memref<32x32xf32, #tpu.memory_space<vmem>>, vector<2x32xf32>
    %324 = arith.truncf %323 : vector<2x32xf32> to vector<2x32xbf16>
    %c160 = arith.constant 160 : index
    %c0_168 = arith.constant 0 : index
    %325 = vector.load %arg14[%c160, %c0_168] : memref<512x512xbf16, #tpu.memory_space<vmem>>, vector<32x512xbf16>
    %cst_169 = arith.constant dense<0.000000e+00> : vector<2x512xf32>
    %326 = tpu.matmul %324, %325, %cst_169 {dimension_numbers = #tpu.dot_dimension_numbers<[1], [0], [0], [1], [0, 0, 1, 1], [], []>} : vector<2x32xbf16>, vector<32x512xbf16>, vector<2x512xf32> -> vector<2x512xf32>
    %327 = arith.addf %322, %326 : vector<2x512xf32>
    %c12 = arith.constant 12 : index
    %c0_170 = arith.constant 0 : index
    %328 = vector.load %arg43[%c12, %c0_170] : memref<32x32xf32, #tpu.memory_space<vmem>>, vector<2x32xf32>
    %329 = arith.truncf %328 : vector<2x32xf32> to vector<2x32xbf16>
    %c192 = arith.constant 192 : index
    %c0_171 = arith.constant 0 : index
    %330 = vector.load %arg14[%c192, %c0_171] : memref<512x512xbf16, #tpu.memory_space<vmem>>, vector<32x512xbf16>
    %cst_172 = arith.constant dense<0.000000e+00> : vector<2x512xf32>
    %331 = tpu.matmul %329, %330, %cst_172 {dimension_numbers = #tpu.dot_dimension_numbers<[1], [0], [0], [1], [0, 0, 1, 1], [], []>} : vector<2x32xbf16>, vector<32x512xbf16>, vector<2x512xf32> -> vector<2x512xf32>
    %332 = arith.addf %327, %331 : vector<2x512xf32>
    %c14 = arith.constant 14 : index
    %c0_173 = arith.constant 0 : index
    %333 = vector.load %arg43[%c14, %c0_173] : memref<32x32xf32, #tpu.memory_space<vmem>>, vector<2x32xf32>
    %334 = arith.truncf %333 : vector<2x32xf32> to vector<2x32xbf16>
    %c224 = arith.constant 224 : index
    %c0_174 = arith.constant 0 : index
    %335 = vector.load %arg14[%c224, %c0_174] : memref<512x512xbf16, #tpu.memory_space<vmem>>, vector<32x512xbf16>
    %cst_175 = arith.constant dense<0.000000e+00> : vector<2x512xf32>
    %336 = tpu.matmul %334, %335, %cst_175 {dimension_numbers = #tpu.dot_dimension_numbers<[1], [0], [0], [1], [0, 0, 1, 1], [], []>} : vector<2x32xbf16>, vector<32x512xbf16>, vector<2x512xf32> -> vector<2x512xf32>
    %337 = arith.addf %332, %336 : vector<2x512xf32>
    %c16 = arith.constant 16 : index
    %c0_176 = arith.constant 0 : index
    %338 = vector.load %arg43[%c16, %c0_176] : memref<32x32xf32, #tpu.memory_space<vmem>>, vector<2x32xf32>
    %339 = arith.truncf %338 : vector<2x32xf32> to vector<2x32xbf16>
    %c256 = arith.constant 256 : index
    %c0_177 = arith.constant 0 : index
    %340 = vector.load %arg14[%c256, %c0_177] : memref<512x512xbf16, #tpu.memory_space<vmem>>, vector<32x512xbf16>
    %cst_178 = arith.constant dense<0.000000e+00> : vector<2x512xf32>
    %341 = tpu.matmul %339, %340, %cst_178 {dimension_numbers = #tpu.dot_dimension_numbers<[1], [0], [0], [1], [0, 0, 1, 1], [], []>} : vector<2x32xbf16>, vector<32x512xbf16>, vector<2x512xf32> -> vector<2x512xf32>
    %342 = arith.addf %337, %341 : vector<2x512xf32>
    %c18 = arith.constant 18 : index
    %c0_179 = arith.constant 0 : index
    %343 = vector.load %arg43[%c18, %c0_179] : memref<32x32xf32, #tpu.memory_space<vmem>>, vector<2x32xf32>
    %344 = arith.truncf %343 : vector<2x32xf32> to vector<2x32xbf16>
    %c288 = arith.constant 288 : index
    %c0_180 = arith.constant 0 : index
    %345 = vector.load %arg14[%c288, %c0_180] : memref<512x512xbf16, #tpu.memory_space<vmem>>, vector<32x512xbf16>
    %cst_181 = arith.constant dense<0.000000e+00> : vector<2x512xf32>
    %346 = tpu.matmul %344, %345, %cst_181 {dimension_numbers = #tpu.dot_dimension_numbers<[1], [0], [0], [1], [0, 0, 1, 1], [], []>} : vector<2x32xbf16>, vector<32x512xbf16>, vector<2x512xf32> -> vector<2x512xf32>
    %347 = arith.addf %342, %346 : vector<2x512xf32>
    %c20 = arith.constant 20 : index
    %c0_182 = arith.constant 0 : index
    %348 = vector.load %arg43[%c20, %c0_182] : memref<32x32xf32, #tpu.memory_space<vmem>>, vector<2x32xf32>
    %349 = arith.truncf %348 : vector<2x32xf32> to vector<2x32xbf16>
    %c320 = arith.constant 320 : index
    %c0_183 = arith.constant 0 : index
    %350 = vector.load %arg14[%c320, %c0_183] : memref<512x512xbf16, #tpu.memory_space<vmem>>, vector<32x512xbf16>
    %cst_184 = arith.constant dense<0.000000e+00> : vector<2x512xf32>
    %351 = tpu.matmul %349, %350, %cst_184 {dimension_numbers = #tpu.dot_dimension_numbers<[1], [0], [0], [1], [0, 0, 1, 1], [], []>} : vector<2x32xbf16>, vector<32x512xbf16>, vector<2x512xf32> -> vector<2x512xf32>
    %352 = arith.addf %347, %351 : vector<2x512xf32>
    %c22 = arith.constant 22 : index
    %c0_185 = arith.constant 0 : index
    %353 = vector.load %arg43[%c22, %c0_185] : memref<32x32xf32, #tpu.memory_space<vmem>>, vector<2x32xf32>
    %354 = arith.truncf %353 : vector<2x32xf32> to vector<2x32xbf16>
    %c352 = arith.constant 352 : index
    %c0_186 = arith.constant 0 : index
    %355 = vector.load %arg14[%c352, %c0_186] : memref<512x512xbf16, #tpu.memory_space<vmem>>, vector<32x512xbf16>
    %cst_187 = arith.constant dense<0.000000e+00> : vector<2x512xf32>
    %356 = tpu.matmul %354, %355, %cst_187 {dimension_numbers = #tpu.dot_dimension_numbers<[1], [0], [0], [1], [0, 0, 1, 1], [], []>} : vector<2x32xbf16>, vector<32x512xbf16>, vector<2x512xf32> -> vector<2x512xf32>
    %357 = arith.addf %352, %356 : vector<2x512xf32>
    %c24 = arith.constant 24 : index
    %c0_188 = arith.constant 0 : index
    %358 = vector.load %arg43[%c24, %c0_188] : memref<32x32xf32, #tpu.memory_space<vmem>>, vector<2x32xf32>
    %359 = arith.truncf %358 : vector<2x32xf32> to vector<2x32xbf16>
    %c384 = arith.constant 384 : index
    %c0_189 = arith.constant 0 : index
    %360 = vector.load %arg14[%c384, %c0_189] : memref<512x512xbf16, #tpu.memory_space<vmem>>, vector<32x512xbf16>
    %cst_190 = arith.constant dense<0.000000e+00> : vector<2x512xf32>
    %361 = tpu.matmul %359, %360, %cst_190 {dimension_numbers = #tpu.dot_dimension_numbers<[1], [0], [0], [1], [0, 0, 1, 1], [], []>} : vector<2x32xbf16>, vector<32x512xbf16>, vector<2x512xf32> -> vector<2x512xf32>
    %362 = arith.addf %357, %361 : vector<2x512xf32>
    %c26 = arith.constant 26 : index
    %c0_191 = arith.constant 0 : index
    %363 = vector.load %arg43[%c26, %c0_191] : memref<32x32xf32, #tpu.memory_space<vmem>>, vector<2x32xf32>
    %364 = arith.truncf %363 : vector<2x32xf32> to vector<2x32xbf16>
    %c416 = arith.constant 416 : index
    %c0_192 = arith.constant 0 : index
    %365 = vector.load %arg14[%c416, %c0_192] : memref<512x512xbf16, #tpu.memory_space<vmem>>, vector<32x512xbf16>
    %cst_193 = arith.constant dense<0.000000e+00> : vector<2x512xf32>
    %366 = tpu.matmul %364, %365, %cst_193 {dimension_numbers = #tpu.dot_dimension_numbers<[1], [0], [0], [1], [0, 0, 1, 1], [], []>} : vector<2x32xbf16>, vector<32x512xbf16>, vector<2x512xf32> -> vector<2x512xf32>
    %367 = arith.addf %362, %366 : vector<2x512xf32>
    %c28 = arith.constant 28 : index
    %c0_194 = arith.constant 0 : index
    %368 = vector.load %arg43[%c28, %c0_194] : memref<32x32xf32, #tpu.memory_space<vmem>>, vector<2x32xf32>
    %369 = arith.truncf %368 : vector<2x32xf32> to vector<2x32xbf16>
    %c448 = arith.constant 448 : index
    %c0_195 = arith.constant 0 : index
    %370 = vector.load %arg14[%c448, %c0_195] : memref<512x512xbf16, #tpu.memory_space<vmem>>, vector<32x512xbf16>
    %cst_196 = arith.constant dense<0.000000e+00> : vector<2x512xf32>
    %371 = tpu.matmul %369, %370, %cst_196 {dimension_numbers = #tpu.dot_dimension_numbers<[1], [0], [0], [1], [0, 0, 1, 1], [], []>} : vector<2x32xbf16>, vector<32x512xbf16>, vector<2x512xf32> -> vector<2x512xf32>
    %372 = arith.addf %367, %371 : vector<2x512xf32>
    %c30 = arith.constant 30 : index
    %c0_197 = arith.constant 0 : index
    %373 = vector.load %arg43[%c30, %c0_197] : memref<32x32xf32, #tpu.memory_space<vmem>>, vector<2x32xf32>
    %374 = arith.truncf %373 : vector<2x32xf32> to vector<2x32xbf16>
    %c480 = arith.constant 480 : index
    %c0_198 = arith.constant 0 : index
    %375 = vector.load %arg14[%c480, %c0_198] : memref<512x512xbf16, #tpu.memory_space<vmem>>, vector<32x512xbf16>
    %cst_199 = arith.constant dense<0.000000e+00> : vector<2x512xf32>
    %376 = tpu.matmul %374, %375, %cst_199 {dimension_numbers = #tpu.dot_dimension_numbers<[1], [0], [0], [1], [0, 0, 1, 1], [], []>} : vector<2x32xbf16>, vector<32x512xbf16>, vector<2x512xf32> -> vector<2x512xf32>
    %377 = arith.addf %372, %376 : vector<2x512xf32>
    %cst_200 = arith.constant 5.000000e-01 : f32
    %378 = vector.broadcast %cst_200 : f32 to vector<2x512xf32>
    %379 = arith.mulf %378, %377 : vector<2x512xf32>
    %cst_201 = arith.constant 0.707106769 : f32
    %380 = vector.broadcast %cst_201 : f32 to vector<2x512xf32>
    %381 = arith.mulf %377, %380 : vector<2x512xf32>
    %382 = math.absf %381 : vector<2x512xf32>
    %cst_202 = arith.constant 0.327591091 : f32
    %383 = vector.broadcast %cst_202 : f32 to vector<2x512xf32>
    %384 = arith.mulf %383, %382 : vector<2x512xf32>
    %cst_203 = arith.constant 1.000000e+00 : f32
    %385 = vector.broadcast %cst_203 : f32 to vector<2x512xf32>
    %386 = arith.addf %385, %384 : vector<2x512xf32>
    %cst_204 = arith.constant 1.000000e+00 : f32
    %387 = vector.broadcast %cst_204 : f32 to vector<2x512xf32>
    %388 = arith.divf %387, %386 : vector<2x512xf32>
    %cst_205 = arith.constant 1.06140542 : f32
    %389 = vector.broadcast %cst_205 : f32 to vector<2x512xf32>
    %390 = arith.mulf %389, %388 : vector<2x512xf32>
    %cst_206 = arith.constant -1.45315206 : f32
    %391 = vector.broadcast %cst_206 : f32 to vector<2x512xf32>
    %392 = arith.addf %390, %391 : vector<2x512xf32>
    %393 = arith.mulf %392, %388 : vector<2x512xf32>
    %cst_207 = arith.constant 1.42141378 : f32
    %394 = vector.broadcast %cst_207 : f32 to vector<2x512xf32>
    %395 = arith.addf %393, %394 : vector<2x512xf32>
    %396 = arith.mulf %395, %388 : vector<2x512xf32>
    %cst_208 = arith.constant -0.284496725 : f32
    %397 = vector.broadcast %cst_208 : f32 to vector<2x512xf32>
    %398 = arith.addf %396, %397 : vector<2x512xf32>
    %399 = arith.mulf %398, %388 : vector<2x512xf32>
    %cst_209 = arith.constant 0.254829586 : f32
    %400 = vector.broadcast %cst_209 : f32 to vector<2x512xf32>
    %401 = arith.addf %399, %400 : vector<2x512xf32>
    %402 = arith.mulf %401, %388 : vector<2x512xf32>
    %cst_210 = arith.constant 0.000000e+00 : f32
    %403 = vector.broadcast %cst_210 : f32 to vector<2x512xf32>
    %404 = arith.subf %403, %382 : vector<2x512xf32>
    %405 = arith.mulf %404, %382 : vector<2x512xf32>
    %406 = math.exp %405 : vector<2x512xf32>
    %407 = arith.mulf %402, %406 : vector<2x512xf32>
    %cst_211 = arith.constant 1.000000e+00 : f32
    %408 = vector.broadcast %cst_211 : f32 to vector<2x512xf32>
    %409 = arith.subf %408, %407 : vector<2x512xf32>
    %cst_212 = arith.constant 0.000000e+00 : f32
    %410 = vector.broadcast %cst_212 : f32 to vector<2x512xf32>
    %411 = arith.cmpf oge, %381, %410 : vector<2x512xf32>
    %cst_213 = arith.constant 0.000000e+00 : f32
    %412 = vector.broadcast %cst_213 : f32 to vector<2x512xf32>
    %413 = arith.subf %412, %409 : vector<2x512xf32>
    %414 = arith.select %411, %409, %413 : vector<2x512xi1>, vector<2x512xf32>
    %cst_214 = arith.constant 1.000000e+00 : f32
    %415 = vector.broadcast %cst_214 : f32 to vector<2x512xf32>
    %416 = arith.addf %415, %414 : vector<2x512xf32>
    %417 = arith.mulf %379, %416 : vector<2x512xf32>
    %418 = vector.extract_strided_slice %417 {offsets = [0, 0], sizes = [2, 32], strides = [1, 1]} : vector<2x512xf32> to vector<2x32xf32>
    %c0_215 = arith.constant 0 : index
    %c0_216 = arith.constant 0 : index
    %419 = vector.load %arg43[%c0_215, %c0_216] : memref<32x32xf32, #tpu.memory_space<vmem>>, vector<2x32xf32>
    tpu.vector_store %arg43[%c0_215, %c0_216], %418 {strides = array<i32>} : memref<32x32xf32, #tpu.memory_space<vmem>>, vector<2x32xf32>,
    %420 = vector.extract_strided_slice %417 {offsets = [0, 32], sizes = [2, 32], strides = [1, 1]} : vector<2x512xf32> to vector<2x32xf32>
    %c2_217 = arith.constant 2 : index
    %c0_218 = arith.constant 0 : index
    %421 = vector.load %arg43[%c2_217, %c0_218] : memref<32x32xf32, #tpu.memory_space<vmem>>, vector<2x32xf32>
    tpu.vector_store %arg43[%c2_217, %c0_218], %420 {strides = array<i32>} : memref<32x32xf32, #tpu.memory_space<vmem>>, vector<2x32xf32>,
    %422 = vector.extract_strided_slice %417 {offsets = [0, 64], sizes = [2, 32], strides = [1, 1]} : vector<2x512xf32> to vector<2x32xf32>
    %c4_219 = arith.constant 4 : index
    %c0_220 = arith.constant 0 : index
    %423 = vector.load %arg43[%c4_219, %c0_220] : memref<32x32xf32, #tpu.memory_space<vmem>>, vector<2x32xf32>
    tpu.vector_store %arg43[%c4_219, %c0_220], %422 {strides = array<i32>} : memref<32x32xf32, #tpu.memory_space<vmem>>, vector<2x32xf32>,
    %424 = vector.extract_strided_slice %417 {offsets = [0, 96], sizes = [2, 32], strides = [1, 1]} : vector<2x512xf32> to vector<2x32xf32>
    %c6_221 = arith.constant 6 : index
    %c0_222 = arith.constant 0 : index
    %425 = vector.load %arg43[%c6_221, %c0_222] : memref<32x32xf32, #tpu.memory_space<vmem>>, vector<2x32xf32>
    tpu.vector_store %arg43[%c6_221, %c0_222], %424 {strides = array<i32>} : memref<32x32xf32, #tpu.memory_space<vmem>>, vector<2x32xf32>,
    %426 = vector.extract_strided_slice %417 {offsets = [0, 128], sizes = [2, 32], strides = [1, 1]} : vector<2x512xf32> to vector<2x32xf32>
    %c8_223 = arith.constant 8 : index
    %c0_224 = arith.constant 0 : index
    %427 = vector.load %arg43[%c8_223, %c0_224] : memref<32x32xf32, #tpu.memory_space<vmem>>, vector<2x32xf32>
    tpu.vector_store %arg43[%c8_223, %c0_224], %426 {strides = array<i32>} : memref<32x32xf32, #tpu.memory_space<vmem>>, vector<2x32xf32>,
    %428 = vector.extract_strided_slice %417 {offsets = [0, 160], sizes = [2, 32], strides = [1, 1]} : vector<2x512xf32> to vector<2x32xf32>
    %c10_225 = arith.constant 10 : index
    %c0_226 = arith.constant 0 : index
    %429 = vector.load %arg43[%c10_225, %c0_226] : memref<32x32xf32, #tpu.memory_space<vmem>>, vector<2x32xf32>
    tpu.vector_store %arg43[%c10_225, %c0_226], %428 {strides = array<i32>} : memref<32x32xf32, #tpu.memory_space<vmem>>, vector<2x32xf32>,
    %430 = vector.extract_strided_slice %417 {offsets = [0, 192], sizes = [2, 32], strides = [1, 1]} : vector<2x512xf32> to vector<2x32xf32>
    %c12_227 = arith.constant 12 : index
    %c0_228 = arith.constant 0 : index
    %431 = vector.load %arg43[%c12_227, %c0_228] : memref<32x32xf32, #tpu.memory_space<vmem>>, vector<2x32xf32>
    tpu.vector_store %arg43[%c12_227, %c0_228], %430 {strides = array<i32>} : memref<32x32xf32, #tpu.memory_space<vmem>>, vector<2x32xf32>,
    %432 = vector.extract_strided_slice %417 {offsets = [0, 224], sizes = [2, 32], strides = [1, 1]} : vector<2x512xf32> to vector<2x32xf32>
    %c14_229 = arith.constant 14 : index
    %c0_230 = arith.constant 0 : index
    %433 = vector.load %arg43[%c14_229, %c0_230] : memref<32x32xf32, #tpu.memory_space<vmem>>, vector<2x32xf32>
    tpu.vector_store %arg43[%c14_229, %c0_230], %432 {strides = array<i32>} : memref<32x32xf32, #tpu.memory_space<vmem>>, vector<2x32xf32>,
    %434 = vector.extract_strided_slice %417 {offsets = [0, 256], sizes = [2, 32], strides = [1, 1]} : vector<2x512xf32> to vector<2x32xf32>
    %c16_231 = arith.constant 16 : index
    %c0_232 = arith.constant 0 : index
    %435 = vector.load %arg43[%c16_231, %c0_232] : memref<32x32xf32, #tpu.memory_space<vmem>>, vector<2x32xf32>
    tpu.vector_store %arg43[%c16_231, %c0_232], %434 {strides = array<i32>} : memref<32x32xf32, #tpu.memory_space<vmem>>, vector<2x32xf32>,
    %436 = vector.extract_strided_slice %417 {offsets = [0, 288], sizes = [2, 32], strides = [1, 1]} : vector<2x512xf32> to vector<2x32xf32>
    %c18_233 = arith.constant 18 : index
    %c0_234 = arith.constant 0 : index
    %437 = vector.load %arg43[%c18_233, %c0_234] : memref<32x32xf32, #tpu.memory_space<vmem>>, vector<2x32xf32>
    tpu.vector_store %arg43[%c18_233, %c0_234], %436 {strides = array<i32>} : memref<32x32xf32, #tpu.memory_space<vmem>>, vector<2x32xf32>,
    %438 = vector.extract_strided_slice %417 {offsets = [0, 320], sizes = [2, 32], strides = [1, 1]} : vector<2x512xf32> to vector<2x32xf32>
    %c20_235 = arith.constant 20 : index
    %c0_236 = arith.constant 0 : index
    %439 = vector.load %arg43[%c20_235, %c0_236] : memref<32x32xf32, #tpu.memory_space<vmem>>, vector<2x32xf32>
    tpu.vector_store %arg43[%c20_235, %c0_236], %438 {strides = array<i32>} : memref<32x32xf32, #tpu.memory_space<vmem>>, vector<2x32xf32>,
    %440 = vector.extract_strided_slice %417 {offsets = [0, 352], sizes = [2, 32], strides = [1, 1]} : vector<2x512xf32> to vector<2x32xf32>
    %c22_237 = arith.constant 22 : index
    %c0_238 = arith.constant 0 : index
    %441 = vector.load %arg43[%c22_237, %c0_238] : memref<32x32xf32, #tpu.memory_space<vmem>>, vector<2x32xf32>
    tpu.vector_store %arg43[%c22_237, %c0_238], %440 {strides = array<i32>} : memref<32x32xf32, #tpu.memory_space<vmem>>, vector<2x32xf32>,
    %442 = vector.extract_strided_slice %417 {offsets = [0, 384], sizes = [2, 32], strides = [1, 1]} : vector<2x512xf32> to vector<2x32xf32>
    %c24_239 = arith.constant 24 : index
    %c0_240 = arith.constant 0 : index
    %443 = vector.load %arg43[%c24_239, %c0_240] : memref<32x32xf32, #tpu.memory_space<vmem>>, vector<2x32xf32>
    tpu.vector_store %arg43[%c24_239, %c0_240], %442 {strides = array<i32>} : memref<32x32xf32, #tpu.memory_space<vmem>>, vector<2x32xf32>,
    %444 = vector.extract_strided_slice %417 {offsets = [0, 416], sizes = [2, 32], strides = [1, 1]} : vector<2x512xf32> to vector<2x32xf32>
    %c26_241 = arith.constant 26 : index
    %c0_242 = arith.constant 0 : index
    %445 = vector.load %arg43[%c26_241, %c0_242] : memref<32x32xf32, #tpu.memory_space<vmem>>, vector<2x32xf32>
    tpu.vector_store %arg43[%c26_241, %c0_242], %444 {strides = array<i32>} : memref<32x32xf32, #tpu.memory_space<vmem>>, vector<2x32xf32>,
    %446 = vector.extract_strided_slice %417 {offsets = [0, 448], sizes = [2, 32], strides = [1, 1]} : vector<2x512xf32> to vector<2x32xf32>
    %c28_243 = arith.constant 28 : index
    %c0_244 = arith.constant 0 : index
    %447 = vector.load %arg43[%c28_243, %c0_244] : memref<32x32xf32, #tpu.memory_space<vmem>>, vector<2x32xf32>
    tpu.vector_store %arg43[%c28_243, %c0_244], %446 {strides = array<i32>} : memref<32x32xf32, #tpu.memory_space<vmem>>, vector<2x32xf32>,
    %448 = vector.extract_strided_slice %417 {offsets = [0, 480], sizes = [2, 32], strides = [1, 1]} : vector<2x512xf32> to vector<2x32xf32>
    %c30_245 = arith.constant 30 : index
    %c0_246 = arith.constant 0 : index
    %449 = vector.load %arg43[%c30_245, %c0_246] : memref<32x32xf32, #tpu.memory_space<vmem>>, vector<2x32xf32>
    tpu.vector_store %arg43[%c30_245, %c0_246], %448 {strides = array<i32>} : memref<32x32xf32, #tpu.memory_space<vmem>>, vector<2x32xf32>,
    %c0_247 = arith.constant 0 : index
    %c0_248 = arith.constant 0 : index
    %450 = vector.load %arg43[%c0_247, %c0_248] : memref<32x32xf32, #tpu.memory_space<vmem>>, vector<32x32xf32>
    %451 = arith.addf %292, %450 : vector<32x32xf32>
    %c0_249 = arith.constant 0 : index
    %c0_250 = arith.constant 0 : index
    %452 = vector.load %arg16[%c0_249, %c0_250] : memref<1x32xf32, #tpu.memory_space<vmem>>, vector<1x32xf32>
    %c0_251 = arith.constant 0 : index
    %c0_252 = arith.constant 0 : index
    %453 = vector.load %arg17[%c0_251, %c0_252] : memref<1x32xf32, #tpu.memory_space<vmem>>, vector<1x32xf32>
    %cst_253 = arith.constant dense<0.000000e+00> : vector<32xf32>
    %454 = vector.multi_reduction <add>, %451, %cst_253 [1] : vector<32x32xf32> to vector<32xf32>
    %455 = vector.shape_cast %454 : vector<32xf32> to vector<32x1xf32>
    %cst_254 = arith.constant 3.200000e+01 : f32
    %456 = vector.broadcast %cst_254 : f32 to vector<32x1xf32>
    %457 = arith.divf %455, %456 : vector<32x1xf32>
    %458 = vector.broadcast %457 : vector<32x1xf32> to vector<32x32xf32>
    %459 = arith.subf %451, %458 : vector<32x32xf32>
    %460 = arith.mulf %459, %459 : vector<32x32xf32>
    %cst_255 = arith.constant dense<0.000000e+00> : vector<32xf32>
    %461 = vector.multi_reduction <add>, %460, %cst_255 [1] : vector<32x32xf32> to vector<32xf32>
    %462 = vector.shape_cast %461 : vector<32xf32> to vector<32x1xf32>
    %cst_256 = arith.constant 3.200000e+01 : f32
    %463 = vector.broadcast %cst_256 : f32 to vector<32x1xf32>
    %464 = arith.divf %462, %463 : vector<32x1xf32>
    %465 = vector.broadcast %457 : vector<32x1xf32> to vector<32x32xf32>
    %466 = arith.subf %451, %465 : vector<32x32xf32>
    %cst_257 = arith.constant 9.99999974E-6 : f32
    %467 = vector.broadcast %cst_257 : f32 to vector<32x1xf32>
    %468 = arith.addf %464, %467 : vector<32x1xf32>
    %469 = math.rsqrt %468 : vector<32x1xf32>
    %470 = vector.broadcast %469 : vector<32x1xf32> to vector<32x32xf32>
    %471 = arith.mulf %466, %470 : vector<32x32xf32>
    %472 = vector.broadcast %452 : vector<1x32xf32> to vector<32x32xf32>
    %473 = arith.mulf %471, %472 : vector<32x32xf32>
    %474 = vector.broadcast %453 : vector<1x32xf32> to vector<32x32xf32>
    %475 = arith.addf %473, %474 : vector<32x32xf32>
    %c0_258 = arith.constant 0 : index
    %c0_259 = arith.constant 0 : index
    %476 = vector.load %arg32[%c0_258, %c0_259] : memref<32x32xf32, #tpu.memory_space<vmem>>, vector<32x32xf32>
    %c0_260 = arith.constant 0 : index
    %c0_261 = arith.constant 0 : index
    %c0_262 = arith.constant 0 : index
    %477 = vector.load %arg18[%c0_260, %c0_261, %c0_262] : memref<1x32x96xf32, #tpu.memory_space<vmem>>, vector<1x32x96xf32>
    %478 = vector.shape_cast %477 : vector<1x32x96xf32> to vector<32x96xf32>
    %cst_263 = arith.constant dense<0.000000e+00> : vector<32x96xf32>
    %479 = tpu.matmul %475, %478, %cst_263 {dimension_numbers = #tpu.dot_dimension_numbers<[1], [0], [0], [1], [0, 0, 1, 1], [], []>} : vector<32x32xf32>, vector<32x96xf32>, vector<32x96xf32> -> vector<32x96xf32>
    %c0_264 = arith.constant 0 : index
    %c0_265 = arith.constant 0 : index
    %c0_266 = arith.constant 0 : index
    %480 = vector.load %arg19[%c0_264, %c0_265, %c0_266] : memref<1x1x96xf32, #tpu.memory_space<vmem>>, vector<1x1x96xf32>
    %481 = vector.shape_cast %480 : vector<1x1x96xf32> to vector<1x96xf32>
    %482 = vector.broadcast %481 : vector<1x96xf32> to vector<32x96xf32>
    %483 = arith.addf %479, %482 : vector<32x96xf32>
    %c0_267 = arith.constant 0 : index
    %c0_268 = arith.constant 0 : index
    %c0_269 = arith.constant 0 : index
    %484 = vector.load %arg21[%c0_267, %c0_268, %c0_269] : memref<1x1x32xf32, #tpu.memory_space<vmem>>, vector<1x1x32xf32>
    %485 = vector.shape_cast %484 : vector<1x1x32xf32> to vector<1x32xf32>
    %486 = vector.extract_strided_slice %483 {offsets = [0, 0], sizes = [32, 16], strides = [1, 1]} : vector<32x96xf32> to vector<32x16xf32>
    %487 = vector.extract_strided_slice %483 {offsets = [0, 32], sizes = [32, 16], strides = [1, 1]} : vector<32x96xf32> to vector<32x16xf32>
    %488 = vector.extract_strided_slice %483 {offsets = [0, 64], sizes = [32, 16], strides = [1, 1]} : vector<32x96xf32> to vector<32x16xf32>
    %cst_270 = arith.constant dense<0.000000e+00> : vector<32x32xf32>
    %489 = tpu.matmul %486, %487, %cst_270 {dimension_numbers = #tpu.dot_dimension_numbers<[1], [1], [0], [0], [0, 0, 1, 0], [], []>} : vector<32x16xf32>, vector<32x16xf32>, vector<32x32xf32> -> vector<32x32xf32>
    %cst_271 = arith.constant 2.500000e-01 : f32
    %490 = vector.broadcast %cst_271 : f32 to vector<32x32xf32>
    %491 = arith.mulf %489, %490 : vector<32x32xf32>
    %492 = arith.addf %491, %476 : vector<32x32xf32>
    %cst_272 = arith.constant dense<0xFF800000> : vector<32xf32>
    %493 = vector.multi_reduction <maximumf>, %492, %cst_272 [1] : vector<32x32xf32> to vector<32xf32>
    %494 = vector.shape_cast %493 : vector<32xf32> to vector<32x1xf32>
    %495 = vector.broadcast %494 : vector<32x1xf32> to vector<32x32xf32>
    %496 = arith.subf %492, %495 : vector<32x32xf32>
    %497 = math.exp %496 : vector<32x32xf32>
    %cst_273 = arith.constant dense<0.000000e+00> : vector<32xf32>
    %498 = vector.multi_reduction <add>, %497, %cst_273 [1] : vector<32x32xf32> to vector<32xf32>
    %499 = vector.shape_cast %498 : vector<32xf32> to vector<32x1xf32>
    %500 = tpu.reciprocal %499 {approx = true} : vector<32x1xf32> -> vector<32x1xf32>
    %501 = vector.broadcast %500 : vector<32x1xf32> to vector<32x32xf32>
    %502 = arith.mulf %497, %501 : vector<32x32xf32>
    %cst_274 = arith.constant dense<0.000000e+00> : vector<32x16xf32>
    %503 = tpu.matmul %502, %488, %cst_274 {dimension_numbers = #tpu.dot_dimension_numbers<[1], [0], [0], [1], [0, 0, 1, 1], [], []>} : vector<32x32xf32>, vector<32x16xf32>, vector<32x16xf32> -> vector<32x16xf32>
    %c0_275 = arith.constant 0 : index
    %c0_276 = arith.constant 0 : index
    %c0_277 = arith.constant 0 : index
    %504 = vector.load %arg20[%c0_275, %c0_276, %c0_277] : memref<2x16x32xf32, #tpu.memory_space<vmem>>, vector<1x16x32xf32>
    %505 = vector.shape_cast %504 : vector<1x16x32xf32> to vector<16x32xf32>
    %cst_278 = arith.constant dense<0.000000e+00> : vector<32x32xf32>
    %506 = tpu.matmul %503, %505, %cst_278 {dimension_numbers = #tpu.dot_dimension_numbers<[1], [0], [0], [1], [0, 0, 1, 1], [], []>} : vector<32x16xf32>, vector<16x32xf32>, vector<32x32xf32> -> vector<32x32xf32>
    %507 = vector.broadcast %485 : vector<1x32xf32> to vector<32x32xf32>
    %508 = arith.addf %507, %506 : vector<32x32xf32>
    %509 = vector.extract_strided_slice %483 {offsets = [0, 16], sizes = [32, 16], strides = [1, 1]} : vector<32x96xf32> to vector<32x16xf32>
    %510 = vector.extract_strided_slice %483 {offsets = [0, 48], sizes = [32, 16], strides = [1, 1]} : vector<32x96xf32> to vector<32x16xf32>
    %511 = vector.extract_strided_slice %483 {offsets = [0, 80], sizes = [32, 16], strides = [1, 1]} : vector<32x96xf32> to vector<32x16xf32>
    %cst_279 = arith.constant dense<0.000000e+00> : vector<32x32xf32>
    %512 = tpu.matmul %509, %510, %cst_279 {dimension_numbers = #tpu.dot_dimension_numbers<[1], [1], [0], [0], [0, 0, 1, 0], [], []>} : vector<32x16xf32>, vector<32x16xf32>, vector<32x32xf32> -> vector<32x32xf32>
    %cst_280 = arith.constant 2.500000e-01 : f32
    %513 = vector.broadcast %cst_280 : f32 to vector<32x32xf32>
    %514 = arith.mulf %512, %513 : vector<32x32xf32>
    %515 = arith.addf %514, %476 : vector<32x32xf32>
    %cst_281 = arith.constant dense<0xFF800000> : vector<32xf32>
    %516 = vector.multi_reduction <maximumf>, %515, %cst_281 [1] : vector<32x32xf32> to vector<32xf32>
    %517 = vector.shape_cast %516 : vector<32xf32> to vector<32x1xf32>
    %518 = vector.broadcast %517 : vector<32x1xf32> to vector<32x32xf32>
    %519 = arith.subf %515, %518 : vector<32x32xf32>
    %520 = math.exp %519 : vector<32x32xf32>
    %cst_282 = arith.constant dense<0.000000e+00> : vector<32xf32>
    %521 = vector.multi_reduction <add>, %520, %cst_282 [1] : vector<32x32xf32> to vector<32xf32>
    %522 = vector.shape_cast %521 : vector<32xf32> to vector<32x1xf32>
    %523 = tpu.reciprocal %522 {approx = true} : vector<32x1xf32> -> vector<32x1xf32>
    %524 = vector.broadcast %523 : vector<32x1xf32> to vector<32x32xf32>
    %525 = arith.mulf %520, %524 : vector<32x32xf32>
    %cst_283 = arith.constant dense<0.000000e+00> : vector<32x16xf32>
    %526 = tpu.matmul %525, %511, %cst_283 {dimension_numbers = #tpu.dot_dimension_numbers<[1], [0], [0], [1], [0, 0, 1, 1], [], []>} : vector<32x32xf32>, vector<32x16xf32>, vector<32x16xf32> -> vector<32x16xf32>
    %c1_284 = arith.constant 1 : index
    %c0_285 = arith.constant 0 : index
    %c0_286 = arith.constant 0 : index
    %527 = vector.load %arg20[%c1_284, %c0_285, %c0_286] : memref<2x16x32xf32, #tpu.memory_space<vmem>>, vector<1x16x32xf32>
    %528 = vector.shape_cast %527 : vector<1x16x32xf32> to vector<16x32xf32>
    %cst_287 = arith.constant dense<0.000000e+00> : vector<32x32xf32>
    %529 = tpu.matmul %526, %528, %cst_287 {dimension_numbers = #tpu.dot_dimension_numbers<[1], [0], [0], [1], [0, 0, 1, 1], [], []>} : vector<32x16xf32>, vector<16x32xf32>, vector<32x32xf32> -> vector<32x32xf32>
    %530 = arith.addf %508, %529 : vector<32x32xf32>
    %531 = arith.addf %475, %530 : vector<32x32xf32>
    %c0_288 = arith.constant 0 : index
    %c0_289 = arith.constant 0 : index
    %c0_290 = arith.constant 0 : index
    %532 = vector.load %arg22[%c0_288, %c0_289, %c0_290] : memref<1x1x32xf32, #tpu.memory_space<vmem>>, vector<1x1x32xf32>
    %533 = vector.shape_cast %532 : vector<1x1x32xf32> to vector<1x32xf32>
    %c0_291 = arith.constant 0 : index
    %c0_292 = arith.constant 0 : index
    %c0_293 = arith.constant 0 : index
    %534 = vector.load %arg23[%c0_291, %c0_292, %c0_293] : memref<1x1x32xf32, #tpu.memory_space<vmem>>, vector<1x1x32xf32>
    %535 = vector.shape_cast %534 : vector<1x1x32xf32> to vector<1x32xf32>
    %cst_294 = arith.constant dense<0.000000e+00> : vector<32xf32>
    %536 = vector.multi_reduction <add>, %531, %cst_294 [1] : vector<32x32xf32> to vector<32xf32>
    %537 = vector.shape_cast %536 : vector<32xf32> to vector<32x1xf32>
    %cst_295 = arith.constant 3.200000e+01 : f32
    %538 = vector.broadcast %cst_295 : f32 to vector<32x1xf32>
    %539 = arith.divf %537, %538 : vector<32x1xf32>
    %540 = vector.broadcast %539 : vector<32x1xf32> to vector<32x32xf32>
    %541 = arith.subf %531, %540 : vector<32x32xf32>
    %542 = arith.mulf %541, %541 : vector<32x32xf32>
    %cst_296 = arith.constant dense<0.000000e+00> : vector<32xf32>
    %543 = vector.multi_reduction <add>, %542, %cst_296 [1] : vector<32x32xf32> to vector<32xf32>
    %544 = vector.shape_cast %543 : vector<32xf32> to vector<32x1xf32>
    %cst_297 = arith.constant 3.200000e+01 : f32
    %545 = vector.broadcast %cst_297 : f32 to vector<32x1xf32>
    %546 = arith.divf %544, %545 : vector<32x1xf32>
    %547 = vector.broadcast %539 : vector<32x1xf32> to vector<32x32xf32>
    %548 = arith.subf %531, %547 : vector<32x32xf32>
    %cst_298 = arith.constant 9.99999974E-6 : f32
    %549 = vector.broadcast %cst_298 : f32 to vector<32x1xf32>
    %550 = arith.addf %546, %549 : vector<32x1xf32>
    %551 = math.rsqrt %550 : vector<32x1xf32>
    %552 = vector.broadcast %551 : vector<32x1xf32> to vector<32x32xf32>
    %553 = arith.mulf %548, %552 : vector<32x32xf32>
    %554 = vector.broadcast %533 : vector<1x32xf32> to vector<32x32xf32>
    %555 = arith.mulf %553, %554 : vector<32x32xf32>
    %556 = vector.broadcast %535 : vector<1x32xf32> to vector<32x32xf32>
    %557 = arith.addf %555, %556 : vector<32x32xf32>
    %c0_299 = arith.constant 0 : index
    %c0_300 = arith.constant 0 : index
    %c0_301 = arith.constant 0 : index
    %558 = vector.load %arg24[%c0_299, %c0_300, %c0_301] : memref<1x32x128xf32, #tpu.memory_space<vmem>>, vector<1x32x128xf32>
    %559 = vector.shape_cast %558 : vector<1x32x128xf32> to vector<32x128xf32>
    %cst_302 = arith.constant dense<0.000000e+00> : vector<32x128xf32>
    %560 = tpu.matmul %557, %559, %cst_302 {dimension_numbers = #tpu.dot_dimension_numbers<[1], [0], [0], [1], [0, 0, 1, 1], [], []>} : vector<32x32xf32>, vector<32x128xf32>, vector<32x128xf32> -> vector<32x128xf32>
    %c0_303 = arith.constant 0 : index
    %c0_304 = arith.constant 0 : index
    %c0_305 = arith.constant 0 : index
    %561 = vector.load %arg25[%c0_303, %c0_304, %c0_305] : memref<1x1x128xf32, #tpu.memory_space<vmem>>, vector<1x1x128xf32>
    %562 = vector.shape_cast %561 : vector<1x1x128xf32> to vector<1x128xf32>
    %563 = vector.broadcast %562 : vector<1x128xf32> to vector<32x128xf32>
    %564 = arith.addf %560, %563 : vector<32x128xf32>
    %cst_306 = arith.constant 5.000000e-01 : f32
    %565 = vector.broadcast %cst_306 : f32 to vector<32x128xf32>
    %566 = arith.mulf %565, %564 : vector<32x128xf32>
    %cst_307 = arith.constant 0.707106769 : f32
    %567 = vector.broadcast %cst_307 : f32 to vector<32x128xf32>
    %568 = arith.mulf %564, %567 : vector<32x128xf32>
    %569 = math.absf %568 : vector<32x128xf32>
    %cst_308 = arith.constant 0.327591091 : f32
    %570 = vector.broadcast %cst_308 : f32 to vector<32x128xf32>
    %571 = arith.mulf %570, %569 : vector<32x128xf32>
    %cst_309 = arith.constant 1.000000e+00 : f32
    %572 = vector.broadcast %cst_309 : f32 to vector<32x128xf32>
    %573 = arith.addf %572, %571 : vector<32x128xf32>
    %cst_310 = arith.constant 1.000000e+00 : f32
    %574 = vector.broadcast %cst_310 : f32 to vector<32x128xf32>
    %575 = arith.divf %574, %573 : vector<32x128xf32>
    %cst_311 = arith.constant 1.06140542 : f32
    %576 = vector.broadcast %cst_311 : f32 to vector<32x128xf32>
    %577 = arith.mulf %576, %575 : vector<32x128xf32>
    %cst_312 = arith.constant -1.45315206 : f32
    %578 = vector.broadcast %cst_312 : f32 to vector<32x128xf32>
    %579 = arith.addf %577, %578 : vector<32x128xf32>
    %580 = arith.mulf %579, %575 : vector<32x128xf32>
    %cst_313 = arith.constant 1.42141378 : f32
    %581 = vector.broadcast %cst_313 : f32 to vector<32x128xf32>
    %582 = arith.addf %580, %581 : vector<32x128xf32>
    %583 = arith.mulf %582, %575 : vector<32x128xf32>
    %cst_314 = arith.constant -0.284496725 : f32
    %584 = vector.broadcast %cst_314 : f32 to vector<32x128xf32>
    %585 = arith.addf %583, %584 : vector<32x128xf32>
    %586 = arith.mulf %585, %575 : vector<32x128xf32>
    %cst_315 = arith.constant 0.254829586 : f32
    %587 = vector.broadcast %cst_315 : f32 to vector<32x128xf32>
    %588 = arith.addf %586, %587 : vector<32x128xf32>
    %589 = arith.mulf %588, %575 : vector<32x128xf32>
    %cst_316 = arith.constant 0.000000e+00 : f32
    %590 = vector.broadcast %cst_316 : f32 to vector<32x128xf32>
    %591 = arith.subf %590, %569 : vector<32x128xf32>
    %592 = arith.mulf %591, %569 : vector<32x128xf32>
    %593 = math.exp %592 : vector<32x128xf32>
    %594 = arith.mulf %589, %593 : vector<32x128xf32>
    %cst_317 = arith.constant 1.000000e+00 : f32
    %595 = vector.broadcast %cst_317 : f32 to vector<32x128xf32>
    %596 = arith.subf %595, %594 : vector<32x128xf32>
    %cst_318 = arith.constant 0.000000e+00 : f32
    %597 = vector.broadcast %cst_318 : f32 to vector<32x128xf32>
    %598 = arith.cmpf oge, %568, %597 : vector<32x128xf32>
    %cst_319 = arith.constant 0.000000e+00 : f32
    %599 = vector.broadcast %cst_319 : f32 to vector<32x128xf32>
    %600 = arith.subf %599, %596 : vector<32x128xf32>
    %601 = arith.select %598, %596, %600 : vector<32x128xi1>, vector<32x128xf32>
    %cst_320 = arith.constant 1.000000e+00 : f32
    %602 = vector.broadcast %cst_320 : f32 to vector<32x128xf32>
    %603 = arith.addf %602, %601 : vector<32x128xf32>
    %604 = arith.mulf %566, %603 : vector<32x128xf32>
    %c0_321 = arith.constant 0 : index
    %c0_322 = arith.constant 0 : index
    %c0_323 = arith.constant 0 : index
    %605 = vector.load %arg26[%c0_321, %c0_322, %c0_323] : memref<1x128x32xf32, #tpu.memory_space<vmem>>, vector<1x128x32xf32>
    %606 = vector.shape_cast %605 : vector<1x128x32xf32> to vector<128x32xf32>
    %cst_324 = arith.constant dense<0.000000e+00> : vector<32x32xf32>
    %607 = tpu.matmul %604, %606, %cst_324 {dimension_numbers = #tpu.dot_dimension_numbers<[1], [0], [0], [1], [0, 0, 1, 1], [], []>} : vector<32x128xf32>, vector<128x32xf32>, vector<32x32xf32> -> vector<32x32xf32>
    %c0_325 = arith.constant 0 : index
    %c0_326 = arith.constant 0 : index
    %c0_327 = arith.constant 0 : index
    %608 = vector.load %arg27[%c0_325, %c0_326, %c0_327] : memref<1x1x32xf32, #tpu.memory_space<vmem>>, vector<1x1x32xf32>
    %609 = vector.shape_cast %608 : vector<1x1x32xf32> to vector<1x32xf32>
    %610 = vector.broadcast %609 : vector<1x32xf32> to vector<32x32xf32>
    %611 = arith.addf %607, %610 : vector<32x32xf32>
    %612 = arith.addf %557, %611 : vector<32x32xf32>
    %c0_328 = arith.constant 0 : index
    %c0_329 = arith.constant 0 : index
    %c0_330 = arith.constant 0 : index
    %613 = vector.load %arg28[%c0_328, %c0_329, %c0_330] : memref<1x1x32xf32, #tpu.memory_space<vmem>>, vector<1x1x32xf32>
    %614 = vector.shape_cast %613 : vector<1x1x32xf32> to vector<1x32xf32>
    %c0_331 = arith.constant 0 : index
    %c0_332 = arith.constant 0 : index
    %c0_333 = arith.constant 0 : index
    %615 = vector.load %arg29[%c0_331, %c0_332, %c0_333] : memref<1x1x32xf32, #tpu.memory_space<vmem>>, vector<1x1x32xf32>
    %616 = vector.shape_cast %615 : vector<1x1x32xf32> to vector<1x32xf32>
    %cst_334 = arith.constant dense<0.000000e+00> : vector<32xf32>
    %617 = vector.multi_reduction <add>, %612, %cst_334 [1] : vector<32x32xf32> to vector<32xf32>
    %618 = vector.shape_cast %617 : vector<32xf32> to vector<32x1xf32>
    %cst_335 = arith.constant 3.200000e+01 : f32
    %619 = vector.broadcast %cst_335 : f32 to vector<32x1xf32>
    %620 = arith.divf %618, %619 : vector<32x1xf32>
    %621 = vector.broadcast %620 : vector<32x1xf32> to vector<32x32xf32>
    %622 = arith.subf %612, %621 : vector<32x32xf32>
    %623 = arith.mulf %622, %622 : vector<32x32xf32>
    %cst_336 = arith.constant dense<0.000000e+00> : vector<32xf32>
    %624 = vector.multi_reduction <add>, %623, %cst_336 [1] : vector<32x32xf32> to vector<32xf32>
    %625 = vector.shape_cast %624 : vector<32xf32> to vector<32x1xf32>
    %cst_337 = arith.constant 3.200000e+01 : f32
    %626 = vector.broadcast %cst_337 : f32 to vector<32x1xf32>
    %627 = arith.divf %625, %626 : vector<32x1xf32>
    %628 = vector.broadcast %620 : vector<32x1xf32> to vector<32x32xf32>
    %629 = arith.subf %612, %628 : vector<32x32xf32>
    %cst_338 = arith.constant 9.99999974E-6 : f32
    %630 = vector.broadcast %cst_338 : f32 to vector<32x1xf32>
    %631 = arith.addf %627, %630 : vector<32x1xf32>
    %632 = math.rsqrt %631 : vector<32x1xf32>
    %633 = vector.broadcast %632 : vector<32x1xf32> to vector<32x32xf32>
    %634 = arith.mulf %629, %633 : vector<32x32xf32>
    %635 = vector.broadcast %614 : vector<1x32xf32> to vector<32x32xf32>
    %636 = arith.mulf %634, %635 : vector<32x32xf32>
    %637 = vector.broadcast %616 : vector<1x32xf32> to vector<32x32xf32>
    %638 = arith.addf %636, %637 : vector<32x32xf32>
    %c0_339 = arith.constant 0 : index
    %c0_340 = arith.constant 0 : index
    %639 = vector.load %arg30[%c0_339, %c0_340] : memref<32x16xf32, #tpu.memory_space<vmem>>, vector<32x16xf32>
    %cst_341 = arith.constant dense<0.000000e+00> : vector<32x16xf32>
    %640 = tpu.matmul %638, %639, %cst_341 {dimension_numbers = #tpu.dot_dimension_numbers<[1], [0], [0], [1], [0, 0, 1, 1], [], []>} : vector<32x32xf32>, vector<32x16xf32>, vector<32x16xf32> -> vector<32x16xf32>
    %c0_342 = arith.constant 0 : index
    %c0_343 = arith.constant 0 : index
    %641 = vector.load %arg31[%c0_342, %c0_343] : memref<1x16xf32, #tpu.memory_space<vmem>>, vector<1x16xf32>
    %642 = vector.broadcast %641 : vector<1x16xf32> to vector<32x16xf32>
    %643 = arith.addf %640, %642 : vector<32x16xf32>
    %c0_344 = arith.constant 0 : index
    %c0_345 = arith.constant 0 : index
    %644 = vector.load %arg33[%c0_344, %c0_345] : memref<32x32xf32, #tpu.memory_space<vmem>>, vector<32x32xf32>
    %cst_346 = arith.constant dense<0.000000e+00> : vector<32x16xf32>
    %645 = tpu.matmul %644, %643, %cst_346 {dimension_numbers = #tpu.dot_dimension_numbers<[1], [0], [0], [1], [0, 0, 1, 1], [], []>} : vector<32x32xf32>, vector<32x16xf32>, vector<32x16xf32> -> vector<32x16xf32>
    %c0_347 = arith.constant 0 : index
    %c0_348 = arith.constant 0 : index
    %646 = vector.load %arg39[%c0_347, %c0_348] : memref<32x16xf32, #tpu.memory_space<vmem>>, vector<32x16xf32>
    tpu.vector_store %arg39[%c0_347, %c0_348], %645 {strides = array<i32>} : memref<32x16xf32, #tpu.memory_space<vmem>>, vector<32x16xf32>,
    %c0_349 = arith.constant 0 : index
    %c0_350 = arith.constant 0 : index
    %647 = vector.load %arg34[%c0_349, %c0_350] : memref<20x32xf32, #tpu.memory_space<vmem>>, vector<20x32xf32>
    %cst_351 = arith.constant dense<0.000000e+00> : vector<20x32xf32>
    %648 = tpu.matmul %647, %277, %cst_351 {dimension_numbers = #tpu.dot_dimension_numbers<[1], [0], [0], [1], [0, 0, 1, 1], [], []>} : vector<20x32xf32>, vector<32x32xf32>, vector<20x32xf32> -> vector<20x32xf32>
    %c0_352 = arith.constant 0 : index
    %c0_353 = arith.constant 0 : index
    %649 = vector.load %arg35[%c0_352, %c0_353] : memref<32x16xf32, #tpu.memory_space<vmem>>, vector<32x16xf32>
    %cst_354 = arith.constant dense<0.000000e+00> : vector<20x16xf32>
    %650 = tpu.matmul %648, %649, %cst_354 {dimension_numbers = #tpu.dot_dimension_numbers<[1], [0], [0], [1], [0, 0, 1, 1], [], []>} : vector<20x32xf32>, vector<32x16xf32>, vector<20x16xf32> -> vector<20x16xf32>
    %c0_355 = arith.constant 0 : index
    %c0_356 = arith.constant 0 : index
    %651 = vector.load %arg36[%c0_355, %c0_356] : memref<1x16xf32, #tpu.memory_space<vmem>>, vector<1x16xf32>
    %652 = vector.broadcast %651 : vector<1x16xf32> to vector<20x16xf32>
    %653 = arith.addf %650, %652 : vector<20x16xf32>
    %654 = tpu.iota {dimensions = array<i32: 1>} : vector<20x8xi32>
    %655 = tpu.iota {dimensions = array<i32: 1>} : vector<20x16xi32>
    %cst_357 = arith.constant 0.000000e+00 : f32
    %656 = vector.broadcast %cst_357 : f32 to vector<1x8xf32>
    %c0_i32 = arith.constant 0 : i32
    %657 = vector.broadcast %c0_i32 : i32 to vector<20x16xi32>
    %658 = vector.extract_strided_slice %653 {offsets = [0, 0], sizes = [20, 8], strides = [1, 1]} : vector<20x16xf32> to vector<20x8xf32>
    %cst_358 = arith.constant dense<0xFF800000> : vector<20xf32>
    %659 = vector.multi_reduction <maximumf>, %658, %cst_358 [1] : vector<20x8xf32> to vector<20xf32>
    %660 = vector.shape_cast %659 : vector<20xf32> to vector<20x1xf32>
    %661 = vector.broadcast %660 : vector<20x1xf32> to vector<20x8xf32>
    %662 = arith.subf %658, %661 : vector<20x8xf32>
    %663 = math.exp %662 : vector<20x8xf32>
    %cst_359 = arith.constant dense<0.000000e+00> : vector<20xf32>
    %664 = vector.multi_reduction <add>, %663, %cst_359 [1] : vector<20x8xf32> to vector<20xf32>
    %665 = vector.shape_cast %664 : vector<20xf32> to vector<20x1xf32>
    %666 = tpu.reciprocal %665 {approx = true} : vector<20x1xf32> -> vector<20x1xf32>
    %667 = vector.broadcast %666 : vector<20x1xf32> to vector<20x8xf32>
    %668 = arith.mulf %663, %667 : vector<20x8xf32>
    %cst_360 = arith.constant dense<0.000000e+00> : vector<8xf32>
    %669 = vector.multi_reduction <add>, %668, %cst_360 [0] : vector<20x8xf32> to vector<8xf32>
    %670 = vector.shape_cast %669 : vector<8xf32> to vector<1x8xf32>
    %671 = arith.addf %656, %670 : vector<1x8xf32>
    %672 = vector.broadcast %660 : vector<20x1xf32> to vector<20x8xf32>
    %673 = arith.cmpf oge, %658, %672 : vector<20x8xf32>
    %c8_i32 = arith.constant 8 : i32
    %674 = vector.broadcast %c8_i32 : i32 to vector<20x8xi32>
    %675 = arith.select %673, %654, %674 : vector<20x8xi1>, vector<20x8xi32>
    %cst_361 = arith.constant dense<2147483647> : vector<20xi32>
    %676 = vector.multi_reduction <minsi>, %675, %cst_361 [1] : vector<20x8xi32> to vector<20xi32>
    %677 = vector.shape_cast %676 : vector<20xi32> to vector<20x1xi32>
    %c0_i32_362 = arith.constant 0 : i32
    %678 = vector.broadcast %c0_i32_362 : i32 to vector<20x16xi32>
    %679 = arith.cmpi sge, %655, %678 : vector<20x16xi32>
    %c8_i32_363 = arith.constant 8 : i32
    %680 = vector.broadcast %c8_i32_363 : i32 to vector<20x16xi32>
    %681 = arith.cmpi slt, %655, %680 : vector<20x16xi32>
    %682 = arith.andi %679, %681 : vector<20x16xi1>
    %c0_i32_364 = arith.constant 0 : i32
    %683 = vector.broadcast %c0_i32_364 : i32 to vector<20x1xi32>
    %684 = arith.addi %677, %683 : vector<20x1xi32>
    %685 = vector.shape_cast %684 : vector<20x1xi32> to vector<20x1xi32>
    %686 = vector.broadcast %685 : vector<20x1xi32> to vector<20x16xi32>
    %687 = arith.select %682, %686, %657 : vector<20x16xi1>, vector<20x16xi32>
    %688 = vector.extract_strided_slice %653 {offsets = [0, 8], sizes = [20, 8], strides = [1, 1]} : vector<20x16xf32> to vector<20x8xf32>
    %cst_365 = arith.constant dense<0xFF800000> : vector<20xf32>
    %689 = vector.multi_reduction <maximumf>, %688, %cst_365 [1] : vector<20x8xf32> to vector<20xf32>
    %690 = vector.shape_cast %689 : vector<20xf32> to vector<20x1xf32>
    %691 = vector.broadcast %690 : vector<20x1xf32> to vector<20x8xf32>
    %692 = arith.subf %688, %691 : vector<20x8xf32>
    %693 = math.exp %692 : vector<20x8xf32>
    %cst_366 = arith.constant dense<0.000000e+00> : vector<20xf32>
    %694 = vector.multi_reduction <add>, %693, %cst_366 [1] : vector<20x8xf32> to vector<20xf32>
    %695 = vector.shape_cast %694 : vector<20xf32> to vector<20x1xf32>
    %696 = tpu.reciprocal %695 {approx = true} : vector<20x1xf32> -> vector<20x1xf32>
    %697 = vector.broadcast %696 : vector<20x1xf32> to vector<20x8xf32>
    %698 = arith.mulf %693, %697 : vector<20x8xf32>
    %cst_367 = arith.constant dense<0.000000e+00> : vector<8xf32>
    %699 = vector.multi_reduction <add>, %698, %cst_367 [0] : vector<20x8xf32> to vector<8xf32>
    %700 = vector.shape_cast %699 : vector<8xf32> to vector<1x8xf32>
    %701 = arith.addf %671, %700 : vector<1x8xf32>
    %702 = vector.broadcast %690 : vector<20x1xf32> to vector<20x8xf32>
    %703 = arith.cmpf oge, %688, %702 : vector<20x8xf32>
    %c8_i32_368 = arith.constant 8 : i32
    %704 = vector.broadcast %c8_i32_368 : i32 to vector<20x8xi32>
    %705 = arith.select %703, %654, %704 : vector<20x8xi1>, vector<20x8xi32>
    %cst_369 = arith.constant dense<2147483647> : vector<20xi32>
    %706 = vector.multi_reduction <minsi>, %705, %cst_369 [1] : vector<20x8xi32> to vector<20xi32>
    %707 = vector.shape_cast %706 : vector<20xi32> to vector<20x1xi32>
    %c8_i32_370 = arith.constant 8 : i32
    %708 = vector.broadcast %c8_i32_370 : i32 to vector<20x16xi32>
    %709 = arith.cmpi sge, %655, %708 : vector<20x16xi32>
    %c16_i32 = arith.constant 16 : i32
    %710 = vector.broadcast %c16_i32 : i32 to vector<20x16xi32>
    %711 = arith.cmpi slt, %655, %710 : vector<20x16xi32>
    %712 = arith.andi %709, %711 : vector<20x16xi1>
    %c8_i32_371 = arith.constant 8 : i32
    %713 = vector.broadcast %c8_i32_371 : i32 to vector<20x1xi32>
    %714 = arith.addi %707, %713 : vector<20x1xi32>
    %715 = vector.shape_cast %714 : vector<20x1xi32> to vector<20x1xi32>
    %716 = vector.broadcast %715 : vector<20x1xi32> to vector<20x16xi32>
    %717 = arith.select %712, %716, %687 : vector<20x16xi1>, vector<20x16xi32>
    %718 = arith.cmpi eq, %655, %717 : vector<20x16xi32>
    %719 = arith.extui %718 : vector<20x16xi1> to vector<20x16xi32>
    %720 = arith.sitofp %719 : vector<20x16xi32> to vector<20x16xf32>
    %c0_372 = arith.constant 0 : index
    %c0_373 = arith.constant 0 : index
    %721 = vector.load %arg37[%c0_372, %c0_373] : memref<16x16xf32, #tpu.memory_space<vmem>>, vector<16x16xf32>
    %cst_374 = arith.constant dense<0.000000e+00> : vector<20x16xf32>
    %722 = tpu.matmul %720, %721, %cst_374 {dimension_numbers = #tpu.dot_dimension_numbers<[1], [0], [0], [1], [0, 0, 1, 1], [], []>} : vector<20x16xf32>, vector<16x16xf32>, vector<20x16xf32> -> vector<20x16xf32>
    %c0_375 = arith.constant 0 : index
    %c0_376 = arith.constant 0 : index
    %723 = vector.load %arg38[%c0_375, %c0_376] : memref<1x16xf32, #tpu.memory_space<vmem>>, vector<1x16xf32>
    %724 = vector.broadcast %723 : vector<1x16xf32> to vector<20x16xf32>
    %725 = arith.addf %722, %724 : vector<20x16xf32>
    %c0_377 = arith.constant 0 : index
    %c0_378 = arith.constant 0 : index
    %726 = vector.load %arg40[%c0_377, %c0_378] : memref<20x16xf32, #tpu.memory_space<vmem>>, vector<20x16xf32>
    tpu.vector_store %arg40[%c0_377, %c0_378], %725 {strides = array<i32>} : memref<20x16xf32, #tpu.memory_space<vmem>>, vector<20x16xf32>,
    %cst_379 = arith.constant 2.500000e-02 : f32
    %727 = vector.broadcast %cst_379 : f32 to vector<1x8xf32>
    %728 = arith.mulf %701, %727 : vector<1x8xf32>
    %cst_380 = arith.constant 1.000000e-07 : f32
    %729 = vector.broadcast %cst_380 : f32 to vector<1x8xf32>
    %730 = arith.addf %728, %729 : vector<1x8xf32>
    %731 = math.log %730 : vector<1x8xf32>
    %732 = arith.mulf %728, %731 : vector<1x8xf32>
    %cst_381 = arith.constant dense<0.000000e+00> : vector<1xf32>
    %733 = vector.multi_reduction <add>, %732, %cst_381 [1] : vector<1x8xf32> to vector<1xf32>
    %734 = vector.shape_cast %733 : vector<1xf32> to vector<1x1xf32>
    %cst_382 = arith.constant 0.000000e+00 : f32
    %735 = vector.broadcast %cst_382 : f32 to vector<1x1xf32>
    %736 = arith.subf %735, %734 : vector<1x1xf32>
    %737 = math.exp %736 : vector<1x1xf32>
    %c0_383 = arith.constant 0 : index
    %c0_384 = arith.constant 0 : index
    %738 = vector.load %arg41[%c0_383, %c0_384] : memref<1x1xf32, #tpu.memory_space<vmem>>, vector<1x1xf32>
    tpu.vector_store %arg41[%c0_383, %c0_384], %737 {strides = array<i32>} : memref<1x1xf32, #tpu.memory_space<vmem>>, vector<1x1xf32>,
    return
  }
}

</mosaic_0001>

<bundles_post_ra>
// kernel: fwd.1
= control target key start
LH: loop header
LB: loop body
LE: loop exit
PB: predicated region body
PF: predicated region fallthrough
CT: control target
= control target key end

     0   :  { %s10639_s6 = smov 1   ;;  %s10640_s10 = smov 2   ;;  %s12926_s0 = inlined_call_operand.smem [shape: u32[42], index: -1, kind: input, shape index: {}] }
   0x1   :  { %s10723_s5 = sld [smem:[%s12926_s0]]   ;;  %s10641_s14 = smov 3  }
   0x2   :  { %s10728_s9 = sld [smem:[%s12926_s0 + %s10639_s6]]   ;;  %s10642_s18 = smov 4  }
   0x3   :  { %s10733_s13 = sld [smem:[%s12926_s0 + %s10640_s10]]   ;;  %s10643_s22 = smov 5  }
   0x4   :  { %s10738_s17 = sld [smem:[%s12926_s0 + %s10641_s14]]   ;;  %s10644_s26 = smov 6  }
   0x5   :  { %s10743_s21 = sld [smem:[%s12926_s0 + %s10642_s18]]   ;;  %s10645_s30 = smov 7  }
   0x6   :  { %s10748_s25 = sld [smem:[%s12926_s0 + %s10643_s22]]   ;;  %s10646_s4 = smov 8  }
   0x7   :  { %12950 = sst [smem:[#allocation52_spill]] %s10723_s5  ;;  %s10647_s10 = smov 9  }
   0x8   :  { %s10753_s29 = sld [smem:[%s12926_s0 + %s10644_s26]]   ;;  %s10648_s15 = smov 10  }
   0x9   :  { %12951 = sst [smem:[#allocation53_spill]] %s10733_s13  ;;  %s10649_s20 = smov 11  }
   0xa   :  { %12952 = sst [smem:[#allocation54_spill]] %s10738_s17  ;;  %s10650_s26 = smov 12  }
   0xb   :  { %12953 = sst [smem:[#allocation55_spill]] %s10743_s21  ;;  %s10651_s1 = smov 13  }
   0xc   :  { %12954 = sst [smem:[#allocation56_spill]] %s10748_s25  ;;  %s10652_s7 = smov 14  }
   0xd   :  { %s10758_s3 = sld [smem:[%s12926_s0 + %s10645_s30]]   ;;  %s10654_s22 = smov 16  }
   0xe   :  { %s10763_s8 = sld [smem:[%s12926_s0 + %s10646_s4]]   ;;  %s10655_s28 = smov 17  }
   0xf   :  { %s10768_s14 = sld [smem:[%s12926_s0 + %s10647_s10]]  }
  0x10   :  { %s10773_s19 = sld [smem:[%s12926_s0 + %s10648_s15]]   ;;  %s10653_s15 = smov 15  }
  0x11   :  { %s10778_s24 = sld [smem:[%s12926_s0 + %s10649_s20]]  }
  0x12   :  { %s10783_s30 = sld [smem:[%s12926_s0 + %s10650_s26]]  }
  0x13   :  { %s10788_s6 = sld [smem:[%s12926_s0 + %s10651_s1]]  }
  0x14   :  { %12955 = sst [smem:[#allocation57_spill]] %s10763_s8 }
  0x15   :  { %s10793_s12 = sld [smem:[%s12926_s0 + %s10652_s7]]   ;;  %s10656_s7 = smov 18  }
  0x16   :  { %12956 = sst [smem:[#allocation58_spill]] %s10773_s19 }
  0x17   :  { %s10798_s20 = sld [smem:[%s12926_s0 + %s10653_s15]]   ;;  %s10657_s15 = smov 19  }
  0x18   :  { %s10803_s27 = sld [smem:[%s12926_s0 + %s10654_s22]]   ;;  %s10658_s22 = smov 20  }
  0x19   :  { %12957 = sst [smem:[#allocation59_spill]] %s10788_s6 }
  0x1a   :  { %s10808_s4 = sld [smem:[%s12926_s0 + %s10655_s28]]   ;;  %s10659_s28 = smov 21  }
  0x1b   :  { %12958 = sst [smem:[#allocation60_spill]] %s10793_s12 }
  0x1c   :  { %s10813_s12 = sld [smem:[%s12926_s0 + %s10656_s7]]   ;;  %s10660_s7 = smov 22  }
  0x1d   :  { %s10818_s8 = sld [smem:[%s12926_s0 + %s10657_s15]]   ;;  %s10661_s15 = smov 23  }
  0x1e   :  { %12959 = sst [smem:[#allocation61_spill]] %s10803_s27 }
  0x1f   :  { %s10823_s27 = sld [smem:[%s12926_s0 + %s10658_s22]]   ;;  %s10662_s22 = smov 24  }
  0x20   :  { %12960 = sst [smem:[#allocation62_spill]] %s10808_s4 }
  0x21   :  { %s10828_s4 = sld [smem:[%s12926_s0 + %s10659_s28]]   ;;  %s10663_s28 = smov 25  }
  0x22   :  { %s10833_s6 = sld [smem:[%s12926_s0 + %s10660_s7]]   ;;  %s10664_s7 = smov 26  }
  0x23   :  { %12961 = sst [smem:[#allocation63_spill]] %s10818_s8 }
  0x24   :  { %s10838_s8 = sld [smem:[%s12926_s0 + %s10661_s15]]   ;;  %s10665_s15 = smov 27  }
  0x25   :  { %s10843_s19 = sld [smem:[%s12926_s0 + %s10662_s22]]   ;;  %s10666_s22 = smov 28  }
  0x26   :  { %s10853_s25 = sld [smem:[%s12926_s0 + %s10664_s7]]   ;;  %s10668_s7 = smov 30  }
  0x27   :  { %12962 = sst [smem:[#allocation64_spill]] %s10828_s4 }
  0x28   :  { %s10848_s4 = sld [smem:[%s12926_s0 + %s10663_s28]]   ;;  %s10667_s28 = smov 29  }
  0x29   :  { %s10858_s21 = sld [smem:[%s12926_s0 + %s10665_s15]]   ;;  %s10669_s15 = smov 31  }
  0x2a   :  { %12963 = sst [smem:[#allocation65_spill]] %s10838_s8 }
  0x2b   :  { %12964 = sst [smem:[#allocation66_spill]] %s10843_s19 }
  0x2c   :  { %12965 = sst [smem:[#allocation67_spill]] %s10853_s25 }
  0x2d   :  { %s10863_s19 = sld [smem:[%s12926_s0 + %s10666_s22]]   ;;  %s10670_s22 = smov 32  }
  0x2e   :  { %s10868_s17 = sld [smem:[%s12926_s0 + %s10667_s28]]   ;;  %s10671_s28 = smov 33  }
  0x2f   :  { %12966 = sst [smem:[#allocation68_spill]] %s10858_s21 }
  0x30   :  { %s10873_s25 = sld [smem:[%s12926_s0 + %s10668_s7]]   ;;  %s10672_s7 = smov 34  }
  0x31   :  { %s10878_s13 = sld [smem:[%s12926_s0 + %s10669_s15]]   ;;  %s10673_s15 = smov 35  }
  0x32   :  { %s10883_s5 = sld [smem:[%s12926_s0 + %s10670_s22]]   ;;  %s10674_s22 = smov 36  }
  0x33   :  { %s10898_s21 = sld [smem:[%s12926_s0 + %s10673_s15]]   ;;  %s10677_s15 = smov 39  }
  0x34   :  { %12967 = sst [smem:[#allocation69_spill]] %s10868_s17 }
  0x35   :  { %s10888_s17 = sld [smem:[%s12926_s0 + %s10671_s28]]   ;;  %s10675_s28 = smov 37  }
  0x36   :  { %12968 = sst [smem:[#allocation70_spill]] %s10873_s25 }
  0x37   :  { %s10893_s25 = sld [smem:[%s12926_s0 + %s10672_s7]]   ;;  %s10676_s7 = smov 38  }
  0x38   :  { %12969 = sst [smem:[#allocation71_spill]] %s10883_s5 }
  0x39   :  { %12971 = sst [smem:[#allocation73_spill]] %s10898_s21 }
  0x3a   :  { %s10903_s5 = sld [smem:[%s12926_s0 + %s10674_s22]]   ;;  %s10678_s22 = smov 40  }
  0x3b   :  { %12970 = sst [smem:[#allocation72_spill]] %s10888_s17 }
  0x3c   :  { %s10908_s17 = sld [smem:[%s12926_s0 + %s10675_s28]]   ;;  %s10679_s28 = smov 41  }
  0x3d   :  { %s10913_s8 = sld [smem:[%s12926_s0 + %s10676_s7]]  }
  0x3e   :  { %s10918_s21 = sld [smem:[%s12926_s0 + %s10677_s15]]  }
  0x40   :  { %12972 = sst [smem:[#allocation74_spill]] %s10903_s5 }
  0x41   :  { %s10923_s5 = sld [smem:[%s12926_s0 + %s10678_s22]]  }
  0x42   :  { %12973 = sst [smem:[#allocation75_spill]] %s10908_s17 }
  0x43   :  { %s10928_s17 = sld [smem:[%s12926_s0 + %s10679_s28]]  }
  0x44   :  { %89 = vsyncpa [#allocation5], 0 }
  0x45   :  { %90 = vsyncpa [#allocation8], 0 }
  0x46   :  { %91 = vsyncpa [#allocation11], 0 }
  0x47   :  { %92 = vsyncpa [#allocation14], 0 }
  0x48   :  { %93 = vsyncpa [#allocation17], 0 }
  0x49   :  { %94 = vsyncpa [#allocation20], 0 }
  0x4a   :  { %95 = vsyncpa [#allocation23], 0 }
  0x4b   :  { %96 = vsyncpa [#allocation26], 0 }
  0x4c   :  { %97 = vsyncpa [#allocation29], 0 }
  0x4d   :  { %98 = vsyncpa [#allocation32], 0 }
  0x4e   :  { %99 = vsyncpa [#allocation35], 0 }
  0x4f   :  { %100 = vsyncpa [#allocation6], 0 }
  0x50   :  { %101 = vsyncpa [#allocation38], 0  ;;  %s10680_s7 = smov [#allocation7]   ;;  %s10681_s0 = smov [#allocation10]  }
  0x51   :  { %s129_s10 = sshll.u32 %s10680_s7, 4  ;;  %s156_s11 = sshll.u32 %s10681_s0, 4  ;;  %s130_s10 = int_to_ptr.vmem [resolvable:$true] %s129_s10  ;;  %s10930_s11 = int_to_ptr.vmem [resolvable:$true] %s156_s11 }
  0x52   :  { %s10129_s15 = scalar_lea.hbm %s10753_s29, 1024 }
  0x53   :  { %p10130_p0 = scmp.ne.s32.totalorder %s10753_s29, %s10129_s15  ;;  %p10133_p1 = scmp.lt.u32.totalorder %s10129_s15, %s10753_s29 }
  0x55   :  { %p10135_p2 = pnand %p10133_p1, %p10130_p0 }
  0x57   :  { %10138 = shalt.err (!%p10135_p2)
}
  0x58   :  { %s10139_s16 = scalar_lea.vmem %s130_s10, 1024  ;;  %p10144_p4 = scmp.lt.s32.totalorder %s130_s10, %s130_s10 }
  0x59   :  { %p10140_p3 = scmp.ne.s32.totalorder %s130_s10, %s10139_s16  ;;  %p10145_p5 = scmp.lt.s32.totalorder %s10139_s16, %s10139_s16 }
  0x5b   :  { %p10146_p6 = por %p10145_p5, %p10144_p4 }
  0x5d   :  { %p10147_p7 = pnand %p10146_p6, %p10140_p3 }
  0x5f   :  { %10150 = shalt.err (!%p10147_p7)
}
  0x60   :  { %s10682_s18 = smov 128   ;;  %s10683_s22 = smov 8  }
  0x61   :  { %135 = dma.hbm_to_vmem [thread:$0]  %s10753_s29, 1024, %s130_s10, [#allocation8], %s10682_s18, %s10682_s18, %s10683_s22  }
  0x62   :  { %s10151_s23 = scalar_lea.hbm %s10768_s14, 16 }
  0x63   :  { %p10152_p8 = scmp.ne.s32.totalorder %s10768_s14, %s10151_s23  ;;  %p10155_p9 = scmp.lt.u32.totalorder %s10151_s23, %s10768_s14 }
  0x65   :  { %p10157_p10 = pnand %p10155_p9, %p10152_p8 }
  0x67   :  { %10160 = shalt.err (!%p10157_p10)
}
  0x68   :  { %s10161_s26 = scalar_lea.vmem %s10930_s11, 16  ;;  %s10165_s28 = scalar_lea.vmem %s10930_s11, 32 }
  0x69   :  { %p10162_p11 = scmp.ne.s32.totalorder %s10930_s11, %s10161_s26  ;;  %p10166_p12 = scmp.lt.s32.totalorder %s10930_s11, %s10930_s11 }
  0x6a   :  { %p10167_p13 = scmp.lt.s32.totalorder %s10165_s28, %s10161_s26 }
  0x6c   :  { %p10168_p0 = por %p10167_p13, %p10166_p12 }
  0x6e   :  { %p10169_p1 = pnand %p10168_p0, %p10162_p11 }
  0x70   :  { %10172 = shalt.err (!%p10169_p1)
}
  0x71   :  { %159 = dma.hbm_to_vmem [thread:$0]  %s10768_s14, 16, %s10930_s11, [#allocation11]  }
  0x72   :  { %s10684_s29 = smov [#allocation13]   ;;  %s10685_s2 = smov [#allocation16]  }
  0x73   :  { %s178_s1 = sshll.u32 %s10684_s29, 4  ;;  %s205_s7 = sshll.u32 %s10685_s2, 4  ;;  %s179_s1 = int_to_ptr.vmem [resolvable:$true] %s178_s1  ;;  %s10949_s7 = int_to_ptr.vmem [resolvable:$true] %s205_s7 }
  0x74   :  { %s10173_s10 = scalar_lea.hbm %s10783_s30, 16 }
  0x75   :  { %p10174_p2 = scmp.ne.s32.totalorder %s10783_s30, %s10173_s10  ;;  %p10177_p3 = scmp.lt.u32.totalorder %s10173_s10, %s10783_s30 }
  0x77   :  { %p10179_p4 = pnand %p10177_p3, %p10174_p2 }
  0x79   :  { %10182 = shalt.err (!%p10179_p4)
}
  0x7a   :  { %s10183_s0 = scalar_lea.vmem %s179_s1, 16  ;;  %s10187_s15 = scalar_lea.vmem %s179_s1, 32 }
  0x7b   :  { %p10184_p5 = scmp.ne.s32.totalorder %s179_s1, %s10183_s0  ;;  %p10188_p6 = scmp.lt.s32.totalorder %s179_s1, %s179_s1 }
  0x7c   :  { %p10189_p7 = scmp.lt.s32.totalorder %s10187_s15, %s10183_s0 }
  0x7e   :  { %p10190_p8 = por %p10189_p7, %p10188_p6 }
  0x80   :  { %p10191_p9 = pnand %p10190_p8, %p10184_p5 }
  0x82   :  { %10194 = shalt.err (!%p10191_p9)
}
  0x83   :  { %181 = dma.hbm_to_vmem [thread:$0]  %s10783_s30, 16, %s179_s1, [#allocation14]  }
  0x84   :  { %s10195_s14 = scalar_lea.hbm %s10813_s12, 512 }
  0x85   :  { %p10196_p10 = scmp.ne.s32.totalorder %s10813_s12, %s10195_s14  ;;  %p10199_p11 = scmp.lt.u32.totalorder %s10195_s14, %s10813_s12 }
  0x87   :  { %p10201_p12 = pnand %p10199_p11, %p10196_p10 }
  0x89   :  { %10204 = shalt.err (!%p10201_p12)
}
  0x8a   :  { %s10205_s11 = scalar_lea.vmem %s10949_s7, 512  ;;  %p10210_p0 = scmp.lt.s32.totalorder %s10949_s7, %s10949_s7 }
  0x8b   :  { %p10206_p13 = scmp.ne.s32.totalorder %s10949_s7, %s10205_s11  ;;  %p10211_p1 = scmp.lt.s32.totalorder %s10205_s11, %s10205_s11 }
  0x8d   :  { %p10212_p2 = por %p10211_p1, %p10210_p0 }
  0x8f   :  { %p10213_p3 = pnand %p10212_p2, %p10206_p13 }
  0x91   :  { %10216 = shalt.err (!%p10213_p3)
}
  0x92   :  { %211 = dma.hbm_to_vmem [thread:$0]  %s10813_s12, 512, %s10949_s7, [#allocation17], %s10682_s18, %s10682_s18, %s10683_s22  }
  0x93   :  { %s10686_s30 = smov [#allocation19]   ;;  %s10687_s23 = smov [#allocation22]  }
  0x94   :  { %s234_s16 = sshll.u32 %s10686_s30, 4  ;;  %s256_s26 = sshll.u32 %s10687_s23, 4  ;;  %s235_s16 = int_to_ptr.vmem [resolvable:$true] %s234_s16  ;;  %s257_s26 = int_to_ptr.vmem [resolvable:$true] %s256_s26 }
  0x95   :  { %s10217_s28 = scalar_lea.hbm %s10833_s6, 16 }
  0x96   :  { %p10218_p4 = scmp.ne.s32.totalorder %s10833_s6, %s10217_s28  ;;  %p10221_p5 = scmp.lt.u32.totalorder %s10217_s28, %s10833_s6 }
  0x98   :  { %p10223_p6 = pnand %p10221_p5, %p10218_p4 }
  0x9a   :  { %10226 = shalt.err (!%p10223_p6)
}
  0x9b   :  { %s10227_s29 = scalar_lea.vmem %s235_s16, 16  ;;  %s10231_s1 = scalar_lea.vmem %s235_s16, 32 }
  0x9c   :  { %p10228_p7 = scmp.ne.s32.totalorder %s235_s16, %s10227_s29  ;;  %p10232_p8 = scmp.lt.s32.totalorder %s235_s16, %s235_s16 }
  0x9d   :  { %p10233_p9 = scmp.lt.s32.totalorder %s10231_s1, %s10227_s29 }
  0x9f   :  { %p10234_p10 = por %p10233_p9, %p10232_p8 }
  0xa1   :  { %p10235_p11 = pnand %p10234_p10, %p10228_p7 }
  0xa3   :  { %10238 = shalt.err (!%p10235_p11)
}
  0xa4   :  { %237 = dma.hbm_to_vmem [thread:$0]  %s10833_s6, 16, %s235_s16, [#allocation20]  }
  0xa5   :  { %s10239_s12 = scalar_lea.hbm %s10848_s4, 16 }
  0xa6   :  { %p10240_p12 = scmp.ne.s32.totalorder %s10848_s4, %s10239_s12  ;;  %p10243_p13 = scmp.lt.u32.totalorder %s10239_s12, %s10848_s4 }
  0xa8   :  { %p10245_p0 = pnand %p10243_p13, %p10240_p12 }
  0xaa   :  { %10248 = shalt.err (!%p10245_p0)
}
  0xab   :  { %s10249_s2 = scalar_lea.vmem %s257_s26, 16  ;;  %s10253_s7 = scalar_lea.vmem %s257_s26, 32 }
  0xac   :  { %p10250_p1 = scmp.ne.s32.totalorder %s257_s26, %s10249_s2  ;;  %p10254_p2 = scmp.lt.s32.totalorder %s257_s26, %s257_s26 }
  0xad   :  { %p10255_p3 = scmp.lt.s32.totalorder %s10253_s7, %s10249_s2 }
  0xaf   :  { %p10256_p4 = por %p10255_p3, %p10254_p2 }
  0xb1   :  { %p10257_p5 = pnand %p10256_p4, %p10250_p1 }
  0xb3   :  { %10260 = shalt.err (!%p10257_p5)
}
  0xb4   :  { %259 = dma.hbm_to_vmem [thread:$0]  %s10848_s4, 16, %s257_s26, [#allocation23]  }
  0xb5   :  { %s10688_s10 = smov [#allocation25]   ;;  %s10689_s0 = smov [#allocation28]  }
  0xb6   :  { %s278_s6 = sshll.u32 %s10688_s10, 4  ;;  %s300_s15 = sshll.u32 %s10689_s0, 4  ;;  %s279_s6 = int_to_ptr.vmem [resolvable:$true] %s278_s6  ;;  %s301_s15 = int_to_ptr.vmem [resolvable:$true] %s300_s15 }
  0xb7   :  { %s10261_s14 = scalar_lea.hbm %s10863_s19, 16 }
  0xb8   :  { %p10262_p6 = scmp.ne.s32.totalorder %s10863_s19, %s10261_s14  ;;  %p10265_p7 = scmp.lt.u32.totalorder %s10261_s14, %s10863_s19 }
  0xba   :  { %p10267_p8 = pnand %p10265_p7, %p10262_p6 }
  0xbc   :  { %10270 = shalt.err (!%p10267_p8)
}
  0xbd   :  { %s10271_s11 = scalar_lea.vmem %s279_s6, 16  ;;  %s10275_s30 = scalar_lea.vmem %s279_s6, 32 }
  0xbe   :  { %p10272_p9 = scmp.ne.s32.totalorder %s279_s6, %s10271_s11  ;;  %p10276_p10 = scmp.lt.s32.totalorder %s279_s6, %s279_s6 }
  0xbf   :  { %p10277_p11 = scmp.lt.s32.totalorder %s10275_s30, %s10271_s11 }
  0xc1   :  { %p10278_p12 = por %p10277_p11, %p10276_p10 }
  0xc3   :  { %p10279_p13 = pnand %p10278_p12, %p10272_p9 }
  0xc5   :  { %10282 = shalt.err (!%p10279_p13)
}
  0xc6   :  { %281 = dma.hbm_to_vmem [thread:$0]  %s10863_s19, 16, %s279_s6, [#allocation26]  }
  0xc7   :  { %s10283_s4 = scalar_lea.hbm %s10878_s13, 16 }
  0xc8   :  { %p10284_p0 = scmp.ne.s32.totalorder %s10878_s13, %s10283_s4  ;;  %p10287_p1 = scmp.lt.u32.totalorder %s10283_s4, %s10878_s13 }
  0xca   :  { %p10289_p2 = pnand %p10287_p1, %p10284_p0 }
  0xcc   :  { %10292 = shalt.err (!%p10289_p2)
}
  0xcd   :  { %s10293_s16 = scalar_lea.vmem %s301_s15, 16  ;;  %s10297_s23 = scalar_lea.vmem %s301_s15, 32 }
  0xce   :  { %p10294_p3 = scmp.ne.s32.totalorder %s301_s15, %s10293_s16  ;;  %p10298_p4 = scmp.lt.s32.totalorder %s301_s15, %s301_s15 }
  0xcf   :  { %p10299_p5 = scmp.lt.s32.totalorder %s10297_s23, %s10293_s16 }
  0xd1   :  { %p10300_p6 = por %p10299_p5, %p10298_p4 }
  0xd3   :  { %p10301_p7 = pnand %p10300_p6, %p10294_p3 }
  0xd5   :  { %10304 = shalt.err (!%p10301_p7)
}
  0xd6   :  { %303 = dma.hbm_to_vmem [thread:$0]  %s10878_s13, 16, %s301_s15, [#allocation29]  }
  0xd7   :  { %s10690_s26 = smov [#allocation31]   ;;  %s10691_s28 = smov [#allocation4]  }
  0xd8   :  { %s323_s19 = sshll.u32 %s10690_s26, 4  ;;  %s109_s29 = sshll.u32 %s10691_s28, 4  ;;  %s324_s19 = int_to_ptr.vmem [resolvable:$true] %s323_s19  ;;  %s10983_s29 = int_to_ptr.vmem [resolvable:$true] %s109_s29 }
  0xd9   :  { %s10305_s1 = scalar_lea.hbm %s10893_s25, 384 }
  0xda   :  { %p10306_p8 = scmp.ne.s32.totalorder %s10893_s25, %s10305_s1  ;;  %p10309_p9 = scmp.lt.u32.totalorder %s10305_s1, %s10893_s25 }
  0xdc   :  { %p10311_p10 = pnand %p10309_p9, %p10306_p8 }
  0xde   :  { %10314 = shalt.err (!%p10311_p10)
}
  0xdf   :  { %s10315_s12 = scalar_lea.vmem %s324_s19, 384  ;;  %p10320_p12 = scmp.lt.s32.totalorder %s324_s19, %s324_s19 }
  0xe0   :  { %p10316_p11 = scmp.ne.s32.totalorder %s324_s19, %s10315_s12  ;;  %p10321_p13 = scmp.lt.s32.totalorder %s10315_s12, %s10315_s12 }
  0xe2   :  { %p10322_p0 = por %p10321_p13, %p10320_p12 }
  0xe4   :  { %p10323_p1 = pnand %p10322_p0, %p10316_p11 }
  0xe6   :  { %10326 = shalt.err (!%p10323_p1)
}
  0xe7   :  { %329 = dma.hbm_to_vmem [thread:$0]  %s10893_s25, 384, %s324_s19, [#allocation32], %s10682_s18, %s10682_s18, %s10683_s22  }
  0xe8   :  { %s10327_s13 = scalar_lea.hbm %s10728_s9, 256 }
  0xe9   :  { %p10328_p2 = scmp.ne.s32.totalorder %s10728_s9, %s10327_s13  ;;  %p10331_p3 = scmp.lt.u32.totalorder %s10327_s13, %s10728_s9 }
  0xeb   :  { %p10333_p4 = pnand %p10331_p3, %p10328_p2 }
  0xed   :  { %10336 = shalt.err (!%p10333_p4)
}
  0xee   :  { %s10337_s2 = scalar_lea.vmem %s10983_s29, 256  ;;  %p10342_p6 = scmp.lt.s32.totalorder %s10983_s29, %s10983_s29 }
  0xef   :  { %p10338_p5 = scmp.ne.s32.totalorder %s10983_s29, %s10337_s2  ;;  %p10343_p7 = scmp.lt.s32.totalorder %s10337_s2, %s10337_s2 }
  0xf1   :  { %p10344_p8 = por %p10343_p7, %p10342_p6 }
  0xf3   :  { %p10345_p9 = pnand %p10344_p8, %p10338_p5 }
  0xf5   :  { %10348 = shalt.err (!%p10345_p9)
}
  0xf6   :  { %115 = dma.hbm_to_vmem [thread:$0]  %s10728_s9, 256, %s10983_s29, [#allocation5], %s10682_s18, %s10682_s18, %s10683_s22  }
  0xf7   :  { %s10692_s25 = smov [#allocation9]   ;;  %s10693_s10 = smov [#allocation12]  }
  0xf8   :  { %s141_s7 = sshll.u32 %s10692_s25, 4  ;;  %s168_s6 = sshll.u32 %s10693_s10, 4  ;;  %s142_s7 = int_to_ptr.vmem [resolvable:$true] %s141_s7  ;;  %s169_s6 = int_to_ptr.vmem [resolvable:$true] %s168_s6 }
  0xf9   :  { %s10349_s0 = scalar_lea.hbm %s10758_s3, 1024 }
  0xfa   :  { %p10350_p10 = scmp.ne.s32.totalorder %s10758_s3, %s10349_s0  ;;  %p10353_p11 = scmp.lt.u32.totalorder %s10349_s0, %s10758_s3 }
  0xfc   :  { %p10355_p12 = pnand %p10353_p11, %p10350_p10 }
  0xfe   :  { %10358 = shalt.err (!%p10355_p12)
}
  0xff   :  { %s10359_s15 = scalar_lea.vmem %s142_s7, 1024  ;;  %p10364_p0 = scmp.lt.s32.totalorder %s142_s7, %s142_s7 }
 0x100   :  { %p10360_p13 = scmp.ne.s32.totalorder %s142_s7, %s10359_s15  ;;  %p10365_p1 = scmp.lt.s32.totalorder %s10359_s15, %s10359_s15 }
 0x102   :  { %p10366_p2 = por %p10365_p1, %p10364_p0 }
 0x104   :  { %p10367_p3 = pnand %p10366_p2, %p10360_p13 }
 0x106   :  { %10370 = shalt.err (!%p10367_p3)
}
 0x107   :  { %147 = dma.hbm_to_vmem [thread:$0]  %s10758_s3, 1024, %s142_s7, [#allocation8], %s10682_s18, %s10682_s18, %s10683_s22  }
 0x108   :  { %s10371_s9 = scalar_lea.hbm %s10778_s24, 16 }
 0x109   :  { %p10372_p4 = scmp.ne.s32.totalorder %s10778_s24, %s10371_s9  ;;  %p10375_p5 = scmp.lt.u32.totalorder %s10371_s9, %s10778_s24 }
 0x10b   :  { %p10377_p6 = pnand %p10375_p5, %p10372_p4 }
 0x10d   :  { %10380 = shalt.err (!%p10377_p6)
}
 0x10e   :  { %s10381_s14 = scalar_lea.vmem %s169_s6, 16  ;;  %s10385_s11 = scalar_lea.vmem %s169_s6, 32 }
 0x10f   :  { %p10382_p7 = scmp.ne.s32.totalorder %s169_s6, %s10381_s14  ;;  %p10386_p8 = scmp.lt.s32.totalorder %s169_s6, %s169_s6 }
 0x110   :  { %p10387_p9 = scmp.lt.s32.totalorder %s10385_s11, %s10381_s14 }
 0x112   :  { %p10388_p10 = por %p10387_p9, %p10386_p8 }
 0x114   :  { %p10389_p11 = pnand %p10388_p10, %p10382_p7 }
 0x116   :  { %10392 = shalt.err (!%p10389_p11)
}
 0x117   :  { %171 = dma.hbm_to_vmem [thread:$0]  %s10778_s24, 16, %s169_s6, [#allocation11]  }
 0x118   :  { %s10694_s30 = smov [#allocation15]   ;;  %s10695_s4 = smov [#allocation18]  }
 0x119   :  { %s192_s3 = sshll.u32 %s10694_s30, 4  ;;  %s219_s16 = sshll.u32 %s10695_s4, 4  ;;  %s193_s3 = int_to_ptr.vmem [resolvable:$true] %s192_s3  ;;  %s11015_s16 = int_to_ptr.vmem [resolvable:$true] %s219_s16 }
 0x11a   :  { %s10393_s23 = scalar_lea.hbm %s10798_s20, 64 }
 0x11b   :  { %p10394_p12 = scmp.ne.s32.totalorder %s10798_s20, %s10393_s23  ;;  %p10397_p13 = scmp.lt.u32.totalorder %s10393_s23, %s10798_s20 }
 0x11d   :  { %p10399_p0 = pnand %p10397_p13, %p10394_p12 }
 0x11f   :  { %10402 = shalt.err (!%p10399_p0)
}
 0x120   :  { %s10403_s26 = scalar_lea.vmem %s193_s3, 64  ;;  %p10408_p2 = scmp.lt.s32.totalorder %s193_s3, %s193_s3 }
 0x121   :  { %p10404_p1 = scmp.ne.s32.totalorder %s193_s3, %s10403_s26  ;;  %p10409_p3 = scmp.lt.s32.totalorder %s10403_s26, %s10403_s26 }
 0x123   :  { %p10410_p4 = por %p10409_p3, %p10408_p2 }
 0x125   :  { %p10411_p5 = pnand %p10410_p4, %p10404_p1 }
 0x127   :  { %10414 = shalt.err (!%p10411_p5)
}
 0x128   :  { %195 = dma.hbm_to_vmem [thread:$0]  %s10798_s20, 64, %s193_s3, [#allocation14]  }
 0x129   :  { %s10415_s24 = scalar_lea.hbm %s10823_s27, 512 }
 0x12a   :  { %p10416_p6 = scmp.ne.s32.totalorder %s10823_s27, %s10415_s24  ;;  %p10419_p7 = scmp.lt.u32.totalorder %s10415_s24, %s10823_s27 }
 0x12c   :  { %p10421_p8 = pnand %p10419_p7, %p10416_p6 }
 0x12e   :  { %10424 = shalt.err (!%p10421_p8)
}
 0x12f   :  { %s10425_s19 = scalar_lea.vmem %s11015_s16, 512  ;;  %p10430_p10 = scmp.lt.s32.totalorder %s11015_s16, %s11015_s16 }
 0x130   :  { %p10426_p9 = scmp.ne.s32.totalorder %s11015_s16, %s10425_s19  ;;  %p10431_p11 = scmp.lt.s32.totalorder %s10425_s19, %s10425_s19 }
 0x132   :  { %p10432_p12 = por %p10431_p11, %p10430_p10 }
 0x134   :  { %p10433_p13 = pnand %p10432_p12, %p10426_p9 }
 0x136   :  { %10436 = shalt.err (!%p10433_p13)
}
 0x137   :  { %s12974_s20 = sld [smem:[#allocation65_spill]]  ;;  %s10696_s28 = smov [#allocation21]  }
 0x138   :  { %225 = dma.hbm_to_vmem [thread:$0]  %s10823_s27, 512, %s11015_s16, [#allocation17], %s10682_s18, %s10682_s18, %s10683_s22  }
 0x139   :  { %s244_s29 = sshll.u32 %s10696_s28, 4  ;;  %s10697_s1 = smov [#allocation24]   ;;  %s245_s29 = int_to_ptr.vmem [resolvable:$true] %s244_s29 }
 0x13a   :  { %s268_s12 = sshll.u32 %s10697_s1, 4  ;;  %s269_s12 = int_to_ptr.vmem [resolvable:$true] %s268_s12 }
 0x13d   :  { %s10437_s13 = scalar_lea.hbm %s12974_s20, 16 }
 0x13e   :  { %p10438_p0 = scmp.ne.s32.totalorder %s12974_s20, %s10437_s13  ;;  %p10441_p1 = scmp.lt.u32.totalorder %s10437_s13, %s12974_s20 }
 0x140   :  { %p10443_p2 = pnand %p10441_p1, %p10438_p0 }
 0x142   :  { %10446 = shalt.err (!%p10443_p2)
}
 0x143   :  { %s10447_s2 = scalar_lea.vmem %s245_s29, 16  ;;  %s10451_s25 = scalar_lea.vmem %s245_s29, 32 }
 0x144   :  { %p10448_p3 = scmp.ne.s32.totalorder %s245_s29, %s10447_s2  ;;  %p10452_p4 = scmp.lt.s32.totalorder %s245_s29, %s245_s29 }
 0x145   :  { %p10453_p5 = scmp.lt.s32.totalorder %s10451_s25, %s10447_s2 }
 0x147   :  { %p10454_p6 = por %p10453_p5, %p10452_p4 }
 0x149   :  { %p10455_p7 = pnand %p10454_p6, %p10448_p3 }
 0x14b   :  { %10458 = shalt.err (!%p10455_p7)
}
 0x14c   :  { %s12975_s27 = sld [smem:[#allocation68_spill]] }
 0x14d   :  { %247 = dma.hbm_to_vmem [thread:$0]  %s12974_s20, 16, %s245_s29, [#allocation20]  }
 0x152   :  { %s10459_s7 = scalar_lea.hbm %s12975_s27, 16 }
 0x153   :  { %p10460_p8 = scmp.ne.s32.totalorder %s12975_s27, %s10459_s7  ;;  %p10463_p9 = scmp.lt.u32.totalorder %s10459_s7, %s12975_s27 }
 0x155   :  { %p10465_p10 = pnand %p10463_p9, %p10460_p8 }
 0x157   :  { %10468 = shalt.err (!%p10465_p10)
}
 0x158   :  { %s10469_s10 = scalar_lea.vmem %s269_s12, 16  ;;  %s10473_s6 = scalar_lea.vmem %s269_s12, 32 }
 0x159   :  { %p10470_p11 = scmp.ne.s32.totalorder %s269_s12, %s10469_s10  ;;  %p10474_p12 = scmp.lt.s32.totalorder %s269_s12, %s269_s12 }
 0x15a   :  { %p10475_p13 = scmp.lt.s32.totalorder %s10473_s6, %s10469_s10 }
 0x15c   :  { %p10476_p0 = por %p10475_p13, %p10474_p12 }
 0x15e   :  { %p10477_p1 = pnand %p10476_p0, %p10470_p11 }
 0x160   :  { %10480 = shalt.err (!%p10477_p1)
}
 0x161   :  { %s12976_s0 = sld [smem:[#allocation69_spill]]  ;;  %s10698_s15 = smov [#allocation27]  }
 0x162   :  { %271 = dma.hbm_to_vmem [thread:$0]  %s12975_s27, 16, %s269_s12, [#allocation23]  }
 0x163   :  { %s288_s9 = sshll.u32 %s10698_s15, 4  ;;  %s10699_s14 = smov [#allocation30]   ;;  %s289_s9 = int_to_ptr.vmem [resolvable:$true] %s288_s9 }
 0x164   :  { %s311_s11 = sshll.u32 %s10699_s14, 4  ;;  %s11041_s11 = int_to_ptr.vmem [resolvable:$true] %s311_s11 }
 0x167   :  { %s10481_s30 = scalar_lea.hbm %s12976_s0, 16 }
 0x168   :  { %p10482_p2 = scmp.ne.s32.totalorder %s12976_s0, %s10481_s30  ;;  %p10485_p3 = scmp.lt.u32.totalorder %s10481_s30, %s12976_s0 }
 0x16a   :  { %p10487_p4 = pnand %p10485_p3, %p10482_p2 }
 0x16c   :  { %10490 = shalt.err (!%p10487_p4)
}
 0x16d   :  { %s10491_s3 = scalar_lea.vmem %s289_s9, 16  ;;  %s10495_s4 = scalar_lea.vmem %s289_s9, 32 }
 0x16e   :  { %p10492_p5 = scmp.ne.s32.totalorder %s289_s9, %s10491_s3  ;;  %p10496_p6 = scmp.lt.s32.totalorder %s289_s9, %s289_s9 }
 0x16f   :  { %p10497_p7 = scmp.lt.s32.totalorder %s10495_s4, %s10491_s3 }
 0x171   :  { %p10498_p8 = por %p10497_p7, %p10496_p6 }
 0x173   :  { %p10499_p9 = pnand %p10498_p8, %p10492_p5 }
 0x175   :  { %10502 = shalt.err (!%p10499_p9)
}
 0x176   :  { %s12977_s16 = sld [smem:[#allocation72_spill]] }
 0x177   :  { %291 = dma.hbm_to_vmem [thread:$0]  %s12976_s0, 16, %s289_s9, [#allocation26]  }
 0x17c   :  { %s10503_s23 = scalar_lea.hbm %s12977_s16, 512 }
 0x17d   :  { %p10504_p10 = scmp.ne.s32.totalorder %s12977_s16, %s10503_s23  ;;  %p10507_p11 = scmp.lt.u32.totalorder %s10503_s23, %s12977_s16 }
 0x17f   :  { %p10509_p12 = pnand %p10507_p11, %p10504_p10 }
 0x181   :  { %10512 = shalt.err (!%p10509_p12)
}
 0x182   :  { %s10513_s26 = scalar_lea.vmem %s11041_s11, 512  ;;  %p10518_p0 = scmp.lt.s32.totalorder %s11041_s11, %s11041_s11 }
 0x183   :  { %p10514_p13 = scmp.ne.s32.totalorder %s11041_s11, %s10513_s26  ;;  %p10519_p1 = scmp.lt.s32.totalorder %s10513_s26, %s10513_s26 }
 0x185   :  { %p10520_p2 = por %p10519_p1, %p10518_p0 }
 0x187   :  { %p10521_p3 = pnand %p10520_p2, %p10514_p13 }
 0x189   :  { %10524 = shalt.err (!%p10521_p3)
}
 0x18a   :  { %s12978_s24 = sld [smem:[#allocation74_spill]]  ;;  %s10700_s19 = smov [#allocation33]  }
 0x18b   :  { %317 = dma.hbm_to_vmem [thread:$0]  %s12977_s16, 512, %s11041_s11, [#allocation29], %s10682_s18, %s10682_s18, %s10683_s22  }
 0x18c   :  { %s338_s20 = sshll.u32 %s10700_s19, 4  ;;  %s10701_s28 = smov [#allocation34]   ;;  %s339_s20 = int_to_ptr.vmem [resolvable:$true] %s338_s20 }
 0x18d   :  { %s350_s29 = sshll.u32 %s10701_s28, 4  ;;  %s351_s29 = int_to_ptr.vmem [resolvable:$true] %s350_s29 }
 0x190   :  { %s10525_s1 = scalar_lea.hbm %s12978_s24, 16 }
 0x191   :  { %p10526_p4 = scmp.ne.s32.totalorder %s12978_s24, %s10525_s1  ;;  %p10529_p5 = scmp.lt.u32.totalorder %s10525_s1, %s12978_s24 }
 0x193   :  { %p10531_p6 = pnand %p10529_p5, %p10526_p4 }
 0x195   :  { %10534 = shalt.err (!%p10531_p6)
}
 0x196   :  { %s10535_s12 = scalar_lea.vmem %s339_s20, 16  ;;  %s10539_s13 = scalar_lea.vmem %s339_s20, 32 }
 0x197   :  { %p10536_p7 = scmp.ne.s32.totalorder %s339_s20, %s10535_s12  ;;  %p10540_p8 = scmp.lt.s32.totalorder %s339_s20, %s339_s20 }
 0x198   :  { %p10541_p9 = scmp.lt.s32.totalorder %s10539_s13, %s10535_s12 }
 0x19a   :  { %p10542_p10 = por %p10541_p9, %p10540_p8 }
 0x19c   :  { %p10543_p11 = pnand %p10542_p10, %p10536_p7 }
 0x19e   :  { %10546 = shalt.err (!%p10543_p11)
}
 0x19f   :  { %341 = dma.hbm_to_vmem [thread:$0]  %s12978_s24, 16, %s339_s20, [#allocation32]  }
 0x1a0   :  { %s10547_s2 = scalar_lea.hbm %s10913_s8, 16 }
 0x1a1   :  { %p10548_p12 = scmp.ne.s32.totalorder %s10913_s8, %s10547_s2  ;;  %p10551_p13 = scmp.lt.u32.totalorder %s10547_s2, %s10913_s8 }
 0x1a3   :  { %p10553_p0 = pnand %p10551_p13, %p10548_p12 }
 0x1a5   :  { %10556 = shalt.err (!%p10553_p0)
}
 0x1a6   :  { %s10557_s25 = scalar_lea.vmem %s351_s29, 16  ;;  %s10561_s27 = scalar_lea.vmem %s351_s29, 32 }
 0x1a7   :  { %p10558_p1 = scmp.ne.s32.totalorder %s351_s29, %s10557_s25  ;;  %p10562_p2 = scmp.lt.s32.totalorder %s351_s29, %s351_s29 }
 0x1a8   :  { %p10563_p3 = scmp.lt.s32.totalorder %s10561_s27, %s10557_s25 }
 0x1aa   :  { %p10564_p4 = por %p10563_p3, %p10562_p2 }
 0x1ac   :  { %p10565_p5 = pnand %p10564_p4, %p10558_p1 }
 0x1ae   :  { %10568 = shalt.err (!%p10565_p5)
}
 0x1af   :  { %353 = dma.hbm_to_vmem [thread:$0]  %s10913_s8, 16, %s351_s29, [#allocation35]  }
 0x1b0   :  { %10613 = dma.done.wait [#allocation5], 256  }
 0x1b1   :  { %10614 = vsyncadd [#allocation5], 4294967040 }
 0x1b2   :  { %10615 = dma.done.wait [#allocation8], 2048  }
 0x1b3   :  { %10616 = vsyncadd [#allocation8], 4294965248 }
 0x1b4   :  { %10617 = dma.done.wait [#allocation11], 32  }
 0x1b5   :  { %10618 = vsyncadd [#allocation11], 4294967264 }
 0x1b6   :  { %10619 = dma.done.wait [#allocation14], 80  }
 0x1b7   :  { %10620 = vsyncadd [#allocation14], 4294967216 }
 0x1b8   :  { %10621 = dma.done.wait [#allocation17], 1024  }
 0x1b9   :  { %10622 = vsyncadd [#allocation17], 4294966272 }
 0x1ba   :  { %10623 = dma.done.wait [#allocation20], 32  }
 0x1bb   :  { %10624 = vsyncadd [#allocation20], 4294967264 }
 0x1bc   :  { %10625 = dma.done.wait [#allocation23], 32  }
 0x1bd   :  { %10626 = vsyncadd [#allocation23], 4294967264 }
 0x1be   :  { %10627 = dma.done.wait [#allocation26], 32  }
 0x1bf   :  { %10628 = vsyncadd [#allocation26], 4294967264 }
 0x1c0   :  { %10629 = dma.done.wait [#allocation29], 528  }
 0x1c1   :  { %10630 = vsyncadd [#allocation29], 4294966768 }
 0x1c2   :  { %10631 = dma.done.wait [#allocation32], 400  }
 0x1c3   :  { %10632 = vsyncadd [#allocation32], 4294966896 }
 0x1c4   :  { %10633 = dma.done.wait [#allocation35], 16  }
 0x1c5   :  { %10634 = vsyncadd [#allocation35], 4294967280  ;;  %v12944_v0 = vmov 0.0   ;;  %vm415_vm0 = vcmask 261120   ;;  %vm10703_vm1 = vmmov 0   ;;  %s12979_s8 = sld [smem:[#allocation52_spill]] }
 0x1c6   :  { %8702 = vmatprep.subr.mxu0 %v12944_v0  ;;  %8760 = vmatprep.subr.mxu1 %v12944_v0  ;;  %416 = vst.msk [vmem:[#allocation2] sm:$0xff] %vm415_vm0, %v12944_v0  ;;  %417 = vst.msk [vmem:[#allocation2 + $0x8] sm:$0xff] %vm415_vm0, %v12944_v0  ;;  %vm482_vm2 = vcmask 1044480   ;;  %vm454_vm3 = vcmask 39936   ;;  %v453_v1 = vld [vmem:[#allocation4 + $0x5] sm:$0x1f] }
 0x1c7   :  { %8704 = vmatprep.mubr.msk.f32.mxu0 %vm10703_vm1, %v12944_v0  ;;  %8762 = vmatprep.mubr.msk.f32.mxu1 %vm10703_vm1, %v12944_v0  ;;  %418 = vst.msk [vmem:[#allocation2 + $0x10] sm:$0xff] %vm415_vm0, %v12944_v0  ;;  %419 = vst.msk [vmem:[#allocation2 + $0x18] sm:$0xff] %vm415_vm0, %v12944_v0  ;;  %v1118_v2 = vld [vmem:[#allocation4 + $0x5] sm:$0x1f]  ;;  %v443_v5 = vld [vmem:[#allocation4] sm:$0x1f] }
 0x1c8   :  { %420 = vst.msk [vmem:[#allocation2 + $0x20] sm:$0xff] %vm415_vm0, %v12944_v0  ;;  %421 = vst.msk [vmem:[#allocation2 + $0x28] sm:$0xff] %vm415_vm0, %v12944_v0  ;;  %8703 = vmatpush3.msk.msra.mxu0 %vm482_vm2, %v453_v1  ;;  %8761 = vmatpush3.msk.msra.mxu1 %vm482_vm2, %v1118_v2  ;;  %v1108_v8 = vld [vmem:[#allocation4] sm:$0x1f]  ;;  %vm751_vm4 = vcmask 253952   ;;  %s12980_s7 = sld [smem:[#allocation53_spill]] }
 0x1c9   :  { %422 = vst.msk [vmem:[#allocation2 + $0x30] sm:$0xff] %vm415_vm0, %v12944_v0  ;;  %423 = vst.msk [vmem:[#allocation2 + $0x38] sm:$0xff] %vm415_vm0, %v12944_v0  ;;  %8731 = vmatprep.subr.mxu0 %v12944_v0  ;;  %8789 = vmatprep.subr.mxu1 %v12944_v0  ;;  %s12981_s10 = sld [smem:[#allocation54_spill]]  ;;  %s12996_s6 = sld [smem:[#allocation55_spill]] }
 0x1ca   :  { %424 = vst.msk [vmem:[#allocation2 + $0x40] sm:$0xff] %vm415_vm0, %v12944_v0  ;;  %425 = vst.msk [vmem:[#allocation2 + $0x48] sm:$0xff] %vm415_vm0, %v12944_v0  ;;  %s12997_s0 = sld [smem:[#allocation56_spill]]  ;;  %s12998_s15 = sld [smem:[#allocation58_spill]] }
 0x1cb   :  { %426 = vst.msk [vmem:[#allocation2 + $0x50] sm:$0xff] %vm415_vm0, %v12944_v0  ;;  %427 = vst.msk [vmem:[#allocation2 + $0x58] sm:$0xff] %vm415_vm0, %v12944_v0  ;;  %v444_v3 = vld [vmem:[%s12979_s8 + $0x1] sm:$0xff]  ;;  %v445_v6 = vld [vmem:[%s12979_s8 + $0x9] sm:$0xff]  ;;  %s12999_s9 = sld [smem:[#allocation59_spill]]  ;;  %s13000_s14 = sld [smem:[#allocation57_spill]] }
 0x1cc   :  { %428 = vst.msk [vmem:[#allocation2 + $0x60] sm:$0xff] %vm415_vm0, %v12944_v0  ;;  %429 = vst.msk [vmem:[#allocation2 + $0x68] sm:$0xff] %vm415_vm0, %v12944_v0  ;;  %v1109_v4 = vld [vmem:[%s12979_s8 + $0x43] sm:$0xff]  ;;  %8705 = vmatmul.mubr.msk.f32.vlgmr.msra.gmra.mrb[0].mxu0 %vm454_vm3, %v444_v3  ;;  %v1110_v7 = vld [vmem:[%s12979_s8 + $0x4b] sm:$0xff]  ;;  %s13001_s11 = sld [smem:[#allocation60_spill]]  ;;  %s10706_s30 = smov 64  }
 0x1cd   :  { %430 = vst.msk [vmem:[#allocation2 + $0x70] sm:$0xff] %vm415_vm0, %v12944_v0  ;;  %431 = vst.msk [vmem:[#allocation2 + $0x78] sm:$0xff] %vm415_vm0, %v12944_v0  ;;  %8763 = vmatmul.mubr.msk.f32.vlgmr.msra.gmra.mrb[0].mxu1 %vm454_vm3, %v1109_v4  ;;  %8732 = vmatpush3.msk.msra.mxu0 %vm482_vm2, %v443_v5  ;;  %v446_v9 = vld [vmem:[%s12979_s8 + $0x11] sm:$0xff]  ;;  %v447_v11 = vld [vmem:[%s12979_s8 + $0x19] sm:$0xff]  ;;  %s10707_s3 = smov 96   ;;  %s10708_s4 = smov 32  }
 0x1ce   :  { %432 = vst.msk [vmem:[#allocation2 + $0x80] sm:$0xff] %vm415_vm0, %v12944_v0  ;;  %433 = vst.msk [vmem:[#allocation2 + $0x88] sm:$0xff] %vm415_vm0, %v12944_v0  ;;  %8707 = vmatprep.mubr.msk.f32.mxu0 %vm10703_vm1, %v12944_v0  ;;  %8765 = vmatprep.mubr.msk.f32.mxu1 %vm10703_vm1, %v12944_v0  ;;  %v1111_v10 = vld [vmem:[%s12979_s8 + $0x53] sm:$0xff]  ;;  %v1112_v12 = vld [vmem:[%s12979_s8 + $0x5b] sm:$0xff]  ;;  %s13002_s16 = sld [smem:[#allocation61_spill]]  ;;  %s13003_s23 = sld [smem:[#allocation62_spill]] }
 0x1cf   :  { %8790 = vmatpush3.msk.msra.mxu1 %vm482_vm2, %v1108_v8  ;;  %v448_v13 = vld [vmem:[%s12979_s8 + $0x21] sm:$0xff]  ;;  %v449_v15 = vld [vmem:[%s12979_s8 + $0x29] sm:$0xff]  ;;  %v450_v17 = vld [vmem:[%s12979_s8 + $0x31] sm:$0xff]  ;;  %s13004_s26 = sld [smem:[#allocation63_spill]]  ;;  %s10709_s24 = smov 80  }
 0x1d0   :  { %8708 = vmatmul.mubr.msk.f32.gmra.mrb[2].mxu0 %vm454_vm3, %v445_v6  ;;  %v1113_v14 = vld [vmem:[%s12979_s8 + $0x63] sm:$0xff]  ;;  %v1114_v16 = vld [vmem:[%s12979_s8 + $0x6b] sm:$0xff]  ;;  %v1115_v18 = vld [vmem:[%s12979_s8 + $0x73] sm:$0xff]  ;;  %s10710_s19 = smov 112   ;;  %s13007_s20 = sld [smem:[#allocation71_spill]] }
 0x1d1   :  { %8766 = vmatmul.mubr.msk.f32.gmra.mrb[2].mxu1 %vm454_vm3, %v1110_v7  ;;  %8710 = vmatprep.mubr.msk.f32.mxu0 %vm10703_vm1, %v12944_v0  ;;  %v451_v19 = vld [vmem:[%s12979_s8 + $0x39] sm:$0xff]  ;;  %v452_v21 = vld [vmem:[%s12979_s8 + $0x41] sm:$0x1]  ;;  %v1117_v22 = vld [vmem:[%s12979_s8 + $0x83] sm:$0x1]  ;;  %s10711_s28 = smov 48  }
 0x1d2   :  { %8768 = vmatprep.mubr.msk.f32.mxu1 %vm10703_vm1, %v12944_v0  ;;  %v1116_v20 = vld [vmem:[%s12979_s8 + $0x7b] sm:$0xff]  ;;  %v435_v25 = vld [vmem:[%s12979_s8 + $0x8] sm:$0xff]  ;;  %v436_v27 = vld [vmem:[%s12979_s8 + $0x10] sm:$0xff]  ;;  %s13008_s29 = sld [smem:[#allocation64_spill]]  ;;  %s13009_s1 = sld [smem:[#allocation66_spill]] }
 0x1d3   :  { %v434_v23 = vld [vmem:[%s12979_s8] sm:$0xff]  ;;  %v1100_v26 = vld [vmem:[%s12979_s8 + $0x4a] sm:$0xff]  ;;  %v1101_v28 = vld [vmem:[%s12979_s8 + $0x52] sm:$0xff]  ;;  %s13010_s12 = sld [smem:[#allocation67_spill]]  ;;  %s13012_s13 = sld [smem:[#allocation70_spill]] }
 0x1d4   :  { %8711 = vmatmul.mubr.msk.f32.gmra.mrb[4].mxu0 %vm454_vm3, %v446_v9  ;;  %v1099_v24 = vld [vmem:[%s12979_s8 + $0x42] sm:$0xff]  ;;  %v437_v29 = vld [vmem:[%s12979_s8 + $0x18] sm:$0xff]  ;;  %v1104_v34 = vld [vmem:[%s12979_s8 + $0x6a] sm:$0xff]  ;;  %s13013_s2 = sld [smem:[#allocation73_spill]]  ;;  %s10712_s25 = smov 120  }
 0x1d5   :  { %8769 = vmatmul.mubr.msk.f32.gmra.mrb[4].mxu1 %vm454_vm3, %v1111_v10  ;;  %8713 = vmatprep.mubr.msk.f32.mxu0 %vm10703_vm1, %v12944_v0  ;;  %v1102_v30 = vld [vmem:[%s12979_s8 + $0x5a] sm:$0xff]  ;;  %v1103_v32 = vld [vmem:[%s12979_s8 + $0x62] sm:$0xff]  ;;  %v440_v35 = vld [vmem:[%s12979_s8 + $0x30] sm:$0xff]  ;;  %s13014_s27 = sld [smem:[#allocation75_spill]] }
 0x1d6   :  { %8771 = vmatprep.mubr.msk.f32.mxu1 %vm10703_vm1, %v12944_v0  ;;  %v438_v31 = vld [vmem:[%s12979_s8 + $0x20] sm:$0xff]  ;;  %v439_v33 = vld [vmem:[%s12979_s8 + $0x28] sm:$0xff]  ;;  %v1105_v36 = vld [vmem:[%s12979_s8 + $0x72] sm:$0xff] }
 0x1d7   :  { %v441_v37 = vld [vmem:[%s12979_s8 + $0x38] sm:$0xff]  ;;  %v442_v39 = vld [vmem:[%s12979_s8 + $0x40] sm:$0x1]  ;;  %v1107_v40 = vld [vmem:[%s12979_s8 + $0x82] sm:$0x1] }
 0x1d8   :  { %8714 = vmatmul.mubr.msk.f32.gmra.mrb[6].mxu0 %vm454_vm3, %v447_v11  ;;  %v1106_v38 = vld [vmem:[%s12979_s8 + $0x7a] sm:$0xff]  ;;  %s10713_s8 = smov [#allocation36]  }
 0x1d9   :  { %8772 = vmatmul.mubr.msk.f32.gmra.mrb[6].mxu1 %vm454_vm3, %v1112_v12  ;;  %8716 = vmatprep.mubr.msk.f32.mxu0 %vm10703_vm1, %v12944_v0 }
 0x1da   :  { %8774 = vmatprep.mubr.msk.f32.mxu1 %vm10703_vm1, %v12944_v0 }
 0x1dc   :  { %8717 = vmatmul.mubr.msk.f32.gmra.mrb[8].mxu0 %vm454_vm3, %v448_v13 }
 0x1dd   :  { %8775 = vmatmul.mubr.msk.f32.gmra.mrb[8].mxu1 %vm454_vm3, %v1113_v14  ;;  %8719 = vmatprep.mubr.msk.f32.mxu0 %vm10703_vm1, %v12944_v0 }
 0x1de   :  { %8777 = vmatprep.mubr.msk.f32.mxu1 %vm10703_vm1, %v12944_v0 }
 0x1e0   :  { %8720 = vmatmul.mubr.msk.f32.gmra.mrb[10].mxu0 %vm454_vm3, %v449_v15 }
 0x1e1   :  { %8778 = vmatmul.mubr.msk.f32.gmra.mrb[10].mxu1 %vm454_vm3, %v1114_v16  ;;  %8722 = vmatprep.mubr.msk.f32.mxu0 %vm10703_vm1, %v12944_v0 }
 0x1e2   :  { %8780 = vmatprep.mubr.msk.f32.mxu1 %vm10703_vm1, %v12944_v0 }
 0x1e4   :  { %8723 = vmatmul.mubr.msk.f32.gmra.mrb[12].mxu0 %vm454_vm3, %v450_v17 }
 0x1e5   :  { %8781 = vmatmul.mubr.msk.f32.gmra.mrb[12].mxu1 %vm454_vm3, %v1115_v18  ;;  %8725 = vmatprep.mubr.msk.f32.mxu0 %vm10703_vm1, %v12944_v0 }
 0x1e6   :  { %8783 = vmatprep.mubr.msk.f32.mxu1 %vm10703_vm1, %v12944_v0 }
 0x1e8   :  { %8726 = vmatmul.mubr.msk.f32.gmra.mrb[14].mxu0 %vm454_vm3, %v451_v19 }
 0x1e9   :  { %8784 = vmatmul.mubr.msk.f32.gmra.mrb[14].mxu1 %vm454_vm3, %v1116_v20  ;;  %8728 = vmatprep.mubr.msk.f32.mxu0 %vm10703_vm1, %v12944_v0 }
 0x1ea   :  { %8786 = vmatprep.mubr.msk.f32.mxu1 %vm10703_vm1, %v12944_v0 }
 0x1ec   :  { %8729 = vmatmul.mubr.msk.f32.gmra.mrb[16].mxu0 %vm454_vm3, %v452_v21 }
 0x1ed   :  { %8787 = vmatmul.mubr.msk.f32.gmra.mrb[16].mxu1 %vm454_vm3, %v1117_v22  ;;  %8733 = vmatprep.mubr.msk.f32.mxu0 %vm10703_vm1, %v12944_v0 }
 0x1ee   :  { %8791 = vmatprep.mubr.msk.f32.mxu1 %vm10703_vm1, %v12944_v0 }
 0x1f0   :  { %8734 = vmatmul.mubr.msk.f32.vlgmr.msra.gmra.mrb[0].mxu0 %vm454_vm3, %v434_v23 }
 0x1f1   :  { %8792 = vmatmul.mubr.msk.f32.vlgmr.msra.gmra.mrb[0].mxu1 %vm454_vm3, %v1099_v24  ;;  %8736 = vmatprep.mubr.msk.f32.mxu0 %vm10703_vm1, %v12944_v0 }
 0x1f2   :  { %8794 = vmatprep.mubr.msk.f32.mxu1 %vm10703_vm1, %v12944_v0 }
 0x1f4   :  { %8737 = vmatmul.mubr.msk.f32.gmra.mrb[2].mxu0 %vm454_vm3, %v435_v25 }
 0x1f5   :  { %8795 = vmatmul.mubr.msk.f32.gmra.mrb[2].mxu1 %vm454_vm3, %v1100_v26  ;;  %8739 = vmatprep.mubr.msk.f32.mxu0 %vm10703_vm1, %v12944_v0 }
 0x1f6   :  { %8797 = vmatprep.mubr.msk.f32.mxu1 %vm10703_vm1, %v12944_v0 }
 0x1f8   :  { %8740 = vmatmul.mubr.msk.f32.gmra.mrb[4].mxu0 %vm454_vm3, %v436_v27 }
 0x1f9   :  { %8798 = vmatmul.mubr.msk.f32.gmra.mrb[4].mxu1 %vm454_vm3, %v1101_v28  ;;  %8742 = vmatprep.mubr.msk.f32.mxu0 %vm10703_vm1, %v12944_v0 }
 0x1fa   :  { %8800 = vmatprep.mubr.msk.f32.mxu1 %vm10703_vm1, %v12944_v0 }
 0x1fc   :  { %8743 = vmatmul.mubr.msk.f32.gmra.mrb[6].mxu0 %vm454_vm3, %v437_v29 }
 0x1fd   :  { %8801 = vmatmul.mubr.msk.f32.gmra.mrb[6].mxu1 %vm454_vm3, %v1102_v30  ;;  %8745 = vmatprep.mubr.msk.f32.mxu0 %vm10703_vm1, %v12944_v0 }
 0x1fe   :  { %8803 = vmatprep.mubr.msk.f32.mxu1 %vm10703_vm1, %v12944_v0 }
 0x200   :  { %8746 = vmatmul.mubr.msk.f32.gmra.mrb[8].mxu0 %vm454_vm3, %v438_v31 }
 0x201   :  { %8804 = vmatmul.mubr.msk.f32.gmra.mrb[8].mxu1 %vm454_vm3, %v1103_v32  ;;  %8748 = vmatprep.mubr.msk.f32.mxu0 %vm10703_vm1, %v12944_v0 }
 0x202   :  { %8806 = vmatprep.mubr.msk.f32.mxu1 %vm10703_vm1, %v12944_v0 }
 0x204   :  { %8749 = vmatmul.mubr.msk.f32.gmra.mrb[10].mxu0 %vm454_vm3, %v439_v33 }
 0x205   :  { %8807 = vmatmul.mubr.msk.f32.gmra.mrb[10].mxu1 %vm454_vm3, %v1104_v34  ;;  %8751 = vmatprep.mubr.msk.f32.mxu0 %vm10703_vm1, %v12944_v0 }
 0x206   :  { %8809 = vmatprep.mubr.msk.f32.mxu1 %vm10703_vm1, %v12944_v0 }
 0x208   :  { %8752 = vmatmul.mubr.msk.f32.gmra.mrb[12].mxu0 %vm454_vm3, %v440_v35 }
 0x209   :  { %8810 = vmatmul.mubr.msk.f32.gmra.mrb[12].mxu1 %vm454_vm3, %v1105_v36  ;;  %8754 = vmatprep.mubr.msk.f32.mxu0 %vm10703_vm1, %v12944_v0 }
 0x20a   :  { %8812 = vmatprep.mubr.msk.f32.mxu1 %vm10703_vm1, %v12944_v0 }
 0x20c   :  { %8755 = vmatmul.mubr.msk.f32.gmra.mrb[14].mxu0 %vm454_vm3, %v441_v37 }
 0x20d   :  { %8813 = vmatmul.mubr.msk.f32.gmra.mrb[14].mxu1 %vm454_vm3, %v1106_v38  ;;  %8757 = vmatprep.mubr.msk.f32.mxu0 %vm10703_vm1, %v12944_v0 }
 0x20e   :  { %8815 = vmatprep.mubr.msk.f32.mxu1 %vm10703_vm1, %v12944_v0 }
 0x210   :  { %8758 = vmatmul.mubr.msk.f32.gmra.mrb[16].mxu0 %vm454_vm3, %v442_v39 }
 0x211   :  { %8816 = vmatmul.mubr.msk.f32.gmra.mrb[16].mxu1 %vm454_vm3, %v1107_v40 }
 0x2c3   :  { %v11255_v41 = vpop.f32.mrb[0].mxu0 }
 0x2c4   :  { %v11257_v42 = vpop.f32.mrb[0].mxu1  ;;  %v8735_v43 = vpop.f32.mrb[1].mxu0  ;;  %v736_v46 = vsel %vm415_vm0, %v11255_v41, 0.0 }
 0x2c5   :  { %v8793_v44 = vpop.f32.mrb[1].mxu1  ;;  %v1399_v50 = vsel %vm415_vm0, %v11257_v42, 0.0 }
 0x2c7   :  { %v11259_v45 = vpop.f32.mrb[2].mxu0 }
 0x2c8   :  { %v737_v47 = vsel %vm415_vm0, %v11259_v45, 0.0  ;;  %v11265_v48 = vpop.f32.mrb[2].mxu1  ;;  %v8738_v49 = vpop.f32.mrb[3].mxu0 }
 0x2c9   :  { %v738_v51 = vadd.f32 %v737_v47, %v736_v46  ;;  %v1400_v52 = vsel %vm415_vm0, %v11265_v48, 0.0  ;;  %v8796_v53 = vpop.f32.mrb[3].mxu1 }
 0x2ca   :  { %v1401_v54 = vadd.f32 %v1400_v52, %v1399_v50 }
 0x2cb   :  { %v11271_v55 = vpop.f32.mrb[4].mxu0 }
 0x2cc   :  { %v739_v56 = vsel %vm415_vm0, %v11271_v55, 0.0  ;;  %v11275_v57 = vpop.f32.mrb[4].mxu1  ;;  %v8741_v58 = vpop.f32.mrb[5].mxu0 }
 0x2cd   :  { %v740_v59 = vadd.f32 %v739_v56, %v738_v51  ;;  %v1402_v60 = vsel %vm415_vm0, %v11275_v57, 0.0  ;;  %v8799_v61 = vpop.f32.mrb[5].mxu1 }
 0x2ce   :  { %v1403_v62 = vadd.f32 %v1402_v60, %v1401_v54 }
 0x2cf   :  { %v11279_v63 = vpop.f32.mrb[6].mxu0 }
 0x2d0   :  { %v741_v1 = vsel %vm415_vm0, %v11279_v63, 0.0  ;;  %v11283_v2 = vpop.f32.mrb[6].mxu1  ;;  %v8744_v3 = vpop.f32.mrb[7].mxu0 }
 0x2d1   :  { %v742_v4 = vadd.f32 %v741_v1, %v740_v59  ;;  %v1404_v5 = vsel %vm415_vm0, %v11283_v2, 0.0  ;;  %v8802_v6 = vpop.f32.mrb[7].mxu1 }
 0x2d2   :  { %v1405_v7 = vadd.f32 %v1404_v5, %v1403_v62 }
 0x2d3   :  { %v712_v8 = vpop.f32.mrb[8].mxu0 }
 0x2d4   :  { %v743_v9 = vsel %vm415_vm0, %v712_v8, 0.0  ;;  %v11288_v10 = vpop.f32.mrb[8].mxu1  ;;  %v8747_v11 = vpop.f32.mrb[9].mxu0 }
 0x2d5   :  { %v744_v12 = vadd.f32 %v743_v9, %v742_v4  ;;  %v1406_v13 = vsel %vm415_vm0, %v11288_v10, 0.0  ;;  %v8805_v14 = vpop.f32.mrb[9].mxu1 }
 0x2d6   :  { %v1407_v15 = vadd.f32 %v1406_v13, %v1405_v7 }
 0x2d7   :  { %v717_v16 = vpop.f32.mrb[10].mxu0 }
 0x2d8   :  { %v745_v17 = vsel %vm415_vm0, %v717_v16, 0.0  ;;  %v11293_v18 = vpop.f32.mrb[10].mxu1  ;;  %v8750_v19 = vpop.f32.mrb[11].mxu0 }
 0x2d9   :  { %v746_v20 = vadd.f32 %v745_v17, %v744_v12  ;;  %v1408_v21 = vsel %vm415_vm0, %v11293_v18, 0.0  ;;  %v8808_v22 = vpop.f32.mrb[11].mxu1 }
 0x2da   :  { %v1409_v23 = vadd.f32 %v1408_v21, %v1407_v15 }
 0x2db   :  { %v722_v24 = vpop.f32.mrb[12].mxu0 }
 0x2dc   :  { %v747_v25 = vsel %vm415_vm0, %v722_v24, 0.0  ;;  %v11298_v26 = vpop.f32.mrb[12].mxu1  ;;  %v8753_v27 = vpop.f32.mrb[13].mxu0 }
 0x2dd   :  { %v748_v28 = vadd.f32 %v747_v25, %v746_v20  ;;  %v1410_v29 = vsel %vm415_vm0, %v11298_v26, 0.0  ;;  %v8811_v30 = vpop.f32.mrb[13].mxu1 }
 0x2de   :  { %v1411_v31 = vadd.f32 %v1410_v29, %v1409_v23 }
 0x2df   :  { %v727_v32 = vpop.f32.mrb[14].mxu0 }
 0x2e0   :  { %v749_v33 = vsel %vm415_vm0, %v727_v32, 0.0  ;;  %v1390_v34 = vpop.f32.mrb[14].mxu1  ;;  %v8756_v35 = vpop.f32.mrb[15].mxu0 }
 0x2e1   :  { %v750_v36 = vadd.f32 %v749_v33, %v748_v28  ;;  %v1412_v37 = vsel %vm415_vm0, %v1390_v34, 0.0  ;;  %v8814_v38 = vpop.f32.mrb[15].mxu1 }
 0x2e2   :  { %v1413_v39 = vadd.f32 %v1412_v37, %v1411_v31 }
 0x2e3   :  { %v732_v40 = vpop.f32.mrb[16].mxu0 }
 0x2e4   :  { %v752_v43 = vsel %vm751_vm4, %v732_v40, 0.0  ;;  %v1395_v44 = vpop.f32.mrb[16].mxu1  ;;  %v8759_v46 = vpop.f32.mrb[17].mxu0 }
 0x2e5   :  { %v753_v47 = vadd.f32 %v752_v43, %v750_v36  ;;  %v1414_v49 = vsel %vm751_vm4, %v1395_v44, 0.0  ;;  %v8817_v50 = vpop.f32.mrb[17].mxu1 }
 0x2e6   :  { %v1415_v51 = vadd.f32 %v1414_v49, %v1413_v39 }
 0x2e7   :  { %v754_v52 = vrot.slane %v753_v47, 4 }
 0x2e8   :  { %v1416_v53 = vrot.slane %v1415_v51, 4 }
 0x2e9   :  { %v755_v54 = vadd.f32 %v754_v52, %v753_v47 }
 0x2ea   :  { %v1417_v56 = vadd.f32 %v1416_v53, %v1415_v51 }
 0x2eb   :  { %v756_v58 = vrot.slane %v755_v54, 2 }
 0x2ec   :  { %v1418_v59 = vrot.slane %v1417_v56, 2 }
 0x2ed   :  { %v757_v60 = vadd.f32 %v756_v58, %v755_v54 }
 0x2ee   :  { %v1419_v61 = vadd.f32 %v1418_v59, %v1417_v56 }
 0x2ef   :  { %v758_v62 = vrot.slane %v757_v60, 1 }
 0x2f0   :  { %v1420_v1 = vrot.slane %v1419_v61, 1 }
 0x2f1   :  { %v759_v3 = vadd.f32 %v758_v62, %v757_v60 }
 0x2f2   :  { %v1421_v5 = vadd.f32 %v1420_v1, %v1419_v61 }
 0x2f3   :  { %v761_v4 = vmul.f32 0.015384615, %v759_v3 }
 0x2f5   :  { %v11307_v6 = vsub.f32 %v11255_v41, %v761_v4  ;;  %v11310_v7 = vsub.f32 %v11259_v45, %v761_v4  ;;  %v11313_v9 = vsub.f32 %v11271_v55, %v761_v4  ;;  %v11316_v11 = vsub.f32 %v11279_v63, %v761_v4 }
 0x2f6   :  { %v11318_v12 = vsub.f32 %v712_v8, %v761_v4  ;;  %v11320_v13 = vsub.f32 %v717_v16, %v761_v4  ;;  %v11322_v14 = vsub.f32 %v722_v24, %v761_v4  ;;  %v11324_v15 = vsub.f32 %v727_v32, %v761_v4 }
 0x2f7   :  { %v11326_v17 = vsub.f32 %v732_v40, %v761_v4  ;;  %v771_v41 = vmul.f32 %v11307_v6, %v11307_v6  ;;  %v772_v45 = vmul.f32 %v11310_v7, %v11310_v7  ;;  %v773_v55 = vmul.f32 %v11313_v9, %v11313_v9 }
 0x2f8   :  { %v774_v63 = vmul.f32 %v11316_v11, %v11316_v11  ;;  %v1422_v8 = vmul.f32 0.015384615, %v1421_v5  ;;  %v775_v21 = vmul.f32 %v11318_v12, %v11318_v12  ;;  %v776_v22 = vmul.f32 %v11320_v13, %v11320_v13 }
 0x2f9   :  { %v780_v16 = vsel %vm415_vm0, %v771_v41, 0.0  ;;  %v781_v19 = vsel %vm415_vm0, %v772_v45, 0.0  ;;  %v783_v23 = vsel %vm415_vm0, %v773_v55, 0.0  ;;  %v779_v46 = vmul.f32 %v11326_v17, %v11326_v17 }
 0x2fa   :  { %v782_v20 = vadd.f32 %v781_v19, %v780_v16  ;;  %v785_v24 = vsel %vm415_vm0, %v774_v63, 0.0  ;;  %v11345_v27 = vsub.f32 %v11257_v42, %v1422_v8  ;;  %v11348_v28 = vsub.f32 %v11265_v48, %v1422_v8 }
 0x2fb   :  { %v11351_v29 = vsub.f32 %v11275_v57, %v1422_v8  ;;  %v11354_v30 = vsub.f32 %v11283_v2, %v1422_v8  ;;  %v11357_v31 = vsub.f32 %v11288_v10, %v1422_v8  ;;  %v11360_v32 = vsub.f32 %v11293_v18, %v1422_v8 }
 0x2fc   :  { %v784_v25 = vadd.f32 %v783_v23, %v782_v20  ;;  %v11363_v33 = vsub.f32 %v11298_v26, %v1422_v8  ;;  %v11365_v35 = vsub.f32 %v1390_v34, %v1422_v8  ;;  %v11367_v48 = vsub.f32 %v1395_v44, %v1422_v8 }
 0x2fd   :  { %v1432_v57 = vmul.f32 %v11345_v27, %v11345_v27  ;;  %v777_v2 = vmul.f32 %v11322_v14, %v11322_v14  ;;  %v787_v10 = vsel %vm415_vm0, %v775_v21, 0.0  ;;  %v1433_v18 = vmul.f32 %v11348_v28, %v11348_v28 }
 0x2fe   :  { %v786_v42 = vadd.f32 %v785_v24, %v784_v25  ;;  %v1434_v26 = vmul.f32 %v11351_v29, %v11351_v29  ;;  %v778_v34 = vmul.f32 %v11324_v15, %v11324_v15  ;;  %v789_v37 = vsel %vm415_vm0, %v776_v22, 0.0 }
 0x2ff   :  { %v1435_v38 = vmul.f32 %v11354_v30, %v11354_v30  ;;  %v1441_v39 = vsel %vm415_vm0, %v1432_v57, 0.0  ;;  %v1442_v40 = vsel %vm415_vm0, %v1433_v18, 0.0  ;;  %v791_v47 = vsel %vm415_vm0, %v777_v2, 0.0 }
 0x300   :  { %v788_v36 = vadd.f32 %v787_v10, %v786_v42  ;;  %v1443_v44 = vadd.f32 %v1442_v40, %v1441_v39  ;;  %v1436_v49 = vmul.f32 %v11357_v31, %v11357_v31  ;;  %v1444_v50 = vsel %vm415_vm0, %v1434_v26, 0.0 }
 0x301   :  { %v793_v53 = vsel %vm415_vm0, %v778_v34, 0.0  ;;  %v1437_v54 = vmul.f32 %v11360_v32, %v11360_v32  ;;  %v1446_v56 = vsel %vm415_vm0, %v1435_v38, 0.0  ;;  %v795_v60 = vsel %vm751_vm4, %v779_v46, 0.0 }
 0x302   :  { %v790_v43 = vadd.f32 %v789_v37, %v788_v36  ;;  %v1445_v52 = vadd.f32 %v1444_v50, %v1443_v44  ;;  %v1438_v61 = vmul.f32 %v11363_v33, %v11363_v33  ;;  %v1448_v62 = vsel %vm415_vm0, %v1436_v49, 0.0 }
 0x303   :  { %v1439_v4 = vmul.f32 %v11365_v35, %v11365_v35  ;;  %v1450_v5 = vsel %vm415_vm0, %v1437_v54, 0.0  ;;  %v1440_v55 = vmul.f32 %v11367_v48, %v11367_v48 }
 0x304   :  { %v792_v51 = vadd.f32 %v791_v47, %v790_v43  ;;  %v1447_v59 = vadd.f32 %v1446_v56, %v1445_v52  ;;  %v1452_v63 = vsel %vm415_vm0, %v1438_v61, 0.0  ;;  %v11408_v43 = vld [vmem:[%s12980_s7] ss:$0 sm:$0xff]  ;;  %s8033_s7 = sshll.u32 %s10713_s8, 4  ;;  %s8034_s7 = int_to_ptr.vmem [resolvable:$true] %s8033_s7 }
 0x305   :  { %v1454_v19 = vsel %vm415_vm0, %v1439_v4, 0.0  ;;  %v1456_v22 = vsel %vm751_vm4, %v1440_v55, 0.0  ;;  %p10574_p7 = scmp.lt.s32.totalorder %s8034_s7, %s8034_s7 }
 0x306   :  { %v794_v58 = vadd.f32 %v793_v53, %v792_v51  ;;  %v1449_v3 = vadd.f32 %v1448_v62, %v1447_v59 }
 0x308   :  { %v796_v1 = vadd.f32 %v795_v60, %v794_v58  ;;  %v1451_v45 = vadd.f32 %v1450_v5, %v1449_v3  ;;  %v11423_v58 = vld [vmem:[%s12981_s10] ss:$0 sm:$0xff]  ;;  %s10569_s10 = scalar_lea.vmem %s8034_s7, 512 }
 0x309   :  { %12982 = vst [vmem:[#allocation76_spill] sm:$0xff] %v11423_v58  ;;  %p10570_p6 = scmp.ne.s32.totalorder %s8034_s7, %s10569_s10  ;;  %p10575_p8 = scmp.lt.s32.totalorder %s10569_s10, %s10569_s10 }
 0x30a   :  { %v797_v41 = vrot.slane %v796_v1, 4  ;;  %v1453_v16 = vadd.f32 %v1452_v63, %v1451_v45 }
 0x30b   :  { %p10576_p9 = por %p10575_p8, %p10574_p7 }
 0x30c   :  { %v798_v8 = vadd.f32 %v797_v41, %v796_v1  ;;  %v1455_v21 = vadd.f32 %v1454_v19, %v1453_v16 }
 0x30d   :  { %p10577_p10 = pnand %p10576_p9, %p10570_p6 }
 0x30e   :  { %v799_v20 = vrot.slane %v798_v8, 2  ;;  %v1457_v24 = vadd.f32 %v1456_v22, %v1455_v21 }
 0x310   :  { %v800_v23 = vadd.f32 %v799_v20, %v798_v8  ;;  %v1458_v42 = vrot.slane %v1457_v24, 4 }
 0x312   :  { %v801_v25 = vrot.slane %v800_v23, 1  ;;  %v1459_v2 = vadd.f32 %v1458_v42, %v1457_v24 }
 0x314   :  { %v802_v57 = vadd.f32 %v801_v25, %v800_v23  ;;  %v1460_v18 = vrot.slane %v1459_v2, 2 }
 0x316   :  { %v803_v10 = vmul.f32 0.015384615, %v802_v57  ;;  %v1461_v34 = vadd.f32 %v1460_v18, %v1459_v2 }
 0x318   :  { %v804_v26 = vadd.f32 1e-05, %v803_v10  ;;  %v1462_v36 = vrot.slane %v1461_v34, 1 }
 0x31a   :  { %9881 = vrsqrt.f32 %v804_v26  ;;  %v1463_v37 = vadd.f32 %v1462_v36, %v1461_v34 }
 0x31c   :  { %v1464_v38 = vmul.f32 0.015384615, %v1463_v37 }
 0x31e   :  { %v1465_v39 = vadd.f32 1e-05, %v1464_v38 }
 0x320   :  { %9883 = vrsqrt.f32 %v1465_v39 }
 0x324   :  { %v9882_v40 = vpop.eup %9881 }
 0x325   :  { %v806_v44 = vmul.f32 %v9882_v40, %v11307_v6  ;;  %v807_v46 = vmul.f32 %v9882_v40, %v11310_v7  ;;  %v808_v47 = vmul.f32 %v9882_v40, %v11313_v9  ;;  %v809_v49 = vmul.f32 %v9882_v40, %v11316_v11 }
 0x326   :  { %v810_v50 = vmul.f32 %v9882_v40, %v11318_v12  ;;  %v811_v51 = vmul.f32 %v9882_v40, %v11320_v13  ;;  %v812_v52 = vmul.f32 %v9882_v40, %v11322_v14  ;;  %v813_v53 = vmul.f32 %v9882_v40, %v11324_v15 }
 0x327   :  { %v814_v54 = vmul.f32 %v9882_v40, %v11326_v17  ;;  %v822_v56 = vmul.f32 %v11408_v43, %v806_v44  ;;  %v823_v6 = vmul.f32 %v11408_v43, %v807_v46  ;;  %v824_v7 = vmul.f32 %v11408_v43, %v808_v47 }
 0x328   :  { %v825_v9 = vmul.f32 %v11408_v43, %v809_v49  ;;  %v826_v11 = vmul.f32 %v11408_v43, %v810_v50  ;;  %v827_v12 = vmul.f32 %v11408_v43, %v811_v51  ;;  %v828_v13 = vmul.f32 %v11408_v43, %v812_v52 }
 0x329   :  { %v829_v14 = vmul.f32 %v11408_v43, %v813_v53  ;;  %v830_v15 = vmul.f32 %v11408_v43, %v814_v54  ;;  %v11432_v17 = vadd.f32 %v11423_v58, %v822_v56  ;;  %v11435_v59 = vadd.f32 %v11423_v58, %v823_v6 }
 0x32a   :  { %v11438_v60 = vadd.f32 %v11423_v58, %v824_v7  ;;  %v11441_v61 = vadd.f32 %v11423_v58, %v825_v9  ;;  %v11444_v62 = vadd.f32 %v11423_v58, %v826_v11  ;;  %v11447_v1 = vadd.f32 %v11423_v58, %v827_v12  ;;  %v9884_v3 = vpop.eup %9883 }
 0x32b   :  { %v11450_v4 = vadd.f32 %v11423_v58, %v828_v13  ;;  %v11453_v5 = vadd.f32 %v11423_v58, %v829_v14  ;;  %v11456_v41 = vadd.f32 %v11423_v58, %v830_v15  ;;  %v11459_v45 = vmul.f32 0.70710677, %v11432_v17 }
 0x32c   :  { %v11462_v55 = vmul.f32 0.70710677, %v11435_v59  ;;  %v11465_v63 = vmul.f32 0.70710677, %v11438_v60  ;;  %v11468_v8 = vmul.f32 %v9884_v3, %v11345_v27  ;;  %v11471_v16 = vmul.f32 0.70710677, %v11441_v61 }
 0x32d   :  { %12983 = vst [vmem:[#allocation77_spill] sm:$0xff] %v11456_v41  ;;  %v11474_v19 = vmul.f32 0.70710677, %v11444_v62  ;;  %v11477_v20 = vmul.f32 0.70710677, %v11447_v1  ;;  %v11480_v21 = vmul.f32 %v9884_v3, %v11348_v28  ;;  %v11492_v24 = vmul.f32 %v9884_v3, %v11351_v29 }
 0x32e   :  { %v11483_v22 = vmul.f32 0.70710677, %v11450_v4  ;;  %v11486_v23 = vmul.f32 0.70710677, %v11453_v5  ;;  %v11489_v27 = vmul.f32 0.70710677, %v11456_v41  ;;  %v11498_v28 = vmul.f32 %v9884_v3, %v11354_v30 }
 0x32f   :  { %v865_v25 = vand.u32 2147483647, %v11459_v45  ;;  %v866_v42 = vand.u32 2147483647, %v11462_v55  ;;  %v867_v57 = vand.u32 2147483647, %v11465_v63  ;;  %v11504_v26 = vmul.f32 %v9884_v3, %v11357_v31 }
 0x330   :  { %12984 = vst [vmem:[#allocation78_spill] sm:$0xff] %v11489_v27  ;;  %v868_v2 = vand.u32 2147483647, %v11471_v16  ;;  %v869_v10 = vand.u32 2147483647, %v11474_v19  ;;  %v11510_v37 = vmul.f32 %v9884_v3, %v11360_v32  ;;  %v11513_v40 = vmul.f32 %v9884_v3, %v11363_v33 }
 0x331   :  { %v870_v18 = vand.u32 2147483647, %v11477_v20  ;;  %v871_v29 = vand.u32 2147483647, %v11483_v22  ;;  %v872_v34 = vand.u32 2147483647, %v11486_v23  ;;  %v11516_v31 = vmul.f32 %v9884_v3, %v11365_v35 }
 0x332   :  { %v873_v36 = vand.u32 2147483647, %v11489_v27  ;;  %v874_v30 = vmul.f32 0.3275911, %v865_v25  ;;  %v875_v38 = vmul.f32 0.3275911, %v866_v42  ;;  %v11519_v51 = vmul.f32 %v9884_v3, %v11367_v48 }
 0x333   :  { %v876_v39 = vmul.f32 0.3275911, %v867_v57  ;;  %v877_v44 = vmul.f32 0.3275911, %v868_v2  ;;  %v878_v46 = vmul.f32 0.3275911, %v869_v10 }
 0x334   :  { %v879_v47 = vmul.f32 0.3275911, %v870_v18  ;;  %12985 = vst [vmem:[#allocation79_spill] sm:$0xff] %v11516_v31  ;;  %v880_v49 = vmul.f32 0.3275911, %v871_v29  ;;  %12986 = vst [vmem:[#allocation80_spill] sm:$0xff] %v11519_v51 }
 0x335   :  { %v881_v50 = vmul.f32 0.3275911, %v872_v34  ;;  %v882_v52 = vmul.f32 0.3275911, %v873_v36  ;;  %v883_v32 = vadd.f32 1.0, %v874_v30  ;;  %v884_v53 = vadd.f32 1.0, %v875_v38 }
 0x336   :  { %v885_v54 = vadd.f32 1.0, %v876_v39  ;;  %v886_v56 = vadd.f32 1.0, %v877_v44  ;;  %v887_v6 = vadd.f32 1.0, %v878_v46  ;;  %v888_v7 = vadd.f32 1.0, %v879_v47 }
 0x337   :  { %v889_v33 = vadd.f32 1.0, %v880_v49  ;;  %v890_v9 = vadd.f32 1.0, %v881_v50  ;;  %9885 = vrcp.f32 %v883_v32  ;;  %v991_v11 = vsub.f32 0.0, %v865_v25 }
 0x338   :  { %v992_v12 = vsub.f32 0.0, %v866_v42  ;;  %9887 = vrcp.f32 %v884_v53  ;;  %v993_v35 = vsub.f32 0.0, %v867_v57  ;;  %v994_v13 = vsub.f32 0.0, %v868_v2 }
 0x339   :  { %v995_v14 = vsub.f32 0.0, %v869_v10  ;;  %v891_v15 = vadd.f32 1.0, %v882_v52  ;;  %9889 = vrcp.f32 %v885_v54  ;;  %v996_v48 = vsub.f32 0.0, %v870_v18 }
 0x33a   :  { %v997_v3 = vsub.f32 0.0, %v871_v29  ;;  %9891 = vrcp.f32 %v886_v56  ;;  %v998_v30 = vsub.f32 0.0, %v872_v34  ;;  %v1000_v38 = vmul.f32 %v991_v11, %v865_v25 }
 0x33b   :  { %v1001_v39 = vmul.f32 %v992_v12, %v866_v42  ;;  %9893 = vrcp.f32 %v887_v6  ;;  %v999_v44 = vsub.f32 0.0, %v873_v36  ;;  %v1002_v46 = vmul.f32 %v993_v35, %v867_v57 }
 0x33c   :  { %v1003_v47 = vmul.f32 %v994_v13, %v868_v2  ;;  %v11522_v49 = vmul.f32 0.5, %v11432_v17  ;;  %v11525_v50 = vmul.f32 0.5, %v11435_v59  ;;  %9895 = vrcp.f32 %v888_v7 }
 0x33d   :  { %v1004_v32 = vmul.f32 %v995_v14, %v869_v10  ;;  %9897 = vrcp.f32 %v889_v33  ;;  %v1005_v52 = vmul.f32 %v996_v48, %v870_v18  ;;  %v1009_v53 = vmul.f32 1.442695, %v1000_v38 }
 0x33e   :  { %v1011_v54 = vmul.f32 1.442695, %v1001_v39  ;;  %v11528_v56 = vmul.f32 0.5, %v11438_v60  ;;  %9899 = vrcp.f32 %v890_v9  ;;  %v1006_v25 = vmul.f32 %v997_v3, %v871_v29 }
 0x33f   :  { %v1013_v42 = vmul.f32 1.442695, %v1002_v46  ;;  %9901 = vrcp.f32 %v891_v15  ;;  %v1007_v57 = vmul.f32 %v998_v30, %v872_v34  ;;  %v1008_v2 = vmul.f32 %v999_v44, %v873_v36 }
 0x340   :  { %v1015_v17 = vmul.f32 1.442695, %v1003_v47  ;;  %v11531_v6 = vmul.f32 0.5, %v11441_v61  ;;  %v11534_v59 = vmul.f32 0.5, %v11444_v62  ;;  %9903 = vpow2.f32 %v1009_v53 }
 0x341   :  { %v1017_v10 = vmul.f32 1.442695, %v1004_v32  ;;  %v11536_v18 = vpop.eup %9885  ;;  %v11539_v60 = vmul.f32 0.5, %v11447_v1  ;;  %v11542_v29 = vmul.f32 0.5, %v11450_v4  ;;  %9905 = vpow2.f32 %v1011_v54 }
 0x342   :  { %v1019_v34 = vmul.f32 1.442695, %v1005_v52  ;;  %v11544_v36 = vpop.eup %9887  ;;  %v11547_v61 = vmul.f32 0.5, %v11453_v5  ;;  %v910_v62 = vmul.f32 1.0614054, %v11536_v18  ;;  %9907 = vpow2.f32 %v1013_v42 }
 0x343   :  { %v1021_v7 = vmul.f32 1.442695, %v1006_v25  ;;  %v11550_v33 = vpop.eup %9889  ;;  %v911_v9 = vmul.f32 1.0614054, %v11544_v36  ;;  %9909 = vpow2.f32 %v1015_v17  ;;  %v1023_v1 = vmul.f32 1.442695, %v1007_v57 }
 0x344   :  { %v11553_v11 = vmul.f32 1.442695, %v1008_v2  ;;  %v11555_v4 = vpop.eup %9891  ;;  %v912_v12 = vmul.f32 1.0614054, %v11550_v33  ;;  %v919_v35 = vadd.f32 -1.4531521, %v910_v62  ;;  %9911 = vpow2.f32 %v1017_v10 }
 0x345   :  { %v11560_v5 = vmul.f32 %v11408_v43, %v11468_v8  ;;  %v11562_v13 = vpop.eup %9893  ;;  %v913_v14 = vmul.f32 1.0614054, %v11555_v4  ;;  %v920_v15 = vadd.f32 -1.4531521, %v911_v9  ;;  %9913 = vpow2.f32 %v1019_v34 }
 0x346   :  { %v11567_v48 = vmul.f32 %v11408_v43, %v11480_v21  ;;  %v11569_v3 = vpop.eup %9895  ;;  %v914_v30 = vmul.f32 1.0614054, %v11562_v13  ;;  %v921_v38 = vadd.f32 -1.4531521, %v912_v12  ;;  %v928_v39 = vmul.f32 %v11536_v18, %v919_v35 }
 0x347   :  { %12987 = vst [vmem:[#allocation81_spill] sm:$0xff] %v11560_v5  ;;  %9915 = vpow2.f32 %v1021_v7  ;;  %v11573_v8 = vpop.eup %9897  ;;  %v915_v44 = vmul.f32 1.0614054, %v11569_v3  ;;  %v922_v46 = vadd.f32 -1.4531521, %v913_v14  ;;  %v929_v47 = vmul.f32 %v11544_v36, %v920_v15 }
 0x348   :  { %12988 = vst [vmem:[#allocation82_spill] sm:$0xff] %v11567_v48  ;;  %9917 = vpow2.f32 %v1023_v1  ;;  %v11577_v32 = vpop.eup %9899  ;;  %v916_v21 = vmul.f32 1.0614054, %v11573_v8  ;;  %v923_v52 = vadd.f32 -1.4531521, %v914_v30  ;;  %v930_v53 = vmul.f32 %v11550_v33, %v921_v38 }
 0x349   :  { %v937_v54 = vadd.f32 1.4214138, %v928_v39  ;;  %v11581_v25 = vpop.eup %9901  ;;  %v917_v42 = vmul.f32 1.0614054, %v11577_v32  ;;  %v924_v57 = vadd.f32 -1.4531521, %v915_v44  ;;  %v931_v2 = vmul.f32 %v11555_v4, %v922_v46 }
 0x34a   :  { %v938_v17 = vadd.f32 1.4214138, %v929_v47  ;;  %v11585_v10 = vpop.eup %9903  ;;  %v918_v34 = vmul.f32 1.0614054, %v11581_v25  ;;  %v925_v62 = vadd.f32 -1.4531521, %v916_v21  ;;  %v932_v7 = vmul.f32 %v11562_v13, %v923_v52 }
 0x34b   :  { %v939_v9 = vadd.f32 1.4214138, %v930_v53  ;;  %v11589_v1 = vpop.eup %9905  ;;  %v926_v12 = vadd.f32 -1.4531521, %v917_v42  ;;  %v933_v35 = vmul.f32 %v11569_v3, %v924_v57  ;;  %v940_v14 = vadd.f32 1.4214138, %v931_v2 }
 0x34c   :  { %v946_v15 = vmul.f32 %v11536_v18, %v937_v54  ;;  %v11593_v30 = vpop.eup %9907  ;;  %v927_v38 = vadd.f32 -1.4531521, %v918_v34  ;;  %v934_v39 = vmul.f32 %v11573_v8, %v925_v62  ;;  %v941_v44 = vadd.f32 1.4214138, %v932_v7 }
 0x34d   :  { %v947_v46 = vmul.f32 %v11544_v36, %v938_v17  ;;  %v11597_v47 = vpop.eup %9909  ;;  %v935_v21 = vmul.f32 %v11577_v32, %v926_v12  ;;  %v942_v52 = vadd.f32 1.4214138, %v933_v35  ;;  %v948_v53 = vmul.f32 %v11550_v33, %v939_v9 }
 0x34e   :  { %v949_v42 = vmul.f32 %v11555_v4, %v940_v14  ;;  %v9912_v57 = vpop.eup %9911  ;;  %v936_v54 = vmul.f32 %v11581_v25, %v927_v38  ;;  %v943_v2 = vadd.f32 1.4214138, %v934_v39  ;;  %v950_v34 = vmul.f32 %v11562_v13, %v941_v44 }
 0x34f   :  { %v955_v0 = vadd.f32 -0.28449672, %v946_v15  ;;  %v9914_v62 = vpop.eup %9913  ;;  %v944_v7 = vadd.f32 1.4214138, %v935_v21  ;;  %v951_v17 = vmul.f32 %v11569_v3, %v942_v52  ;;  %v956_v48 = vadd.f32 -0.28449672, %v947_v46 }
 0x350   :  { %v957_v58 = vadd.f32 -0.28449672, %v948_v53  ;;  %v945_v12 = vadd.f32 1.4214138, %v936_v54  ;;  %v952_v35 = vmul.f32 %v11573_v8, %v943_v2  ;;  %v958_v9 = vadd.f32 -0.28449672, %v949_v42 }
 0x351   :  { %v9916_v5 = vpop.eup %9915  ;;  %v959_v41 = vadd.f32 -0.28449672, %v950_v34  ;;  %v953_v51 = vmul.f32 %v11577_v32, %v944_v7  ;;  %v960_v38 = vadd.f32 -0.28449672, %v951_v17  ;;  %v964_v39 = vmul.f32 %v11536_v18, %v955_v0 }
 0x352   :  { %v9918_v14 = vpop.eup %9917  ;;  %v965_v15 = vmul.f32 %v11544_v36, %v956_v48  ;;  %v954_v44 = vmul.f32 %v11581_v25, %v945_v12  ;;  %v961_v21 = vadd.f32 -0.28449672, %v952_v35  ;;  %v966_v46 = vmul.f32 %v11550_v33, %v957_v58 }
 0x353   :  { %v967_v52 = vmul.f32 %v11555_v4, %v958_v9  ;;  %v962_v53 = vadd.f32 -0.28449672, %v953_v51  ;;  %v968_v54 = vmul.f32 %v11562_v13, %v959_v41  ;;  %v969_v42 = vmul.f32 %v11569_v3, %v960_v38 }
 0x354   :  { %v973_v2 = vadd.f32 0.2548296, %v964_v39  ;;  %v963_v34 = vadd.f32 -0.28449672, %v954_v44  ;;  %v970_v7 = vmul.f32 %v11573_v8, %v961_v21  ;;  %v974_v17 = vadd.f32 0.2548296, %v965_v15 }
 0x355   :  { %v975_v0 = vadd.f32 0.2548296, %v966_v46  ;;  %v971_v48 = vmul.f32 %v11577_v32, %v962_v53  ;;  %v976_v27 = vadd.f32 0.2548296, %v967_v52  ;;  %v977_v12 = vadd.f32 0.2548296, %v968_v54 }
 0x356   :  { %v978_v35 = vadd.f32 0.2548296, %v969_v42  ;;  %v972_v58 = vmul.f32 %v11581_v25, %v963_v34  ;;  %v979_v31 = vadd.f32 0.2548296, %v970_v7  ;;  %v982_v51 = vmul.f32 %v11536_v18, %v973_v2 }
 0x357   :  { %v983_v41 = vmul.f32 %v11544_v36, %v974_v17  ;;  %vm1045_vm5 = vcmp.ge.f32.partialorder %v11459_v45, 0.0  ;;  %vm1046_vm6 = vcmp.ge.f32.partialorder %v11462_v55, 0.0  ;;  %v980_v9 = vadd.f32 0.2548296, %v971_v48 }
 0x358   :  { %v984_v38 = vmul.f32 %v11550_v33, %v975_v0  ;;  %v985_v39 = vmul.f32 %v11555_v4, %v976_v27  ;;  %v986_v15 = vmul.f32 %v11562_v13, %v977_v12  ;;  %vm1047_vm7 = vcmp.ge.f32.partialorder %v11465_v63, 0.0 }
 0x359   :  { %vm1048_vm8 = vcmp.ge.f32.partialorder %v11471_v16, 0.0  ;;  %vm1049_vm9 = vcmp.ge.f32.partialorder %v11474_v19, 0.0  ;;  %vm1050_vm10 = vcmp.ge.f32.partialorder %v11477_v20, 0.0  ;;  %v981_v18 = vadd.f32 0.2548296, %v972_v58 }
 0x35a   :  { %v987_v36 = vmul.f32 %v11569_v3, %v978_v35  ;;  %v988_v44 = vmul.f32 %v11573_v8, %v979_v31  ;;  %9919 = vpow2.f32 %v11553_v11  ;;  %vm1051_vm11 = vcmp.ge.f32.partialorder %v11483_v22, 0.0 }
 0x35b   :  { %vm1052_vm12 = vcmp.ge.f32.partialorder %v11486_v23, 0.0  ;;  %v989_v27 = vmul.f32 %v11577_v32, %v980_v9  ;;  %v1027_v33 = vmul.f32 %v11585_v10, %v982_v51  ;;  %v1028_v4 = vmul.f32 %v11589_v1, %v983_v41 }
 0x35c   :  { %v1029_v13 = vmul.f32 %v11593_v30, %v984_v38  ;;  %v990_v21 = vmul.f32 %v11581_v25, %v981_v18  ;;  %v1030_v3 = vmul.f32 %v11597_v47, %v985_v39  ;;  %v1031_v46 = vmul.f32 %v9912_v57, %v986_v15 }
 0x35d   :  { %v1032_v31 = vmul.f32 %v9914_v62, %v987_v36  ;;  %v1033_v8 = vmul.f32 %v9916_v5, %v988_v44  ;;  %v1034_v11 = vmul.f32 %v9918_v14, %v989_v27  ;;  %v1036_v52 = vsub.f32 1.0, %v1027_v33 }
 0x35e   :  { %v1037_v53 = vsub.f32 1.0, %v1028_v4  ;;  %v1038_v54 = vsub.f32 1.0, %v1029_v13  ;;  %v1039_v42 = vsub.f32 1.0, %v1030_v3  ;;  %v1040_v2 = vsub.f32 1.0, %v1031_v46  ;;  %v12992_v13 = vld [vmem:[#allocation77_spill] sm:$0xff] }
 0x35f   :  { %v1041_v32 = vsub.f32 1.0, %v1032_v31  ;;  %v1042_v34 = vsub.f32 1.0, %v1033_v8  ;;  %v1043_v10 = vsub.f32 1.0, %v1034_v11  ;;  %v1054_v7 = vsub.f32 0.0, %v1036_v52  ;;  %v12993_v46 = vld [vmem:[#allocation81_spill] sm:$0xff]  ;;  %v12994_v31 = vld [vmem:[#allocation76_spill] sm:$0xff] }
 0x360   :  { %v1055_v1 = vsub.f32 0.0, %v1037_v53  ;;  %v1056_v17 = vsub.f32 0.0, %v1038_v54  ;;  %v1057_v30 = vsub.f32 0.0, %v1039_v42  ;;  %v1058_v0 = vsub.f32 0.0, %v1040_v2  ;;  %v12995_v11 = vld [vmem:[#allocation82_spill] sm:$0xff] }
 0x361   :  { %v1059_v25 = vsub.f32 0.0, %v1041_v32  ;;  %v1060_v48 = vsub.f32 0.0, %v1042_v34  ;;  %v1061_v47 = vsub.f32 0.0, %v1043_v10  ;;  %v1063_v5 = vsel %vm1045_vm5, %v1036_v52, %v1054_v7 }
 0x362   :  { %v1064_v57 = vsel %vm1046_vm6, %v1037_v53, %v1055_v1  ;;  %v1065_v62 = vsel %vm1047_vm7, %v1038_v54, %v1056_v17  ;;  %v1066_v14 = vsel %vm1048_vm8, %v1039_v42, %v1057_v30  ;;  %v1067_v12 = vsel %vm1049_vm9, %v1040_v2, %v1058_v0 }
 0x363   :  { %v1068_v35 = vsel %vm1050_vm10, %v1041_v32, %v1059_v25  ;;  %v1069_v58 = vsel %vm1051_vm11, %v1042_v34, %v1060_v48  ;;  %v1070_v45 = vsel %vm1052_vm12, %v1043_v10, %v1061_v47  ;;  %v1072_v55 = vadd.f32 1.0, %v1063_v5 }
 0x364   :  { %v1073_v51 = vadd.f32 1.0, %v1064_v57  ;;  %v9920_v41 = vpop.eup %9919  ;;  %v1074_v63 = vadd.f32 1.0, %v1065_v62  ;;  %v1075_v9 = vadd.f32 1.0, %v1066_v14  ;;  %v1076_v38 = vadd.f32 1.0, %v1067_v12 }
 0x365   :  { %v1077_v16 = vadd.f32 1.0, %v1068_v35  ;;  %v1035_v39 = vmul.f32 %v9920_v41, %v990_v21  ;;  %v1078_v15 = vadd.f32 1.0, %v1069_v58  ;;  %v1079_v19 = vadd.f32 1.0, %v1070_v45 }
 0x366   :  { %v1081_v18 = vmul.f32 %v1072_v55, %v11522_v49  ;;  %v1082_v20 = vmul.f32 %v1073_v51, %v11525_v50  ;;  %v1083_v22 = vmul.f32 %v1074_v63, %v11528_v56  ;;  %v1084_v36 = vmul.f32 %v1075_v9, %v11531_v6 }
 0x367   :  { %v1085_v23 = vmul.f32 %v1076_v38, %v11534_v59  ;;  %v1044_v44 = vsub.f32 1.0, %v1035_v39  ;;  %v1086_v27 = vmul.f32 %v1077_v16, %v11539_v60  ;;  %v1087_v33 = vmul.f32 %v1078_v15, %v11542_v29 }
 0x368   :  { %v1088_v4 = vmul.f32 %v1079_v19, %v11547_v61  ;;  %1090 = vst.msk [vmem:[#allocation2] sm:$0xff] %vm415_vm0, %v1081_v18  ;;  %1093 = vst.msk [vmem:[#allocation2 + $0x18] sm:$0xff] %vm415_vm0, %v1084_v36  ;;  %v1485_v49 = vmul.f32 %v11408_v43, %v11492_v24  ;;  %v1486_v50 = vmul.f32 %v11408_v43, %v11498_v28  ;;  %v12989_v24 = vld [vmem:[#allocation79_spill] sm:$0xff]  ;;  %v12990_v28 = vld [vmem:[#allocation78_spill] sm:$0xff]  ;;  %v855_v21 = vmul.f32 0.5, %v12992_v13 }
 0x369   :  { %1094 = vst.msk [vmem:[#allocation2 + $0x20] sm:$0xff] %vm415_vm0, %v1085_v23  ;;  %1091 = vst.msk [vmem:[#allocation2 + $0x8] sm:$0xff] %vm415_vm0, %v1082_v20  ;;  %v1487_v56 = vmul.f32 %v11408_v43, %v11504_v26  ;;  %v1062_v6 = vsub.f32 0.0, %v1044_v44  ;;  %v1488_v59 = vmul.f32 %v11408_v43, %v11510_v37  ;;  %v1489_v60 = vmul.f32 %v11408_v43, %v11513_v40  ;;  %v12991_v61 = vld [vmem:[#allocation80_spill] sm:$0xff] }
 0x36a   :  { %1092 = vst.msk [vmem:[#allocation2 + $0x10] sm:$0xff] %vm415_vm0, %v1083_v22  ;;  %1095 = vst.msk [vmem:[#allocation2 + $0x28] sm:$0xff] %vm415_vm0, %v1086_v27  ;;  %v1490_v29 = vmul.f32 %v11408_v43, %v12989_v24  ;;  %vm1053_vm13 = vcmp.ge.f32.partialorder %v12990_v28, 0.0  ;;  %v1491_v26 = vmul.f32 %v11408_v43, %v12991_v61  ;;  %v1499_v8 = vadd.f32 %v12994_v31, %v12993_v46 }
 0x36b   :  { %1096 = vst.msk [vmem:[#allocation2 + $0x30] sm:$0xff] %vm415_vm0, %v1087_v33  ;;  %1097 = vst.msk [vmem:[#allocation2 + $0x38] sm:$0xff] %vm415_vm0, %v1088_v4  ;;  %v1071_v3 = vsel %vm1053_vm13, %v1044_v44, %v1062_v6  ;;  %v11691_v37 = vadd.f32 %v12994_v31, %v12995_v11  ;;  %v11694_v40 = vadd.f32 %v12994_v31, %v1485_v49  ;;  %v10704_v0 = vmov 0.0|0.0  }
 0x36c   :  { %v1080_v52 = vadd.f32 1.0, %v1071_v3  ;;  %v11697_v53 = vadd.f32 %v12994_v31, %v1486_v50  ;;  %v11700_v54 = vadd.f32 %v12994_v31, %v1487_v56  ;;  %v11703_v43 = vadd.f32 %v12994_v31, %v1488_v59  ;;  %9165 = vmatprep.subr.bf16.mxu0 %v10704_v0 }
 0x36d   :  { %v11706_v42 = vadd.f32 %v12994_v31, %v1489_v60  ;;  %v11709_v2 = vadd.f32 %v12994_v31, %v1490_v29  ;;  %v11712_v34 = vadd.f32 %v12994_v31, %v1491_v26  ;;  %v11714_v10 = vmul.f32 0.70710677, %v1499_v8 }
 0x36e   :  { %v1089_v32 = vmul.f32 %v1080_v52, %v855_v21  ;;  %v11717_v7 = vmul.f32 0.70710677, %v11691_v37  ;;  %v11721_v1 = vmul.f32 0.70710677, %v11694_v40  ;;  %v11724_v17 = vmul.f32 0.70710677, %v11697_v53 }
 0x36f   :  { %v11727_v30 = vmul.f32 0.70710677, %v11700_v54  ;;  %v11731_v25 = vmul.f32 0.70710677, %v11703_v43  ;;  %v11734_v48 = vmul.f32 0.70710677, %v11706_v42 }
 0x370   :  { %1098 = vst.msk [vmem:[#allocation2 + $0x40] sm:$0x1] %vm751_vm4, %v1089_v32  ;;  %v11737_v47 = vmul.f32 0.70710677, %v11709_v2  ;;  %v11740_v5 = vmul.f32 0.70710677, %v11712_v34 }
 0x371   :  { %v1526_v57 = vand.u32 2147483647, %v11714_v10  ;;  %v1527_v62 = vand.u32 2147483647, %v11717_v7  ;;  %v1528_v14 = vand.u32 2147483647, %v11721_v1 }
 0x372   :  { %v1529_v12 = vand.u32 2147483647, %v11724_v17  ;;  %v1530_v35 = vand.u32 2147483647, %v11727_v30  ;;  %v1531_v58 = vand.u32 2147483647, %v11731_v25 }
 0x373   :  { %v1532_v45 = vand.u32 2147483647, %v11734_v48  ;;  %v1533_v55 = vand.u32 2147483647, %v11737_v47  ;;  %v1534_v51 = vand.u32 2147483647, %v11740_v5 }
 0x374   :  { %v1535_v41 = vmul.f32 0.3275911, %v1526_v57  ;;  %v1536_v63 = vmul.f32 0.3275911, %v1527_v62  ;;  %v1537_v9 = vmul.f32 0.3275911, %v1528_v14 }
 0x375   :  { %v1538_v38 = vmul.f32 0.3275911, %v1529_v12  ;;  %v1539_v16 = vmul.f32 0.3275911, %v1530_v35  ;;  %v1540_v39 = vmul.f32 0.3275911, %v1531_v58 }
 0x376   :  { %v1541_v15 = vmul.f32 0.3275911, %v1532_v45  ;;  %v1542_v19 = vmul.f32 0.3275911, %v1533_v55  ;;  %v1543_v18 = vmul.f32 0.3275911, %v1534_v51 }
 0x377   :  { %v1544_v20 = vadd.f32 1.0, %v1535_v41  ;;  %v1545_v22 = vadd.f32 1.0, %v1536_v63  ;;  %v1546_v36 = vadd.f32 1.0, %v1537_v9  ;;  %v11751_v23 = vmul.f32 0.5, %v1499_v8 }
 0x378   :  { %v1547_v44 = vadd.f32 1.0, %v1538_v38  ;;  %v1548_v27 = vadd.f32 1.0, %v1539_v16  ;;  %v1549_v33 = vadd.f32 1.0, %v1540_v39  ;;  %v1550_v4 = vadd.f32 1.0, %v1541_v15  ;;  %v1760_v16 = vld [vmem:[#allocation2] sm:$0xff] }
 0x379   :  { %v1551_v49 = vadd.f32 1.0, %v1542_v19  ;;  %9921 = vrcp.f32 %v1544_v20  ;;  %v1652_v50 = vsub.f32 0.0, %v1526_v57  ;;  %v1653_v56 = vsub.f32 0.0, %v1527_v62 }
 0x37a   :  { %9923 = vrcp.f32 %v1545_v22  ;;  %v1654_v6 = vsub.f32 0.0, %v1528_v14  ;;  %v1655_v59 = vsub.f32 0.0, %v1529_v12  ;;  %v1552_v60 = vadd.f32 1.0, %v1543_v18 }
 0x37b   :  { %9925 = vrcp.f32 %v1546_v36  ;;  %v1656_v24 = vsub.f32 0.0, %v1530_v35  ;;  %v1657_v29 = vsub.f32 0.0, %v1531_v58  ;;  %v1658_v28 = vsub.f32 0.0, %v1532_v45 }
 0x37c   :  { %9927 = vrcp.f32 %v1547_v44  ;;  %v1659_v61 = vsub.f32 0.0, %v1533_v55  ;;  %v1661_v26 = vmul.f32 %v1652_v50, %v1526_v57  ;;  %v1662_v13 = vmul.f32 %v1653_v56, %v1527_v62 }
 0x37d   :  { %9929 = vrcp.f32 %v1548_v27  ;;  %v1663_v21 = vmul.f32 %v1654_v6, %v1528_v14  ;;  %v1664_v3 = vmul.f32 %v1655_v59, %v1529_v12  ;;  %v11754_v46 = vmul.f32 0.5, %v11691_v37 }
 0x37e   :  { %9931 = vrcp.f32 %v1549_v33  ;;  %v1660_v31 = vsub.f32 0.0, %v1534_v51  ;;  %v1665_v8 = vmul.f32 %v1656_v24, %v1530_v35  ;;  %v11757_v11 = vmul.f32 0.5, %v11694_v40 }
 0x37f   :  { %9933 = vrcp.f32 %v1550_v4  ;;  %v1666_v52 = vmul.f32 %v1657_v29, %v1531_v58  ;;  %v1670_v32 = vmul.f32 1.442695, %v1661_v26  ;;  %v1667_v41 = vmul.f32 %v1658_v28, %v1532_v45 }
 0x380   :  { %9935 = vrcp.f32 %v1551_v49  ;;  %v1672_v63 = vmul.f32 1.442695, %v1662_v13  ;;  %v1674_v57 = vmul.f32 1.442695, %v1663_v21  ;;  %v11760_v62 = vmul.f32 0.5, %v11697_v53 }
 0x381   :  { %9937 = vrcp.f32 %v1552_v60  ;;  %v1668_v14 = vmul.f32 %v1659_v61, %v1533_v55  ;;  %v1676_v37 = vmul.f32 1.442695, %v1664_v3  ;;  %v11763_v12 = vmul.f32 0.5, %v11700_v54 }
 0x382   :  { %v1669_v35 = vmul.f32 %v1660_v31, %v1534_v51  ;;  %9939 = vpow2.f32 %v1670_v32  ;;  %v1678_v40 = vmul.f32 1.442695, %v1665_v8  ;;  %v11768_v58 = vmul.f32 0.5, %v11703_v43  ;;  %v1761_v51 = vld [vmem:[#allocation2 + $0x8] sm:$0xff] }
 0x383   :  { %v11765_v9 = vpop.eup %9921  ;;  %v11771_v45 = vmul.f32 0.5, %v11706_v42  ;;  %9941 = vpow2.f32 %v1672_v63  ;;  %v1680_v53 = vmul.f32 1.442695, %v1666_v52  ;;  %v1682_v54 = vmul.f32 1.442695, %v1667_v41 }
 0x384   :  { %v11773_v38 = vpop.eup %9923  ;;  %v1571_v55 = vmul.f32 1.0614054, %v11765_v9  ;;  %9943 = vpow2.f32 %v1674_v57  ;;  %v11779_v15 = vmul.f32 0.5, %v11709_v2  ;;  %v1684_v42 = vmul.f32 1.442695, %v1668_v14 }
 0x385   :  { %v11776_v39 = vpop.eup %9925  ;;  %v1572_v43 = vmul.f32 1.0614054, %v11773_v38  ;;  %9945 = vpow2.f32 %v1676_v37  ;;  %v11785_v22 = vmul.f32 1.442695, %v1669_v35  ;;  %v9166_v2 = vpack.c.bf16 %v1761_v51, %v1760_v16 }
 0x386   :  { %v11782_v19 = vpop.eup %9927  ;;  %v1573_v18 = vmul.f32 1.0614054, %v11776_v39  ;;  %v1580_v20 = vadd.f32 -1.4531521, %v1571_v55  ;;  %9947 = vpow2.f32 %v1678_v40  ;;  %vm1706_vm14 = vcmp.ge.f32.partialorder %v11714_v10, 0.0 }
 0x387   :  { %v11787_v36 = vpop.eup %9929  ;;  %v1574_v44 = vmul.f32 1.0614054, %v11782_v19  ;;  %v1581_v27 = vadd.f32 -1.4531521, %v1572_v43  ;;  %9949 = vpow2.f32 %v1680_v53  ;;  %9167 = vmatpush1.bf16.msra.mxu0 %v9166_v2  ;;  %vm1707_vm15 = vcmp.ge.f32.partialorder %v11717_v7, 0.0 }
 0x388   :  { %v11790_v33 = vpop.eup %9931  ;;  %v1575_v4 = vmul.f32 1.0614054, %v11787_v36  ;;  %v1582_v49 = vadd.f32 -1.4531521, %v1573_v18  ;;  %v1589_v50 = vmul.f32 %v11765_v9, %v1580_v20  ;;  %9951 = vpow2.f32 %v1682_v54  ;;  %9168 = vmatprep.subr.bf16.mxu0 %v10704_v0 }
 0x389   :  { %v11794_v56 = vpop.eup %9933  ;;  %v1576_v6 = vmul.f32 1.0614054, %v11790_v33  ;;  %v1583_v59 = vadd.f32 -1.4531521, %v1574_v44  ;;  %v1590_v60 = vmul.f32 %v11773_v38, %v1581_v27  ;;  %9953 = vpow2.f32 %v1684_v42 }
 0x38a   :  { %v11798_v24 = vpop.eup %9935  ;;  %v1577_v29 = vmul.f32 1.0614054, %v11794_v56  ;;  %v1584_v28 = vadd.f32 -1.4531521, %v1575_v4  ;;  %v1591_v61 = vmul.f32 %v11776_v39, %v1582_v49  ;;  %v1598_v26 = vadd.f32 1.4214138, %v1589_v50 }
 0x38b   :  { %v11803_v13 = vpop.eup %9937  ;;  %v1578_v21 = vmul.f32 1.0614054, %v11798_v24  ;;  %v1585_v3 = vadd.f32 -1.4531521, %v1576_v6  ;;  %v1592_v31 = vmul.f32 %v11782_v19, %v1583_v59  ;;  %v1599_v8 = vadd.f32 1.4214138, %v1590_v60 }
 0x38c   :  { %v11807_v52 = vpop.eup %9939  ;;  %v1579_v32 = vmul.f32 1.0614054, %v11803_v13  ;;  %v1586_v41 = vadd.f32 -1.4531521, %v1577_v29  ;;  %v1593_v63 = vmul.f32 %v11787_v36, %v1584_v28  ;;  %v1600_v57 = vadd.f32 1.4214138, %v1591_v61 }
 0x38d   :  { %v11811_v14 = vpop.eup %9941  ;;  %v1587_v37 = vadd.f32 -1.4531521, %v1578_v21  ;;  %v1594_v35 = vmul.f32 %v11790_v33, %v1585_v3  ;;  %v1601_v40 = vadd.f32 1.4214138, %v1592_v31  ;;  %v1607_v53 = vmul.f32 %v11765_v9, %v1598_v26 }
 0x38e   :  { %v11815_v55 = vpop.eup %9943  ;;  %v1588_v54 = vadd.f32 -1.4531521, %v1579_v32  ;;  %v1595_v16 = vmul.f32 %v11794_v56, %v1586_v41  ;;  %v1602_v51 = vadd.f32 1.4214138, %v1593_v63  ;;  %v1608_v43 = vmul.f32 %v11773_v38, %v1599_v8 }
 0x38f   :  { %v11819_v42 = vpop.eup %9945  ;;  %v1596_v18 = vmul.f32 %v11798_v24, %v1587_v37  ;;  %v1603_v20 = vadd.f32 1.4214138, %v1594_v35  ;;  %v1609_v44 = vmul.f32 %v11776_v39, %v1600_v57  ;;  %v1610_v27 = vmul.f32 %v11782_v19, %v1601_v40 }
 0x390   :  { %v9948_v2 = vpop.eup %9947  ;;  %v1597_v4 = vmul.f32 %v11803_v13, %v1588_v54  ;;  %v1604_v49 = vadd.f32 1.4214138, %v1595_v16  ;;  %v1611_v50 = vmul.f32 %v11787_v36, %v1602_v51  ;;  %v1616_v6 = vadd.f32 -0.28449672, %v1607_v53 }
 0x391   :  { %v9950_v59 = vpop.eup %9949  ;;  %v1605_v60 = vadd.f32 1.4214138, %v1596_v18  ;;  %v1612_v29 = vmul.f32 %v11790_v33, %v1603_v20  ;;  %v1617_v28 = vadd.f32 -0.28449672, %v1608_v43  ;;  %v1618_v61 = vadd.f32 -0.28449672, %v1609_v44 }
 0x392   :  { %v9952_v26 = vpop.eup %9951  ;;  %v1606_v21 = vadd.f32 1.4214138, %v1597_v4  ;;  %v1613_v3 = vmul.f32 %v11794_v56, %v1604_v49  ;;  %v1619_v31 = vadd.f32 -0.28449672, %v1610_v27  ;;  %v1620_v8 = vadd.f32 -0.28449672, %v1611_v50 }
 0x393   :  { %v9954_v32 = vpop.eup %9953  ;;  %v1614_v41 = vmul.f32 %v11798_v24, %v1605_v60  ;;  %v1621_v63 = vadd.f32 -0.28449672, %v1612_v29  ;;  %v1625_v57 = vmul.f32 %v11765_v9, %v1616_v6  ;;  %v1626_v37 = vmul.f32 %v11773_v38, %v1617_v28 }
 0x394   :  { %v1615_v35 = vmul.f32 %v11803_v13, %v1606_v21  ;;  %v1622_v40 = vadd.f32 -0.28449672, %v1613_v3  ;;  %v1627_v53 = vmul.f32 %v11776_v39, %v1618_v61  ;;  %v1628_v54 = vmul.f32 %v11782_v19, %v1619_v31 }
 0x395   :  { %v1623_v16 = vadd.f32 -0.28449672, %v1614_v41  ;;  %v1629_v51 = vmul.f32 %v11787_v36, %v1620_v8  ;;  %v1630_v43 = vmul.f32 %v11790_v33, %v1621_v63  ;;  %v1634_v18 = vadd.f32 0.2548296, %v1625_v57 }
 0x396   :  { %v1624_v20 = vadd.f32 -0.28449672, %v1615_v35  ;;  %v1631_v44 = vmul.f32 %v11794_v56, %v1622_v40  ;;  %v1635_v27 = vadd.f32 0.2548296, %v1626_v37  ;;  %v1636_v4 = vadd.f32 0.2548296, %v1627_v53 }
 0x397   :  { %v1632_v49 = vmul.f32 %v11798_v24, %v1623_v16  ;;  %v1637_v50 = vadd.f32 0.2548296, %v1628_v54  ;;  %v1638_v6 = vadd.f32 0.2548296, %v1629_v51  ;;  %v1639_v60 = vadd.f32 0.2548296, %v1630_v43 }
 0x398   :  { %v1633_v29 = vmul.f32 %v11803_v13, %v1624_v20  ;;  %v1640_v28 = vadd.f32 0.2548296, %v1631_v44  ;;  %v1643_v61 = vmul.f32 %v11765_v9, %v1634_v18  ;;  %v1644_v21 = vmul.f32 %v11773_v38, %v1635_v27 }
 0x399   :  { %v1641_v3 = vadd.f32 0.2548296, %v1632_v49  ;;  %v1645_v31 = vmul.f32 %v11776_v39, %v1636_v4  ;;  %v1646_v8 = vmul.f32 %v11782_v19, %v1637_v50  ;;  %v1647_v41 = vmul.f32 %v11787_v36, %v1638_v6 }
 0x39a   :  { %vm1708_vm2 = vcmp.ge.f32.partialorder %v11721_v1, 0.0  ;;  %vm1709_vm3 = vcmp.ge.f32.partialorder %v11724_v17, 0.0  ;;  %vm1710_vm5 = vcmp.ge.f32.partialorder %v11727_v30, 0.0  ;;  %vm1711_vm6 = vcmp.ge.f32.partialorder %v11731_v25, 0.0 }
 0x39b   :  { %v1642_v9 = vadd.f32 0.2548296, %v1633_v29  ;;  %v1648_v38 = vmul.f32 %v11790_v33, %v1639_v60  ;;  %v1649_v63 = vmul.f32 %v11794_v56, %v1640_v28  ;;  %9955 = vpow2.f32 %v11785_v22 }
 0x39c   :  { %vm1712_vm7 = vcmp.ge.f32.partialorder %v11734_v48, 0.0  ;;  %vm1713_vm8 = vcmp.ge.f32.partialorder %v11737_v47, 0.0  ;;  %v1650_v39 = vmul.f32 %v11798_v24, %v1641_v3  ;;  %v1688_v19 = vmul.f32 %v11807_v52, %v1643_v61 }
 0x39d   :  { %v1689_v36 = vmul.f32 %v11811_v14, %v1644_v21  ;;  %v1690_v57 = vmul.f32 %v11815_v55, %v1645_v31  ;;  %v1651_v37 = vmul.f32 %v11803_v13, %v1642_v9  ;;  %v1691_v33 = vmul.f32 %v11819_v42, %v1646_v8  ;;  %v1762_v31 = vld [vmem:[#allocation2 + $0x10] sm:$0xff]  ;;  %v1763_v8 = vld [vmem:[#allocation2 + $0x18] sm:$0xff] }
 0x39e   :  { %v1692_v35 = vmul.f32 %v9948_v2, %v1647_v41  ;;  %v1693_v56 = vmul.f32 %v9950_v59, %v1648_v38  ;;  %v1694_v40 = vmul.f32 %v9952_v26, %v1649_v63  ;;  %v1695_v22 = vmul.f32 %v9954_v32, %v1650_v39  ;;  %v1779_v38 = vld [vmem:[%s12996_s6 + $0x8] sm:$0xff] }
 0x39f   :  { %v1697_v53 = vsub.f32 1.0, %v1688_v19  ;;  %v1698_v54 = vsub.f32 1.0, %v1689_v36  ;;  %v1699_v16 = vsub.f32 1.0, %v1690_v57  ;;  %v1700_v51 = vsub.f32 1.0, %v1691_v33  ;;  %v1766_v57 = vld [vmem:[#allocation2 + $0x30] sm:$0xff] }
 0x3a0   :  { %v1701_v43 = vsub.f32 1.0, %v1692_v35  ;;  %v1702_v24 = vsub.f32 1.0, %v1693_v56  ;;  %v1703_v18 = vsub.f32 1.0, %v1694_v40  ;;  %v1704_v52 = vsub.f32 1.0, %v1695_v22  ;;  %v1768_v56 = vld [vmem:[#allocation2 + $0x40] sm:$0xff] }
 0x3a1   :  { %v1715_v20 = vsub.f32 0.0, %v1697_v53  ;;  %v1716_v14 = vsub.f32 0.0, %v1698_v54  ;;  %v1717_v44 = vsub.f32 0.0, %v1699_v16  ;;  %v1718_v55 = vsub.f32 0.0, %v1700_v51 }
 0x3a2   :  { %v1719_v27 = vsub.f32 0.0, %v1701_v43  ;;  %v1720_v13 = vsub.f32 0.0, %v1702_v24  ;;  %v1721_v4 = vsub.f32 0.0, %v1703_v18  ;;  %v1722_v42 = vsub.f32 0.0, %v1704_v52 }
 0x3a3   :  { %v1724_v2 = vsel %vm1706_vm14, %v1697_v53, %v1715_v20  ;;  %v1725_v59 = vsel %vm1707_vm15, %v1698_v54, %v1716_v14  ;;  %v1726_v26 = vsel %vm1708_vm2, %v1699_v16, %v1717_v44  ;;  %v1727_v32 = vsel %vm1709_vm3, %v1700_v51, %v1718_v55  ;;  %v1778_v44 = vld [vmem:[%s12996_s6] sm:$0xff]  ;;  %v1781_v55 = vld [vmem:[%s12996_s6 + $0x18] sm:$0xff] }
 0x3a4   :  { %v1728_v49 = vsel %vm1710_vm5, %v1701_v43, %v1719_v27  ;;  %v1729_v50 = vsel %vm1711_vm6, %v1702_v24, %v1720_v13  ;;  %v1730_v6 = vsel %vm1712_vm7, %v1703_v18, %v1721_v4  ;;  %v1731_v10 = vsel %vm1713_vm8, %v1704_v52, %v1722_v42  ;;  %v1780_v27 = vld [vmem:[%s12996_s6 + $0x10] sm:$0xff]  ;;  %v1783_v13 = vld [vmem:[%s12996_s6 + $0x28] sm:$0xff]  ;;  %v1782_v4 = vld [vmem:[%s12996_s6 + $0x20] sm:$0xff] }
 0x3a5   :  { %v1733_v7 = vadd.f32 1.0, %v1724_v2  ;;  %v1734_v60 = vadd.f32 1.0, %v1725_v59  ;;  %v9956_v1 = vpop.eup %9955  ;;  %v1735_v29 = vadd.f32 1.0, %v1726_v26  ;;  %v1736_v28 = vadd.f32 1.0, %v1727_v32  ;;  %v1785_v42 = vld [vmem:[%s12996_s6 + $0x38] sm:$0xff]  ;;  %v1784_v2 = vld [vmem:[%s12996_s6 + $0x30] sm:$0xff] }
 0x3a6   :  { %v1737_v17 = vadd.f32 1.0, %v1728_v49  ;;  %v1738_v61 = vadd.f32 1.0, %v1729_v50  ;;  %v1696_v21 = vmul.f32 %v9956_v1, %v1651_v37  ;;  %v1739_v30 = vadd.f32 1.0, %v1730_v6  ;;  %v1767_v37 = vld [vmem:[#allocation2 + $0x38] sm:$0xff]  ;;  %v1787_v59 = vld [vmem:[%s12996_s6 + $0x48] sm:$0xff]  ;;  %v1786_v26 = vld [vmem:[%s12996_s6 + $0x40] sm:$0xff] }
 0x3a7   :  { %v1740_v3 = vadd.f32 1.0, %v1731_v10  ;;  %v1742_v25 = vmul.f32 %v1733_v7, %v11751_v23  ;;  %v1743_v48 = vmul.f32 %v1734_v60, %v11754_v46  ;;  %v1744_v47 = vmul.f32 %v1735_v29, %v11757_v11  ;;  %v1764_v11 = vld [vmem:[#allocation2 + $0x20] sm:$0xff]  ;;  %v1789_v32 = vld [vmem:[%s12996_s6 + $0x58] sm:$0xff]  ;;  %v1788_v49 = vld [vmem:[%s12996_s6 + $0x50] sm:$0xff] }
 0x3a8   :  { %v1745_v41 = vmul.f32 %v1736_v28, %v11760_v62  ;;  %v1746_v9 = vmul.f32 %v1737_v17, %v11763_v12  ;;  %v1705_v63 = vsub.f32 1.0, %v1696_v21  ;;  %v1747_v39 = vmul.f32 %v1738_v61, %v11768_v58  ;;  %v1765_v62 = vld [vmem:[#allocation2 + $0x28] sm:$0xff]  ;;  %v1790_v6 = vld [vmem:[%s12996_s6 + $0x60] sm:$0xff]  ;;  %v1793_v10 = vld [vmem:[%s12996_s6 + $0x78] sm:$0xff] }
 0x3a9   :  { %v1748_v19 = vmul.f32 %v1739_v30, %v11771_v45  ;;  %v1749_v36 = vmul.f32 %v1740_v3, %v11779_v15  ;;  %1751 = vst.msk [vmem:[#allocation2 + $0x48] sm:$0xff] %vm415_vm0, %v1742_v25  ;;  %1752 = vst.msk [vmem:[#allocation2 + $0x50] sm:$0xff] %vm415_vm0, %v1743_v48  ;;  %v9169_v23 = vpack.c.bf16 %v1763_v8, %v1762_v31  ;;  %vm1826_vm9 = vcmask 130048   ;;  %v1791_v50 = vld [vmem:[%s12996_s6 + $0x68] sm:$0xff]  ;;  %v1792_v7 = vld [vmem:[%s12996_s6 + $0x70] sm:$0xff] }
 0x3aa   :  { %1754 = vst.msk [vmem:[#allocation2 + $0x60] sm:$0xff] %vm415_vm0, %v1745_v41  ;;  %1755 = vst.msk [vmem:[#allocation2 + $0x68] sm:$0xff] %vm415_vm0, %v1746_v9  ;;  %v1723_v46 = vsub.f32 0.0, %v1705_v63  ;;  %8158 = vmatprep.mubr.msk.f32.mxu0 %vm1826_vm9, %v1779_v38  ;;  %vm1714_vm10 = vcmp.ge.f32.partialorder %v11740_v5, 0.0  ;;  %v1516_v58 = vmul.f32 0.5, %v11712_v34  ;;  %v9172_v15 = vpack.c.bf16 %v1765_v62, %v1764_v11  ;;  %v1795_v60 = vld [vmem:[%s12996_s6 + $0x88] sm:$0xff] }
 0x3ab   :  { %1753 = vst.msk [vmem:[#allocation2 + $0x58] sm:$0xff] %vm415_vm0, %v1744_v47  ;;  %1756 = vst.msk [vmem:[#allocation2 + $0x70] sm:$0xff] %vm415_vm0, %v1747_v39  ;;  %9170 = vmatpush1.bf16.msra.mxu0 %v9169_v23  ;;  %v9175_v35 = vpack.c.bf16 %v1767_v37, %v1766_v57  ;;  %v1794_v1 = vld [vmem:[%s12996_s6 + $0x80] sm:$0xff]  ;;  %v1797_v29 = vld [vmem:[%s12996_s6 + $0x98] sm:$0xff] }
 0x3ac   :  { %1757 = vst.msk [vmem:[#allocation2 + $0x78] sm:$0xff] %vm415_vm0, %v1748_v19  ;;  %1758 = vst.msk [vmem:[#allocation2 + $0x80] sm:$0xff] %vm415_vm0, %v1749_v36  ;;  %v1732_v12 = vsel %vm1714_vm10, %v1705_v63, %v1723_v46  ;;  %9171 = vmatprep.subr.bf16.mxu0 %v10704_v0  ;;  %v1796_v28 = vld [vmem:[%s12996_s6 + $0x90] sm:$0xff]  ;;  %v1799_v17 = vld [vmem:[%s12996_s6 + $0xa8] sm:$0xff] }
 0x3ad   :  { %v1741_v45 = vadd.f32 1.0, %v1732_v12  ;;  %v1798_v61 = vld [vmem:[%s12996_s6 + $0xa0] sm:$0xff]  ;;  %v1801_v21 = vld [vmem:[%s12996_s6 + $0xb8] sm:$0xff]  ;;  %v1800_v30 = vld [vmem:[%s12996_s6 + $0xb0] sm:$0xff] }
 0x3ae   :  { %v1803_v3 = vld [vmem:[%s12996_s6 + $0xc8] sm:$0xff]  ;;  %v1802_v25 = vld [vmem:[%s12996_s6 + $0xc0] sm:$0xff]  ;;  %v1805_v31 = vld [vmem:[%s12996_s6 + $0xd8] sm:$0xff] }
 0x3af   :  { %v1750_v33 = vmul.f32 %v1741_v45, %v1516_v58  ;;  %9173 = vmatpush1.bf16.msra.mxu0 %v9172_v15  ;;  %v1804_v8 = vld [vmem:[%s12996_s6 + $0xd0] sm:$0xff]  ;;  %v1807_v48 = vld [vmem:[%s12996_s6 + $0xe8] sm:$0xff]  ;;  %v1806_v47 = vld [vmem:[%s12996_s6 + $0xe0] sm:$0xff] }
 0x3b0   :  { %9174 = vmatprep.subr.bf16.mxu0 %v10704_v0  ;;  %v1769_v40 = vld [vmem:[#allocation2 + $0x48] sm:$0xff]  ;;  %v1770_v22 = vld [vmem:[#allocation2 + $0x50] sm:$0xff]  ;;  %v1809_v41 = vld [vmem:[%s12996_s6 + $0xf8] sm:$0xff] }
 0x3b1   :  { %1759 = vst.msk [vmem:[#allocation2 + $0x88] sm:$0x1] %vm751_vm4, %v1750_v33  ;;  %v9178_v5 = vpack.c.bf16 %v1769_v40, %v1768_v56  ;;  %v1772_v54 = vld [vmem:[#allocation2 + $0x60] sm:$0xff]  ;;  %v1773_v16 = vld [vmem:[#allocation2 + $0x68] sm:$0xff]  ;;  %v1808_v9 = vld [vmem:[%s12996_s6 + $0xf0] sm:$0xff]  ;;  %vm2717_vm4 = vcmask 523264  }
 0x3b2   :  { %v1771_v53 = vld [vmem:[#allocation2 + $0x58] sm:$0xff]  ;;  %v9184_v51 = vpack.c.bf16 %v1773_v16, %v1772_v54  ;;  %v1774_v43 = vld [vmem:[#allocation2 + $0x70] sm:$0xff]  ;;  %v1811_v38 = vld [vmem:[%s12996_s6 + $0x108] sm:$0xff] }
 0x3b3   :  { %9176 = vmatpush1.bf16.msra.mxu0 %v9175_v35  ;;  %v9181_v34 = vpack.c.bf16 %v1771_v53, %v1770_v22  ;;  %v1775_v24 = vld [vmem:[#allocation2 + $0x78] sm:$0xff]  ;;  %v1776_v52 = vld [vmem:[#allocation2 + $0x80] sm:$0xff]  ;;  %v1812_v19 = vld [vmem:[%s12996_s6 + $0x110] sm:$0xff] }
 0x3b4   :  { %9177 = vmatprep.subr.bf16.mxu0 %v10704_v0  ;;  %v9187_v18 = vpack.c.bf16 %v1775_v24, %v1774_v43  ;;  %v1810_v63 = vld [vmem:[%s12996_s6 + $0x100] sm:$0xff]  ;;  %v1813_v39 = vld [vmem:[%s12996_s6 + $0x118] sm:$0xff]  ;;  %v1815_v36 = vld [vmem:[%s12996_s6 + $0x128] sm:$0xff] }
 0x3b5   :  { %v1814_v23 = vld [vmem:[%s12996_s6 + $0x120] sm:$0xff]  ;;  %v1817_v46 = vld [vmem:[%s12996_s6 + $0x138] sm:$0xff]  ;;  %v1816_v11 = vld [vmem:[%s12996_s6 + $0x130] sm:$0xff] }
 0x3b6   :  { %v1819_v62 = vld [vmem:[%s12996_s6 + $0x148] sm:$0xff]  ;;  %v1818_v12 = vld [vmem:[%s12996_s6 + $0x140] sm:$0xff]  ;;  %v1821_v58 = vld [vmem:[%s12996_s6 + $0x158] sm:$0xff] }
 0x3b7   :  { %9179 = vmatpush1.bf16.msra.mxu0 %v9178_v5  ;;  %v1820_v45 = vld [vmem:[%s12996_s6 + $0x150] sm:$0xff]  ;;  %v1823_v15 = vld [vmem:[%s12996_s6 + $0x168] sm:$0xff]  ;;  %v1822_v57 = vld [vmem:[%s12996_s6 + $0x160] sm:$0xff] }
 0x3b8   :  { %9180 = vmatprep.subr.bf16.mxu0 %v10704_v0  ;;  %v1777_v20 = vld [vmem:[#allocation2 + $0x88] sm:$0xff]  ;;  %v1825_v37 = vld [vmem:[%s12996_s6 + $0x178] sm:$0xff]  ;;  %v1824_v33 = vld [vmem:[%s12996_s6 + $0x170] sm:$0xff] }
 0x3b9   :  { %v9190_v14 = vpack.c.bf16 %v1777_v20, %v1776_v52  ;;  %v8182_v35 = vld [vmem:[%s12997_s0 + $0x20] sm:$0xff]  ;;  %v8183_v56 = vld [vmem:[%s12997_s0 + $0x28] sm:$0xff]  ;;  %v8184_v5 = vld [vmem:[%s12997_s0 + $0x30] sm:$0xff] }
 0x3ba   :  { %v9192_v40 = vpack.c.bf16 %v8183_v56, %v8182_v35  ;;  %v8185_v22 = vld [vmem:[%s12997_s0 + $0x38] sm:$0xff]  ;;  %v2085_v54 = vld [vmem:[%s12997_s0 + $0x8] sm:$0xff] }
 0x3bb   :  { %9182 = vmatpush1.bf16.msra.mxu0 %v9181_v34  ;;  %v9196_v53 = vpack.c.bf16 %v8185_v22, %v8184_v5  ;;  %v2084_v34 = vld [vmem:[%s12997_s0] sm:$0xff] }
 0x3bc   :  { %9183 = vmatprep.subr.bf16.mxu0 %v10704_v0  ;;  %9193 = vmatprep.subr.bf16.mxu1 %v9192_v40  ;;  %v9200_v16 = vpack.c.bf16 %v2085_v54, %v2084_v34  ;;  %v2709_v5 = vld [vmem:[#allocation7] sm:$0xff] }
 0x3bd   :  { %9195 = vmatpush3.bf16.msra.mxu1 %v9192_v40 }
 0x3be   :  { %9197 = vmatprep.subr.bf16.mxu1 %v9196_v53 }
 0x3bf   :  { %9185 = vmatpush1.bf16.msra.mxu0 %v9184_v51 }
 0x3c0   :  { %9186 = vmatprep.subr.bf16.mxu0 %v10704_v0 }
 0x3c1   :  { %9199 = vmatpush3.bf16.msra.mxu1 %v9196_v53 }
 0x3c2   :  { %9201 = vmatprep.subr.bf16.mxu1 %v9200_v16 }
 0x3c3   :  { %9188 = vmatpush1.bf16.msra.mxu0 %v9187_v18 }
 0x3c4   :  { %9189 = vmatprep.subr.bf16.mxu0 %v10704_v0 }
 0x3c7   :  { %9191 = vmatpush1.bf16.msra.mxu0 %v9190_v14 }
 0x3ca   :  { %1964 = vmatmul.mubr.f32.vlgmr.msra.gmra.mrb[18].mxu0 %v1778_v44 }
 0x3cb   :  { %8159 = vmatprep.mubr.msk.f32.mxu0 %vm1826_vm9, %v1781_v55 }
 0x3ce   :  { %1969 = vmatmul.mubr.f32.gmra.mrb[20].mxu0 %v1780_v27 }
 0x3cf   :  { %8160 = vmatprep.mubr.msk.f32.mxu0 %vm1826_vm9, %v1783_v13 }
 0x3d2   :  { %1974 = vmatmul.mubr.f32.gmra.mrb[22].mxu0 %v1782_v4 }
 0x3d3   :  { %8161 = vmatprep.mubr.msk.f32.mxu0 %vm1826_vm9, %v1785_v42 }
 0x3d6   :  { %1979 = vmatmul.mubr.f32.gmra.mrb[24].mxu0 %v1784_v2 }
 0x3d7   :  { %8162 = vmatprep.mubr.msk.f32.mxu0 %vm1826_vm9, %v1787_v59 }
 0x3da   :  { %1984 = vmatmul.mubr.f32.gmra.mrb[26].mxu0 %v1786_v26 }
 0x3db   :  { %8163 = vmatprep.mubr.msk.f32.mxu0 %vm1826_vm9, %v1789_v32 }
 0x3de   :  { %1989 = vmatmul.mubr.f32.gmra.mrb[28].mxu0 %v1788_v49  ;;  %v2086_v49 = vld [vmem:[%s12997_s0 + $0x10] sm:$0xff] }
 0x3df   :  { %8164 = vmatprep.mubr.msk.f32.mxu0 %vm1826_vm9, %v1791_v50  ;;  %v2087_v50 = vld [vmem:[%s12997_s0 + $0x18] sm:$0xff] }
 0x3e2   :  { %1994 = vmatmul.mubr.f32.gmra.mrb[30].mxu0 %v1790_v6 }
 0x3e3   :  { %8165 = vmatprep.mubr.msk.f32.mxu0 %vm1826_vm9, %v1793_v10  ;;  %v9204_v10 = vpack.c.bf16 %v2087_v50, %v2086_v49 }
 0x3e6   :  { %1999 = vmatmul.mubr.f32.gmra.mrb[32].mxu0 %v1792_v7 }
 0x3e7   :  { %8166 = vmatprep.mubr.msk.f32.mxu0 %vm1826_vm9, %v1795_v60  ;;  %v8202_v60 = vld [vmem:[%s12997_s0 + $0x40] sm:$0xff] }
 0x3ea   :  { %2004 = vmatmul.mubr.f32.gmra.mrb[34].mxu0 %v1794_v1  ;;  %v8203_v1 = vld [vmem:[%s12997_s0 + $0x48] sm:$0xff] }
 0x3eb   :  { %8167 = vmatprep.mubr.msk.f32.mxu0 %vm1826_vm9, %v1797_v29 }
 0x3ee   :  { %2009 = vmatmul.mubr.f32.gmra.mrb[36].mxu0 %v1796_v28  ;;  %v9208_v28 = vpack.c.bf16 %v8203_v1, %v8202_v60 }
 0x3ef   :  { %8168 = vmatprep.mubr.msk.f32.mxu0 %vm1826_vm9, %v1799_v17 }
 0x3f2   :  { %2014 = vmatmul.mubr.f32.gmra.mrb[38].mxu0 %v1798_v61 }
 0x3f3   :  { %8169 = vmatprep.mubr.msk.f32.mxu0 %vm1826_vm9, %v1801_v21 }
 0x3f6   :  { %2019 = vmatmul.mubr.f32.gmra.mrb[40].mxu0 %v1800_v30 }
 0x3f7   :  { %8170 = vmatprep.mubr.msk.f32.mxu0 %vm1826_vm9, %v1803_v3 }
 0x3fa   :  { %2024 = vmatmul.mubr.f32.gmra.mrb[42].mxu0 %v1802_v25 }
 0x3fb   :  { %8171 = vmatprep.mubr.msk.f32.mxu0 %vm1826_vm9, %v1805_v31 }
 0x3fe   :  { %2029 = vmatmul.mubr.f32.gmra.mrb[44].mxu0 %v1804_v8 }
 0x3ff   :  { %8172 = vmatprep.mubr.msk.f32.mxu0 %vm1826_vm9, %v1807_v48 }
 0x402   :  { %2034 = vmatmul.mubr.f32.gmra.mrb[46].mxu0 %v1806_v47 }
 0x403   :  { %8173 = vmatprep.mubr.msk.f32.mxu0 %vm1826_vm9, %v1809_v41 }
 0x406   :  { %2039 = vmatmul.mubr.f32.gmra.mrb[48].mxu0 %v1808_v9  ;;  %v8204_v9 = vld [vmem:[%s12997_s0 + $0x50] sm:$0xff] }
 0x407   :  { %8174 = vmatprep.mubr.msk.f32.mxu0 %vm1826_vm9, %v1811_v38  ;;  %v8205_v38 = vld [vmem:[%s12997_s0 + $0x58] sm:$0xff] }
 0x40a   :  { %2044 = vmatmul.mubr.f32.gmra.mrb[50].mxu0 %v1810_v63 }
 0x40b   :  { %8175 = vmatprep.mubr.msk.f32.mxu0 %vm1826_vm9, %v1813_v39  ;;  %v9212_v39 = vpack.c.bf16 %v8205_v38, %v8204_v9 }
 0x40e   :  { %2049 = vmatmul.mubr.f32.gmra.mrb[52].mxu0 %v1812_v19 }
 0x40f   :  { %8176 = vmatprep.mubr.msk.f32.mxu0 %vm1826_vm9, %v1815_v36 }
 0x412   :  { %2054 = vmatmul.mubr.f32.gmra.mrb[54].mxu0 %v1814_v23 }
 0x413   :  { %8177 = vmatprep.mubr.msk.f32.mxu0 %vm1826_vm9, %v1817_v46 }
 0x416   :  { %2059 = vmatmul.mubr.f32.gmra.mrb[56].mxu0 %v1816_v11 }
 0x417   :  { %8178 = vmatprep.mubr.msk.f32.mxu0 %vm1826_vm9, %v1819_v62 }
 0x41a   :  { %2064 = vmatmul.mubr.f32.gmra.mrb[58].mxu0 %v1818_v12 }
 0x41b   :  { %8179 = vmatprep.mubr.msk.f32.mxu0 %vm1826_vm9, %v1821_v58 }
 0x41e   :  { %2069 = vmatmul.mubr.f32.gmra.mrb[60].mxu0 %v1820_v45 }
 0x41f   :  { %8180 = vmatprep.mubr.msk.f32.mxu0 %vm1826_vm9, %v1823_v15 }
 0x422   :  { %2074 = vmatmul.mubr.f32.gmra.mrb[62].mxu0 %v1822_v57 }
 0x423   :  { %8181 = vmatprep.mubr.msk.f32.mxu0 %vm1826_vm9, %v1825_v37 }
 0x426   :  { %2079 = vmatmul.mubr.f32.gmra.mrb[64].mxu0 %v1824_v33 }
 0x49d   :  { %v1965_v51 = vpop.f32.mrb[18].mxu0 }
 0x49e   :  { %v1967_v43 = vpop.f32.mrb[19].mxu0 }
 0x4a1   :  { %v1970_v24 = vpop.f32.mrb[20].mxu0 }
 0x4a2   :  { %v1972_v18 = vpop.f32.mrb[21].mxu0 }
 0x4a5   :  { %v1975_v52 = vpop.f32.mrb[22].mxu0 }
 0x4a6   :  { %v1977_v20 = vpop.f32.mrb[23].mxu0 }
 0x4a9   :  { %v1980_v14 = vpop.f32.mrb[24].mxu0 }
 0x4aa   :  { %v1982_v44 = vpop.f32.mrb[25].mxu0 }
 0x4ad   :  { %v1985_v55 = vpop.f32.mrb[26].mxu0 }
 0x4ae   :  { %v1987_v27 = vpop.f32.mrb[27].mxu0 }
 0x4b1   :  { %v1990_v13 = vpop.f32.mrb[28].mxu0 }
 0x4b2   :  { %v1992_v4 = vpop.f32.mrb[29].mxu0 }
 0x4b5   :  { %v1995_v42 = vpop.f32.mrb[30].mxu0 }
 0x4b6   :  { %v1997_v2 = vpop.f32.mrb[31].mxu0 }
 0x4b9   :  { %v2000_v59 = vpop.f32.mrb[32].mxu0 }
 0x4ba   :  { %v2002_v26 = vpop.f32.mrb[33].mxu0 }
 0x4bd   :  { %v2005_v32 = vpop.f32.mrb[34].mxu0 }
 0x4be   :  { %v2007_v6 = vpop.f32.mrb[35].mxu0  ;;  %8826 = vmatprep.mubr.msk.f32.mxu1 %vm415_vm0, %v2005_v32 }
 0x4c1   :  { %v2010_v7 = vpop.f32.mrb[36].mxu0 }
 0x4c2   :  { %v2012_v29 = vpop.f32.mrb[37].mxu0  ;;  %8827 = vmatmul.mubr.msk.f32.vlgmr.msra.gmra.mrb[18].mxu1 %vm415_vm0, %v2010_v7 }
 0x4c3   :  { %9203 = vmatpush3.bf16.msra.mxu1 %v9200_v16 }
 0x4c4   :  { %9205 = vmatprep.subr.bf16.mxu1 %v9204_v10 }
 0x4c5   :  { %v2015_v17 = vpop.f32.mrb[38].mxu0 }
 0x4c6   :  { %v2017_v61 = vpop.f32.mrb[39].mxu0  ;;  %8829 = vmatprep.mubr.msk.f32.mxu1 %vm415_vm0, %v2015_v17 }
 0x4c7   :  { %9207 = vmatpush3.bf16.msra.mxu1 %v9204_v10 }
 0x4c8   :  { %9209 = vmatprep.subr.bf16.mxu1 %v9208_v28 }
 0x4c9   :  { %v2020_v21 = vpop.f32.mrb[40].mxu0 }
 0x4ca   :  { %v2022_v30 = vpop.f32.mrb[41].mxu0  ;;  %8830 = vmatmul.mubr.msk.f32.gmra.mrb[20].mxu1 %vm415_vm0, %v2020_v21 }
 0x4cd   :  { %v2025_v3 = vpop.f32.mrb[42].mxu0 }
 0x4ce   :  { %v2027_v25 = vpop.f32.mrb[43].mxu0  ;;  %8832 = vmatprep.mubr.msk.f32.mxu1 %vm415_vm0, %v2025_v3 }
 0x4d1   :  { %v2030_v31 = vpop.f32.mrb[44].mxu0 }
 0x4d2   :  { %v2032_v8 = vpop.f32.mrb[45].mxu0  ;;  %8833 = vmatmul.mubr.msk.f32.gmra.mrb[22].mxu1 %vm415_vm0, %v2030_v31 }
 0x4d5   :  { %v2035_v48 = vpop.f32.mrb[46].mxu0 }
 0x4d6   :  { %v2037_v47 = vpop.f32.mrb[47].mxu0  ;;  %8835 = vmatprep.mubr.msk.f32.mxu1 %vm415_vm0, %v2035_v48 }
 0x4d9   :  { %v2040_v41 = vpop.f32.mrb[48].mxu0 }
 0x4da   :  { %v2042_v63 = vpop.f32.mrb[49].mxu0  ;;  %8836 = vmatmul.mubr.msk.f32.gmra.mrb[24].mxu1 %vm415_vm0, %v2040_v41 }
 0x4db   :  { %8846 = vmatprep.mubr.msk.f32.mxu1 %vm415_vm0, %v1965_v51 }
 0x4dd   :  { %v2045_v19 = vpop.f32.mrb[50].mxu0 }
 0x4de   :  { %v2047_v36 = vpop.f32.mrb[51].mxu0  ;;  %8847 = vmatmul.mubr.msk.f32.vlgmr.msra.gmra.mrb[18].mxu1 %vm415_vm0, %v1970_v24 }
 0x4df   :  { %8849 = vmatprep.mubr.msk.f32.mxu1 %vm415_vm0, %v1975_v52  ;;  %9211 = vmatpush3.bf16.msra.mxu1 %v9208_v28 }
 0x4e0   :  { %9213 = vmatprep.subr.bf16.mxu1 %v9212_v39 }
 0x4e1   :  { %v2050_v23 = vpop.f32.mrb[52].mxu0 }
 0x4e2   :  { %v2052_v46 = vpop.f32.mrb[53].mxu0  ;;  %8850 = vmatmul.mubr.msk.f32.gmra.mrb[20].mxu1 %vm415_vm0, %v1980_v14 }
 0x4e3   :  { %8852 = vmatprep.mubr.msk.f32.mxu1 %vm415_vm0, %v1985_v55  ;;  %9215 = vmatpush3.bf16.msra.mxu1 %v9212_v39 }
 0x4e5   :  { %v2055_v11 = vpop.f32.mrb[54].mxu0 }
 0x4e6   :  { %v2057_v62 = vpop.f32.mrb[55].mxu0  ;;  %8853 = vmatmul.mubr.msk.f32.gmra.mrb[22].mxu1 %vm415_vm0, %v1990_v13 }
 0x4e7   :  { %8855 = vmatprep.mubr.msk.f32.mxu1 %vm415_vm0, %v1995_v42 }
 0x4e9   :  { %v2060_v12 = vpop.f32.mrb[56].mxu0 }
 0x4ea   :  { %v2062_v58 = vpop.f32.mrb[57].mxu0  ;;  %8856 = vmatmul.mubr.msk.f32.gmra.mrb[24].mxu1 %vm415_vm0, %v2000_v59 }
 0x4eb   :  { %8866 = vmatprep.mubr.msk.f32.mxu1 %vm415_vm0, %v2045_v19 }
 0x4ed   :  { %v2065_v45 = vpop.f32.mrb[58].mxu0 }
 0x4ee   :  { %v2067_v15 = vpop.f32.mrb[59].mxu0  ;;  %8867 = vmatmul.mubr.msk.f32.vlgmr.msra.gmra.mrb[18].mxu1 %vm415_vm0, %v2050_v23 }
 0x4ef   :  { %8869 = vmatprep.mubr.msk.f32.mxu1 %vm415_vm0, %v2055_v11 }
 0x4f1   :  { %v2070_v57 = vpop.f32.mrb[60].mxu0 }
 0x4f2   :  { %v2072_v37 = vpop.f32.mrb[61].mxu0  ;;  %8870 = vmatmul.mubr.msk.f32.gmra.mrb[20].mxu1 %vm415_vm0, %v2060_v12 }
 0x4f3   :  { %8872 = vmatprep.mubr.msk.f32.mxu1 %vm415_vm0, %v2065_v45 }
 0x4f5   :  { %v2075_v33 = vpop.f32.mrb[62].mxu0 }
 0x4f6   :  { %v2077_v35 = vpop.f32.mrb[63].mxu0  ;;  %8873 = vmatmul.mubr.msk.f32.gmra.mrb[22].mxu1 %vm415_vm0, %v2070_v57 }
 0x4f7   :  { %8875 = vmatprep.mubr.msk.f32.mxu1 %vm415_vm0, %v2075_v33 }
 0x4f9   :  { %v2080_v56 = vpop.f32.mrb[64].mxu0 }
 0x4fa   :  { %v2082_v40 = vpop.f32.mrb[65].mxu0  ;;  %8876 = vmatmul.mubr.msk.f32.gmra.mrb[24].mxu1 %vm415_vm0, %v2080_v56 }
 0x4fb   :  { %8894 = vmatprep.mubr.msk.f32.mxu1 %vm2717_vm4, %v2709_v5 }
 0x5c1   :  { %v8868_v22 = vpop.f32.mrb[18].mxu1 }
 0x5c2   :  { %v12012_v53 = vmul.f32 0.70710677, %v8868_v22  ;;  %v2446_v34 = vpop.f32.mrb[19].mxu1  ;;  %v12043_v30 = vmul.f32 0.5, %v8868_v22 }
 0x5c3   :  { %v12014_v54 = vmul.f32 0.70710677, %v2446_v34  ;;  %v12048_v48 = vmul.f32 0.5, %v2446_v34 }
 0x5c4   :  { %v2510_v16 = vand.u32 2147483647, %v12012_v53  ;;  %vm2670_vm11 = vcmp.ge.f32.partialorder %v12012_v53, 0.0 }
 0x5c5   :  { %v2509_v51 = vand.u32 2147483647, %v12014_v54  ;;  %v8871_v43 = vpop.f32.mrb[20].mxu1  ;;  %vm2669_vm12 = vcmp.ge.f32.partialorder %v12014_v54, 0.0 }
 0x5c6   :  { %v2518_v24 = vmul.f32 0.3275911, %v2510_v16  ;;  %v12018_v18 = vmul.f32 0.70710677, %v8871_v43  ;;  %v12020_v20 = vpop.f32.mrb[21].mxu1  ;;  %v2622_v4 = vsub.f32 0.0, %v2510_v16 }
 0x5c7   :  { %v2517_v52 = vmul.f32 0.3275911, %v2509_v51  ;;  %v12024_v27 = vmul.f32 0.70710677, %v12020_v20  ;;  %v2621_v59 = vsub.f32 0.0, %v2509_v51  ;;  %v12061_v57 = vmul.f32 0.5, %v8871_v43 }
 0x5c8   :  { %v2526_v14 = vadd.f32 1.0, %v2518_v24  ;;  %v2512_v44 = vand.u32 2147483647, %v12018_v18  ;;  %v2630_v10 = vmul.f32 %v2622_v4, %v2510_v16  ;;  %vm2672_vm13 = vcmp.ge.f32.partialorder %v12018_v18, 0.0 }
 0x5c9   :  { %v2525_v55 = vadd.f32 1.0, %v2517_v52  ;;  %v12026_v13 = vpop.f32.mrb[22].mxu1  ;;  %v2511_v26 = vand.u32 2147483647, %v12024_v27  ;;  %v2629_v1 = vmul.f32 %v2621_v59, %v2509_v51  ;;  %vm2671_vm14 = vcmp.ge.f32.partialorder %v12024_v27, 0.0 }
 0x5ca   :  { %9957 = vrcp.f32 %v2526_v14  ;;  %v2520_v42 = vmul.f32 0.3275911, %v2512_v44  ;;  %v12028_v2 = vpop.f32.mrb[23].mxu1  ;;  %v12032_v50 = vmul.f32 0.70710677, %v12026_v13  ;;  %v2624_v17 = vsub.f32 0.0, %v2512_v44 }
 0x5cb   :  { %9959 = vrcp.f32 %v2525_v55  ;;  %v2519_v49 = vmul.f32 0.3275911, %v2511_v26  ;;  %v12037_v7 = vmul.f32 0.70710677, %v12028_v2  ;;  %v2623_v61 = vsub.f32 0.0, %v2511_v26 }
 0x5cc   :  { %v2528_v32 = vadd.f32 1.0, %v2520_v42  ;;  %v2514_v28 = vand.u32 2147483647, %v12032_v50  ;;  %v2639_v25 = vmul.f32 1.442695, %v2630_v10  ;;  %v2632_v63 = vmul.f32 %v2624_v17, %v2512_v44 }
 0x5cd   :  { %v12034_v6 = vpop.f32.mrb[24].mxu1  ;;  %v2527_v29 = vadd.f32 1.0, %v2519_v49  ;;  %v2513_v21 = vand.u32 2147483647, %v12037_v7  ;;  %v2637_v47 = vmul.f32 1.442695, %v2629_v1  ;;  %v2631_v39 = vmul.f32 %v2623_v61, %v2511_v26 }
 0x5ce   :  { %9961 = vrcp.f32 %v2528_v32  ;;  %v12039_v60 = vpop.f32.mrb[25].mxu1  ;;  %v2522_v3 = vmul.f32 0.3275911, %v2514_v28  ;;  %v12046_v8 = vmul.f32 0.70710677, %v12034_v6  ;;  %v2626_v11 = vsub.f32 0.0, %v2514_v28 }
 0x5cf   :  { %9963 = vrcp.f32 %v2527_v29  ;;  %v2521_v31 = vmul.f32 0.3275911, %v2513_v21  ;;  %v12051_v9 = vmul.f32 0.70710677, %v12039_v60  ;;  %v2625_v58 = vsub.f32 0.0, %v2513_v21 }
 0x5d0   :  { %v2530_v41 = vadd.f32 1.0, %v2522_v3  ;;  %v2516_v36 = vand.u32 2147483647, %v12046_v8  ;;  %v2643_v40 = vmul.f32 1.442695, %v2632_v63  ;;  %v2634_v51 = vmul.f32 %v2626_v11, %v2514_v28 }
 0x5d1   :  { %v2529_v19 = vadd.f32 1.0, %v2521_v31  ;;  %v2515_v62 = vand.u32 2147483647, %v12051_v9  ;;  %v2641_v14 = vmul.f32 1.442695, %v2631_v39  ;;  %v2633_v44 = vmul.f32 %v2625_v58, %v2513_v21 }
 0x5d2   :  { %9965 = vrcp.f32 %v2530_v41  ;;  %v2524_v45 = vmul.f32 0.3275911, %v2516_v36  ;;  %v2628_v37 = vsub.f32 0.0, %v2516_v36  ;;  %v2647_v1 = vmul.f32 1.442695, %v2634_v51 }
 0x5d3   :  { %9967 = vrcp.f32 %v2529_v19  ;;  %v2523_v33 = vmul.f32 0.3275911, %v2515_v62  ;;  %v2627_v22 = vsub.f32 0.0, %v2515_v62  ;;  %v2645_v17 = vmul.f32 1.442695, %v2633_v44 }
 0x5d4   :  { %v12053_v38 = vpop.eup %9957  ;;  %v2532_v5 = vadd.f32 1.0, %v2524_v45  ;;  %v2636_v42 = vmul.f32 %v2628_v37, %v2516_v36  ;;  %vm2674_vm15 = vcmp.ge.f32.partialorder %v12032_v50, 0.0  ;;  %vm2673_vm2 = vcmp.ge.f32.partialorder %v12037_v7, 0.0 }
 0x5d5   :  { %v12056_v23 = vpop.eup %9959  ;;  %v2550_v46 = vmul.f32 1.0614054, %v12053_v38  ;;  %v2531_v24 = vadd.f32 1.0, %v2523_v33  ;;  %v2635_v32 = vmul.f32 %v2627_v22, %v2515_v62  ;;  %vm2676_vm3 = vcmp.ge.f32.partialorder %v12046_v8, 0.0 }
 0x5d6   :  { %v2549_v12 = vmul.f32 1.0614054, %v12056_v23  ;;  %9969 = vrcp.f32 %v2532_v5  ;;  %vm2675_vm5 = vcmp.ge.f32.partialorder %v12051_v9, 0.0  ;;  %v2713_v9 = vld [vmem:[#allocation7 + $0x20] sm:$0xff] }
 0x5d7   :  { %v2558_v15 = vadd.f32 -1.4531521, %v2550_v46  ;;  %9971 = vrcp.f32 %v2531_v24  ;;  %v2649_v39 = vmul.f32 1.442695, %v2635_v32 }
 0x5d8   :  { %v12063_v35 = vpop.eup %9961  ;;  %v2557_v56 = vadd.f32 -1.4531521, %v2549_v12  ;;  %9973 = vpow2.f32 %v2639_v25  ;;  %v2651_v25 = vmul.f32 1.442695, %v2636_v42 }
 0x5d9   :  { %v2566_v34 = vmul.f32 %v12053_v38, %v2558_v15  ;;  %v2552_v16 = vmul.f32 1.0614054, %v12063_v35  ;;  %v12068_v43 = vpop.eup %9963  ;;  %9975 = vpow2.f32 %v2637_v47 }
 0x5da   :  { %v2565_v52 = vmul.f32 %v12056_v23, %v2557_v56  ;;  %v2551_v26 = vmul.f32 1.0614054, %v12068_v43  ;;  %9977 = vpow2.f32 %v2643_v40 }
 0x5db   :  { %v2574_v55 = vadd.f32 1.4214138, %v2566_v34  ;;  %v2560_v4 = vadd.f32 -1.4531521, %v2552_v16  ;;  %9979 = vpow2.f32 %v2641_v14 }
 0x5dc   :  { %v2573_v59 = vadd.f32 1.4214138, %v2565_v52  ;;  %v2559_v28 = vadd.f32 -1.4531521, %v2551_v26  ;;  %v12074_v61 = vpop.eup %9965  ;;  %9981 = vpow2.f32 %v2647_v1 }
 0x5dd   :  { %v2582_v49 = vmul.f32 %v12053_v38, %v2574_v55  ;;  %v2568_v10 = vmul.f32 %v12063_v35, %v2560_v4  ;;  %v12076_v31 = vpop.eup %9967  ;;  %v2554_v47 = vmul.f32 1.0614054, %v12074_v61  ;;  %9983 = vpow2.f32 %v2645_v17 }
 0x5de   :  { %v2581_v29 = vmul.f32 %v12056_v23, %v2573_v59  ;;  %v2567_v63 = vmul.f32 %v12068_v43, %v2559_v28  ;;  %v2553_v46 = vmul.f32 1.0614054, %v12076_v31  ;;  %9985 = vpow2.f32 %v2651_v25 }
 0x5df   :  { %v2590_v21 = vadd.f32 -0.28449672, %v2582_v49  ;;  %v2576_v3 = vadd.f32 1.4214138, %v2568_v10  ;;  %v2562_v12 = vadd.f32 -1.4531521, %v2554_v47  ;;  %9987 = vpow2.f32 %v2649_v39 }
 0x5e0   :  { %v2589_v41 = vadd.f32 -0.28449672, %v2581_v29  ;;  %v2575_v62 = vadd.f32 1.4214138, %v2567_v63  ;;  %v2561_v15 = vadd.f32 -1.4531521, %v2553_v46  ;;  %v12084_v37 = vpop.eup %9969 }
 0x5e1   :  { %v2598_v19 = vmul.f32 %v12053_v38, %v2590_v21  ;;  %v2584_v36 = vmul.f32 %v12063_v35, %v2576_v3  ;;  %v2570_v40 = vmul.f32 %v12074_v61, %v2562_v12  ;;  %v12089_v5 = vpop.eup %9971  ;;  %v2556_v51 = vmul.f32 1.0614054, %v12084_v37 }
 0x5e2   :  { %v2597_v11 = vmul.f32 %v12056_v23, %v2589_v41  ;;  %v2583_v56 = vmul.f32 %v12068_v43, %v2575_v62  ;;  %v2569_v16 = vmul.f32 %v12076_v31, %v2561_v15  ;;  %v9974_v24 = vpop.eup %9973  ;;  %v2555_v55 = vmul.f32 1.0614054, %v12089_v5 }
 0x5e3   :  { %v2606_v58 = vadd.f32 0.2548296, %v2598_v19  ;;  %v2592_v45 = vadd.f32 -0.28449672, %v2584_v36  ;;  %v2578_v44 = vadd.f32 1.4214138, %v2570_v40  ;;  %v9976_v4 = vpop.eup %9975 }
 0x5e4   :  { %v2605_v33 = vadd.f32 0.2548296, %v2597_v11  ;;  %v2591_v14 = vadd.f32 -0.28449672, %v2583_v56  ;;  %v2577_v26 = vadd.f32 1.4214138, %v2569_v16  ;;  %v9978_v32 = vpop.eup %9977 }
 0x5e5   :  { %v2614_v22 = vmul.f32 %v12053_v38, %v2606_v58  ;;  %v2600_v34 = vmul.f32 %v12063_v35, %v2592_v45  ;;  %v2564_v38 = vadd.f32 -1.4531521, %v2556_v51  ;;  %v2586_v1 = vmul.f32 %v12074_v61, %v2578_v44  ;;  %v9980_v28 = vpop.eup %9979 }
 0x5e6   :  { %v2613_v52 = vmul.f32 %v12056_v23, %v2605_v33  ;;  %v2599_v10 = vmul.f32 %v12068_v43, %v2591_v14  ;;  %v2563_v29 = vadd.f32 -1.4531521, %v2555_v55  ;;  %v2585_v21 = vmul.f32 %v12076_v31, %v2577_v26  ;;  %v9982_v39 = vpop.eup %9981 }
 0x5e7   :  { %v2654_v42 = vmul.f32 %v9974_v24, %v2614_v22  ;;  %v2608_v59 = vadd.f32 0.2548296, %v2600_v34  ;;  %v2572_v3 = vmul.f32 %v12084_v37, %v2564_v38  ;;  %v2594_v63 = vadd.f32 -0.28449672, %v2586_v1  ;;  %v9984_v62 = vpop.eup %9983 }
 0x5e8   :  { %v2653_v49 = vmul.f32 %v9976_v4, %v2613_v52  ;;  %v2607_v41 = vadd.f32 0.2548296, %v2599_v10  ;;  %v2571_v47 = vmul.f32 %v12089_v5, %v2563_v29  ;;  %v2593_v46 = vadd.f32 -0.28449672, %v2585_v21  ;;  %v9986_v15 = vpop.eup %9985 }
 0x5e9   :  { %v2662_v23 = vsub.f32 1.0, %v2654_v42  ;;  %v2616_v17 = vmul.f32 %v12063_v35, %v2608_v59  ;;  %v2580_v11 = vadd.f32 1.4214138, %v2572_v3  ;;  %v2602_v35 = vmul.f32 %v12074_v61, %v2594_v63  ;;  %v9988_v34 = vpop.eup %9987 }
 0x5ea   :  { %v2661_v25 = vsub.f32 1.0, %v2653_v49  ;;  %v2615_v58 = vmul.f32 %v12068_v43, %v2607_v41  ;;  %v2579_v45 = vadd.f32 1.4214138, %v2571_v47  ;;  %v2601_v40 = vmul.f32 %v12076_v31, %v2593_v46 }
 0x5eb   :  { %v2678_v19 = vsub.f32 0.0, %v2662_v23  ;;  %v2656_v36 = vmul.f32 %v9978_v32, %v2616_v17  ;;  %v2588_v22 = vmul.f32 %v12084_v37, %v2580_v11  ;;  %v2610_v52 = vadd.f32 0.2548296, %v2602_v35 }
 0x5ec   :  { %v2677_v12 = vsub.f32 0.0, %v2661_v25  ;;  %v2655_v24 = vmul.f32 %v9980_v28, %v2615_v58  ;;  %v2609_v44 = vadd.f32 0.2548296, %v2601_v40  ;;  %v2587_v59 = vmul.f32 %v12089_v5, %v2579_v45 }
 0x5ed   :  { %v2686_v33 = vsel %vm2670_vm11, %v2662_v23, %v2678_v19  ;;  %v2664_v56 = vsub.f32 1.0, %v2656_v36  ;;  %v2596_v55 = vadd.f32 -0.28449672, %v2588_v22  ;;  %v2618_v42 = vmul.f32 %v12074_v61, %v2610_v52 }
 0x5ee   :  { %v2694_v16 = vadd.f32 1.0, %v2686_v33  ;;  %v2685_v51 = vsel %vm2669_vm12, %v2661_v25, %v2677_v12  ;;  %v2663_v53 = vsub.f32 1.0, %v2655_v24  ;;  %v2617_v54 = vmul.f32 %v12076_v31, %v2609_v44  ;;  %v2715_v44 = vld [vmem:[#allocation7 + $0x30] sm:$0xff] }
 0x5ef   :  { %v2693_v43 = vadd.f32 1.0, %v2685_v51  ;;  %v2680_v14 = vsub.f32 0.0, %v2664_v56  ;;  %v2604_v32 = vmul.f32 %v12084_v37, %v2596_v55  ;;  %v2658_v1 = vmul.f32 %v9982_v39, %v2618_v42  ;;  %v2853_v51 = vld [vmem:[#allocation9 + $0x28] sm:$0xff]  ;;  %v2716_v55 = vld [vmem:[#allocation7 + $0x38] sm:$0xff] }
 0x5f0   :  { %v2702_v4 = vmul.f32 %v2694_v16, %v12043_v30  ;;  %v2679_v10 = vsub.f32 0.0, %v2663_v53  ;;  %v2595_v29 = vadd.f32 -0.28449672, %v2587_v59  ;;  %v2657_v30 = vmul.f32 %v9984_v62, %v2617_v54  ;;  %v2852_v16 = vld [vmem:[#allocation9 + $0x20] sm:$0xff] }
 0x5f1   :  { %v2701_v26 = vmul.f32 %v2693_v43, %v12048_v48  ;;  %v2688_v38 = vsel %vm2672_vm13, %v2664_v56, %v2680_v14  ;;  %v2612_v28 = vadd.f32 0.2548296, %v2604_v32  ;;  %v2495_v23 = vmul.f32 0.5, %v12020_v20  ;;  %v2710_v43 = vld [vmem:[#allocation7 + $0x8] sm:$0xff]  ;;  %v2711_v14 = vld [vmem:[#allocation7 + $0x10] sm:$0xff]  ;;  %v2847_v59 = vld [vmem:[#allocation9] sm:$0xff] }
 0x5f2   :  { %v2696_v49 = vadd.f32 1.0, %v2688_v38  ;;  %v2687_v17 = vsel %vm2671_vm14, %v2663_v53, %v2679_v10  ;;  %v2666_v48 = vsub.f32 1.0, %v2658_v1  ;;  %v2603_v18 = vmul.f32 %v12089_v5, %v2595_v29  ;;  %v2855_v53 = vld [vmem:[#allocation9 + $0x38] sm:$0xff]  ;;  %v2849_v1 = vld [vmem:[#allocation9 + $0x10] sm:$0xff] }
 0x5f3   :  { %v9216_v61 = vpack.c.bf16 %v2702_v4, %v2701_v26  ;;  %v2695_v31 = vadd.f32 1.0, %v2687_v17  ;;  %v2665_v3 = vsub.f32 1.0, %v2657_v30  ;;  %v2620_v25 = vmul.f32 %v12084_v37, %v2612_v28  ;;  %v2854_v4 = vld [vmem:[#allocation9 + $0x30] sm:$0xff]  ;;  %v2848_v26 = vld [vmem:[#allocation9 + $0x8] sm:$0xff]  ;;  %v2850_v29 = vld [vmem:[#allocation9 + $0x18] sm:$0xff] }
 0x5f4   :  { %v2704_v21 = vmul.f32 %v2696_v49, %v12061_v57  ;;  %v2682_v41 = vsub.f32 0.0, %v2666_v48  ;;  %v2611_v63 = vadd.f32 0.2548296, %v2603_v18  ;;  %v2498_v20 = vmul.f32 0.5, %v12026_v13 }
 0x5f5   :  { %9217 = vmatprep.subr.bf16.mxu1 %v9216_v61  ;;  %v2703_v27 = vmul.f32 %v2695_v31, %v2495_v23  ;;  %v2681_v47 = vsub.f32 0.0, %v2665_v3  ;;  %v2660_v39 = vmul.f32 %v9986_v15, %v2620_v25  ;;  %v2497_v62 = vmul.f32 0.5, %v12028_v2 }
 0x5f6   :  { %9219 = vmatpush3.bf16.msra.mxu1 %v9216_v61  ;;  %v2690_v19 = vsel %vm2674_vm15, %v2666_v48, %v2682_v41  ;;  %v2619_v57 = vmul.f32 %v12089_v5, %v2611_v63  ;;  %v2500_v56 = vmul.f32 0.5, %v12034_v6  ;;  %v2499_v22 = vmul.f32 0.5, %v12039_v60  ;;  %v2712_v6 = vld [vmem:[#allocation7 + $0x18] sm:$0xff]  ;;  %v2714_v60 = vld [vmem:[#allocation7 + $0x28] sm:$0xff]  ;;  %vm12536_vm15 = vmpackc.low %vm1826_vm9, %vm1826_vm9 }
 0x5f7   :  { %v2698_v36 = vadd.f32 1.0, %v2690_v19  ;;  %v2689_v46 = vsel %vm2673_vm2, %v2665_v3, %v2681_v47  ;;  %v2668_v11 = vsub.f32 1.0, %v2660_v39  ;;  %v9220_v37 = vpack.c.bf16 %v2704_v21, %v2703_v27 }
 0x5f8   :  { %v2697_v12 = vadd.f32 1.0, %v2689_v46  ;;  %v2659_v58 = vmul.f32 %v9988_v34, %v2619_v57  ;;  %v9232_v52 = vpack.c.bf16 %v2853_v51, %v2852_v16  ;;  %v9236_v42 = vpack.c.bf16 %v2855_v53, %v2854_v4 }
 0x5f9   :  { %v2706_v35 = vmul.f32 %v2698_v36, %v2498_v20  ;;  %v2684_v45 = vsub.f32 0.0, %v2668_v11  ;;  %9221 = vmatprep.subr.bf16.mxu1 %v9220_v37  ;;  %v9240_v38 = vpack.c.bf16 %v2848_v26, %v2847_v59  ;;  %v9244_v61 = vpack.c.bf16 %v2850_v29, %v2849_v1 }
 0x5fa   :  { %v2705_v50 = vmul.f32 %v2697_v12, %v2497_v62  ;;  %v2667_v13 = vsub.f32 1.0, %v2659_v58  ;;  %9223 = vmatpush3.bf16.msra.mxu1 %v9220_v37  ;;  %vm5770_vm12 = vcmask 254976  }
 0x5fb   :  { %v2692_v15 = vsel %vm2676_vm3, %v2668_v11, %v2684_v45 }
 0x5fc   :  { %v2700_v7 = vadd.f32 1.0, %v2692_v15  ;;  %v2683_v33 = vsub.f32 0.0, %v2667_v13  ;;  %v9224_v5 = vpack.c.bf16 %v2706_v35, %v2705_v50 }
 0x5fe   :  { %v2691_v40 = vsel %vm2675_vm5, %v2667_v13, %v2683_v33  ;;  %9225 = vmatprep.subr.bf16.mxu1 %v9224_v5  ;;  %v2708_v2 = vmul.f32 %v2700_v7, %v2500_v56 }
 0x5ff   :  { %v2699_v34 = vadd.f32 1.0, %v2691_v40  ;;  %9227 = vmatpush3.bf16.msra.mxu1 %v9224_v5 }
 0x601   :  { %v2707_v8 = vmul.f32 %v2699_v34, %v2499_v22 }
 0x603   :  { %v9228_v24 = vpack.c.bf16 %v2708_v2, %v2707_v8 }
 0x605   :  { %9229 = vmatprep.subr.bf16.mxu1 %v9228_v24 }
 0x606   :  { %9231 = vmatpush3.bf16.msra.mxu1 %v9228_v24 }
 0x607   :  { %9233 = vmatprep.subr.bf16.mxu1 %v9232_v52 }
 0x609   :  { %8895 = vmatmul.mubr.msk.f32.vlgmr.msra.gmra.mrb[26].mxu1 %vm2717_vm4, %v2710_v43 }
 0x60a   :  { %8897 = vmatprep.mubr.msk.f32.mxu1 %vm2717_vm4, %v2711_v14  ;;  %9235 = vmatpush3.bf16.msra.mxu1 %v9232_v52 }
 0x60b   :  { %9237 = vmatprep.subr.bf16.mxu1 %v9236_v42 }
 0x60d   :  { %8898 = vmatmul.mubr.msk.f32.gmra.mrb[28].mxu1 %vm2717_vm4, %v2712_v6 }
 0x60e   :  { %8900 = vmatprep.mubr.msk.f32.mxu1 %vm2717_vm4, %v2713_v9  ;;  %9239 = vmatpush3.bf16.msra.mxu1 %v9236_v42 }
 0x60f   :  { %9241 = vmatprep.subr.bf16.mxu1 %v9240_v38 }
 0x611   :  { %8901 = vmatmul.mubr.msk.f32.gmra.mrb[30].mxu1 %vm2717_vm4, %v2714_v60 }
 0x612   :  { %8903 = vmatprep.mubr.msk.f32.mxu1 %vm2717_vm4, %v2715_v44 }
 0x615   :  { %8904 = vmatmul.mubr.msk.f32.gmra.mrb[32].mxu1 %vm2717_vm4, %v2716_v55 }
 0x6dc   :  { %v8896_v54 = vpop.f32.mrb[26].mxu1 }
 0x6dd   :  { %v2808_v32 = vpop.f32.mrb[27].mxu1 }
 0x6e0   :  { %v8899_v49 = vpop.f32.mrb[28].mxu1 }
 0x6e1   :  { %v2818_v10 = vpop.f32.mrb[29].mxu1 }
 0x6e4   :  { %v8902_v30 = vpop.f32.mrb[30].mxu1 }
 0x6e5   :  { %v2828_v28 = vpop.f32.mrb[31].mxu1 }
 0x6e6   :  { %8914 = vmatprep.mubr.msk.f32.mxu1 %vm415_vm0, %v2828_v28 }
 0x6e7   :  { %8915 = vmatmul.mubr.msk.f32.vlgmr.msra.gmra.mrb[34].mxu1 %vm415_vm0, %v8902_v30 }
 0x6e8   :  { %v8905_v23 = vpop.f32.mrb[32].mxu1  ;;  %9243 = vmatpush3.bf16.msra.mxu1 %v9240_v38 }
 0x6e9   :  { %v2838_v17 = vpop.f32.mrb[33].mxu1  ;;  %9245 = vmatprep.subr.bf16.mxu1 %v9244_v61 }
 0x6ea   :  { %8917 = vmatprep.mubr.msk.f32.mxu1 %vm415_vm0, %v2838_v17 }
 0x6eb   :  { %8918 = vmatmul.mubr.msk.f32.gmra.mrb[36].mxu1 %vm415_vm0, %v8905_v23 }
 0x6ec   :  { %9247 = vmatpush3.bf16.msra.mxu1 %v9244_v61  ;;  %8928 = vmatprep.mubr.msk.f32.mxu1 %vm415_vm0, %v2808_v32 }
 0x6ef   :  { %8929 = vmatmul.mubr.msk.f32.vlgmr.msra.gmra.mrb[34].mxu1 %vm415_vm0, %v8896_v54 }
 0x6f0   :  { %8931 = vmatprep.mubr.msk.f32.mxu1 %vm415_vm0, %v2818_v10 }
 0x6f3   :  { %8932 = vmatmul.mubr.msk.f32.gmra.mrb[36].mxu1 %vm415_vm0, %v8899_v49 }
 0x7c2   :  { %v12150_v48 = vpop.f32.mrb[34].mxu1 }
 0x7c3   :  { %v12153_v18 = vmul.f32 0.70710677, %v12150_v48  ;;  %v12155_v21 = vpop.f32.mrb[35].mxu1 }
 0x7c4   :  { %v12158_v31 = vmul.f32 0.70710677, %v12155_v21 }
 0x7c5   :  { %v3059_v3 = vand.u32 2147483647, %v12153_v18  ;;  %vm3139_vm6 = vcmp.ge.f32.partialorder %v12153_v18, 0.0 }
 0x7c6   :  { %v3058_v25 = vand.u32 2147483647, %v12158_v31  ;;  %v12162_v41 = vpop.f32.mrb[36].mxu1  ;;  %vm3138_vm7 = vcmp.ge.f32.partialorder %v12158_v31, 0.0 }
 0x7c7   :  { %v3063_v63 = vmul.f32 0.3275911, %v3059_v3  ;;  %v12164_v47 = vpop.f32.mrb[37].mxu1  ;;  %v3115_v11 = vsub.f32 0.0, %v3059_v3 }
 0x7c8   :  { %v3062_v27 = vmul.f32 0.3275911, %v3058_v25  ;;  %v12167_v19 = vmul.f32 0.70710677, %v12164_v47  ;;  %v3114_v37 = vsub.f32 0.0, %v3058_v25  ;;  %v3052_v31 = vmul.f32 0.5, %v12164_v47 }
 0x7c9   :  { %v3067_v39 = vadd.f32 1.0, %v3063_v63  ;;  %v3119_v12 = vmul.f32 %v3115_v11, %v3059_v3 }
 0x7ca   :  { %v3066_v20 = vadd.f32 1.0, %v3062_v27  ;;  %v3060_v57 = vand.u32 2147483647, %v12167_v19  ;;  %v3118_v35 = vmul.f32 %v3114_v37, %v3058_v25  ;;  %vm3140_vm8 = vcmp.ge.f32.partialorder %v12167_v19, 0.0 }
 0x7cb   :  { %9989 = vrcp.f32 %v3067_v39  ;;  %v3124_v7 = vmul.f32 1.442695, %v3119_v12  ;;  %v3050_v39 = vmul.f32 0.5, %v12155_v21 }
 0x7cc   :  { %9991 = vrcp.f32 %v3066_v20  ;;  %v3064_v36 = vmul.f32 0.3275911, %v3060_v57  ;;  %v3116_v13 = vsub.f32 0.0, %v3060_v57  ;;  %v3122_v5 = vmul.f32 1.442695, %v3118_v35 }
 0x7ce   :  { %v3068_v46 = vadd.f32 1.0, %v3064_v36  ;;  %v3120_v22 = vmul.f32 %v3116_v13, %v3060_v57 }
 0x7d0   :  { %9993 = vrcp.f32 %v3068_v46  ;;  %v3126_v43 = vmul.f32 1.442695, %v3120_v22  ;;  %v3051_v46 = vmul.f32 0.5, %v12150_v48  ;;  %v3057_v48 = vmul.f32 0.70710677, %v12162_v41 }
 0x7d1   :  { %9995 = vpow2.f32 %v3124_v7 }
 0x7d2   :  { %9997 = vpow2.f32 %v3122_v5  ;;  %vm3141_vm10 = vcmp.ge.f32.partialorder %v3057_v48, 0.0 }
 0x7d3   :  { %9999 = vpow2.f32 %v3126_v43 }
 0x7d5   :  { %v9990_v62 = vpop.eup %9989 }
 0x7d6   :  { %v9992_v58 = vpop.eup %9991  ;;  %v3079_v45 = vmul.f32 1.0614054, %v9990_v62 }
 0x7d7   :  { %v3078_v50 = vmul.f32 1.0614054, %v9992_v58 }
 0x7d8   :  { %v3083_v15 = vadd.f32 -1.4531521, %v3079_v45 }
 0x7d9   :  { %v3082_v33 = vadd.f32 -1.4531521, %v3078_v50  ;;  %v3061_v50 = vand.u32 2147483647, %v3057_v48 }
 0x7da   :  { %v3087_v56 = vmul.f32 %v9990_v62, %v3083_v15  ;;  %v9994_v2 = vpop.eup %9993 }
 0x7db   :  { %v3086_v40 = vmul.f32 %v9992_v58, %v3082_v33  ;;  %v3080_v51 = vmul.f32 1.0614054, %v9994_v2  ;;  %v9996_v26 = vpop.eup %9995  ;;  %v3065_v13 = vmul.f32 0.3275911, %v3061_v50  ;;  %v3117_v47 = vsub.f32 0.0, %v3061_v50 }
 0x7dc   :  { %v3091_v34 = vadd.f32 1.4214138, %v3087_v56  ;;  %v9998_v32 = vpop.eup %9997 }
 0x7dd   :  { %v3090_v16 = vadd.f32 1.4214138, %v3086_v40  ;;  %v3084_v52 = vadd.f32 -1.4531521, %v3080_v51  ;;  %v10000_v3 = vpop.eup %9999  ;;  %v3069_v19 = vadd.f32 1.0, %v3065_v13 }
 0x7de   :  { %v3095_v8 = vmul.f32 %v9990_v62, %v3091_v34  ;;  %v8230_v13 = vld [vmem:[%s13000_s14] ss:$0 sm:$0xff] }
 0x7df   :  { %v3094_v24 = vmul.f32 %v9992_v58, %v3090_v16  ;;  %v3088_v9 = vmul.f32 %v9994_v2, %v3084_v52  ;;  %10001 = vrcp.f32 %v3069_v19 }
 0x7e0   :  { %v3099_v14 = vadd.f32 -0.28449672, %v3095_v8 }
 0x7e1   :  { %v3098_v6 = vadd.f32 -0.28449672, %v3094_v24  ;;  %v3092_v55 = vadd.f32 1.4214138, %v3088_v9 }
 0x7e2   :  { %v3103_v60 = vmul.f32 %v9990_v62, %v3099_v14 }
 0x7e3   :  { %v3102_v44 = vmul.f32 %v9992_v58, %v3098_v6  ;;  %v3096_v42 = vmul.f32 %v9994_v2, %v3092_v55 }
 0x7e4   :  { %v3107_v4 = vadd.f32 0.2548296, %v3103_v60 }
 0x7e5   :  { %v3106_v53 = vadd.f32 0.2548296, %v3102_v44  ;;  %v3100_v54 = vadd.f32 -0.28449672, %v3096_v42 }
 0x7e6   :  { %v3111_v59 = vmul.f32 %v9990_v62, %v3107_v4 }
 0x7e7   :  { %v3110_v38 = vmul.f32 %v9992_v58, %v3106_v53  ;;  %v3104_v1 = vmul.f32 %v9994_v2, %v3100_v54  ;;  %v3053_v54 = vmul.f32 0.5, %v12162_v41 }
 0x7e8   :  { %v3131_v49 = vmul.f32 %v9996_v26, %v3111_v59 }
 0x7e9   :  { %v3130_v10 = vmul.f32 %v9998_v32, %v3110_v38  ;;  %v3108_v28 = vadd.f32 0.2548296, %v3104_v1  ;;  %v10002_v15 = vpop.eup %10001 }
 0x7ea   :  { %v3135_v29 = vsub.f32 1.0, %v3131_v49  ;;  %v3081_v7 = vmul.f32 1.0614054, %v10002_v15 }
 0x7eb   :  { %v3134_v30 = vsub.f32 1.0, %v3130_v10  ;;  %v3112_v17 = vmul.f32 %v9994_v2, %v3108_v28  ;;  %v3121_v2 = vmul.f32 %v3117_v47, %v3061_v50 }
 0x7ec   :  { %v3143_v61 = vsub.f32 0.0, %v3135_v29  ;;  %v3085_v33 = vadd.f32 -1.4531521, %v3081_v7 }
 0x7ed   :  { %v3142_v23 = vsub.f32 0.0, %v3134_v30  ;;  %v3132_v27 = vmul.f32 %v10000_v3, %v3112_v17  ;;  %v3128_v34 = vmul.f32 1.442695, %v3121_v2  ;;  %v3234_v17 = vld [vmem:[%s12998_s15 + $0x8] sm:$0xff]  ;;  %v3235_v3 = vld [vmem:[%s12998_s15 + $0x10] sm:$0xff] }
 0x7ee   :  { %v3147_v25 = vsel %vm3139_vm6, %v3135_v29, %v3143_v61  ;;  %v3089_v5 = vmul.f32 %v10002_v15, %v3085_v33 }
 0x7ef   :  { %v3146_v63 = vsel %vm3138_vm7, %v3134_v30, %v3142_v23  ;;  %v3151_v57 = vadd.f32 1.0, %v3147_v25  ;;  %v3136_v36 = vsub.f32 1.0, %v3132_v27  ;;  %10003 = vpow2.f32 %v3128_v34  ;;  %v3233_v23 = vld [vmem:[%s12998_s15] sm:$0xff]  ;;  %v3236_v25 = vld [vmem:[%s12998_s15 + $0x18] sm:$0xff] }
 0x7f0   :  { %v3150_v20 = vadd.f32 1.0, %v3146_v63  ;;  %v3093_v56 = vadd.f32 1.4214138, %v3089_v5  ;;  %v9248_v41 = vpack.c.bf16 %v3234_v17, %v3233_v23  ;;  %v9252_v63 = vpack.c.bf16 %v3236_v25, %v3235_v3  ;;  %v3341_v27 = vld [vmem:[%s12999_s9] sm:$0xff] }
 0x7f1   :  { %v3144_v37 = vsub.f32 0.0, %v3136_v36  ;;  %v3155_v62 = vmul.f32 %v3151_v57, %v3051_v46  ;;  %v12227_v23 = vld [vmem:[#allocation13] ss:$0 sm:$0xff]  ;;  %v12229_v17 = vld [vmem:[#allocation12] ss:$0 sm:$0xff]  ;;  %vm7778_vm7 = vcmask 130112  }
 0x7f2   :  { %v3154_v11 = vmul.f32 %v3150_v20, %v3050_v39  ;;  %v3097_v40 = vmul.f32 %v10002_v15, %v3093_v56  ;;  %9249 = vmatprep.subr.bf16.mxu1 %v9248_v41  ;;  %v10705_v39 = vmov 0   ;;  %v3345_v20 = vsub.f32 1.0, %v3341_v27 }
 0x7f3   :  { %v3148_v12 = vsel %vm3140_vm8, %v3136_v36, %v3144_v37  ;;  %v3163_v35 = vsel %vm415_vm0, %v3155_v62, 0.0  ;;  %9251 = vmatpush3.bf16.msra.mxu1 %v9248_v41  ;;  %9648 = vset.pattern.permute.xlu1 %v10705_v39  ;;  %vm7674_vm8 = vcmask 64512  }
 0x7f4   :  { %v3160_v18 = vsel %vm415_vm0, %v3154_v11, 0.0  ;;  %v3152_v58 = vadd.f32 1.0, %v3148_v12  ;;  %v3101_v22 = vadd.f32 -0.28449672, %v3097_v40  ;;  %9253 = vmatprep.subr.bf16.mxu1 %v9252_v63  ;;  %9647 = vset.pattern.permute.xlu0 %v10705_v39 }
 0x7f5   :  { %3161 = vadd.xlane.f32.xlu0 %v3160_v18  ;;  %3564 = vmatprep.mubr.bf16.mxu0 %v10705_v39 }
 0x7f6   :  { %v3156_v21 = vmul.f32 %v3152_v58, %v3052_v31  ;;  %v3105_v16 = vmul.f32 %v10002_v15, %v3101_v22 }
 0x7f7   :  { %9255 = vmatpush3.bf16.msra.mxu1 %v9252_v63 }
 0x7f8   :  { %v3166_v45 = vsel %vm415_vm0, %v3156_v21, 0.0  ;;  %v3109_v51 = vadd.f32 0.2548296, %v3105_v16 }
 0x7f9   :  { %3164 = vadd.xlane.f32.xlu0 %v3163_v35  ;;  %v10004_v24 = vpop.eup %10003 }
 0x7fa   :  { %v3113_v8 = vmul.f32 %v10002_v15, %v3109_v51  ;;  %v8231_v15 = vld [vmem:[#allocation10] ss:$0 sm:$0xff] }
 0x7fc   :  { %v3133_v52 = vmul.f32 %v10004_v24, %v3113_v8  ;;  %v3342_v8 = vld [vmem:[%s12999_s9 + $0x8] sm:$0xff] }
 0x7fd   :  { %3167 = vadd.xlane.f32.xlu0 %v3166_v45  ;;  %v3346_v24 = vsub.f32 1.0, %v3342_v8 }
 0x7fe   :  { %v3137_v43 = vsub.f32 1.0, %v3133_v52  ;;  %v3343_v52 = vld [vmem:[%s12999_s9 + $0x10] sm:$0xff] }
 0x800   :  { %v3145_v6 = vsub.f32 0.0, %v3137_v43 }
 0x802   :  { %v3149_v55 = vsel %vm3141_vm10, %v3137_v43, %v3145_v6  ;;  %v3347_v43 = vsub.f32 1.0, %v3343_v52  ;;  %vm7681_vm10 = vcmask 60416  }
 0x803   :  { %v3153_v26 = vadd.f32 1.0, %v3149_v55  ;;  %v9694_v55 = vld [vmem:[%s13001_s11 + $0x4] ss:$16 sps:$4 sm:$0xff]  }
 0x804   :  { %3491 = vmatprep.subr.bf16.mxu1 %v9694_v55  ;;  %v9739_v55 = vld [vmem:[%s13001_s11 + $0x104] ss:$16 sps:$4 sm:$0xff]  }
 0x805   :  { %v3157_v29 = vmul.f32 %v3153_v26, %v3053_v54  ;;  %v9703_v26 = vld [vmem:[%s13001_s11 + $0x44] ss:$16 sps:$4 sm:$0xff]  }
 0x807   :  { %v3169_v28 = vsel %vm415_vm0, %v3157_v29, 0.0 }
 0x882   :  { %v3162_v14 = vpop.xlane.xlu0 %3161 }
 0x883   :  { %v3173_v9 = vmul.f32 0.03125, %v3162_v14  ;;  %v3344_v14 = vld [vmem:[%s12999_s9 + $0x18] sm:$0xff] }
 0x884   :  { %v3348_v6 = vsub.f32 1.0, %v3344_v14 }
 0x885   :  { %v3177_v60 = vsub.f32 %v3154_v11, %v3173_v9  ;;  %v9689_v9 = vld [vmem:[%s13001_s11 + $0x8] ss:$16 sps:$4 sm:$0xff]  }
 0x886   :  { %v3165_v44 = vpop.xlane.xlu0 %3164 }
 0x887   :  { %v3174_v4 = vmul.f32 0.03125, %v3165_v44  ;;  %v3181_v53 = vmul.f32 %v3177_v60, %v3177_v60  ;;  %v9692_v44 = vld [vmem:[%s13001_s11] ss:$16 sps:$4 sm:$0xff]  }
 0x889   :  { %v3178_v42 = vsub.f32 %v3155_v62, %v3174_v4  ;;  %v3185_v59 = vsel %vm415_vm0, %v3181_v53, 0.0  ;;  %v9697_v4 = vld [vmem:[%s13001_s11 + $0x24] ss:$16 sps:$4 sm:$0xff]   ;;  %v9698_v53 = vld [vmem:[%s13001_s11 + $0x28] ss:$16 sps:$4 sm:$0xff]  }
 0x88a   :  { %3186 = vadd.xlane.f32.xlu1 %v3185_v59  ;;  %v3168_v38 = vpop.xlane.xlu0 %3167  ;;  %v9695_v59 = vld [vmem:[%s13001_s11 + $0x20] ss:$16 sps:$4 sm:$0xff]  }
 0x88b   :  { %v3175_v32 = vmul.f32 0.03125, %v3168_v38  ;;  %v3182_v49 = vmul.f32 %v3178_v42, %v3178_v42  ;;  %v9706_v38 = vld [vmem:[%s13001_s11 + $0x4c] ss:$16 sps:$4 sm:$0xff]  }
 0x88d   :  { %v3179_v10 = vsub.f32 %v3156_v21, %v3175_v32  ;;  %v3188_v1 = vsel %vm415_vm0, %v3182_v49, 0.0 }
 0x88e   :  { %3189 = vadd.xlane.f32.xlu1 %v3188_v1 }
 0x88f   :  { %v3183_v30 = vmul.f32 %v3179_v10, %v3179_v10 }
 0x891   :  { %v3191_v61 = vsel %vm415_vm0, %v3183_v30, 0.0 }
 0x892   :  { %3170 = vadd.xlane.f32.xlu1 %v3169_v28  ;;  %3192 = vadd.xlane.f32.xlu0 %v3191_v61 }
 0x8a8   :  { %3351 = vperm.xlu0 %9647, %v3345_v20  }
 0x917   :  { %v3187_v57 = vpop.xlane.xlu1 %3186 }
 0x918   :  { %v3197_v36 = vmul.f32 0.03125, %v3187_v57 }
 0x91a   :  { %v3201_v46 = vadd.f32 1e-05, %v3197_v36 }
 0x91b   :  { %v3190_v11 = vpop.xlane.xlu1 %3189 }
 0x91c   :  { %10005 = vrsqrt.f32 %v3201_v46  ;;  %v3198_v37 = vmul.f32 0.03125, %v3190_v11 }
 0x91e   :  { %v3202_v18 = vadd.f32 1e-05, %v3198_v37 }
 0x91f   :  { %v3171_v62 = vpop.xlane.xlu1 %3170  ;;  %v3193_v12 = vpop.xlane.xlu0 %3192 }
 0x920   :  { %10007 = vrsqrt.f32 %v3202_v18  ;;  %v3176_v31 = vmul.f32 0.03125, %v3171_v62  ;;  %v3199_v58 = vmul.f32 0.03125, %v3193_v12  ;;  %v9701_v12 = vld [vmem:[%s13001_s11 + $0x40] ss:$16 sps:$4 sm:$0xff]  }
 0x922   :  { %v3180_v35 = vsub.f32 %v3157_v29, %v3176_v31  ;;  %v3203_v21 = vadd.f32 1e-05, %v3199_v58  ;;  %v9704_v31 = vld [vmem:[%s13001_s11 + $0x48] ss:$16 sps:$4 sm:$0xff]  }
 0x924   :  { %10009 = vrsqrt.f32 %v3203_v21  ;;  %v3184_v45 = vmul.f32 %v3180_v35, %v3180_v35  ;;  %v9712_v21 = vld [vmem:[%s13001_s11 + $0x6c] ss:$16 sps:$4 sm:$0xff]  }
 0x926   :  { %v10006_v48 = vpop.eup %10005  ;;  %v3194_v50 = vsel %vm415_vm0, %v3184_v45, 0.0  ;;  %v9707_v45 = vld [vmem:[%s13001_s11 + $0x60] ss:$16 sps:$4 sm:$0xff]  }
 0x927   :  { %3195 = vadd.xlane.f32.xlu1 %v3194_v50  ;;  %v3209_v19 = vmul.f32 %v10006_v48, %v3177_v60  ;;  %v9691_v60 = vld [vmem:[%s13001_s11 + $0xc] ss:$16 sps:$4 sm:$0xff]   ;;  %v3352_v20 = vpop.permute.xlu0 %3351  ;;  %v9710_v48 = vld [vmem:[%s13001_s11 + $0x68] ss:$16 sps:$4 sm:$0xff]   ;;  %v9715_v50 = vld [vmem:[%s13001_s11 + $0x84] ss:$16 sps:$4 sm:$0xff]  }
 0x928   :  { %3532 = vmatprep.subr.bf16.mxu0 %v9691_v60  ;;  %v9731_v60 = vld [vmem:[%s13001_s11 + $0xe0] ss:$16 sps:$4 sm:$0xff]  }
 0x929   :  { %v3219_v7 = vmul.f32 %v8230_v13, %v3209_v19  ;;  %3533 = vmatpush1.bf16.msra.mxu0 %v9689_v9  ;;  %v9736_v9 = vld [vmem:[%s13001_s11 + $0xec] ss:$16 sps:$4 sm:$0xff]  }
 0x92a   :  { %v10008_v33 = vpop.eup %10007 }
 0x92b   :  { %v3210_v5 = vmul.f32 %v10008_v33, %v3178_v42  ;;  %v12195_v56 = vadd.f32 %v8231_v15, %v3219_v7  ;;  %v9700_v42 = vld [vmem:[%s13001_s11 + $0x2c] ss:$16 sps:$4 sm:$0xff]   ;;  %v9716_v7 = vld [vmem:[%s13001_s11 + $0x88] ss:$16 sps:$4 sm:$0xff]  }
 0x92c   :  { %3534 = vmatprep.subr.bf16.mxu0 %v9700_v42  ;;  %v9737_v42 = vld [vmem:[%s13001_s11 + $0x100] ss:$16 sps:$4 sm:$0xff]  }
 0x92d   :  { %v3220_v47 = vmul.f32 %v8230_v13, %v3210_v5  ;;  %8942 = vmatprep.mubr.msk.f32.mxu1 %vm415_vm0, %v12195_v56  ;;  %3535 = vmatpush1.bf16.msra.mxu0 %v9698_v53  ;;  %v9721_v5 = vld [vmem:[%s13001_s11 + $0xa4] ss:$16 sps:$4 sm:$0xff]  }
 0x92e   :  { %v10010_v40 = vpop.eup %10009  ;;  %3671 = vmatprep.subr.bf16.mxu0 %v9706_v38  ;;  %v9745_v38 = vld [vmem:[%s13001_s11 + $0x124] ss:$16 sps:$4 sm:$0xff]  }
 0x92f   :  { %v12199_v2 = vadd.f32 %v8231_v15, %v3220_v47  ;;  %v3211_v22 = vmul.f32 %v10010_v40, %v3179_v10  ;;  %v9724_v47 = vld [vmem:[%s13001_s11 + $0xac] ss:$16 sps:$4 sm:$0xff]   ;;  %v9719_v40 = vld [vmem:[%s13001_s11 + $0xa0] ss:$16 sps:$4 sm:$0xff]  }
 0x931   :  { %8943 = vmatmul.mubr.msk.f32.vlgmr.msra.gmra.mrb[38].mxu1 %vm415_vm0, %v12199_v2  ;;  %v3221_v34 = vmul.f32 %v8230_v13, %v3211_v22  ;;  %v9369_v16 = vpack.c.bf16 %v12199_v2, %v12195_v56  ;;  %v9722_v22 = vld [vmem:[%s13001_s11 + $0xa8] ss:$16 sps:$4 sm:$0xff]   ;;  %v7481_v56 = vld [vmem:[#allocation31 + $0x8] sm:$0xff] }
 0x932   :  { %3492 = vmatpush1.bf16.msra.mxu1 %v9692_v44  ;;  %v9734_v44 = vld [vmem:[%s13001_s11 + $0xe8] ss:$16 sps:$4 sm:$0xff]  }
 0x933   :  { %v12205_v51 = vadd.f32 %v8231_v15, %v3221_v34  ;;  %3493 = vmatprep.subr.bf16.mxu1 %v9697_v4  ;;  %v9727_v34 = vld [vmem:[%s13001_s11 + $0xc4] ss:$16 sps:$4 sm:$0xff]   ;;  %v9742_v4 = vld [vmem:[%s13001_s11 + $0x10c] ss:$16 sps:$4 sm:$0xff]   ;;  %v7482_v2 = vld [vmem:[#allocation31 + $0x10] sm:$0xf] }
 0x935   :  { %8945 = vmatprep.mubr.msk.f32.mxu1 %vm415_vm0, %v12205_v51 }
 0x936   :  { %3494 = vmatpush1.bf16.msra.mxu1 %v9695_v59  ;;  %v9740_v59 = vld [vmem:[%s13001_s11 + $0x108] ss:$16 sps:$4 sm:$0xff]  }
 0x937   :  { %3630 = vmatprep.subr.bf16.mxu1 %v9703_v26 }
 0x938   :  { %3382 = vperm.xlu1 %9648, %v3341_v27  }
 0x93c   :  { %3356 = vperm.xlu1 %9648, %v3346_v24  }
 0x940   :  { %3387 = vperm.xlu1 %9648, %v3342_v8   ;;  %v9730_v8 = vld [vmem:[%s13001_s11 + $0xcc] ss:$16 sps:$4 sm:$0xff]  }
 0x944   :  { %3361 = vperm.xlu1 %9648, %v3347_v43   ;;  %v9728_v43 = vld [vmem:[%s13001_s11 + $0xc8] ss:$16 sps:$4 sm:$0xff]  }
 0x948   :  { %3392 = vperm.xlu1 %9648, %v3343_v52   ;;  %v9725_v52 = vld [vmem:[%s13001_s11 + $0xc0] ss:$16 sps:$4 sm:$0xff]  }
 0x94c   :  { %3366 = vperm.xlu1 %9648, %v3348_v6   ;;  %v9733_v6 = vld [vmem:[%s13001_s11 + $0xe4] ss:$16 sps:$4 sm:$0xff]  }
 0x950   :  { %3397 = vperm.xlu1 %9648, %v3344_v14  }
 0x9b4   :  { %v3196_v54 = vpop.xlane.xlu1 %3195 }
 0x9b5   :  { %v3200_v32 = vmul.f32 0.03125, %v3196_v54  ;;  %v9748_v54 = vld [vmem:[%s13001_s11 + $0x12c] ss:$16 sps:$4 sm:$0xff]  }
 0x9b7   :  { %v3204_v49 = vadd.f32 1e-05, %v3200_v32  ;;  %v9743_v32 = vld [vmem:[%s13001_s11 + $0x120] ss:$16 sps:$4 sm:$0xff]  }
 0x9b8   :  { %v3383_v28 = vpop.permute.xlu1 %3382 }
 0x9b9   :  { %10011 = vrsqrt.f32 %v3204_v49  ;;  %v3400_v57 = vmul.f32 %v12227_v23, %v3383_v28  ;;  %v9746_v49 = vld [vmem:[%s13001_s11 + $0x128] ss:$16 sps:$4 sm:$0xff]   ;;  %v9749_v28 = vld [vmem:[%s13001_s11 + $0x140] ss:$16 sps:$4 sm:$0xff]  }
 0x9bc   :  { %v3357_v61 = vpop.permute.xlu1 %3356 }
 0x9c0   :  { %v3388_v3 = vpop.permute.xlu1 %3387 }
 0x9c1   :  { %v3401_v27 = vmul.f32 %v12227_v23, %v3388_v3 }
 0x9c3   :  { %v10012_v10 = vpop.eup %10011 }
 0x9c4   :  { %v3212_v1 = vmul.f32 %v10012_v10, %v3180_v35  ;;  %v9709_v35 = vld [vmem:[%s13001_s11 + $0x64] ss:$16 sps:$4 sm:$0xff]  }
 0x9c5   :  { %v9751_v10 = vld [vmem:[%s13001_s11 + $0x144] ss:$16 sps:$4 sm:$0xff]  }
 0x9c6   :  { %v3222_v29 = vmul.f32 %v8230_v13, %v3212_v1  ;;  %v9718_v13 = vld [vmem:[%s13001_s11 + $0x8c] ss:$16 sps:$4 sm:$0xff]  }
 0x9c7   :  { %v9754_v1 = vld [vmem:[%s13001_s11 + $0x14c] ss:$16 sps:$4 sm:$0xff]  }
 0x9c8   :  { %v12222_v30 = vadd.f32 %v8231_v15, %v3222_v29  ;;  %v9713_v15 = vld [vmem:[%s13001_s11 + $0x80] ss:$16 sps:$4 sm:$0xff]  }
 0x9ca   :  { %8946 = vmatmul.mubr.msk.f32.gmra.mrb[40].mxu1 %vm415_vm0, %v12222_v30 }
 0x9cb   :  { %3523 = vmatprep.mubr.bf16.mxu1 %v10705_v39 }
 0xa04   :  { %v8944_v41 = vpop.f32.mrb[38].mxu1 }
 0xa05   :  { %v3328_v25 = vadd.f32 %v8944_v41, %v12229_v17  ;;  %v3322_v63 = vpop.f32.mrb[39].mxu1  ;;  %v9757_v41 = vld [vmem:[%s13001_s11 + $0x164] ss:$16 sps:$4 sm:$0xff]  }
 0xa06   :  { %v3323_v36 = vadd.f32 %v12229_v17, %v3322_v63  ;;  %v9755_v63 = vld [vmem:[%s13001_s11 + $0x160] ss:$16 sps:$4 sm:$0xff]  }
 0xa07   :  { %v3370_v46 = vmul.f32 %v3357_v61, %v3328_v25  ;;  %v9752_v61 = vld [vmem:[%s13001_s11 + $0x148] ss:$16 sps:$4 sm:$0xff]   ;;  %v9760_v25 = vld [vmem:[%s13001_s11 + $0x16c] ss:$16 sps:$4 sm:$0xff]  }
 0xa08   :  { %v3369_v11 = vmul.f32 %v3352_v20, %v3323_v36  ;;  %v9763_v20 = vld [vmem:[%s13001_s11 + $0x184] ss:$16 sps:$4 sm:$0xff]  }
 0xa09   :  { %v12235_v37 = vadd.f32 %v3401_v27, %v3370_v46  ;;  %v9758_v27 = vld [vmem:[%s13001_s11 + $0x168] ss:$16 sps:$4 sm:$0xff]   ;;  %v9761_v46 = vld [vmem:[%s13001_s11 + $0x180] ss:$16 sps:$4 sm:$0xff]  }
 0xa0a   :  { %v12237_v18 = vadd.f32 %v3400_v57, %v3369_v11  ;;  %v9766_v57 = vld [vmem:[%s13001_s11 + $0x18c] ss:$16 sps:$4 sm:$0xff]   ;;  %v9764_v11 = vld [vmem:[%s13001_s11 + $0x188] ss:$16 sps:$4 sm:$0xff]  }
 0xa0b   :  { %3409 = vst.msk [vmem:[#allocation3 + $0x8] sm:$0xff] %vm415_vm0, %v12235_v37 }
 0xa0c   :  { %3408 = vst.msk [vmem:[#allocation3] sm:$0xff] %vm415_vm0, %v12237_v18 }
 0xa12   :  { %v3994_v29 = vld [vmem:[#allocation3 + $0x8] sm:$0x3]  ;;  %v4133_v36 = vld [vmem:[#allocation3 + $0xa] sm:$0x3] }
 0xa13   :  { %v3438_v62 = vld [vmem:[#allocation3] sm:$0x3]  ;;  %v3577_v19 = vld [vmem:[#allocation3 + $0x2] sm:$0x3]  ;;  %v3716_v24 = vld [vmem:[#allocation3 + $0x4] sm:$0x3]  ;;  %v3995_v3 = vpack.c.bf16 %v3994_v29, %v3994_v29 }
 0xa14   :  { %v3439_v58 = vpack.c.bf16 %v3438_v62, %v3438_v62  ;;  %v3578_v33 = vpack.c.bf16 %v3577_v19, %v3577_v19  ;;  %v3717_v14 = vpack.c.bf16 %v3716_v24, %v3716_v24  ;;  %v3855_v53 = vld [vmem:[#allocation3 + $0x6] sm:$0x3]  ;;  %v4134_v62 = vpack.c.bf16 %v4133_v36, %v4133_v36  ;;  %v9809_v36 = vld [vmem:[%s13001_s11 + $0x280] ss:$16 sps:$4 sm:$0xff]  }
 0xa15   :  { %v3856_v26 = vpack.c.bf16 %v3855_v53, %v3855_v53 }
 0xa16   :  { %8246 = vmatmul.mubr.msk.bf16.vlgmr.msra.gmra.mrb[44].mxu1 %vm415_vm0, %v3439_v58  ;;  %8247 = vmatmul.mubr.msk.bf16.vlgmr.msra.gmra.mrb[68].mxu0 %vm415_vm0, %v3439_v58  ;;  %v9767_v58 = vld [vmem:[%s13001_s11 + $0x1a0] ss:$16 sps:$4 sm:$0xff]  }
 0xa17   :  { %3631 = vmatpush1.bf16.msra.mxu1 %v9701_v12  ;;  %3672 = vmatpush1.bf16.msra.mxu0 %v9704_v31  ;;  %v9769_v12 = vld [vmem:[%s13001_s11 + $0x1a4] ss:$16 sps:$4 sm:$0xff]   ;;  %v9772_v31 = vld [vmem:[%s13001_s11 + $0x1ac] ss:$16 sps:$4 sm:$0xff]  }
 0xa18   :  { %3632 = vmatprep.subr.bf16.mxu1 %v9709_v35  ;;  %3673 = vmatprep.subr.bf16.mxu0 %v9712_v21  ;;  %v9770_v35 = vld [vmem:[%s13001_s11 + $0x1a8] ss:$16 sps:$4 sm:$0xff]   ;;  %v9775_v21 = vld [vmem:[%s13001_s11 + $0x1c4] ss:$16 sps:$4 sm:$0xff]  }
 0xa19   :  { %3662 = vmatprep.mubr.bf16.mxu1 %v10705_v39  ;;  %3703 = vmatprep.mubr.bf16.mxu0 %v10705_v39 }
 0xa1b   :  { %3633 = vmatpush1.bf16.msra.mxu1 %v9707_v45  ;;  %3674 = vmatpush1.bf16.msra.mxu0 %v9710_v48  ;;  %v9778_v45 = vld [vmem:[%s13001_s11 + $0x1cc] ss:$16 sps:$4 sm:$0xff]  }
 0xa1c   :  { %3769 = vmatprep.subr.bf16.mxu1 %v9715_v50  ;;  %3810 = vmatprep.subr.bf16.mxu0 %v9718_v13  ;;  %v4272_v48 = vld [vmem:[#allocation3 + $0xc] sm:$0x3]  ;;  %v9773_v50 = vld [vmem:[%s13001_s11 + $0x1c0] ss:$16 sps:$4 sm:$0xff]   ;;  %v9776_v13 = vld [vmem:[%s13001_s11 + $0x1c8] ss:$16 sps:$4 sm:$0xff]  }
 0xa1d   :  { %v4273_v19 = vpack.c.bf16 %v4272_v48, %v4272_v48  ;;  %v9821_v48 = vld [vmem:[%s13001_s11 + $0x2c0] ss:$16 sps:$4 sm:$0xff]  }
 0xa22   :  { %8256 = vmatmul.mubr.msk.bf16.vlgmr.msra.gmra.mrb[44].mxu1 %vm415_vm0, %v3578_v33  ;;  %8257 = vmatmul.mubr.msk.bf16.vlgmr.msra.gmra.mrb[68].mxu0 %vm415_vm0, %v3578_v33  ;;  %v9779_v33 = vld [vmem:[%s13001_s11 + $0x1e0] ss:$16 sps:$4 sm:$0xff]  }
 0xa23   :  { %3770 = vmatpush1.bf16.msra.mxu1 %v9713_v15  ;;  %3811 = vmatpush1.bf16.msra.mxu0 %v9716_v7  ;;  %v9781_v15 = vld [vmem:[%s13001_s11 + $0x1e4] ss:$16 sps:$4 sm:$0xff]   ;;  %v9784_v7 = vld [vmem:[%s13001_s11 + $0x1ec] ss:$16 sps:$4 sm:$0xff]  }
 0xa24   :  { %3771 = vmatprep.subr.bf16.mxu1 %v9721_v5  ;;  %3812 = vmatprep.subr.bf16.mxu0 %v9724_v47  ;;  %v9782_v5 = vld [vmem:[%s13001_s11 + $0x1e8] ss:$16 sps:$4 sm:$0xff]   ;;  %v9787_v47 = vld [vmem:[%s13001_s11 + $0x204] ss:$16 sps:$4 sm:$0xff]  }
 0xa25   :  { %3801 = vmatprep.mubr.bf16.mxu1 %v10705_v39  ;;  %3842 = vmatprep.mubr.bf16.mxu0 %v10705_v39 }
 0xa27   :  { %3772 = vmatpush1.bf16.msra.mxu1 %v9719_v40  ;;  %3813 = vmatpush1.bf16.msra.mxu0 %v9722_v22  ;;  %v9790_v40 = vld [vmem:[%s13001_s11 + $0x20c] ss:$16 sps:$4 sm:$0xff]  }
 0xa28   :  { %3908 = vmatprep.subr.bf16.mxu1 %v9727_v34  ;;  %3949 = vmatprep.subr.bf16.mxu0 %v9730_v8  ;;  %v4411_v22 = vld [vmem:[#allocation3 + $0xe] sm:$0x3]  ;;  %v9785_v34 = vld [vmem:[%s13001_s11 + $0x200] ss:$16 sps:$4 sm:$0xff]   ;;  %v9788_v8 = vld [vmem:[%s13001_s11 + $0x208] ss:$16 sps:$4 sm:$0xff]  }
 0xa29   :  { %v4412_v24 = vpack.c.bf16 %v4411_v22, %v4411_v22  ;;  %v9833_v22 = vld [vmem:[%s13001_s11 + $0x300] ss:$16 sps:$4 sm:$0xff]  }
 0xa2e   :  { %8266 = vmatmul.mubr.msk.bf16.vlgmr.msra.gmra.mrb[44].mxu1 %vm415_vm0, %v3717_v14  ;;  %8267 = vmatmul.mubr.msk.bf16.vlgmr.msra.gmra.mrb[68].mxu0 %vm415_vm0, %v3717_v14  ;;  %v9791_v14 = vld [vmem:[%s13001_s11 + $0x220] ss:$16 sps:$4 sm:$0xff]  }
 0xa2f   :  { %3909 = vmatpush1.bf16.msra.mxu1 %v9725_v52  ;;  %3950 = vmatpush1.bf16.msra.mxu0 %v9728_v43  ;;  %v9793_v52 = vld [vmem:[%s13001_s11 + $0x224] ss:$16 sps:$4 sm:$0xff]   ;;  %v9796_v43 = vld [vmem:[%s13001_s11 + $0x22c] ss:$16 sps:$4 sm:$0xff]  }
 0xa30   :  { %3910 = vmatprep.subr.bf16.mxu1 %v9733_v6  ;;  %3951 = vmatprep.subr.bf16.mxu0 %v9736_v9  ;;  %v9794_v6 = vld [vmem:[%s13001_s11 + $0x228] ss:$16 sps:$4 sm:$0xff]   ;;  %v9799_v9 = vld [vmem:[%s13001_s11 + $0x244] ss:$16 sps:$4 sm:$0xff]  }
 0xa31   :  { %3940 = vmatprep.mubr.bf16.mxu1 %v10705_v39  ;;  %3981 = vmatprep.mubr.bf16.mxu0 %v10705_v39 }
 0xa33   :  { %3911 = vmatpush1.bf16.msra.mxu1 %v9731_v60  ;;  %3952 = vmatpush1.bf16.msra.mxu0 %v9734_v44  ;;  %v9802_v60 = vld [vmem:[%s13001_s11 + $0x24c] ss:$16 sps:$4 sm:$0xff]   ;;  %v3362_v44 = vpop.permute.xlu1 %3361 }
 0xa34   :  { %4047 = vmatprep.subr.bf16.mxu1 %v9739_v55  ;;  %4088 = vmatprep.subr.bf16.mxu0 %v9742_v4 }
 0xa37   :  { %v3393_v55 = vpop.permute.xlu1 %3392 }
 0xa3a   :  { %8276 = vmatmul.mubr.msk.bf16.vlgmr.msra.gmra.mrb[44].mxu1 %vm415_vm0, %v3856_v26  ;;  %8277 = vmatmul.mubr.msk.bf16.vlgmr.msra.gmra.mrb[68].mxu0 %vm415_vm0, %v3856_v26 }
 0xa3b   :  { %4048 = vmatpush1.bf16.msra.mxu1 %v9737_v42  ;;  %4089 = vmatpush1.bf16.msra.mxu0 %v9740_v59  ;;  %v3367_v4 = vpop.permute.xlu1 %3366 }
 0xa3c   :  { %4049 = vmatprep.subr.bf16.mxu1 %v9745_v38  ;;  %4090 = vmatprep.subr.bf16.mxu0 %v9748_v54 }
 0xa3d   :  { %4079 = vmatprep.mubr.bf16.mxu1 %v10705_v39  ;;  %4120 = vmatprep.mubr.bf16.mxu0 %v10705_v39 }
 0xa3f   :  { %4050 = vmatpush1.bf16.msra.mxu1 %v9743_v32  ;;  %4091 = vmatpush1.bf16.msra.mxu0 %v9746_v49  ;;  %v3398_v53 = vpop.permute.xlu1 %3397  ;;  %v3402_v49 = vmul.f32 %v12227_v23, %v3393_v55  ;;  %v9848_v55 = vld [vmem:[%s13001_s11 + $0x348] ss:$16 sps:$4 sm:$0xff]  }
 0xa40   :  { %4186 = vmatprep.subr.bf16.mxu1 %v9751_v10  ;;  %4227 = vmatprep.subr.bf16.mxu0 %v9754_v1  ;;  %v3403_v54 = vmul.f32 %v12227_v23, %v3398_v53  ;;  %v9805_v23 = vld [vmem:[%s13001_s11 + $0x264] ss:$16 sps:$4 sm:$0xff]  }
 0xa41   :  { %v9853_v53 = vld [vmem:[%s13001_s11 + $0x364] ss:$16 sps:$4 sm:$0xff]  }
 0xa46   :  { %8286 = vmatmul.mubr.msk.bf16.vlgmr.msra.gmra.mrb[44].mxu1 %vm415_vm0, %v3995_v3  ;;  %8287 = vmatmul.mubr.msk.bf16.vlgmr.msra.gmra.mrb[68].mxu0 %vm415_vm0, %v3995_v3 }
 0xa47   :  { %4187 = vmatpush1.bf16.msra.mxu1 %v9749_v28  ;;  %4228 = vmatpush1.bf16.msra.mxu0 %v9752_v61  ;;  %v9797_v28 = vld [vmem:[%s13001_s11 + $0x240] ss:$16 sps:$4 sm:$0xff]   ;;  %v9800_v61 = vld [vmem:[%s13001_s11 + $0x248] ss:$16 sps:$4 sm:$0xff]  }
 0xa48   :  { %4188 = vmatprep.subr.bf16.mxu1 %v9757_v41  ;;  %4229 = vmatprep.subr.bf16.mxu0 %v9760_v25  ;;  %v9808_v41 = vld [vmem:[%s13001_s11 + $0x26c] ss:$16 sps:$4 sm:$0xff]   ;;  %v9803_v25 = vld [vmem:[%s13001_s11 + $0x260] ss:$16 sps:$4 sm:$0xff]  }
 0xa49   :  { %4218 = vmatprep.mubr.bf16.mxu1 %v10705_v39  ;;  %4259 = vmatprep.mubr.bf16.mxu0 %v10705_v39 }
 0xa4b   :  { %4189 = vmatpush1.bf16.msra.mxu1 %v9755_v63  ;;  %4230 = vmatpush1.bf16.msra.mxu0 %v9758_v27  ;;  %v9806_v63 = vld [vmem:[%s13001_s11 + $0x268] ss:$16 sps:$4 sm:$0xff]   ;;  %v9811_v27 = vld [vmem:[%s13001_s11 + $0x284] ss:$16 sps:$4 sm:$0xff]  }
 0xa4c   :  { %4325 = vmatprep.subr.bf16.mxu1 %v9763_v20  ;;  %4366 = vmatprep.subr.bf16.mxu0 %v9766_v57  ;;  %v9814_v20 = vld [vmem:[%s13001_s11 + $0x28c] ss:$16 sps:$4 sm:$0xff]  }
 0xa52   :  { %8296 = vmatmul.mubr.msk.bf16.vlgmr.msra.gmra.mrb[44].mxu1 %vm415_vm0, %v4134_v62  ;;  %8297 = vmatmul.mubr.msk.bf16.vlgmr.msra.gmra.mrb[68].mxu0 %vm415_vm0, %v4134_v62  ;;  %v9817_v62 = vld [vmem:[%s13001_s11 + $0x2a4] ss:$16 sps:$4 sm:$0xff]  }
 0xa53   :  { %4326 = vmatpush1.bf16.msra.mxu1 %v9761_v46  ;;  %4367 = vmatpush1.bf16.msra.mxu0 %v9764_v11  ;;  %v9812_v46 = vld [vmem:[%s13001_s11 + $0x288] ss:$16 sps:$4 sm:$0xff]  }
 0xa54   :  { %4327 = vmatprep.subr.bf16.mxu1 %v9769_v12  ;;  %4368 = vmatprep.subr.bf16.mxu0 %v9772_v31  ;;  %v9820_v12 = vld [vmem:[%s13001_s11 + $0x2ac] ss:$16 sps:$4 sm:$0xff]   ;;  %v9815_v31 = vld [vmem:[%s13001_s11 + $0x2a0] ss:$16 sps:$4 sm:$0xff]  }
 0xa55   :  { %4357 = vmatprep.mubr.bf16.mxu1 %v10705_v39  ;;  %4398 = vmatprep.mubr.bf16.mxu0 %v10705_v39 }
 0xa57   :  { %4328 = vmatpush1.bf16.msra.mxu1 %v9767_v58  ;;  %4369 = vmatpush1.bf16.msra.mxu0 %v9770_v35  ;;  %v9818_v58 = vld [vmem:[%s13001_s11 + $0x2a8] ss:$16 sps:$4 sm:$0xff]   ;;  %v9823_v35 = vld [vmem:[%s13001_s11 + $0x2c4] ss:$16 sps:$4 sm:$0xff]  }
 0xa58   :  { %4464 = vmatprep.subr.bf16.mxu1 %v9775_v21  ;;  %4505 = vmatprep.subr.bf16.mxu0 %v9778_v45  ;;  %v9826_v21 = vld [vmem:[%s13001_s11 + $0x2cc] ss:$16 sps:$4 sm:$0xff]  }
 0xa5e   :  { %8306 = vmatmul.mubr.msk.bf16.vlgmr.msra.gmra.mrb[44].mxu1 %vm415_vm0, %v4273_v19  ;;  %8307 = vmatmul.mubr.msk.bf16.vlgmr.msra.gmra.mrb[68].mxu0 %vm415_vm0, %v4273_v19  ;;  %v9829_v19 = vld [vmem:[%s13001_s11 + $0x2e4] ss:$16 sps:$4 sm:$0xff]  }
 0xa5f   :  { %4465 = vmatpush1.bf16.msra.mxu1 %v9773_v50  ;;  %4506 = vmatpush1.bf16.msra.mxu0 %v9776_v13  ;;  %v9824_v50 = vld [vmem:[%s13001_s11 + $0x2c8] ss:$16 sps:$4 sm:$0xff]  }
 0xa60   :  { %4466 = vmatprep.subr.bf16.mxu1 %v9781_v15  ;;  %4507 = vmatprep.subr.bf16.mxu0 %v9784_v7  ;;  %v9832_v15 = vld [vmem:[%s13001_s11 + $0x2ec] ss:$16 sps:$4 sm:$0xff]   ;;  %v9827_v7 = vld [vmem:[%s13001_s11 + $0x2e0] ss:$16 sps:$4 sm:$0xff]  }
 0xa61   :  { %4496 = vmatprep.mubr.bf16.mxu1 %v10705_v39  ;;  %4537 = vmatprep.mubr.bf16.mxu0 %v10705_v39 }
 0xa63   :  { %4467 = vmatpush1.bf16.msra.mxu1 %v9779_v33  ;;  %4508 = vmatpush1.bf16.msra.mxu0 %v9782_v5  ;;  %v9830_v33 = vld [vmem:[%s13001_s11 + $0x2e8] ss:$16 sps:$4 sm:$0xff]   ;;  %v9835_v5 = vld [vmem:[%s13001_s11 + $0x304] ss:$16 sps:$4 sm:$0xff]  }
 0xa64   :  { %4603 = vmatprep.subr.bf16.mxu1 %v9787_v47  ;;  %4644 = vmatprep.subr.bf16.mxu0 %v9790_v40  ;;  %v9838_v47 = vld [vmem:[%s13001_s11 + $0x30c] ss:$16 sps:$4 sm:$0xff]  }
 0xa6a   :  { %8316 = vmatmul.mubr.msk.bf16.vlgmr.msra.gmra.mrb[44].mxu1 %vm415_vm0, %v4412_v24  ;;  %8317 = vmatmul.mubr.msk.bf16.vlgmr.msra.gmra.mrb[68].mxu0 %vm415_vm0, %v4412_v24  ;;  %v9841_v24 = vld [vmem:[%s13001_s11 + $0x324] ss:$16 sps:$4 sm:$0xff]  }
 0xa6b   :  { %4604 = vmatpush1.bf16.msra.mxu1 %v9785_v34  ;;  %4645 = vmatpush1.bf16.msra.mxu0 %v9788_v8  ;;  %v9836_v34 = vld [vmem:[%s13001_s11 + $0x308] ss:$16 sps:$4 sm:$0xff]  }
 0xa6c   :  { %4605 = vmatprep.subr.bf16.mxu1 %v9793_v52  ;;  %4646 = vmatprep.subr.bf16.mxu0 %v9796_v43  ;;  %v9844_v52 = vld [vmem:[%s13001_s11 + $0x32c] ss:$16 sps:$4 sm:$0xff]   ;;  %v9839_v43 = vld [vmem:[%s13001_s11 + $0x320] ss:$16 sps:$4 sm:$0xff]  }
 0xa6d   :  { %4635 = vmatprep.mubr.bf16.mxu1 %v10705_v39  ;;  %4676 = vmatprep.mubr.bf16.mxu0 %v10705_v39 }
 0xa6f   :  { %4606 = vmatpush1.bf16.msra.mxu1 %v9791_v14  ;;  %4647 = vmatpush1.bf16.msra.mxu0 %v9794_v6  ;;  %v9842_v14 = vld [vmem:[%s13001_s11 + $0x328] ss:$16 sps:$4 sm:$0xff]   ;;  %v9847_v6 = vld [vmem:[%s13001_s11 + $0x344] ss:$16 sps:$4 sm:$0xff]  }
 0xa70   :  { %4742 = vmatprep.subr.bf16.mxu1 %v9799_v9  ;;  %4783 = vmatprep.subr.bf16.mxu0 %v9802_v60  ;;  %v9850_v9 = vld [vmem:[%s13001_s11 + $0x34c] ss:$16 sps:$4 sm:$0xff]  }
 0xa9d   :  { %v8947_v42 = vpop.f32.mrb[40].mxu1 }
 0xa9e   :  { %v3338_v59 = vadd.f32 %v8947_v42, %v12229_v17  ;;  %v3332_v26 = vpop.f32.mrb[41].mxu1  ;;  %v9856_v42 = vld [vmem:[%s13001_s11 + $0x36c] ss:$16 sps:$4 sm:$0xff]  }
 0xa9f   :  { %v3333_v38 = vadd.f32 %v12229_v17, %v3332_v26  ;;  %v9854_v26 = vld [vmem:[%s13001_s11 + $0x368] ss:$16 sps:$4 sm:$0xff]  }
 0xaa0   :  { %v3372_v32 = vmul.f32 %v3367_v4, %v3338_v59  ;;  %v9851_v59 = vld [vmem:[%s13001_s11 + $0x360] ss:$16 sps:$4 sm:$0xff]  }
 0xaa1   :  { %v3371_v10 = vmul.f32 %v3362_v44, %v3333_v38  ;;  %v9845_v44 = vld [vmem:[%s13001_s11 + $0x340] ss:$16 sps:$4 sm:$0xff]   ;;  %v9859_v38 = vld [vmem:[%s13001_s11 + $0x384] ss:$16 sps:$4 sm:$0xff]  }
 0xaa2   :  { %v12343_v1 = vadd.f32 %v3403_v54, %v3372_v32  ;;  %v9862_v54 = vld [vmem:[%s13001_s11 + $0x38c] ss:$16 sps:$4 sm:$0xff]  }
 0xaa3   :  { %v12345_v29 = vadd.f32 %v3402_v49, %v3371_v10  ;;  %v9857_v49 = vld [vmem:[%s13001_s11 + $0x380] ss:$16 sps:$4 sm:$0xff]   ;;  %v9860_v10 = vld [vmem:[%s13001_s11 + $0x388] ss:$16 sps:$4 sm:$0xff]  }
 0xaa4   :  { %3411 = vst.msk [vmem:[#allocation3 + $0x18] sm:$0xff] %vm415_vm0, %v12343_v1 }
 0xaa5   :  { %3410 = vst.msk [vmem:[#allocation3 + $0x10] sm:$0xff] %vm415_vm0, %v12345_v29 }
 0xaab   :  { %v5106_v60 = vld [vmem:[#allocation3 + $0x18] sm:$0x3]  ;;  %v5245_v32 = vld [vmem:[#allocation3 + $0x1a] sm:$0x3] }
 0xaac   :  { %v4550_v17 = vld [vmem:[#allocation3 + $0x10] sm:$0x3]  ;;  %v4689_v57 = vld [vmem:[#allocation3 + $0x12] sm:$0x3]  ;;  %v4828_v45 = vld [vmem:[#allocation3 + $0x14] sm:$0x3]  ;;  %v5107_v4 = vpack.c.bf16 %v5106_v60, %v5106_v60 }
 0xaad   :  { %v4551_v3 = vpack.c.bf16 %v4550_v17, %v4550_v17  ;;  %v4690_v11 = vpack.c.bf16 %v4689_v57, %v4689_v57  ;;  %v4829_v13 = vpack.c.bf16 %v4828_v45, %v4828_v45  ;;  %v4967_v40 = vld [vmem:[#allocation3 + $0x16] sm:$0x3]  ;;  %v5246_v17 = vpack.c.bf16 %v5245_v32, %v5245_v32 }
 0xaae   :  { %v4968_v8 = vpack.c.bf16 %v4967_v40, %v4967_v40 }
 0xaaf   :  { %8326 = vmatmul.mubr.msk.bf16.vlgmr.msra.gmra.mrb[44].mxu1 %vm415_vm0, %v4551_v3  ;;  %8327 = vmatmul.mubr.msk.bf16.vlgmr.msra.gmra.mrb[68].mxu0 %vm415_vm0, %v4551_v3  ;;  %v9863_v3 = vld [vmem:[%s13001_s11 + $0x3a0] ss:$16 sps:$4 sm:$0xff]  }
 0xab0   :  { %4743 = vmatpush1.bf16.msra.mxu1 %v9797_v28  ;;  %4784 = vmatpush1.bf16.msra.mxu0 %v9800_v61  ;;  %v9865_v28 = vld [vmem:[%s13001_s11 + $0x3a4] ss:$16 sps:$4 sm:$0xff]   ;;  %v9868_v61 = vld [vmem:[%s13001_s11 + $0x3ac] ss:$16 sps:$4 sm:$0xff]  }
 0xab1   :  { %4744 = vmatprep.subr.bf16.mxu1 %v9805_v23  ;;  %4785 = vmatprep.subr.bf16.mxu0 %v9808_v41  ;;  %v9866_v23 = vld [vmem:[%s13001_s11 + $0x3a8] ss:$16 sps:$4 sm:$0xff]   ;;  %v9871_v41 = vld [vmem:[%s13001_s11 + $0x3c4] ss:$16 sps:$4 sm:$0xff]  }
 0xab2   :  { %4774 = vmatprep.mubr.bf16.mxu1 %v10705_v39  ;;  %4815 = vmatprep.mubr.bf16.mxu0 %v10705_v39 }
 0xab4   :  { %4745 = vmatpush1.bf16.msra.mxu1 %v9803_v25  ;;  %4786 = vmatpush1.bf16.msra.mxu0 %v9806_v63  ;;  %v9874_v25 = vld [vmem:[%s13001_s11 + $0x3cc] ss:$16 sps:$4 sm:$0xff]  }
 0xab5   :  { %4881 = vmatprep.subr.bf16.mxu1 %v9811_v27  ;;  %4922 = vmatprep.subr.bf16.mxu0 %v9814_v20  ;;  %v5384_v63 = vld [vmem:[#allocation3 + $0x1c] sm:$0x3]  ;;  %v9869_v27 = vld [vmem:[%s13001_s11 + $0x3c0] ss:$16 sps:$4 sm:$0xff]   ;;  %v9872_v20 = vld [vmem:[%s13001_s11 + $0x3c8] ss:$16 sps:$4 sm:$0xff]  }
 0xab6   :  { %v5385_v57 = vpack.c.bf16 %v5384_v63, %v5384_v63 }
 0xabb   :  { %8336 = vmatmul.mubr.msk.bf16.vlgmr.msra.gmra.mrb[44].mxu1 %vm415_vm0, %v4690_v11  ;;  %8337 = vmatmul.mubr.msk.bf16.vlgmr.msra.gmra.mrb[68].mxu0 %vm415_vm0, %v4690_v11  ;;  %v9875_v11 = vld [vmem:[%s13001_s11 + $0x3e0] ss:$16 sps:$4 sm:$0xff]  }
 0xabc   :  { %4882 = vmatpush1.bf16.msra.mxu1 %v9809_v36  ;;  %4923 = vmatpush1.bf16.msra.mxu0 %v9812_v46  ;;  %v9877_v36 = vld [vmem:[%s13001_s11 + $0x3e4] ss:$16 sps:$4 sm:$0xff]   ;;  %v9880_v46 = vld [vmem:[%s13001_s11 + $0x3ec] ss:$16 sps:$4 sm:$0xff]  }
 0xabd   :  { %4883 = vmatprep.subr.bf16.mxu1 %v9817_v62  ;;  %4924 = vmatprep.subr.bf16.mxu0 %v9820_v12  ;;  %v9878_v62 = vld [vmem:[%s13001_s11 + $0x3e8] ss:$16 sps:$4 sm:$0xff]   ;;  %v5523_v12 = vld [vmem:[#allocation3 + $0x1e] sm:$0x3] }
 0xabe   :  { %4913 = vmatprep.mubr.bf16.mxu1 %v10705_v39  ;;  %4954 = vmatprep.mubr.bf16.mxu0 %v10705_v39 }
 0xac0   :  { %4884 = vmatpush1.bf16.msra.mxu1 %v9815_v31  ;;  %4925 = vmatpush1.bf16.msra.mxu0 %v9818_v58  ;;  %v5524_v31 = vpack.c.bf16 %v5523_v12, %v5523_v12  ;;  %v3414_v58 = vlaneseq }
 0xac1   :  { %5020 = vmatprep.subr.bf16.mxu1 %v9823_v35  ;;  %5061 = vmatprep.subr.bf16.mxu0 %v9826_v21 }
 0xac2   :  { %v3415_v35 = vshrl.u32 %v3414_v58, 7 }
 0xac4   :  { %v3416_v21 = vsub.s32 0, %v3415_v35  ;;  %v3424_v45 = vsub.s32 2, %v3415_v35 }
 0xac7   :  { %8346 = vmatmul.mubr.msk.bf16.vlgmr.msra.gmra.mrb[44].mxu1 %vm415_vm0, %v4829_v13  ;;  %8347 = vmatmul.mubr.msk.bf16.vlgmr.msra.gmra.mrb[68].mxu0 %vm415_vm0, %v4829_v13  ;;  %v3428_v13 = vsub.s32 3, %v3415_v35 }
 0xac8   :  { %5021 = vmatpush1.bf16.msra.mxu1 %v9821_v48  ;;  %5062 = vmatpush1.bf16.msra.mxu0 %v9824_v50  ;;  %v3412_v48 = vld [vmem:[#allocation15] sm:$0xf]  ;;  %v3420_v50 = vsub.s32 1, %v3415_v35 }
 0xac9   :  { %5022 = vmatprep.subr.bf16.mxu1 %v9829_v19  ;;  %5063 = vmatprep.subr.bf16.mxu0 %v9832_v15  ;;  %v3417_v19 = vrot.slane %v3412_v48, %v3416_v21  ;;  %v3425_v15 = vrot.slane %v3412_v48, %v3424_v45 }
 0xaca   :  { %5052 = vmatprep.mubr.bf16.mxu1 %v10705_v39  ;;  %5093 = vmatprep.mubr.bf16.mxu0 %v10705_v39 }
 0xacc   :  { %5023 = vmatpush1.bf16.msra.mxu1 %v9827_v7  ;;  %5064 = vmatpush1.bf16.msra.mxu0 %v9830_v33  ;;  %v3421_v7 = vrot.slane %v3412_v48, %v3420_v50 }
 0xacd   :  { %5159 = vmatprep.subr.bf16.mxu1 %v9835_v5  ;;  %5200 = vmatprep.subr.bf16.mxu0 %v9838_v47 }
 0xad3   :  { %8356 = vmatmul.mubr.msk.bf16.vlgmr.msra.gmra.mrb[44].mxu1 %vm415_vm0, %v4968_v8  ;;  %8357 = vmatmul.mubr.msk.bf16.vlgmr.msra.gmra.mrb[68].mxu0 %vm415_vm0, %v4968_v8 }
 0xad4   :  { %5160 = vmatpush1.bf16.msra.mxu1 %v9833_v22  ;;  %5201 = vmatpush1.bf16.msra.mxu0 %v9836_v34 }
 0xad5   :  { %5161 = vmatprep.subr.bf16.mxu1 %v9841_v24  ;;  %5202 = vmatprep.subr.bf16.mxu0 %v9844_v52 }
 0xad6   :  { %5191 = vmatprep.mubr.bf16.mxu1 %v10705_v39  ;;  %5232 = vmatprep.mubr.bf16.mxu0 %v10705_v39 }
 0xad8   :  { %5162 = vmatpush1.bf16.msra.mxu1 %v9839_v43  ;;  %5203 = vmatpush1.bf16.msra.mxu0 %v9842_v14 }
 0xad9   :  { %5298 = vmatprep.subr.bf16.mxu1 %v9847_v6  ;;  %5339 = vmatprep.subr.bf16.mxu0 %v9850_v9 }
 0xadf   :  { %8366 = vmatmul.mubr.msk.bf16.vlgmr.msra.gmra.mrb[44].mxu1 %vm415_vm0, %v5107_v4  ;;  %8367 = vmatmul.mubr.msk.bf16.vlgmr.msra.gmra.mrb[68].mxu0 %vm415_vm0, %v5107_v4 }
 0xae0   :  { %5299 = vmatpush1.bf16.msra.mxu1 %v9845_v44  ;;  %5340 = vmatpush1.bf16.msra.mxu0 %v9848_v55 }
 0xae1   :  { %5300 = vmatprep.subr.bf16.mxu1 %v9853_v53  ;;  %5341 = vmatprep.subr.bf16.mxu0 %v9856_v42 }
 0xae2   :  { %5330 = vmatprep.mubr.bf16.mxu1 %v10705_v39  ;;  %5371 = vmatprep.mubr.bf16.mxu0 %v10705_v39 }
 0xae4   :  { %5301 = vmatpush1.bf16.msra.mxu1 %v9851_v59  ;;  %5342 = vmatpush1.bf16.msra.mxu0 %v9854_v26 }
 0xae5   :  { %5437 = vmatprep.subr.bf16.mxu1 %v9859_v38  ;;  %5478 = vmatprep.subr.bf16.mxu0 %v9862_v54 }
 0xaeb   :  { %8376 = vmatmul.mubr.msk.bf16.vlgmr.msra.gmra.mrb[44].mxu1 %vm415_vm0, %v5246_v17  ;;  %8377 = vmatmul.mubr.msk.bf16.vlgmr.msra.gmra.mrb[68].mxu0 %vm415_vm0, %v5246_v17 }
 0xaec   :  { %5438 = vmatpush1.bf16.msra.mxu1 %v9857_v49  ;;  %5479 = vmatpush1.bf16.msra.mxu0 %v9860_v10 }
 0xaed   :  { %5439 = vmatprep.subr.bf16.mxu1 %v9865_v28  ;;  %5480 = vmatprep.subr.bf16.mxu0 %v9868_v61 }
 0xaee   :  { %5469 = vmatprep.mubr.bf16.mxu1 %v10705_v39  ;;  %5510 = vmatprep.mubr.bf16.mxu0 %v10705_v39 }
 0xaf0   :  { %5440 = vmatpush1.bf16.msra.mxu1 %v9863_v3  ;;  %5481 = vmatpush1.bf16.msra.mxu0 %v9866_v23 }
 0xaf1   :  { %5576 = vmatprep.subr.bf16.mxu1 %v9871_v41  ;;  %5617 = vmatprep.subr.bf16.mxu0 %v9874_v25 }
 0xaf7   :  { %8386 = vmatmul.mubr.msk.bf16.vlgmr.msra.gmra.mrb[44].mxu1 %vm415_vm0, %v5385_v57  ;;  %8387 = vmatmul.mubr.msk.bf16.vlgmr.msra.gmra.mrb[68].mxu0 %vm415_vm0, %v5385_v57 }
 0xaf8   :  { %5577 = vmatpush1.bf16.msra.mxu1 %v9869_v27  ;;  %5618 = vmatpush1.bf16.msra.mxu0 %v9872_v20 }
 0xaf9   :  { %5578 = vmatprep.subr.bf16.mxu1 %v9877_v36  ;;  %5619 = vmatprep.subr.bf16.mxu0 %v9880_v46 }
 0xafa   :  { %5608 = vmatprep.mubr.bf16.mxu1 %v10705_v39  ;;  %5649 = vmatprep.mubr.bf16.mxu0 %v10705_v39  ;;  %v3429_v39 = vrot.slane %v3412_v48, %v3428_v13 }
 0xafc   :  { %5579 = vmatpush1.bf16.msra.mxu1 %v9875_v11  ;;  %5620 = vmatpush1.bf16.msra.mxu0 %v9878_v62 }
 0xb03   :  { %8396 = vmatmul.mubr.msk.bf16.vlgmr.msra.gmra.mrb[44].mxu1 %vm415_vm0, %v5524_v31  ;;  %8397 = vmatmul.mubr.msk.bf16.vlgmr.msra.gmra.mrb[68].mxu0 %vm415_vm0, %v5524_v31 }
 0xbd6   :  { %v5610_v33 = vpop.f32.mrb[44].mxu1  ;;  %v5651_v5 = vpop.f32.mrb[68].mxu0 }
 0xbd7   :  { %v12436_v47 = vadd.f32 %v5610_v33, %v3417_v19  ;;  %v12438_v40 = vadd.f32 %v5651_v5, %v3425_v15  ;;  %v5612_v22 = vpop.f32.mrb[45].mxu1  ;;  %v5653_v34 = vpop.f32.mrb[69].mxu0 }
 0xbd8   :  { %v12440_v8 = vadd.f32 %v5612_v22, %v3421_v7  ;;  %v12442_v24 = vadd.f32 %v5653_v34, %v3429_v39  ;;  %v5614_v52 = vpop.f32.mrb[46].mxu1  ;;  %v5655_v43 = vpop.f32.mrb[70].mxu0 }
 0xbd9   :  { %v12445_v14 = vmul.f32 0.70710677, %v12436_v47  ;;  %v12448_v6 = vmul.f32 0.70710677, %v12438_v40  ;;  %v5615_v49 = vpop.f32.mrb[47].mxu1  ;;  %v5656_v10 = vpop.f32.mrb[71].mxu0 }
 0xbda   :  { %v12451_v9 = vmul.f32 0.70710677, %v12440_v8  ;;  %v12454_v60 = vmul.f32 0.70710677, %v12442_v24 }
 0xbdb   :  { %v5670_v44 = vand.u32 2147483647, %v12445_v14  ;;  %v5672_v55 = vand.u32 2147483647, %v12448_v6  ;;  %vm5750_vm4 = vcmp.ge.f32.partialorder %v12445_v14, 0.0  ;;  %vm5752_vm11 = vcmp.ge.f32.partialorder %v12448_v6, 0.0 }
 0xbdc   :  { %v5671_v4 = vand.u32 2147483647, %v12451_v9  ;;  %v5673_v53 = vand.u32 2147483647, %v12454_v60  ;;  %vm5751_vm13 = vcmp.ge.f32.partialorder %v12451_v9, 0.0  ;;  %v5663_v6 = vmul.f32 0.5, %v12440_v8 }
 0xbdd   :  { %v5674_v42 = vmul.f32 0.3275911, %v5670_v44  ;;  %v5676_v59 = vmul.f32 0.3275911, %v5672_v55  ;;  %v5726_v61 = vsub.f32 0.0, %v5670_v44  ;;  %v5728_v3 = vsub.f32 0.0, %v5672_v55 }
 0xbde   :  { %v5675_v26 = vmul.f32 0.3275911, %v5671_v4  ;;  %v5677_v32 = vmul.f32 0.3275911, %v5673_v53  ;;  %v5727_v25 = vsub.f32 0.0, %v5671_v4  ;;  %v5729_v36 = vsub.f32 0.0, %v5673_v53 }
 0xbdf   :  { %v5678_v38 = vadd.f32 1.0, %v5674_v42  ;;  %v5680_v54 = vadd.f32 1.0, %v5676_v59  ;;  %v5730_v41 = vmul.f32 %v5726_v61, %v5670_v44  ;;  %v5732_v20 = vmul.f32 %v5728_v3, %v5672_v55 }
 0xbe0   :  { %v5679_v17 = vadd.f32 1.0, %v5675_v26  ;;  %v5681_v28 = vadd.f32 1.0, %v5677_v32  ;;  %v5731_v31 = vmul.f32 %v5727_v25, %v5671_v4  ;;  %v5733_v13 = vmul.f32 %v5729_v36, %v5673_v53 }
 0xbe1   :  { %10013 = vrcp.f32 %v5678_v38  ;;  %v5734_v62 = vmul.f32 1.442695, %v5730_v41  ;;  %v5738_v21 = vmul.f32 1.442695, %v5732_v20  ;;  %vm5753_vm14 = vcmp.ge.f32.partialorder %v12454_v60, 0.0 }
 0xbe2   :  { %10015 = vrcp.f32 %v5680_v54  ;;  %v5736_v33 = vmul.f32 1.442695, %v5731_v31  ;;  %v5740_v43 = vmul.f32 1.442695, %v5733_v13  ;;  %v5665_v9 = vmul.f32 0.5, %v12442_v24 }
 0xbe3   :  { %10017 = vrcp.f32 %v5679_v17 }
 0xbe4   :  { %10019 = vrcp.f32 %v5681_v28 }
 0xbe5   :  { %10021 = vpow2.f32 %v5734_v62 }
 0xbe6   :  { %10023 = vpow2.f32 %v5738_v21 }
 0xbe7   :  { %10025 = vpow2.f32 %v5736_v33  ;;  %v5664_v33 = vmul.f32 0.5, %v12438_v40 }
 0xbe8   :  { %10027 = vpow2.f32 %v5740_v43 }
 0xbeb   :  { %v10014_v23 = vpop.eup %10013 }
 0xbec   :  { %v10016_v63 = vpop.eup %10015  ;;  %v5690_v27 = vmul.f32 1.0614054, %v10014_v23 }
 0xbed   :  { %v5692_v57 = vmul.f32 1.0614054, %v10016_v63  ;;  %v10018_v11 = vpop.eup %10017 }
 0xbee   :  { %v5694_v46 = vadd.f32 -1.4531521, %v5690_v27  ;;  %v5691_v45 = vmul.f32 1.0614054, %v10018_v11  ;;  %v10020_v48 = vpop.eup %10019 }
 0xbef   :  { %v5696_v12 = vadd.f32 -1.4531521, %v5692_v57  ;;  %v5693_v7 = vmul.f32 1.0614054, %v10020_v48  ;;  %v10022_v3 = vpop.eup %10021 }
 0xbf0   :  { %v5698_v35 = vmul.f32 %v10014_v23, %v5694_v46  ;;  %v5695_v15 = vadd.f32 -1.4531521, %v5691_v45  ;;  %v10024_v25 = vpop.eup %10023 }
 0xbf1   :  { %v5700_v50 = vmul.f32 %v10016_v63, %v5696_v12  ;;  %v5697_v34 = vadd.f32 -1.4531521, %v5693_v7  ;;  %v10026_v31 = vpop.eup %10025  ;;  %v5662_v7 = vmul.f32 0.5, %v12436_v47 }
 0xbf2   :  { %v5702_v19 = vadd.f32 1.4214138, %v5698_v35  ;;  %v5699_v22 = vmul.f32 %v10018_v11, %v5695_v15  ;;  %v10028_v13 = vpop.eup %10027 }
 0xbf3   :  { %v5704_v39 = vadd.f32 1.4214138, %v5700_v50  ;;  %v5701_v4 = vmul.f32 %v10020_v48, %v5697_v34 }
 0xbf4   :  { %v5706_v5 = vmul.f32 %v10014_v23, %v5702_v19  ;;  %v5703_v55 = vadd.f32 1.4214138, %v5699_v22 }
 0xbf5   :  { %v5708_v52 = vmul.f32 %v10016_v63, %v5704_v39  ;;  %v5705_v53 = vadd.f32 1.4214138, %v5701_v4 }
 0xbf6   :  { %v5710_v44 = vadd.f32 -0.28449672, %v5706_v5  ;;  %v5707_v26 = vmul.f32 %v10018_v11, %v5703_v55 }
 0xbf7   :  { %v5712_v42 = vadd.f32 -0.28449672, %v5708_v52  ;;  %v5709_v49 = vmul.f32 %v10020_v48, %v5705_v53 }
 0xbf8   :  { %v5714_v59 = vmul.f32 %v10014_v23, %v5710_v44  ;;  %v5711_v32 = vadd.f32 -0.28449672, %v5707_v26 }
 0xbf9   :  { %v5716_v38 = vmul.f32 %v10016_v63, %v5712_v42  ;;  %v5713_v61 = vadd.f32 -0.28449672, %v5709_v49 }
 0xbfa   :  { %v5718_v54 = vadd.f32 0.2548296, %v5714_v59  ;;  %v5715_v28 = vmul.f32 %v10018_v11, %v5711_v32 }
 0xbfb   :  { %v5720_v10 = vadd.f32 0.2548296, %v5716_v38  ;;  %v5717_v57 = vmul.f32 %v10020_v48, %v5713_v61 }
 0xbfc   :  { %v5722_v17 = vmul.f32 %v10014_v23, %v5718_v54  ;;  %v5719_v20 = vadd.f32 0.2548296, %v5715_v28 }
 0xbfd   :  { %v5724_v41 = vmul.f32 %v10016_v63, %v5720_v10  ;;  %v5721_v12 = vadd.f32 0.2548296, %v5717_v57 }
 0xbfe   :  { %v5742_v27 = vmul.f32 %v10022_v3, %v5722_v17  ;;  %v5723_v62 = vmul.f32 %v10018_v11, %v5719_v20 }
 0xbff   :  { %v5744_v36 = vmul.f32 %v10024_v25, %v5724_v41  ;;  %v5725_v50 = vmul.f32 %v10020_v48, %v5721_v12 }
 0xc00   :  { %v5746_v46 = vsub.f32 1.0, %v5742_v27  ;;  %v5743_v45 = vmul.f32 %v10026_v31, %v5723_v62 }
 0xc01   :  { %v5748_v35 = vsub.f32 1.0, %v5744_v36  ;;  %v5745_v15 = vmul.f32 %v10028_v13, %v5725_v50 }
 0xc02   :  { %v5754_v21 = vsub.f32 0.0, %v5746_v46  ;;  %v5747_v63 = vsub.f32 1.0, %v5743_v45 }
 0xc03   :  { %v5756_v23 = vsub.f32 0.0, %v5748_v35  ;;  %v5749_v34 = vsub.f32 1.0, %v5745_v15 }
 0xc04   :  { %v5758_v19 = vsel %vm5750_vm4, %v5746_v46, %v5754_v21  ;;  %v5755_v22 = vsub.f32 0.0, %v5747_v63 }
 0xc05   :  { %v5762_v39 = vadd.f32 1.0, %v5758_v19  ;;  %v5760_v11 = vsel %vm5752_vm11, %v5748_v35, %v5756_v23  ;;  %v5757_v43 = vsub.f32 0.0, %v5749_v34 }
 0xc06   :  { %v5764_v5 = vadd.f32 1.0, %v5760_v11  ;;  %v5759_v52 = vsel %vm5751_vm13, %v5747_v63, %v5755_v22  ;;  %v5913_v22 = vld [vmem:[#allocation16] sm:$0xff] }
 0xc07   :  { %v5766_v48 = vmul.f32 %v5762_v39, %v5662_v7  ;;  %v5763_v44 = vadd.f32 1.0, %v5759_v52  ;;  %v5761_v47 = vsel %vm5753_vm14, %v5749_v34, %v5757_v43  ;;  %v5914_v34 = vld [vmem:[#allocation16 + $0x8] sm:$0xff]  ;;  %v5916_v52 = vld [vmem:[#allocation16 + $0x18] sm:$0xff] }
 0xc08   :  { %v5768_v14 = vmul.f32 %v5764_v5, %v5664_v33  ;;  %v5765_v55 = vadd.f32 1.0, %v5761_v47 }
 0xc09   :  { %5771 = vst.msk [vmem:[#allocation3] sm:$0x3] %vm5770_vm12, %v5766_v48  ;;  %5777 = vrot.lane.b32.xlu0 %v5766_v48, %s10706_s30  ;;  %5773 = vrot.lane.b32.xlu1 %v5766_v48, %s10707_s3  ;;  %v5767_v40 = vmul.f32 %v5763_v44, %v5663_v6 }
 0xc0a   :  { %5799 = vst.msk [vmem:[#allocation3 + $0x10] sm:$0x3] %vm5770_vm12, %v5768_v14  ;;  %v5769_v4 = vmul.f32 %v5765_v55, %v5665_v9 }
 0xc0b   :  { %5785 = vst.msk [vmem:[#allocation3 + $0x8] sm:$0x3] %vm5770_vm12, %v5767_v40 }
 0xc0c   :  { %5813 = vst.msk [vmem:[#allocation3 + $0x18] sm:$0x3] %vm5770_vm12, %v5769_v4 }
 0xc0d   :  { %5781 = vrot.lane.b32.xlu1 %v5766_v48, %s10708_s4  ;;  %5805 = vrot.lane.b32.xlu0 %v5768_v14, %s10706_s30  ;;  %v9256_v48 = vpack.c.bf16 %v5914_v34, %v5913_v22 }
 0xc0f   :  { %9257 = vmatprep.subr.bf16.mxu1 %v9256_v48 }
 0xc10   :  { %9259 = vmatpush3.bf16.msra.mxu1 %v9256_v48 }
 0xc11   :  { %5787 = vrot.lane.b32.xlu0 %v5767_v40, %s10707_s3  ;;  %5801 = vrot.lane.b32.xlu1 %v5768_v14, %s10707_s3 }
 0xc15   :  { %5795 = vrot.lane.b32.xlu0 %v5767_v40, %s10708_s4  ;;  %5791 = vrot.lane.b32.xlu1 %v5767_v40, %s10706_s30 }
 0xc19   :  { %5809 = vrot.lane.b32.xlu1 %v5768_v14, %s10708_s4  ;;  %5815 = vrot.lane.b32.xlu0 %v5769_v4, %s10707_s3  ;;  %v5915_v14 = vld [vmem:[#allocation16 + $0x10] sm:$0xff] }
 0xc1a   :  { %v9260_v43 = vpack.c.bf16 %v5916_v52, %v5915_v14 }
 0xc1c   :  { %9261 = vmatprep.subr.bf16.mxu1 %v9260_v43 }
 0xc1d   :  { %5819 = vrot.lane.b32.xlu1 %v5769_v4, %s10706_s30  ;;  %5823 = vrot.lane.b32.xlu0 %v5769_v4, %s10708_s4 }
 0xc1e   :  { %9263 = vmatpush3.bf16.msra.mxu1 %v9260_v43 }
 0xc7b   :  { %v5778_v8 = vpop.permute.xlu0 %5777  ;;  %v5774_v24 = vpop.permute.xlu1 %5773 }
 0xc7c   :  { %5780 = vst.msk [vmem:[#allocation3 + $0x4] sm:$0x3] %vm5770_vm12, %v5778_v8  ;;  %5776 = vst.msk [vmem:[#allocation3 + $0x2] sm:$0x3] %vm5770_vm12, %v5774_v24 }
 0xc7f   :  { %v5782_v60 = vpop.permute.xlu1 %5781  ;;  %v5806_v42 = vpop.permute.xlu0 %5805 }
 0xc80   :  { %5784 = vst.msk [vmem:[#allocation3 + $0x6] sm:$0x3] %vm5770_vm12, %v5782_v60  ;;  %5808 = vst.msk [vmem:[#allocation3 + $0x14] sm:$0x3] %vm5770_vm12, %v5806_v42  ;;  %v8398_v42 = vld [vmem:[%s13002_s16] ss:$0 sm:$0xff] }
 0xc83   :  { %v5788_v59 = vpop.permute.xlu0 %5787  ;;  %v5802_v26 = vpop.permute.xlu1 %5801 }
 0xc84   :  { %5790 = vst.msk [vmem:[#allocation3 + $0xa] sm:$0x3] %vm5770_vm12, %v5788_v59  ;;  %5804 = vst.msk [vmem:[#allocation3 + $0x12] sm:$0x3] %vm5770_vm12, %v5802_v26 }
 0xc87   :  { %v5796_v53 = vpop.permute.xlu0 %5795  ;;  %v5792_v38 = vpop.permute.xlu1 %5791  ;;  %v5827_v54 = vld [vmem:[#allocation3] sm:$0xff] }
 0xc88   :  { %5798 = vst.msk [vmem:[#allocation3 + $0xe] sm:$0x3] %vm5770_vm12, %v5796_v53  ;;  %5794 = vst.msk [vmem:[#allocation3 + $0xc] sm:$0x3] %vm5770_vm12, %v5792_v38  ;;  %v5831_v32 = vadd.f32 %v5827_v54, %v12237_v18  ;;  %v8399_v38 = vld [vmem:[%s13003_s23] ss:$0 sm:$0xff] }
 0xc8a   :  { %v5837_v49 = vsel %vm415_vm0, %v5831_v32, 0.0 }
 0xc8b   :  { %v5810_v10 = vpop.permute.xlu1 %5809  ;;  %5838 = vadd.xlane.f32.xlu1 %v5837_v49  ;;  %v5816_v17 = vpop.permute.xlu0 %5815 }
 0xc8c   :  { %5812 = vst.msk [vmem:[#allocation3 + $0x16] sm:$0x3] %vm5770_vm12, %v5810_v10  ;;  %5818 = vst.msk [vmem:[#allocation3 + $0x1a] sm:$0x3] %vm5770_vm12, %v5816_v17 }
 0xc8f   :  { %v5820_v28 = vpop.permute.xlu1 %5819  ;;  %v5824_v61 = vpop.permute.xlu0 %5823  ;;  %v5828_v3 = vld [vmem:[#allocation3 + $0x8] sm:$0xff] }
 0xc90   :  { %5822 = vst.msk [vmem:[#allocation3 + $0x1c] sm:$0x3] %vm5770_vm12, %v5820_v28  ;;  %5826 = vst.msk [vmem:[#allocation3 + $0x1e] sm:$0x3] %vm5770_vm12, %v5824_v61  ;;  %v5832_v41 = vadd.f32 %v5828_v3, %v12235_v37 }
 0xc92   :  { %v5840_v18 = vsel %vm415_vm0, %v5832_v41, 0.0 }
 0xc93   :  { %5841 = vadd.xlane.f32.xlu0 %v5840_v18  ;;  %v5829_v25 = vld [vmem:[#allocation3 + $0x10] sm:$0xff] }
 0xc94   :  { %v5833_v27 = vadd.f32 %v5829_v25, %v12345_v29 }
 0xc96   :  { %v5843_v20 = vsel %vm415_vm0, %v5833_v27, 0.0 }
 0xc97   :  { %5844 = vadd.xlane.f32.xlu0 %v5843_v20  ;;  %v5830_v57 = vld [vmem:[#allocation3 + $0x18] sm:$0xff] }
 0xc98   :  { %v5834_v36 = vadd.f32 %v5830_v57, %v12343_v1 }
 0xc9a   :  { %v5846_v46 = vsel %vm415_vm0, %v5834_v36, 0.0 }
 0xc9b   :  { %5847 = vadd.xlane.f32.xlu1 %v5846_v46  ;;  %v8400_v46 = vld [vmem:[%s13004_s26] ss:$0 sm:$0xff] }
 0xd18   :  { %v5839_v62 = vpop.xlane.xlu1 %5838 }
 0xd19   :  { %v5849_v12 = vmul.f32 0.03125, %v5839_v62 }
 0xd1b   :  { %v5853_v31 = vsub.f32 %v5831_v32, %v5849_v12 }
 0xd1d   :  { %v5857_v35 = vmul.f32 %v5853_v31, %v5853_v31 }
 0xd1f   :  { %v5861_v37 = vsel %vm415_vm0, %v5857_v35, 0.0 }
 0xd20   :  { %5862 = vadd.xlane.f32.xlu0 %v5861_v37  ;;  %v5842_v21 = vpop.xlane.xlu0 %5841 }
 0xd21   :  { %v5850_v45 = vmul.f32 0.03125, %v5842_v21 }
 0xd23   :  { %v5854_v50 = vsub.f32 %v5832_v41, %v5850_v45 }
 0xd24   :  { %v5845_v29 = vpop.xlane.xlu0 %5844 }
 0xd25   :  { %v5851_v13 = vmul.f32 0.03125, %v5845_v29  ;;  %v5858_v23 = vmul.f32 %v5854_v50, %v5854_v50 }
 0xd27   :  { %v5855_v19 = vsub.f32 %v5833_v27, %v5851_v13  ;;  %v5864_v63 = vsel %vm415_vm0, %v5858_v23, 0.0 }
 0xd28   :  { %5865 = vadd.xlane.f32.xlu1 %v5864_v63  ;;  %v5848_v1 = vpop.xlane.xlu1 %5847 }
 0xd29   :  { %v5852_v15 = vmul.f32 0.03125, %v5848_v1  ;;  %v5859_v7 = vmul.f32 %v5855_v19, %v5855_v19 }
 0xd2b   :  { %v5856_v39 = vsub.f32 %v5834_v36, %v5852_v15  ;;  %v5867_v11 = vsel %vm415_vm0, %v5859_v7, 0.0 }
 0xd2c   :  { %5868 = vadd.xlane.f32.xlu0 %v5867_v11 }
 0xd2d   :  { %v5860_v33 = vmul.f32 %v5856_v39, %v5856_v39 }
 0xd2f   :  { %v5870_v5 = vsel %vm415_vm0, %v5860_v33, 0.0 }
 0xd30   :  { %5871 = vadd.xlane.f32.xlu1 %v5870_v5 }
 0xdad   :  { %v5863_v6 = vpop.xlane.xlu0 %5862 }
 0xdae   :  { %v5873_v44 = vmul.f32 0.03125, %v5863_v6 }
 0xdb0   :  { %v5877_v47 = vadd.f32 1e-05, %v5873_v44 }
 0xdb2   :  { %10029 = vrsqrt.f32 %v5877_v47 }
 0xdb5   :  { %v5866_v40 = vpop.xlane.xlu1 %5865 }
 0xdb6   :  { %v5874_v9 = vmul.f32 0.03125, %v5866_v40 }
 0xdb8   :  { %v5878_v55 = vadd.f32 1e-05, %v5874_v9 }
 0xdb9   :  { %v5869_v4 = vpop.xlane.xlu0 %5868 }
 0xdba   :  { %10031 = vrsqrt.f32 %v5878_v55  ;;  %v5875_v8 = vmul.f32 0.03125, %v5869_v4  ;;  %v5910_v4 = vld [vmem:[%s13007_s20 + $0x8] sm:$0xff] }
 0xdbc   :  { %v10030_v24 = vpop.eup %10029  ;;  %v5879_v60 = vadd.f32 1e-05, %v5875_v8 }
 0xdbd   :  { %v5872_v59 = vpop.xlane.xlu1 %5871  ;;  %v5885_v26 = vmul.f32 %v10030_v24, %v5853_v31 }
 0xdbe   :  { %10033 = vrsqrt.f32 %v5879_v60  ;;  %v5876_v53 = vmul.f32 0.03125, %v5872_v59  ;;  %v5909_v60 = vld [vmem:[%s13007_s20] sm:$0xff] }
 0xdbf   :  { %v5895_v54 = vmul.f32 %v8398_v42, %v5885_v26 }
 0xdc0   :  { %v5880_v32 = vadd.f32 1e-05, %v5876_v53 }
 0xdc1   :  { %v12506_v49 = vadd.f32 %v8399_v38, %v5895_v54 }
 0xdc2   :  { %10035 = vrsqrt.f32 %v5880_v32 }
 0xdc3   :  { %8956 = vmatprep.mubr.msk.f32.mxu1 %vm415_vm0, %v12506_v49 }
 0xdc4   :  { %v10032_v10 = vpop.eup %10031 }
 0xdc5   :  { %v5886_v17 = vmul.f32 %v10032_v10, %v5854_v50 }
 0xdc7   :  { %v5896_v28 = vmul.f32 %v8398_v42, %v5886_v17  ;;  %v5911_v17 = vld [vmem:[%s13007_s20 + $0x10] sm:$0xff] }
 0xdc8   :  { %v10034_v61 = vpop.eup %10033 }
 0xdc9   :  { %v12510_v3 = vadd.f32 %v8399_v38, %v5896_v28  ;;  %v5887_v41 = vmul.f32 %v10034_v61, %v5855_v19 }
 0xdcb   :  { %8957 = vmatmul.mubr.msk.f32.vlgmr.msra.gmra.mrb[42].mxu1 %vm415_vm0, %v12510_v3  ;;  %v5897_v18 = vmul.f32 %v8398_v42, %v5887_v41 }
 0xdcc   :  { %v10036_v25 = vpop.eup %10035 }
 0xdcd   :  { %v12514_v27 = vadd.f32 %v8399_v38, %v5897_v18  ;;  %v5888_v20 = vmul.f32 %v10036_v25, %v5856_v39 }
 0xdcf   :  { %8959 = vmatprep.mubr.msk.f32.mxu1 %vm415_vm0, %v12514_v27  ;;  %v5898_v57 = vmul.f32 %v8398_v42, %v5888_v20 }
 0xdd1   :  { %v12518_v36 = vadd.f32 %v8399_v38, %v5898_v57  ;;  %v5912_v38 = vld [vmem:[%s13007_s20 + $0x18] sm:$0xff] }
 0xdd3   :  { %8960 = vmatmul.mubr.msk.f32.gmra.mrb[48].mxu1 %vm415_vm0, %v12518_v36 }
 0xe9e   :  { %v8958_v62 = vpop.f32.mrb[42].mxu1 }
 0xe9f   :  { %v6008_v12 = vadd.f32 %v8958_v62, %v8400_v46  ;;  %v6002_v31 = vpop.f32.mrb[43].mxu1 }
 0xea0   :  { %v6003_v35 = vadd.f32 %v8400_v46, %v6002_v31 }
 0xea2   :  { %8970 = vmatprep.mubr.msk.f32.mxu0 %vm1826_vm9, %v6003_v35  ;;  %v12524_v37 = vpack.i.bf16 %v6008_v12, %v6003_v35 }
 0xea4   :  { %9650 = vrot.lane.b32.xlu0 %v12524_v37, %s10707_s3 }
 0xea6   :  { %v8961_v21 = vpop.f32.mrb[48].mxu1 }
 0xea7   :  { %v6018_v45 = vadd.f32 %v8961_v21, %v8400_v46  ;;  %v6012_v50 = vpop.f32.mrb[49].mxu1 }
 0xea8   :  { %v6013_v29 = vadd.f32 %v8400_v46, %v6012_v50 }
 0xeaa   :  { %v12528_v13 = vpack.i.bf16 %v6018_v45, %v6013_v29 }
 0xeac   :  { %9665 = vrot.lane.b32.xlu0 %v12528_v13, %s10709_s24  ;;  %9655 = vrot.lane.b32.xlu1 %v12528_v13, %s10707_s3 }
 0xeb0   :  { %6407 = vrot.lane.b32.xlu0 %v6008_v12, %s10710_s19  ;;  %9660 = vrot.lane.b32.xlu1 %v12524_v37, %s10709_s24 }
 0xeb4   :  { %6411 = vrot.lane.b32.xlu0 %v6018_v45, %s10710_s19  ;;  %6405 = vrot.lane.b32.xlu1 %v6003_v35, %s10710_s19 }
 0xeb8   :  { %6409 = vrot.lane.b32.xlu1 %v6013_v29, %s10710_s19 }
 0xf16   :  { %v9651_v23 = vpop.permute.xlu0 %9650 }
 0xf17   :  { %v9653_v19 = vunpack.i.h.bf16 %v9651_v23  ;;  %v9652_v63 = vunpack.i.l.bf16 %v9651_v23 }
 0xf19   :  { %v9264_v15 = vpack.c.bf16 %v9653_v19, %v9652_v63 }
 0xf1b   :  { %9266 = vmatprep.subr.msk.bf16.mxu0 %vm12536_vm15, %v9264_v15 }
 0xf1c   :  { %9269 = vmatpush3.bf16.xpose.msk.msra.mxu0 %vm12536_vm15, %v9264_v15 }
 0xf1e   :  { %v9656_v7 = vpop.permute.xlu1 %9655  ;;  %v9666_v48 = vpop.permute.xlu0 %9665 }
 0xf1f   :  { %v9658_v39 = vunpack.i.h.bf16 %v9656_v7  ;;  %v9657_v11 = vunpack.i.l.bf16 %v9656_v7  ;;  %v9668_v52 = vunpack.i.h.bf16 %v9666_v48  ;;  %v9667_v43 = vunpack.i.l.bf16 %v9666_v48 }
 0xf21   :  { %v9270_v33 = vpack.c.bf16 %v9658_v39, %v9657_v11  ;;  %v9294_v6 = vpack.c.bf16 %v9668_v52, %v9667_v43 }
 0xf22   :  { %v9661_v5 = vpop.permute.xlu1 %9660  ;;  %v6408_v47 = vpop.permute.xlu0 %6407 }
 0xf23   :  { %v9663_v22 = vunpack.i.h.bf16 %v9661_v5  ;;  %v9662_v34 = vunpack.i.l.bf16 %v9661_v5  ;;  %9272 = vmatprep.subr.msk.bf16.mxu0 %vm12536_vm15, %v9270_v33 }
 0xf24   :  { %9275 = vmatpush3.bf16.xpose.msk.msra.mxu0 %vm12536_vm15, %v9270_v33 }
 0xf25   :  { %v9288_v14 = vpack.c.bf16 %v9663_v22, %v9662_v34 }
 0xf26   :  { %v6406_v44 = vpop.permute.xlu1 %6405  ;;  %v6412_v9 = vpop.permute.xlu0 %6411 }
 0xf27   :  { %9290 = vmatprep.subr.msk.bf16.mxu0 %vm12536_vm15, %v9288_v14 }
 0xf2a   :  { %v6410_v40 = vpop.permute.xlu1 %6409 }
 0xf2b   :  { %8971 = vmatmul.mubr.msk.f32.vlgmr.msra.gmra.mrb[66].mxu0 %vm1826_vm9, %v6008_v12 }
 0xf2c   :  { %8973 = vmatprep.mubr.msk.f32.mxu0 %vm1826_vm9, %v6013_v29  ;;  %9293 = vmatpush3.bf16.xpose.msk.msra.mxu0 %vm12536_vm15, %v9288_v14 }
 0xf2d   :  { %9296 = vmatprep.subr.msk.bf16.mxu0 %vm12536_vm15, %v9294_v6 }
 0xf2f   :  { %8974 = vmatmul.mubr.msk.f32.gmra.mrb[72].mxu0 %vm1826_vm9, %v6018_v45 }
 0xf30   :  { %9008 = vmatprep.mubr.msk.f32.mxu0 %vm1826_vm9, %v6406_v44 }
 0xf34   :  { %9299 = vmatpush3.bf16.xpose.msk.msra.mxu0 %vm12536_vm15, %v9294_v6 }
 0xf3b   :  { %9009 = vmatmul.mubr.msk.f32.vlgmr.msra.gmra.mrb[74].mxu0 %vm1826_vm9, %v6408_v47 }
 0xf3c   :  { %9011 = vmatprep.mubr.msk.f32.mxu0 %vm1826_vm9, %v6410_v40 }
 0xf3f   :  { %9012 = vmatmul.mubr.msk.f32.gmra.mrb[76].mxu0 %vm1826_vm9, %v6412_v9 }
 0xffe   :  { %v8972_v55 = vpop.f32.mrb[66].mxu0 }
 0xfff   :  { %v6136_v8 = vmul.f32 0.25, %v8972_v55  ;;  %v6116_v24 = vpop.f32.mrb[67].mxu0 }
0x1000   :  { %v6135_v42 = vmul.f32 0.25, %v6116_v24 }
0x1001   :  { %v6140_v59 = vadd.f32 %v6136_v8, %v5910_v4 }
0x1002   :  { %v8975_v26 = vpop.f32.mrb[72].mxu0  ;;  %v6139_v53 = vadd.f32 %v6135_v42, %v5909_v60 }
0x1003   :  { %v6138_v54 = vmul.f32 0.25, %v8975_v26  ;;  %v6126_v32 = vpop.f32.mrb[73].mxu0  ;;  %v6146_v10 = vsel %vm415_vm0, %v6140_v59, -inf }
0x1004   :  { %v6137_v28 = vmul.f32 0.25, %v6126_v32  ;;  %6147 = vmax.xlane.f32.xlu0 %v6146_v10  ;;  %v6143_v61 = vsel %vm415_vm0, %v6139_v53, -inf }
0x1005   :  { %6144 = vmax.xlane.f32.xlu1 %v6143_v61  ;;  %v6142_v41 = vadd.f32 %v6138_v54, %v5912_v38 }
0x1006   :  { %v6141_v18 = vadd.f32 %v6137_v28, %v5911_v17 }
0x1007   :  { %v6152_v25 = vsel %vm415_vm0, %v6142_v41, -inf }
0x1008   :  { %v6149_v20 = vsel %vm415_vm0, %v6141_v18, -inf }
0x1009   :  { %6153 = vmax.xlane.f32.xlu1 %v6152_v25  ;;  %6150 = vmax.xlane.f32.xlu0 %v6149_v20 }
0x100e   :  { %v9010_v57 = vpop.f32.mrb[74].mxu0 }
0x100f   :  { %v6523_v46 = vmul.f32 0.25, %v9010_v57  ;;  %v6503_v62 = vpop.f32.mrb[75].mxu0 }
0x1010   :  { %v6522_v12 = vmul.f32 0.25, %v6503_v62 }
0x1011   :  { %v12571_v31 = vadd.f32 %v6523_v46, %v5910_v4 }
0x1012   :  { %v9013_v35 = vpop.f32.mrb[76].mxu0  ;;  %v12573_v21 = vadd.f32 %v6522_v12, %v5909_v60 }
0x1013   :  { %v6525_v45 = vmul.f32 0.25, %v9013_v35  ;;  %v6513_v50 = vpop.f32.mrb[77].mxu0  ;;  %v6533_v8 = vsel %vm415_vm0, %v12571_v31, -inf }
0x1014   :  { %v6524_v29 = vmul.f32 0.25, %v6513_v50  ;;  %v6530_v4 = vsel %vm415_vm0, %v12573_v21, -inf }
0x1015   :  { %v12575_v23 = vadd.f32 %v6525_v45, %v5912_v38 }
0x1016   :  { %v12577_v19 = vadd.f32 %v6524_v29, %v5911_v17 }
0x1017   :  { %v6539_v24 = vsel %vm415_vm0, %v12575_v23, -inf }
0x1018   :  { %v6536_v60 = vsel %vm415_vm0, %v12577_v19, -inf }
0x1091   :  { %v6148_v63 = vpop.xlane.xlu0 %6147 }
0x1092   :  { %v6156_v1 = vsub.f32 %v6140_v59, %v6148_v63  ;;  %v6145_v15 = vpop.xlane.xlu1 %6144 }
0x1093   :  { %v6155_v7 = vsub.f32 %v6139_v53, %v6145_v15 }
0x1094   :  { %v6161_v39 = vmul.f32 1.442695, %v6156_v1 }
0x1095   :  { %v6159_v11 = vmul.f32 1.442695, %v6155_v7 }
0x1096   :  { %10037 = vpow2.f32 %v6161_v39  ;;  %v6154_v33 = vpop.xlane.xlu1 %6153  ;;  %v6151_v5 = vpop.xlane.xlu0 %6150 }
0x1097   :  { %10039 = vpow2.f32 %v6159_v11  ;;  %v6158_v22 = vsub.f32 %v6142_v41, %v6154_v33  ;;  %v6157_v34 = vsub.f32 %v6141_v18, %v6151_v5 }
0x1099   :  { %v6165_v48 = vmul.f32 1.442695, %v6158_v22  ;;  %v6163_v14 = vmul.f32 1.442695, %v6157_v34 }
0x109b   :  { %10041 = vpow2.f32 %v6165_v48 }
0x109c   :  { %10043 = vpow2.f32 %v6163_v14 }
0x10a0   :  { %v10038_v52 = vpop.eup %10037 }
0x10a1   :  { %v10040_v43 = vpop.eup %10039  ;;  %v6170_v6 = vsel %vm415_vm0, %v10038_v52, 0.0 }
0x10a2   :  { %6171 = vadd.xlane.f32.xlu1 %v6170_v6  ;;  %v6167_v44 = vsel %vm415_vm0, %v10040_v43, 0.0  ;;  %v6297_v6 = vld [vmem:[#allocation18 + $0x8] sm:$0xff] }
0x10a3   :  { %6168 = vadd.xlane.f32.xlu0 %v6167_v44 }
0x10a5   :  { %v10042_v47 = vpop.eup %10041 }
0x10a6   :  { %v10044_v40 = vpop.eup %10043  ;;  %v6176_v9 = vsel %vm415_vm0, %v10042_v47, 0.0 }
0x10a7   :  { %6177 = vadd.xlane.f32.xlu1 %v6176_v9  ;;  %v6173_v55 = vsel %vm415_vm0, %v10044_v40, 0.0 }
0x10a8   :  { %6174 = vadd.xlane.f32.xlu0 %v6173_v55 }
0x10b8   :  { %9675 = vrot.lane.b32.xlu1 %v12528_v13, %s10706_s30 }
0x10be   :  { %9670 = vrot.lane.b32.xlu0 %v12524_v37, %s10706_s30 }
0x10dc   :  { %6531 = vmax.xlane.f32.xlu1 %v6530_v4 }
0x10dd   :  { %6534 = vmax.xlane.f32.xlu0 %v6533_v8 }
0x10e0   :  { %6540 = vmax.xlane.f32.xlu1 %v6539_v24 }
0x10e1   :  { %6537 = vmax.xlane.f32.xlu0 %v6536_v60 }
0x112f   :  { %v6172_v42 = vpop.xlane.xlu1 %6171 }
0x1130   :  { %v6169_v59 = vpop.xlane.xlu0 %6168 }
0x1131   :  { %10045 = vrcp.f32 %v6169_v59 }
0x1132   :  { %10047 = vrcp.f32 %v6172_v42 }
0x1134   :  { %v6178_v26 = vpop.xlane.xlu1 %6177 }
0x1135   :  { %v6175_v53 = vpop.xlane.xlu0 %6174 }
0x1136   :  { %10049 = vrcp.f32 %v6175_v53  ;;  %v6684_v53 = vld [vmem:[#allocation18 + $0x10] sm:$0xff] }
0x1137   :  { %10051 = vrcp.f32 %v6178_v26 }
0x1138   :  { %v9676_v38 = vpop.permute.xlu1 %9675 }
0x1139   :  { %v9671_v54 = vpop.permute.xlu0 %9670  ;;  %v9678_v32 = vunpack.i.h.bf16 %v9676_v38  ;;  %v9677_v10 = vunpack.i.l.bf16 %v9676_v38  ;;  %v6685_v38 = vld [vmem:[#allocation18 + $0x18] sm:$0xff] }
0x113a   :  { %v9673_v17 = vunpack.i.h.bf16 %v9671_v54  ;;  %v9672_v28 = vunpack.i.l.bf16 %v9671_v54 }
0x113b   :  { %v10046_v61 = vpop.eup %10045  ;;  %v9280_v25 = vpack.c.bf16 %v9678_v32, %v9677_v10 }
0x113c   :  { %v9276_v41 = vpack.c.bf16 %v9673_v17, %v9672_v28  ;;  %v6183_v18 = vmul.f32 %v10046_v61, %v10040_v43  ;;  %v10048_v20 = vpop.eup %10047  ;;  %v9308_v28 = vpack.c.bf16 %v6685_v38, %v6684_v53  ;;  %v6867_v53 = vld [vmem:[%s13009_s1 + $0x10] sm:$0xff] }
0x113d   :  { %v6184_v46 = vmul.f32 %v10048_v20, %v10038_v52 }
0x113e   :  { %9277 = vmatprep.subr.bf16.mxu1 %v9276_v41  ;;  %8984 = vmatprep.mubr.msk.f32.mxu1 %vm415_vm0, %v6183_v18 }
0x113f   :  { %9279 = vmatpush3.bf16.msra.mxu1 %v9276_v41 }
0x1140   :  { %9281 = vmatprep.subr.bf16.mxu1 %v9280_v25  ;;  %v10050_v57 = vpop.eup %10049 }
0x1141   :  { %v10052_v62 = vpop.eup %10051  ;;  %v6185_v12 = vmul.f32 %v10050_v57, %v10044_v40 }
0x1142   :  { %v6186_v35 = vmul.f32 %v10052_v62, %v10042_v47 }
0x1143   :  { %9283 = vmatpush3.bf16.msra.mxu1 %v9280_v25 }
0x1146   :  { %8985 = vmatmul.mubr.msk.f32.vlgmr.msra.gmra.mrb[50].mxu1 %vm415_vm0, %v6184_v46 }
0x1147   :  { %8987 = vmatprep.mubr.msk.f32.mxu1 %vm415_vm0, %v6185_v12 }
0x114a   :  { %8988 = vmatmul.mubr.msk.f32.gmra.mrb[52].mxu1 %vm415_vm0, %v6186_v35 }
0x1169   :  { %v6532_v45 = vpop.xlane.xlu1 %6531 }
0x116a   :  { %v6542_v50 = vsub.f32 %v12573_v21, %v6532_v45  ;;  %v6535_v29 = vpop.xlane.xlu0 %6534 }
0x116b   :  { %v6543_v63 = vsub.f32 %v12571_v31, %v6535_v29 }
0x116c   :  { %v6546_v1 = vmul.f32 1.442695, %v6542_v50  ;;  %v8421_v50 = vld [vmem:[%s13008_s29] ss:$0 sm:$0xff] }
0x116d   :  { %v6548_v15 = vmul.f32 1.442695, %v6543_v63  ;;  %v6541_v7 = vpop.xlane.xlu1 %6540 }
0x116e   :  { %10053 = vpow2.f32 %v6546_v1  ;;  %v6545_v39 = vsub.f32 %v12575_v23, %v6541_v7  ;;  %v6538_v11 = vpop.xlane.xlu0 %6537 }
0x116f   :  { %10055 = vpow2.f32 %v6548_v15  ;;  %v6544_v33 = vsub.f32 %v12577_v19, %v6538_v11  ;;  %v6296_v19 = vld [vmem:[#allocation18] sm:$0xff] }
0x1170   :  { %v6552_v5 = vmul.f32 1.442695, %v6545_v39  ;;  %v9284_v44 = vpack.c.bf16 %v6297_v6, %v6296_v19 }
0x1171   :  { %v6550_v22 = vmul.f32 1.442695, %v6544_v33 }
0x1172   :  { %10057 = vpow2.f32 %v6552_v5  ;;  %9285 = vmatprep.subr.bf16.mxu1 %v9284_v44 }
0x1173   :  { %10059 = vpow2.f32 %v6550_v22  ;;  %9287 = vmatpush3.bf16.msra.mxu1 %v9284_v44 }
0x1178   :  { %v10054_v34 = vpop.eup %10053 }
0x1179   :  { %v10056_v48 = vpop.eup %10055  ;;  %v6554_v21 = vsel %vm415_vm0, %v10054_v34, 0.0 }
0x117a   :  { %6555 = vadd.xlane.f32.xlu0 %v6554_v21  ;;  %v6557_v31 = vsel %vm415_vm0, %v10056_v48, 0.0 }
0x117b   :  { %6558 = vadd.xlane.f32.xlu1 %v6557_v31 }
0x117c   :  { %v10058_v14 = vpop.eup %10057 }
0x117d   :  { %v10060_v52 = vpop.eup %10059  ;;  %v6563_v23 = vsel %vm415_vm0, %v10058_v14, 0.0 }
0x117e   :  { %v6560_v43 = vsel %vm415_vm0, %v10060_v52, 0.0 }
0x117f   :  { %6564 = vadd.xlane.f32.xlu1 %v6563_v23  ;;  %6561 = vadd.xlane.f32.xlu0 %v6560_v43 }
0x1190   :  { %9685 = vrot.lane.b32.xlu1 %v12528_v13, %s10711_s28 }
0x1195   :  { %9680 = vrot.lane.b32.xlu0 %v12524_v37, %s10711_s28 }
0x1207   :  { %v6556_v47 = vpop.xlane.xlu0 %6555 }
0x1208   :  { %v6559_v40 = vpop.xlane.xlu1 %6558  ;;  %10061 = vrcp.f32 %v6556_v47 }
0x1209   :  { %10063 = vrcp.f32 %v6559_v40 }
0x120c   :  { %v6562_v9 = vpop.xlane.xlu0 %6561  ;;  %v6565_v55 = vpop.xlane.xlu1 %6564 }
0x120d   :  { %10065 = vrcp.f32 %v6562_v9 }
0x120e   :  { %10067 = vrcp.f32 %v6565_v55 }
0x1210   :  { %v9681_v4 = vpop.permute.xlu0 %9680  ;;  %v9686_v42 = vpop.permute.xlu1 %9685 }
0x1211   :  { %v9683_v8 = vunpack.i.h.bf16 %v9681_v4  ;;  %v9682_v24 = vunpack.i.l.bf16 %v9681_v4  ;;  %v9688_v13 = vunpack.i.h.bf16 %v9686_v42  ;;  %v9687_v59 = vunpack.i.l.bf16 %v9686_v42 }
0x1212   :  { %v10062_v54 = vpop.eup %10061 }
0x1213   :  { %v9300_v60 = vpack.c.bf16 %v9683_v8, %v9682_v24  ;;  %v9304_v32 = vpack.c.bf16 %v9688_v13, %v9687_v59  ;;  %v10064_v61 = vpop.eup %10063  ;;  %v6570_v41 = vmul.f32 %v10062_v54, %v10054_v34  ;;  %v6868_v54 = vld [vmem:[%s13009_s1 + $0x18] sm:$0xff] }
0x1214   :  { %v6571_v25 = vmul.f32 %v10064_v61, %v10056_v48 }
0x1215   :  { %9301 = vmatprep.subr.bf16.mxu1 %v9300_v60 }
0x1217   :  { %v10066_v18 = vpop.eup %10065 }
0x1218   :  { %v10068_v20 = vpop.eup %10067  ;;  %v6572_v57 = vmul.f32 %v10066_v18, %v10060_v52 }
0x1219   :  { %v8986_v37 = vpop.f32.mrb[50].mxu1  ;;  %v6573_v46 = vmul.f32 %v10068_v20, %v10058_v14 }
0x121a   :  { %v6277_v26 = vpop.f32.mrb[51].mxu1 }
0x121b   :  { %8994 = vmatprep.mubr.msk.f32.mxu1 %vm1826_vm9, %v6277_v26  ;;  %v6866_v26 = vld [vmem:[%s13009_s1 + $0x8] sm:$0xff] }
0x121c   :  { %8995 = vmatmul.mubr.msk.f32.vlgmr.msra.gmra.mrb[54].mxu1 %vm1826_vm9, %v8986_v37  ;;  %v6865_v37 = vld [vmem:[%s13009_s1] sm:$0xff] }
0x121d   :  { %9303 = vmatpush3.bf16.msra.mxu1 %v9300_v60  ;;  %v8989_v10 = vpop.f32.mrb[52].mxu1  ;;  %v9312_v38 = vpack.c.bf16 %v6866_v26, %v6865_v37  ;;  %v7095_v37 = vld [vmem:[%s13010_s12 + $0x70] sm:$0xff]  ;;  %v7096_v26 = vld [vmem:[%s13010_s12 + $0x78] sm:$0xff] }
0x121e   :  { %9305 = vmatprep.subr.bf16.mxu1 %v9304_v32  ;;  %v6287_v17 = vpop.f32.mrb[53].mxu1 }
0x121f   :  { %8997 = vmatprep.mubr.msk.f32.mxu1 %vm1826_vm9, %v6287_v17  ;;  %9313 = vmatprep.subr.bf16.mxu0 %v9312_v38 }
0x1220   :  { %8998 = vmatmul.mubr.msk.f32.gmra.mrb[56].mxu1 %vm1826_vm9, %v8989_v10  ;;  %9315 = vmatpush3.bf16.msra.mxu0 %v9312_v38  ;;  %v8440_v38 = vld [vmem:[#allocation22] ss:$0 sm:$0xff] }
0x1221   :  { %9307 = vmatpush3.bf16.msra.mxu1 %v9304_v32  ;;  %9022 = vmatprep.mubr.msk.f32.mxu1 %vm415_vm0, %v6570_v41  ;;  %v9316_v32 = vpack.c.bf16 %v6868_v54, %v6867_v53  ;;  %v9348_v53 = vpack.c.bf16 %v7096_v26, %v7095_v37 }
0x1222   :  { %9309 = vmatprep.subr.bf16.mxu1 %v9308_v28 }
0x1223   :  { %9317 = vmatprep.subr.bf16.mxu0 %v9316_v32 }
0x1224   :  { %9023 = vmatmul.mubr.msk.f32.vlgmr.msra.gmra.mrb[58].mxu1 %vm415_vm0, %v6571_v25  ;;  %9319 = vmatpush3.bf16.msra.mxu0 %v9316_v32 }
0x1225   :  { %9025 = vmatprep.mubr.msk.f32.mxu1 %vm415_vm0, %v6572_v57  ;;  %9311 = vmatpush3.bf16.msra.mxu1 %v9308_v28 }
0x1228   :  { %9026 = vmatmul.mubr.msk.f32.gmra.mrb[60].mxu1 %vm415_vm0, %v6573_v46 }
0x12f7   :  { %v9024_v62 = vpop.f32.mrb[58].mxu1 }
0x12f8   :  { %v6664_v12 = vpop.f32.mrb[59].mxu1 }
0x12f9   :  { %9032 = vmatprep.mubr.msk.f32.mxu1 %vm1826_vm9, %v6664_v12 }
0x12fa   :  { %9033 = vmatmul.mubr.msk.f32.vlgmr.msra.gmra.mrb[54].mxu1 %vm1826_vm9, %v9024_v62 }
0x12fb   :  { %v9027_v35 = vpop.f32.mrb[60].mxu1 }
0x12fc   :  { %v6674_v45 = vpop.f32.mrb[61].mxu1 }
0x12fd   :  { %9035 = vmatprep.mubr.msk.f32.mxu1 %vm1826_vm9, %v6674_v45  ;;  %v8438_v45 = vld [vmem:[#allocation19] ss:$0 sm:$0xff] }
0x12fe   :  { %9036 = vmatmul.mubr.msk.f32.gmra.mrb[56].mxu1 %vm1826_vm9, %v9027_v35 }
0x13cd   :  { %v9034_v29 = vpop.f32.mrb[54].mxu1 }
0x13ce   :  { %v9387_v63 = vadd.f32 %v9034_v29, %v8421_v50  ;;  %v6764_v1 = vpop.f32.mrb[55].mxu1 }
0x13cf   :  { %v9388_v15 = vadd.f32 %v8421_v50, %v6764_v1  ;;  %v8439_v1 = vld [vmem:[#allocation21] ss:$0 sm:$0xff] }
0x13d0   :  { %v6788_v7 = vadd.f32 %v9387_v63, %v12510_v3 }
0x13d1   :  { %v9037_v39 = vpop.f32.mrb[56].mxu1  ;;  %v6787_v11 = vadd.f32 %v9388_v15, %v12506_v49 }
0x13d2   :  { %v9389_v33 = vadd.f32 %v9037_v39, %v8421_v50  ;;  %v6774_v5 = vpop.f32.mrb[57].mxu1  ;;  %v6796_v22 = vsel %vm415_vm0, %v6788_v7, 0.0 }
0x13d3   :  { %v9390_v34 = vadd.f32 %v8421_v50, %v6774_v5  ;;  %6797 = vadd.xlane.f32.xlu0 %v6796_v22  ;;  %v6793_v48 = vsel %vm415_vm0, %v6787_v11, 0.0 }
0x13d4   :  { %6794 = vadd.xlane.f32.xlu1 %v6793_v48  ;;  %v6790_v21 = vadd.f32 %v9389_v33, %v12518_v36 }
0x13d5   :  { %v6789_v31 = vadd.f32 %v9390_v34, %v12514_v27 }
0x13d6   :  { %v6802_v14 = vsel %vm415_vm0, %v6790_v21, 0.0 }
0x13d7   :  { %v6799_v3 = vsel %vm415_vm0, %v6789_v31, 0.0 }
0x13d8   :  { %6803 = vadd.xlane.f32.xlu1 %v6802_v14  ;;  %6800 = vadd.xlane.f32.xlu0 %v6799_v3  ;;  %v7081_v3 = vld [vmem:[%s13010_s12] sm:$0xff] }
0x1460   :  { %v6798_v49 = vpop.xlane.xlu0 %6797 }
0x1461   :  { %v6806_v52 = vmul.f32 0.03125, %v6798_v49  ;;  %v6795_v23 = vpop.xlane.xlu1 %6794  ;;  %v7082_v49 = vld [vmem:[%s13010_s12 + $0x8] sm:$0xff] }
0x1462   :  { %v6805_v43 = vmul.f32 0.03125, %v6795_v23  ;;  %v7083_v23 = vld [vmem:[%s13010_s12 + $0x10] sm:$0xff] }
0x1463   :  { %v6810_v19 = vsub.f32 %v6788_v7, %v6806_v52  ;;  %v9320_v52 = vpack.c.bf16 %v7082_v49, %v7081_v3 }
0x1464   :  { %v6809_v6 = vsub.f32 %v6787_v11, %v6805_v43  ;;  %v7084_v43 = vld [vmem:[%s13010_s12 + $0x18] sm:$0xff] }
0x1465   :  { %v6804_v44 = vpop.xlane.xlu1 %6803  ;;  %v6801_v47 = vpop.xlane.xlu0 %6800  ;;  %v6814_v40 = vmul.f32 %v6810_v19, %v6810_v19  ;;  %9321 = vmatprep.subr.bf16.mxu1 %v9320_v52 }
0x1466   :  { %v6808_v9 = vmul.f32 0.03125, %v6804_v44  ;;  %v6807_v36 = vmul.f32 0.03125, %v6801_v47  ;;  %v6813_v27 = vmul.f32 %v6809_v6, %v6809_v6  ;;  %v7086_v44 = vld [vmem:[%s13010_s12 + $0x28] sm:$0xff]  ;;  %9323 = vmatpush3.bf16.msra.mxu1 %v9320_v52 }
0x1467   :  { %v6820_v55 = vsel %vm415_vm0, %v6814_v40, 0.0  ;;  %v7087_v40 = vld [vmem:[%s13010_s12 + $0x30] sm:$0xff] }
0x1468   :  { %v6812_v4 = vsub.f32 %v6790_v21, %v6808_v9  ;;  %v6811_v8 = vsub.f32 %v6789_v31, %v6807_v36  ;;  %6821 = vadd.xlane.f32.xlu1 %v6820_v55  ;;  %v6817_v24 = vsel %vm415_vm0, %v6813_v27, 0.0  ;;  %v7088_v9 = vld [vmem:[%s13010_s12 + $0x38] sm:$0xff]  ;;  %v7089_v27 = vld [vmem:[%s13010_s12 + $0x40] sm:$0xff]  ;;  %v7090_v55 = vld [vmem:[%s13010_s12 + $0x48] sm:$0xff] }
0x1469   :  { %6818 = vadd.xlane.f32.xlu0 %v6817_v24  ;;  %v9332_v36 = vpack.c.bf16 %v7088_v9, %v7087_v40  ;;  %v7092_v24 = vld [vmem:[%s13010_s12 + $0x58] sm:$0xff] }
0x146a   :  { %v6816_v60 = vmul.f32 %v6812_v4, %v6812_v4  ;;  %v6815_v42 = vmul.f32 %v6811_v8, %v6811_v8 }
0x146c   :  { %v6826_v13 = vsel %vm415_vm0, %v6816_v60, 0.0  ;;  %v6823_v59 = vsel %vm415_vm0, %v6815_v42, 0.0  ;;  %v7093_v42 = vld [vmem:[%s13010_s12 + $0x60] sm:$0xff] }
0x146d   :  { %6827 = vadd.xlane.f32.xlu1 %v6826_v13  ;;  %6824 = vadd.xlane.f32.xlu0 %v6823_v59  ;;  %v7094_v13 = vld [vmem:[%s13010_s12 + $0x68] sm:$0xff] }
0x146e   :  { %v9344_v59 = vpack.c.bf16 %v7094_v13, %v7093_v42 }
0x14f5   :  { %v6822_v10 = vpop.xlane.xlu1 %6821 }
0x14f6   :  { %v6830_v17 = vmul.f32 0.03125, %v6822_v10  ;;  %v6819_v28 = vpop.xlane.xlu0 %6818 }
0x14f7   :  { %v6829_v61 = vmul.f32 0.03125, %v6819_v28 }
0x14f8   :  { %v6834_v41 = vadd.f32 1e-05, %v6830_v17 }
0x14f9   :  { %v6833_v18 = vadd.f32 1e-05, %v6829_v61 }
0x14fa   :  { %10069 = vrsqrt.f32 %v6834_v41  ;;  %v6828_v25 = vpop.xlane.xlu1 %6827  ;;  %v6825_v20 = vpop.xlane.xlu0 %6824 }
0x14fb   :  { %10071 = vrsqrt.f32 %v6833_v18  ;;  %v6832_v57 = vmul.f32 0.03125, %v6828_v25  ;;  %v6831_v46 = vmul.f32 0.03125, %v6825_v20 }
0x14fd   :  { %v6836_v62 = vadd.f32 1e-05, %v6832_v57  ;;  %v6835_v12 = vadd.f32 1e-05, %v6831_v46 }
0x14ff   :  { %10073 = vrsqrt.f32 %v6836_v62 }
0x1500   :  { %10075 = vrsqrt.f32 %v6835_v12 }
0x1504   :  { %v10070_v35 = vpop.eup %10069 }
0x1505   :  { %v10072_v50 = vpop.eup %10071  ;;  %v6842_v29 = vmul.f32 %v10070_v35, %v6810_v19  ;;  %v7085_v19 = vld [vmem:[%s13010_s12 + $0x20] sm:$0xff] }
0x1506   :  { %v6841_v63 = vmul.f32 %v10072_v50, %v6809_v6  ;;  %v9324_v6 = vpack.c.bf16 %v7084_v43, %v7083_v23  ;;  %v9328_v47 = vpack.c.bf16 %v7086_v44, %v7085_v19 }
0x1507   :  { %v6852_v15 = vmul.f32 %v8438_v45, %v6842_v29 }
0x1508   :  { %v6851_v7 = vmul.f32 %v8438_v45, %v6841_v63  ;;  %9325 = vmatprep.subr.bf16.mxu1 %v9324_v6 }
0x1509   :  { %v10074_v39 = vpop.eup %10073  ;;  %v12640_v22 = vadd.f32 %v8439_v1, %v6852_v15  ;;  %9327 = vmatpush3.bf16.msra.mxu1 %v9324_v6 }
0x150a   :  { %v10076_v11 = vpop.eup %10075  ;;  %v12638_v33 = vadd.f32 %v8439_v1, %v6851_v7  ;;  %v6844_v5 = vmul.f32 %v10074_v39, %v6812_v4  ;;  %9329 = vmatprep.subr.bf16.mxu1 %v9328_v47  ;;  %v9336_v4 = vpack.c.bf16 %v7090_v55, %v7089_v27 }
0x150b   :  { %v6843_v34 = vmul.f32 %v10076_v11, %v6811_v8  ;;  %v7091_v8 = vld [vmem:[%s13010_s12 + $0x50] sm:$0xff] }
0x150c   :  { %9046 = vmatprep.mubr.msk.f32.mxu0 %vm415_vm0, %v12638_v33  ;;  %v6854_v48 = vmul.f32 %v8438_v45, %v6844_v5  ;;  %v9340_v60 = vpack.c.bf16 %v7092_v24, %v7091_v8 }
0x150d   :  { %9047 = vmatmul.mubr.msk.f32.vlgmr.msra.gmra.mrb[78].mxu0 %vm415_vm0, %v12640_v22  ;;  %v6853_v21 = vmul.f32 %v8438_v45, %v6843_v34  ;;  %9331 = vmatpush3.bf16.msra.mxu1 %v9328_v47 }
0x150e   :  { %v12646_v31 = vadd.f32 %v8439_v1, %v6854_v48  ;;  %9333 = vmatprep.subr.bf16.mxu1 %v9332_v36 }
0x150f   :  { %v12648_v14 = vadd.f32 %v8439_v1, %v6853_v21 }
0x1511   :  { %9049 = vmatprep.mubr.msk.f32.mxu0 %vm415_vm0, %v12648_v14  ;;  %9335 = vmatpush3.bf16.msra.mxu1 %v9332_v36 }
0x1512   :  { %9050 = vmatmul.mubr.msk.f32.gmra.mrb[80].mxu0 %vm415_vm0, %v12646_v31  ;;  %9337 = vmatprep.subr.bf16.mxu1 %v9336_v4 }
0x1515   :  { %9339 = vmatpush3.bf16.msra.mxu1 %v9336_v4 }
0x1516   :  { %9341 = vmatprep.subr.bf16.mxu1 %v9340_v60 }
0x1519   :  { %9343 = vmatpush3.bf16.msra.mxu1 %v9340_v60 }
0x151a   :  { %9345 = vmatprep.subr.bf16.mxu1 %v9344_v59 }
0x151d   :  { %9347 = vmatpush3.bf16.msra.mxu1 %v9344_v59 }
0x151e   :  { %9349 = vmatprep.subr.bf16.mxu1 %v9348_v53 }
0x1521   :  { %9351 = vmatpush3.bf16.msra.mxu1 %v9348_v53 }
0x1522   :  { %9374 = vmatprep.subr.bf16.mxu1 %v10704_v0 }
0x15e0   :  { %v9048_v54 = vpop.f32.mrb[78].mxu0 }
0x15e1   :  { %v12671_v32 = vadd.f32 %v9048_v54, %v8440_v38  ;;  %v6954_v10 = vpop.f32.mrb[79].mxu0 }
0x15e2   :  { %v12673_v17 = vadd.f32 %v8440_v38, %v6954_v10 }
0x15e3   :  { %v12676_v28 = vmul.f32 0.70710677, %v12671_v32 }
0x15e4   :  { %v12679_v61 = vmul.f32 0.70710677, %v12673_v17 }
0x15e5   :  { %v6982_v41 = vand.u32 2147483647, %v12676_v28  ;;  %v9051_v18 = vpop.f32.mrb[80].mxu0  ;;  %vm7062_vm2 = vcmp.ge.f32.partialorder %v12676_v28, 0.0 }
0x15e6   :  { %v6981_v25 = vand.u32 2147483647, %v12679_v61  ;;  %v12683_v20 = vadd.f32 %v9051_v18, %v8440_v38  ;;  %v6964_v57 = vpop.f32.mrb[81].mxu0  ;;  %vm7061_vm3 = vcmp.ge.f32.partialorder %v12679_v61, 0.0 }
0x15e7   :  { %v6986_v46 = vmul.f32 0.3275911, %v6982_v41  ;;  %v12685_v62 = vadd.f32 %v8440_v38, %v6964_v57  ;;  %v7038_v5 = vsub.f32 0.0, %v6982_v41 }
0x15e8   :  { %v6985_v12 = vmul.f32 0.3275911, %v6981_v25  ;;  %v12688_v35 = vmul.f32 0.70710677, %v12683_v20  ;;  %v7037_v34 = vsub.f32 0.0, %v6981_v25 }
0x15e9   :  { %v6990_v45 = vadd.f32 1.0, %v6986_v46  ;;  %v12691_v50 = vmul.f32 0.70710677, %v12685_v62  ;;  %v7042_v21 = vmul.f32 %v7038_v5, %v6982_v41 }
0x15ea   :  { %v6989_v29 = vadd.f32 1.0, %v6985_v12  ;;  %v6984_v63 = vand.u32 2147483647, %v12688_v35  ;;  %v7041_v52 = vmul.f32 %v7037_v34, %v6981_v25  ;;  %vm7064_vm5 = vcmp.ge.f32.partialorder %v12688_v35, 0.0 }
0x15eb   :  { %10077 = vrcp.f32 %v6990_v45  ;;  %v6983_v1 = vand.u32 2147483647, %v12691_v50  ;;  %v7047_v44 = vmul.f32 1.442695, %v7042_v21  ;;  %vm7063_vm6 = vcmp.ge.f32.partialorder %v12691_v50, 0.0 }
0x15ec   :  { %10079 = vrcp.f32 %v6989_v29  ;;  %v6988_v15 = vmul.f32 0.3275911, %v6984_v63  ;;  %v7040_v23 = vsub.f32 0.0, %v6984_v63  ;;  %v7045_v36 = vmul.f32 1.442695, %v7041_v52 }
0x15ed   :  { %v6987_v7 = vmul.f32 0.3275911, %v6983_v1  ;;  %v7039_v43 = vsub.f32 0.0, %v6983_v1  ;;  %v13011_v35 = vmov 0.0  }
0x15ee   :  { %v6992_v39 = vadd.f32 1.0, %v6988_v15  ;;  %v7044_v27 = vmul.f32 %v7040_v23, %v6984_v63 }
0x15ef   :  { %v6991_v11 = vadd.f32 1.0, %v6987_v7  ;;  %v7043_v4 = vmul.f32 %v7039_v43, %v6983_v1 }
0x15f0   :  { %10081 = vrcp.f32 %v6992_v39  ;;  %v7051_v26 = vmul.f32 1.442695, %v7044_v27 }
0x15f1   :  { %10083 = vrcp.f32 %v6991_v11  ;;  %v7049_v38 = vmul.f32 1.442695, %v7043_v4 }
0x15f2   :  { %10085 = vpow2.f32 %v7047_v44 }
0x15f3   :  { %10087 = vpow2.f32 %v7045_v36 }
0x15f4   :  { %10089 = vpow2.f32 %v7051_v26 }
0x15f5   :  { %v10078_v48 = vpop.eup %10077  ;;  %10091 = vpow2.f32 %v7049_v38 }
0x15f6   :  { %v10080_v3 = vpop.eup %10079  ;;  %v7002_v49 = vmul.f32 1.0614054, %v10078_v48 }
0x15f7   :  { %v7001_v19 = vmul.f32 1.0614054, %v10080_v3 }
0x15f8   :  { %v7006_v6 = vadd.f32 -1.4531521, %v7002_v49 }
0x15f9   :  { %v7005_v47 = vadd.f32 -1.4531521, %v7001_v19 }
0x15fa   :  { %v10082_v40 = vpop.eup %10081  ;;  %v7010_v9 = vmul.f32 %v10078_v48, %v7006_v6 }
0x15fb   :  { %v10084_v55 = vpop.eup %10083  ;;  %v7009_v8 = vmul.f32 %v10080_v3, %v7005_v47  ;;  %v7004_v24 = vmul.f32 1.0614054, %v10082_v40 }
0x15fc   :  { %v7014_v60 = vadd.f32 1.4214138, %v7010_v9  ;;  %v7003_v42 = vmul.f32 1.0614054, %v10084_v55  ;;  %v10086_v5 = vpop.eup %10085 }
0x15fd   :  { %v7013_v13 = vadd.f32 1.4214138, %v7009_v8  ;;  %v7008_v59 = vadd.f32 -1.4531521, %v7004_v24  ;;  %v10088_v49 = vpop.eup %10087 }
0x15fe   :  { %v7018_v37 = vmul.f32 %v10078_v48, %v7014_v60  ;;  %v7007_v53 = vadd.f32 -1.4531521, %v7003_v42  ;;  %v10090_v36 = vpop.eup %10089 }
0x15ff   :  { %v7017_v54 = vmul.f32 %v10080_v3, %v7013_v13  ;;  %v7012_v10 = vmul.f32 %v10082_v40, %v7008_v59  ;;  %v10092_v8 = vpop.eup %10091 }
0x1600   :  { %v7022_v41 = vadd.f32 -0.28449672, %v7018_v37  ;;  %v7011_v18 = vmul.f32 %v10084_v55, %v7007_v53  ;;  %v6973_v37 = vmul.f32 0.5, %v12673_v17 }
0x1601   :  { %v7021_v25 = vadd.f32 -0.28449672, %v7017_v54  ;;  %v7016_v57 = vadd.f32 1.4214138, %v7012_v10 }
0x1602   :  { %v7026_v46 = vmul.f32 %v10078_v48, %v7022_v41  ;;  %v7015_v12 = vadd.f32 1.4214138, %v7011_v18  ;;  %v6975_v18 = vmul.f32 0.5, %v12685_v62 }
0x1603   :  { %v7025_v45 = vmul.f32 %v10080_v3, %v7021_v25  ;;  %v7020_v29 = vmul.f32 %v10082_v40, %v7016_v57  ;;  %v6976_v25 = vmul.f32 0.5, %v12683_v20 }
0x1604   :  { %v7030_v63 = vadd.f32 0.2548296, %v7026_v46  ;;  %v7019_v1 = vmul.f32 %v10084_v55, %v7015_v12  ;;  %v8445_v46 = vld [vmem:[#allocation24] ss:$0 sm:$0xff] }
0x1605   :  { %v7029_v15 = vadd.f32 0.2548296, %v7025_v45  ;;  %v7024_v7 = vadd.f32 -0.28449672, %v7020_v29 }
0x1606   :  { %v7034_v39 = vmul.f32 %v10078_v48, %v7030_v63  ;;  %v7023_v11 = vadd.f32 -0.28449672, %v7019_v1 }
0x1607   :  { %v7033_v34 = vmul.f32 %v10080_v3, %v7029_v15  ;;  %v7028_v21 = vmul.f32 %v10082_v40, %v7024_v7 }
0x1608   :  { %v7054_v52 = vmul.f32 %v10086_v5, %v7034_v39  ;;  %v7027_v23 = vmul.f32 %v10084_v55, %v7023_v11 }
0x1609   :  { %v7053_v43 = vmul.f32 %v10088_v49, %v7033_v34  ;;  %v7032_v19 = vadd.f32 0.2548296, %v7028_v21 }
0x160a   :  { %v7058_v6 = vsub.f32 1.0, %v7054_v52  ;;  %v7031_v44 = vadd.f32 0.2548296, %v7027_v23 }
0x160b   :  { %v7057_v47 = vsub.f32 1.0, %v7053_v43  ;;  %v7036_v9 = vmul.f32 %v10082_v40, %v7032_v19  ;;  %v6974_v40 = vmul.f32 0.5, %v12671_v32 }
0x160c   :  { %v7066_v27 = vsub.f32 0.0, %v7058_v6  ;;  %v7035_v4 = vmul.f32 %v10084_v55, %v7031_v44 }
0x160d   :  { %v7065_v48 = vsub.f32 0.0, %v7057_v47  ;;  %v7056_v24 = vmul.f32 %v10090_v36, %v7036_v9 }
0x160e   :  { %v7070_v60 = vsel %vm7062_vm2, %v7058_v6, %v7066_v27  ;;  %v7055_v3 = vmul.f32 %v10092_v8, %v7035_v4 }
0x160f   :  { %v7074_v42 = vadd.f32 1.0, %v7070_v60  ;;  %v7069_v13 = vsel %vm7061_vm3, %v7057_v47, %v7065_v48  ;;  %v7060_v59 = vsub.f32 1.0, %v7056_v24 }
0x1610   :  { %v7073_v26 = vadd.f32 1.0, %v7069_v13  ;;  %v7059_v53 = vsub.f32 1.0, %v7055_v3  ;;  %v7268_v13 = vld [vmem:[%s13012_s13 + $0x8] sm:$0xff] }
0x1611   :  { %v7068_v38 = vsub.f32 0.0, %v7060_v59  ;;  %v7078_v54 = vmul.f32 %v7074_v42, %v6974_v40  ;;  %v7267_v42 = vld [vmem:[%s13012_s13] sm:$0xff] }
0x1612   :  { %v7077_v55 = vmul.f32 %v7073_v26, %v6973_v37  ;;  %v7067_v28 = vsub.f32 0.0, %v7059_v53  ;;  %v9352_v37 = vpack.c.bf16 %v7268_v13, %v7267_v42  ;;  %v7270_v26 = vld [vmem:[%s13012_s13 + $0x18] sm:$0xff] }
0x1613   :  { %v7072_v10 = vsel %vm7064_vm5, %v7060_v59, %v7068_v38  ;;  %v7269_v59 = vld [vmem:[%s13012_s13 + $0x10] sm:$0xff] }
0x1614   :  { %9084 = vmatprep.mubr.f32.mxu1 %v7077_v55  ;;  %v7071_v61 = vsel %vm7063_vm6, %v7059_v53, %v7067_v28  ;;  %v7076_v41 = vadd.f32 1.0, %v7072_v10  ;;  %v9356_v53 = vpack.c.bf16 %v7270_v26, %v7269_v59  ;;  %9353 = vmatprep.subr.bf16.mxu0 %v9352_v37 }
0x1615   :  { %9085 = vmatmul.mubr.f32.vlgmr.msra.gmra.mrb[62].mxu1 %v7078_v54  ;;  %v7075_v17 = vadd.f32 1.0, %v7071_v61  ;;  %9355 = vmatpush3.bf16.msra.mxu0 %v9352_v37 }
0x1616   :  { %v7080_v32 = vmul.f32 %v7076_v41, %v6976_v25  ;;  %9357 = vmatprep.subr.bf16.mxu0 %v9356_v53 }
0x1617   :  { %v7079_v57 = vmul.f32 %v7075_v17, %v6975_v18 }
0x1619   :  { %9087 = vmatprep.mubr.f32.mxu1 %v7079_v57  ;;  %9359 = vmatpush3.bf16.msra.mxu0 %v9356_v53 }
0x161a   :  { %9088 = vmatmul.mubr.f32.gmra.mrb[64].mxu1 %v7080_v32 }
0x161b   :  { %9143 = vmatprep.mubr.msk.f32.mxu1 %vm10703_vm1, %v13011_v35 }
0x16e8   :  { %v9086_v12 = vpop.f32.mrb[62].mxu1 }
0x16e9   :  { %v7176_v50 = vadd.f32 %v9086_v12, %v8445_v46  ;;  %v7170_v45 = vpop.f32.mrb[63].mxu1 }
0x16ea   :  { %v7171_v29 = vadd.f32 %v8445_v46, %v7170_v45 }
0x16eb   :  { %v7190_v63 = vadd.f32 %v7176_v50, %v12640_v22 }
0x16ec   :  { %v7189_v62 = vadd.f32 %v7171_v29, %v12638_v33  ;;  %v8447_v29 = vld [vmem:[#allocation27] ss:$0 sm:$0xff] }
0x16ed   :  { %v9089_v1 = vpop.f32.mrb[64].mxu1  ;;  %v7198_v15 = vsel %vm415_vm0, %v7190_v63, 0.0 }
0x16ee   :  { %v7186_v20 = vadd.f32 %v9089_v1, %v8445_v46  ;;  %v7180_v7 = vpop.f32.mrb[65].mxu1  ;;  %7199 = vadd.xlane.f32.xlu1 %v7198_v15  ;;  %v7195_v39 = vsel %vm415_vm0, %v7189_v62, 0.0 }
0x16ef   :  { %v7181_v11 = vadd.f32 %v8445_v46, %v7180_v7  ;;  %7196 = vadd.xlane.f32.xlu0 %v7195_v39  ;;  %v8446_v46 = vld [vmem:[#allocation25] ss:$0 sm:$0xff] }
0x16f0   :  { %v7192_v5 = vadd.f32 %v7186_v20, %v12646_v31 }
0x16f1   :  { %v7191_v34 = vadd.f32 %v7181_v11, %v12648_v14 }
0x16f2   :  { %v7204_v21 = vsel %vm415_vm0, %v7192_v5, 0.0 }
0x16f3   :  { %7205 = vadd.xlane.f32.xlu1 %v7204_v21  ;;  %v7201_v22 = vsel %vm415_vm0, %v7191_v34, 0.0 }
0x16f4   :  { %7202 = vadd.xlane.f32.xlu0 %v7201_v22 }
0x177b   :  { %v7200_v33 = vpop.xlane.xlu1 %7199 }
0x177c   :  { %v7208_v49 = vmul.f32 0.03125, %v7200_v33  ;;  %v7197_v52 = vpop.xlane.xlu0 %7196  ;;  %v7375_v33 = vld [vmem:[#allocation30] sm:$0xff] }
0x177d   :  { %v7207_v23 = vmul.f32 0.03125, %v7197_v52 }
0x177e   :  { %v7212_v43 = vsub.f32 %v7190_v63, %v7208_v49  ;;  %v8448_v49 = vld [vmem:[#allocation28] ss:$0 sm:$0xff] }
0x177f   :  { %v7211_v19 = vsub.f32 %v7189_v62, %v7207_v23 }
0x1780   :  { %v7206_v6 = vpop.xlane.xlu1 %7205  ;;  %v7216_v44 = vmul.f32 %v7212_v43, %v7212_v43 }
0x1781   :  { %v7210_v47 = vmul.f32 0.03125, %v7206_v6  ;;  %v7203_v9 = vpop.xlane.xlu0 %7202  ;;  %v7215_v31 = vmul.f32 %v7211_v19, %v7211_v19 }
0x1782   :  { %v7209_v14 = vmul.f32 0.03125, %v7203_v9  ;;  %v7222_v36 = vsel %vm415_vm0, %v7216_v44, 0.0 }
0x1783   :  { %v7214_v27 = vsub.f32 %v7192_v5, %v7210_v47  ;;  %7223 = vadd.xlane.f32.xlu1 %v7222_v36  ;;  %v7219_v4 = vsel %vm415_vm0, %v7215_v31, 0.0  ;;  %v7376_v36 = vld [vmem:[#allocation30 + $0x8] sm:$0xff] }
0x1784   :  { %v7213_v8 = vsub.f32 %v7191_v34, %v7209_v14  ;;  %7220 = vadd.xlane.f32.xlu0 %v7219_v4  ;;  %v7378_v4 = vld [vmem:[#allocation30 + $0x18] sm:$0xff] }
0x1785   :  { %v7218_v48 = vmul.f32 %v7214_v27, %v7214_v27 }
0x1786   :  { %v7217_v24 = vmul.f32 %v7213_v8, %v7213_v8 }
0x1787   :  { %v7228_v60 = vsel %vm415_vm0, %v7218_v48, 0.0  ;;  %v7480_v48 = vld [vmem:[#allocation31] sm:$0xff] }
0x1788   :  { %7229 = vadd.xlane.f32.xlu1 %v7228_v60  ;;  %v7225_v3 = vsel %vm415_vm0, %v7217_v24, 0.0  ;;  %v7574_v24 = vld [vmem:[%s13013_s2 + $0x10] sm:$0xff]  ;;  %v7575_v60 = vld [vmem:[%s13013_s2 + $0x18] sm:$0xff] }
0x1789   :  { %7226 = vadd.xlane.f32.xlu0 %v7225_v3  ;;  %v9378_v3 = vpack.c.bf16 %v7575_v60, %v7574_v24 }
0x1810   :  { %v7224_v40 = vpop.xlane.xlu1 %7223 }
0x1811   :  { %v7232_v38 = vmul.f32 0.03125, %v7224_v40  ;;  %v7221_v55 = vpop.xlane.xlu0 %7220 }
0x1812   :  { %v7231_v28 = vmul.f32 0.03125, %v7221_v55 }
0x1813   :  { %v7236_v54 = vadd.f32 1e-05, %v7232_v38 }
0x1814   :  { %v7235_v10 = vadd.f32 1e-05, %v7231_v28  ;;  %v8460_v28 = vld [vmem:[#allocation33] ss:$0 sm:$0xff] }
0x1815   :  { %10093 = vrsqrt.f32 %v7236_v54  ;;  %v7230_v61 = vpop.xlane.xlu1 %7229 }
0x1816   :  { %10095 = vrsqrt.f32 %v7235_v10  ;;  %v7234_v41 = vmul.f32 0.03125, %v7230_v61  ;;  %v7227_v18 = vpop.xlane.xlu0 %7226 }
0x1817   :  { %v7233_v17 = vmul.f32 0.03125, %v7227_v18 }
0x1818   :  { %v7238_v25 = vadd.f32 1e-05, %v7234_v41 }
0x1819   :  { %v7237_v57 = vadd.f32 1e-05, %v7233_v17 }
0x181a   :  { %10097 = vrsqrt.f32 %v7238_v25 }
0x181b   :  { %10099 = vrsqrt.f32 %v7237_v57 }
0x181f   :  { %v10094_v32 = vpop.eup %10093 }
0x1820   :  { %v10096_v12 = vpop.eup %10095  ;;  %v7244_v50 = vmul.f32 %v10094_v32, %v7212_v43 }
0x1821   :  { %v7243_v45 = vmul.f32 %v10096_v12, %v7211_v19 }
0x1822   :  { %v7254_v63 = vmul.f32 %v8446_v46, %v7244_v50 }
0x1823   :  { %v7253_v62 = vmul.f32 %v8446_v46, %v7243_v45 }
0x1824   :  { %v10098_v1 = vpop.eup %10097  ;;  %v7264_v39 = vadd.f32 %v8447_v29, %v7254_v63 }
0x1825   :  { %v10100_v15 = vpop.eup %10099  ;;  %v7263_v20 = vadd.f32 %v8447_v29, %v7253_v62  ;;  %v7246_v7 = vmul.f32 %v10098_v1, %v7214_v27  ;;  %v7377_v27 = vld [vmem:[#allocation30 + $0x10] sm:$0xff]  ;;  %v12783_v62 = vand.u32 127, %v3414_v58 }
0x1826   :  { %v7245_v11 = vmul.f32 %v10100_v15, %v7213_v8  ;;  %v9372_v8 = vpack.c.bf16 %v12222_v30, %v12205_v51  ;;  %v7573_v51 = vld [vmem:[%s13013_s2 + $0x8] sm:$0xff] }
0x1827   :  { %9098 = vmatprep.mubr.msk.f32.mxu0 %vm415_vm0, %v7263_v20  ;;  %v7256_v5 = vmul.f32 %v8446_v46, %v7246_v7 }
0x1828   :  { %9099 = vmatmul.mubr.msk.f32.vlgmr.msra.gmra.mrb[82].mxu0 %vm415_vm0, %v7264_v39  ;;  %v7255_v34 = vmul.f32 %v8446_v46, %v7245_v11 }
0x1829   :  { %v7266_v22 = vadd.f32 %v8447_v29, %v7256_v5 }
0x182a   :  { %v7265_v21 = vadd.f32 %v8447_v29, %v7255_v34 }
0x182c   :  { %9101 = vmatprep.mubr.msk.f32.mxu0 %vm415_vm0, %v7265_v21 }
0x182d   :  { %9102 = vmatmul.mubr.msk.f32.gmra.mrb[84].mxu0 %vm415_vm0, %v7266_v22 }
0x182e   :  { %9112 = vmatprep.mubr.msk.f32.mxu0 %vm415_vm0, %v7375_v33 }
0x18fb   :  { %v9100_v52 = vpop.f32.mrb[82].mxu0 }
0x18fc   :  { %v7362_v23 = vadd.f32 %v9100_v52, %v8448_v49  ;;  %v7356_v43 = vpop.f32.mrb[83].mxu0 }
0x18fd   :  { %v7357_v19 = vadd.f32 %v8448_v49, %v7356_v43 }
0x18ff   :  { %v9360_v6 = vpack.c.bf16 %v7362_v23, %v7357_v19 }
0x1900   :  { %v9103_v44 = vpop.f32.mrb[84].mxu0 }
0x1901   :  { %v7372_v47 = vadd.f32 %v9103_v44, %v8448_v49  ;;  %v7366_v9 = vpop.f32.mrb[85].mxu0  ;;  %9361 = vmatprep.subr.bf16.mxu0 %v9360_v6 }
0x1902   :  { %v7367_v31 = vadd.f32 %v8448_v49, %v7366_v9  ;;  %9363 = vmatpush3.bf16.msra.mxu0 %v9360_v6 }
0x1904   :  { %v9364_v14 = vpack.c.bf16 %v7372_v47, %v7367_v31 }
0x1906   :  { %9365 = vmatprep.subr.bf16.mxu0 %v9364_v14 }
0x1907   :  { %9367 = vmatpush3.bf16.msra.mxu0 %v9364_v14 }
0x1908   :  { %9368 = vmatprep.subr.bf16.mxu0 %v10704_v0 }
0x190a   :  { %9113 = vmatmul.mubr.msk.f32.vlgmr.msra.gmra.mrb[86].mxu0 %vm415_vm0, %v7376_v36 }
0x190b   :  { %9370 = vmatpush3.bf16.msra.mxu0 %v9369_v16  ;;  %9115 = vmatprep.mubr.msk.f32.mxu0 %vm415_vm0, %v7377_v27  ;;  %v7572_v16 = vld [vmem:[%s13013_s2] sm:$0xff] }
0x190c   :  { %9371 = vmatprep.subr.bf16.mxu0 %v10704_v0  ;;  %v9375_v30 = vpack.c.bf16 %v7573_v51, %v7572_v16 }
0x190e   :  { %9116 = vmatmul.mubr.msk.f32.gmra.mrb[88].mxu0 %vm415_vm0, %v7378_v4  ;;  %9376 = vmatpush3.bf16.msra.mxu1 %v9375_v30 }
0x190f   :  { %9373 = vmatpush3.bf16.msra.mxu0 %v9372_v8  ;;  %9126 = vmatprep.mubr.msk.f32.mxu0 %vm10703_vm1, %v13011_v35 }
0x1910   :  { %9380 = vmatprep.subr.bf16.mxu0 %v10704_v0  ;;  %9377 = vmatprep.subr.bf16.mxu1 %v10704_v0 }
0x1912   :  { %9127 = vmatmul.mubr.msk.f32.vlgmr.msra.gmra.mrb[90].mxu0 %vm415_vm0, %v7480_v48  ;;  %9379 = vmatpush3.bf16.msra.mxu1 %v9378_v3 }
0x1913   :  { %9129 = vmatprep.mubr.msk.f32.mxu0 %vm10703_vm1, %v13011_v35 }
0x1916   :  { %9130 = vmatmul.mubr.msk.f32.gmra.mrb[92].mxu0 %vm415_vm0, %v7481_v56 }
0x1917   :  { %9132 = vmatprep.mubr.msk.f32.mxu0 %vm10703_vm1, %v13011_v35 }
0x191a   :  { %9133 = vmatmul.mubr.msk.f32.gmra.mrb[94].mxu0 %vm415_vm0, %v7482_v2 }
0x191b   :  { %9156 = vmatprep.mubr.msk.f32.mxu0 %vm10703_vm1, %v13011_v35 }
0x19dd   :  { %v9114_v42 = vpop.f32.mrb[86].mxu0 }
0x19de   :  { %7477 = vst.msk [vmem:[#allocation36 + $0x8] sm:$0xff] %vm1826_vm9, %v9114_v42  ;;  %v7457_v13 = vpop.f32.mrb[87].mxu0 }
0x19df   :  { %7476 = vst.msk [vmem:[#allocation36] sm:$0xff] %vm1826_vm9, %v7457_v13 }
0x19e1   :  { %v9117_v59 = vpop.f32.mrb[88].mxu0 }
0x19e2   :  { %7479 = vst.msk [vmem:[#allocation36 + $0x18] sm:$0xff] %vm1826_vm9, %v9117_v59  ;;  %v7467_v37 = vpop.f32.mrb[89].mxu0 }
0x19e3   :  { %7478 = vst.msk [vmem:[#allocation36 + $0x10] sm:$0xff] %vm1826_vm9, %v7467_v37 }
0x19e5   :  { %v7558_v26 = vpop.f32.mrb[90].mxu0 }
0x19e6   :  { %v9128_v53 = vpop.f32.mrb[91].mxu0  ;;  %9144 = vmatmul.mubr.msk.f32.vlgmr.msra.gmra.mrb[66].mxu1 %vm415_vm0, %v7558_v26 }
0x19e7   :  { %9146 = vmatprep.mubr.msk.f32.mxu1 %vm10703_vm1, %v13011_v35 }
0x19e9   :  { %v7563_v0 = vpop.f32.mrb[92].mxu0 }
0x19ea   :  { %v9131_v40 = vpop.f32.mrb[93].mxu0  ;;  %9147 = vmatmul.mubr.msk.f32.gmra.mrb[68].mxu1 %vm415_vm0, %v7563_v0 }
0x19eb   :  { %9149 = vmatprep.mubr.msk.f32.mxu1 %vm10703_vm1, %v13011_v35 }
0x19ed   :  { %v7568_v38 = vpop.f32.mrb[94].mxu0 }
0x19ee   :  { %v9134_v55 = vpop.f32.mrb[95].mxu0  ;;  %9150 = vmatmul.mubr.msk.f32.gmra.mrb[70].mxu1 %vm415_vm0, %v7568_v38  ;;  %vm7785_vm0 = vcmask 126016  }
0x1ab9   :  { %v7658_v54 = vpop.f32.mrb[66].mxu1 }
0x1aba   :  { %v12764_v10 = vadd.f32 %v8460_v28, %v7658_v54  ;;  %v9145_v61 = vpop.f32.mrb[67].mxu1 }
0x1abc   :  { %v7779_v41 = vsel %vm7778_vm7, %v12764_v10, -inf  ;;  %v7675_v18 = vsel %vm7674_vm8, %v12764_v10, -inf }
0x1abd   :  { %7780 = vmax.xlane.f32.xlu0 %v7779_v41  ;;  %7676 = vmax.xlane.f32.xlu1 %v7675_v18  ;;  %v7663_v17 = vpop.f32.mrb[68].mxu1 }
0x1abe   :  { %v12770_v25 = vadd.f32 %v8460_v28, %v7663_v17  ;;  %v9148_v57 = vpop.f32.mrb[69].mxu1 }
0x1ac0   :  { %v7782_v32 = vsel %vm7778_vm7, %v12770_v25, -inf  ;;  %v7678_v46 = vsel %vm7674_vm8, %v12770_v25, -inf }
0x1ac1   :  { %7783 = vmax.xlane.f32.xlu0 %v7782_v32  ;;  %7679 = vmax.xlane.f32.xlu1 %v7678_v46  ;;  %v7668_v12 = vpop.f32.mrb[70].mxu1 }
0x1ac2   :  { %v12776_v50 = vadd.f32 %v8460_v28, %v7668_v12  ;;  %v9151_v45 = vpop.f32.mrb[71].mxu1 }
0x1ac4   :  { %v7786_v29 = vsel %vm7785_vm0, %v12776_v50, -inf  ;;  %v7682_v63 = vsel %vm7681_vm10, %v12776_v50, -inf }
0x1ac5   :  { %7787 = vmax.xlane.f32.xlu0 %v7786_v29  ;;  %7683 = vmax.xlane.f32.xlu1 %v7682_v63 }
0x1adb   :  { %7844 = vrot.lane.b32.xlu0 %v12783_v62, %s10683_s22 }
0x1b4a   :  { %v7781_v1 = vpop.xlane.xlu0 %7780  ;;  %v7677_v15 = vpop.xlane.xlu1 %7676 }
0x1b4b   :  { %vm7721_vm4 = vcmp.ge.f32.partialorder %v12764_v10, %v7677_v15  ;;  %vm7841_vm12 = vcmp.ge.f32.partialorder %v12764_v10, %v7781_v1  ;;  %v7789_v16 = vsub.f32 %v12764_v10, %v7781_v1  ;;  %v7685_v26 = vsub.f32 %v12764_v10, %v7677_v15 }
0x1b4c   :  { %v7724_v5 = vsel %vm7721_vm4, %v12783_v62, 8 }
0x1b4d   :  { %v7727_v52 = vsel %vm7674_vm8, %v7724_v5, 2147483647  ;;  %v7792_v30 = vmul.f32 1.442695, %v7789_v16  ;;  %v7688_v53 = vmul.f32 1.442695, %v7685_v26 }
0x1b4e   :  { %v7784_v20 = vpop.xlane.xlu0 %7783  ;;  %v12787_v7 = vpop.xlane.xlu1 %7679  ;;  %v7729_v44 = vshra.s32 %v7727_v52, 16  ;;  %v7728_v54 = vand.u32 65535, %v7727_v52 }
0x1b4f   :  { %vm7842_vm13 = vcmp.ge.f32.partialorder %v12770_v25, %v7784_v20  ;;  %vm7722_vm14 = vcmp.ge.f32.partialorder %v12770_v25, %v12787_v7  ;;  %v7790_v24 = vsub.f32 %v12770_v25, %v7784_v20  ;;  %10101 = vpow2.f32 %v7792_v30 }
0x1b50   :  { %v7725_v9 = vsel %vm7722_vm14, %v12783_v62, 8  ;;  %v7731_v31 = vcvt.s32.f32 %v7729_v44  ;;  %v7730_v17 = vcvt.s32.f32 %v7728_v54  ;;  %v7912_v44 = vld [vmem:[%s13014_s27] sm:$0xff]  ;;  %vm7773_vm14 = vcmp.lt.s32.totalorder %v12783_v62, 8 }
0x1b51   :  { %v7742_v36 = vsel %vm7674_vm8, %v7725_v9, 2147483647  ;;  %v7794_v60 = vmul.f32 1.442695, %v7790_v24 }
0x1b52   :  { %v7788_v39 = vpop.xlane.xlu0 %7787  ;;  %v7684_v11 = vpop.xlane.xlu1 %7683  ;;  %v7744_v8 = vshra.s32 %v7742_v36, 16  ;;  %v7743_v45 = vand.u32 65535, %v7742_v36 }
0x1b53   :  { %vm7723_vm11 = vcmp.ge.f32.partialorder %v12776_v50, %v7684_v11  ;;  %vm7843_vm15 = vcmp.ge.f32.partialorder %v12776_v50, %v7788_v39  ;;  %v7791_v3 = vsub.f32 %v12776_v50, %v7788_v39  ;;  %10103 = vpow2.f32 %v7794_v60 }
0x1b54   :  { %v7726_v34 = vsel %vm7723_vm11, %v12783_v62, 8  ;;  %v7746_v56 = vcvt.s32.f32 %v7744_v8  ;;  %v7687_v0 = vsub.f32 %v12776_v50, %v7684_v11  ;;  %v7745_v15 = vcvt.s32.f32 %v7743_v45 }
0x1b55   :  { %v12795_v21 = vsel %vm7681_vm10, %v7726_v34, 2147483647  ;;  %v7796_v42 = vmul.f32 1.442695, %v7791_v3 }
0x1b56   :  { %v7845_v58 = vpop.permute.xlu0 %7844  ;;  %v7759_v33 = vshra.s32 %v12795_v21, 16  ;;  %v7692_v40 = vmul.f32 1.442695, %v7687_v0 }
0x1b57   :  { %v7846_v22 = vsel %vm7841_vm12, %v7845_v58, 8  ;;  %v7847_v23 = vsel %vm7842_vm13, %v7845_v58, 8  ;;  %v7848_v27 = vsel %vm7843_vm15, %v7845_v58, 8  ;;  %10105 = vpow2.f32 %v7796_v42 }
0x1b58   :  { %v7849_v49 = vsel %vm7778_vm7, %v7846_v22, 2147483647  ;;  %v12803_v19 = vcvt.s32.f32 %v7759_v33  ;;  %v7864_v47 = vsel %vm7778_vm7, %v7847_v23, 2147483647  ;;  %v7879_v48 = vsel %vm7785_vm0, %v7848_v27, 2147483647 }
0x1b59   :  { %v7851_v43 = vshra.s32 %v7849_v49, 16  ;;  %v7866_v14 = vshra.s32 %v7864_v47, 16  ;;  %v7881_v2 = vshra.s32 %v7879_v48, 16  ;;  %v12814_v13 = vpop.eup %10101  ;;  %10107 = vpow2.f32 %v7688_v53 }
0x1b5a   :  { %7762 = vmin.xlane.f32.xlu0 %v12803_v19  ;;  %v7850_v38 = vand.u32 65535, %v7849_v49  ;;  %10109 = vpow2.f32 %v7692_v40  ;;  %v7865_v10 = vand.u32 65535, %v7864_v47  ;;  %v7880_v20 = vand.u32 65535, %v7879_v48  ;;  %v7913_v47 = vld [vmem:[%s13014_s27 + $0x8] sm:$0xff] }
0x1b5b   :  { %v7853_v6 = vcvt.s32.f32 %v7851_v43  ;;  %v7868_v4 = vcvt.s32.f32 %v7866_v14  ;;  %v7883_v51 = vcvt.s32.f32 %v7881_v2  ;;  %v7758_v58 = vand.u32 65535, %v12795_v21 }
0x1b5c   :  { %v7852_v28 = vcvt.s32.f32 %v7850_v38  ;;  %v7867_v50 = vcvt.s32.f32 %v7865_v10  ;;  %v7882_v34 = vcvt.s32.f32 %v7880_v20  ;;  %v7686_v22 = vsub.f32 %v12770_v25, %v12787_v7 }
0x1b5d   :  { %7854 = vmin.xlane.f32.xlu1 %v7853_v6  ;;  %v12818_v59 = vpop.eup %10103  ;;  %v7760_v52 = vcvt.s32.f32 %v7758_v58  ;;  %v9381_v9 = vpack.c.bf16 %v7913_v47, %v7912_v44  ;;  %vm7894_vm12 = vcmp.ge.s32.totalorder %v12783_v62, 8  ;;  %vm7895_vm13 = vcmp.lt.s32.totalorder %v12783_v62, 16 }
0x1b5e   :  { %v7690_v23 = vmul.f32 1.442695, %v7686_v22  ;;  %vm12866_vm15 = vmand %vm7894_vm12, %vm7895_vm13 }
0x1b5f   :  { %9382 = vmatpush3.bf16.msra.mxu0 %v9381_v9 }
0x1b60   :  { %10111 = vpow2.f32 %v7690_v23 }
0x1b61   :  { %7732 = vmin.xlane.f32.xlu1 %v7731_v31  ;;  %v12822_v37 = vpop.eup %10105 }
0x1b63   :  { %v12831_v41 = vpop.eup %10107 }
0x1b64   :  { %v7694_v57 = vsel %vm7674_vm8, %v12831_v41, 0.0  ;;  %v12835_v46 = vpop.eup %10109 }
0x1b65   :  { %7869 = vmin.xlane.f32.xlu1 %v7868_v4  ;;  %v7700_v29 = vsel %vm7681_vm10, %v12835_v46, 0.0 }
0x1b69   :  { %7747 = vmin.xlane.f32.xlu1 %v7746_v56 }
0x1b6d   :  { %7884 = vmin.xlane.f32.xlu1 %v7883_v51 }
0x1b7e   :  { %7801 = vrot.lane.b32.xlu1 %v12814_v13, %s10712_s25 }
0x1b82   :  { %7803 = vrot.lane.b32.xlu1 %v12818_v59, %s10712_s25 }
0x1b86   :  { %7805 = vrot.lane.b32.xlu1 %v12822_v37, %s10712_s25 }
0x1be7   :  { %v12842_v11 = vpop.xlane.xlu0 %7762 }
0x1be8   :  { %vm7764_vm11 = vcmp.eq.f32.partialorder %v12803_v19, %v12842_v11  ;;  %v12857_v19 = vpop.eup %10111 }
0x1be9   :  { %v7765_v43 = vsel %vm7764_vm11, %v7760_v52, inf  ;;  %v7697_v14 = vsel %vm7674_vm8, %v12857_v19, 0.0 }
0x1bea   :  { %v12828_v55 = vpop.xlane.xlu1 %7854 }
0x1beb   :  { %vm7856_vm2 = vcmp.eq.f32.partialorder %v7853_v6, %v12828_v55  ;;  %v7861_v36 = vcvt.f32.s32 %v12828_v55 }
0x1bec   :  { %v7857_v61 = vsel %vm7856_vm2, %v7852_v28, inf }
0x1bed   :  { %7858 = vmin.xlane.f32.xlu1 %v7857_v61  ;;  %v7862_v48 = vshll.u32 %v7861_v36, 16 }
0x1bee   :  { %v7733_v18 = vpop.xlane.xlu1 %7732 }
0x1bef   :  { %vm7734_vm3 = vcmp.eq.f32.partialorder %v7731_v31, %v7733_v18 }
0x1bf0   :  { %v7735_v32 = vsel %vm7734_vm3, %v7730_v17, inf }
0x1bf1   :  { %7695 = vadd.xlane.f32.xlu1 %v7694_v57  ;;  %7736 = vmin.xlane.f32.xlu0 %v7735_v32 }
0x1bf2   :  { %v12837_v12 = vpop.xlane.xlu1 %7869 }
0x1bf3   :  { %vm7871_vm5 = vcmp.eq.f32.partialorder %v7868_v4, %v12837_v12  ;;  %v7739_v4 = vcvt.f32.s32 %v7733_v18  ;;  %v7876_v30 = vcvt.f32.s32 %v12837_v12  ;;  %v7769_v12 = vcvt.f32.s32 %v12842_v11 }
0x1bf4   :  { %v7872_v63 = vsel %vm7871_vm5, %v7867_v50, inf }
0x1bf5   :  { %7701 = vadd.xlane.f32.xlu1 %v7700_v29  ;;  %7873 = vmin.xlane.f32.xlu0 %v7872_v63  ;;  %v7740_v16 = vshll.u32 %v7739_v4, 16  ;;  %v7877_v40 = vshll.u32 %v7876_v30, 16 }
0x1bf6   :  { %v7748_v1 = vpop.xlane.xlu1 %7747 }
0x1bf7   :  { %vm7749_vm6 = vcmp.eq.f32.partialorder %v7746_v56, %v7748_v1  ;;  %v7754_v26 = vcvt.f32.s32 %v7748_v1 }
0x1bf8   :  { %v7750_v39 = vsel %vm7749_vm6, %v7745_v15, inf }
0x1bf9   :  { %7751 = vmin.xlane.f32.xlu0 %v7750_v39  ;;  %v7755_v61 = vshll.u32 %v7754_v26, 16  ;;  %v7770_v39 = vshll.u32 %v7769_v12, 16 }
0x1bfa   :  { %v12844_v5 = vpop.xlane.xlu1 %7884 }
0x1bfb   :  { %vm7886_vm4 = vcmp.eq.f32.partialorder %v7883_v51, %v12844_v5  ;;  %v7891_v17 = vcvt.f32.s32 %v12844_v5 }
0x1bfc   :  { %v7887_v33 = vsel %vm7886_vm4, %v7882_v34, inf }
0x1bfd   :  { %7888 = vmin.xlane.f32.xlu0 %v7887_v33  ;;  %v7892_v29 = vshll.u32 %v7891_v17, 16 }
0x1bfe   :  { %v7802_v49 = vpop.permute.xlu1 %7801 }
0x1bff   :  { %v7810_v21 = vsel %vm7674_vm8, %v7802_v49, 0.0 }
0x1c01   :  { %7766 = vmin.xlane.f32.xlu0 %v7765_v43 }
0x1c02   :  { %v7804_v6 = vpop.permute.xlu1 %7803 }
0x1c03   :  { %v7813_v25 = vsel %vm7674_vm8, %v7804_v6, 0.0 }
0x1c05   :  { %7811 = vadd.xlane.f32.xlu0 %v7810_v21 }
0x1c06   :  { %v7806_v7 = vpop.permute.xlu1 %7805 }
0x1c07   :  { %v7816_v31 = vsel %vm7681_vm10, %v7806_v7, 0.0 }
0x1c09   :  { %7814 = vadd.xlane.f32.xlu0 %v7813_v25 }
0x1c0d   :  { %7817 = vadd.xlane.f32.xlu0 %v7816_v31 }
0x1c11   :  { %7698 = vadd.xlane.f32.xlu0 %v7697_v14 }
0x1c7a   :  { %v7859_v27 = vpop.xlane.xlu1 %7858 }
0x1c7b   :  { %v7860_v8 = vcvt.f32.s32 %v7859_v27 }
0x1c7d   :  { %v7863_v56 = vadd.s32 %v7862_v48, %v7860_v8 }
0x1c7e   :  { %v7737_v2 = vpop.xlane.xlu0 %7736 }
0x1c7f   :  { %v7738_v51 = vcvt.f32.s32 %v7737_v2  ;;  %v7897_v3 = vadd.s32 8, %v7863_v56 }
0x1c81   :  { %v7741_v60 = vadd.s32 %v7740_v16, %v7738_v51 }
0x1c82   :  { %v7874_v42 = vpop.xlane.xlu0 %7873 }
0x1c83   :  { %v7775_v53 = vsel %vm7773_vm14, %v7741_v60, 0  ;;  %v7875_v0 = vcvt.f32.s32 %v7874_v42 }
0x1c84   :  { %v7900_v38 = vsel %vm12866_vm15, %v7897_v3, %v7775_v53 }
0x1c85   :  { %vm7903_vm2 = vcmp.eq.s32.totalorder %v12783_v62, %v7900_v38  ;;  %v7878_v55 = vadd.s32 %v7877_v40, %v7875_v0 }
0x1c86   :  { %v7752_v28 = vpop.xlane.xlu0 %7751  ;;  %v8464_v54 = vsel %vm7903_vm2, 1.0, %v13011_v35 }
0x1c87   :  { %v7753_v18 = vcvt.f32.s32 %v7752_v28  ;;  %9157 = vmatmul.mubr.msk.f32.vlgmr.msra.gmra.mrb[96].mxu0 %vm1826_vm9, %v8464_v54  ;;  %v7898_v57 = vadd.s32 8, %v7878_v55 }
0x1c88   :  { %9159 = vmatprep.mubr.msk.f32.mxu0 %vm10703_vm1, %v13011_v35 }
0x1c89   :  { %v7756_v10 = vadd.s32 %v7755_v61, %v7753_v18 }
0x1c8a   :  { %v7889_v32 = vpop.xlane.xlu0 %7888 }
0x1c8b   :  { %v7776_v50 = vsel %vm7773_vm14, %v7756_v10, 0  ;;  %v7890_v45 = vcvt.f32.s32 %v7889_v32 }
0x1c8c   :  { %v7901_v63 = vsel %vm12866_vm15, %v7898_v57, %v7776_v50 }
0x1c8d   :  { %vm7904_vm3 = vcmp.eq.s32.totalorder %v12783_v62, %v7901_v63  ;;  %v7893_v1 = vadd.s32 %v7892_v29, %v7890_v45 }
0x1c8e   :  { %v7767_v15 = vpop.xlane.xlu0 %7766  ;;  %v8465_v20 = vsel %vm7904_vm3, 1.0, %v13011_v35 }
0x1c8f   :  { %v7768_v5 = vcvt.f32.s32 %v7767_v15  ;;  %9160 = vmatmul.mubr.msk.f32.gmra.mrb[98].mxu0 %vm1826_vm9, %v8465_v20  ;;  %v7899_v34 = vadd.s32 8, %v7893_v1 }
0x1c90   :  { %9162 = vmatprep.mubr.msk.f32.mxu0 %vm10703_vm1, %v13011_v35  ;;  %vm8019_vm1 = vcmask 57344  }
0x1c91   :  { %v7771_v11 = vadd.s32 %v7770_v39, %v7768_v5 }
0x1c92   :  { %v7812_v58 = vpop.xlane.xlu0 %7811 }
0x1c93   :  { %v7777_v22 = vsel %vm7773_vm14, %v7771_v11, 0  ;;  %10113 = vrcp.f32 %v7812_v58 }
0x1c94   :  { %v7902_v33 = vsel %vm12866_vm15, %v7899_v34, %v7777_v22 }
0x1c95   :  { %vm7905_vm5 = vcmp.eq.s32.totalorder %v12783_v62, %v7902_v33 }
0x1c96   :  { %v7815_v49 = vpop.xlane.xlu0 %7814  ;;  %v8466_v52 = vsel %vm7905_vm5, 1.0, %v13011_v35 }
0x1c97   :  { %10115 = vrcp.f32 %v7815_v49  ;;  %9163 = vmatmul.mubr.msk.f32.gmra.mrb[100].mxu0 %vm1826_vm9, %v8466_v52 }
0x1c9a   :  { %v7818_v23 = vpop.xlane.xlu0 %7817 }
0x1c9b   :  { %10117 = vrcp.f32 %v7818_v23 }
0x1c9d   :  { %v10114_v43 = vpop.eup %10113 }
0x1c9e   :  { %v7822_v21 = vmul.f32 %v10114_v43, %v12814_v13  ;;  %v7696_v13 = vpop.xlane.xlu1 %7695 }
0x1ca0   :  { %v7825_v47 = vsel %vm7778_vm7, %v7822_v21, 0.0 }
0x1ca1   :  { %v10116_v6 = vpop.eup %10115 }
0x1ca2   :  { %v7823_v25 = vmul.f32 %v10116_v6, %v12818_v59  ;;  %v7699_v59 = vpop.xlane.xlu0 %7698  ;;  %v7702_v56 = vpop.xlane.xlu1 %7701 }
0x1ca3   :  { %10119 = vrcp.f32 %v7699_v59 }
0x1ca4   :  { %v7826_v7 = vsel %vm7778_vm7, %v7823_v25, 0.0  ;;  %10121 = vrcp.f32 %v7696_v13 }
0x1ca5   :  { %v10118_v44 = vpop.eup %10117  ;;  %v7827_v9 = vadd.f32 %v7826_v7, %v7825_v47  ;;  %10123 = vrcp.f32 %v7702_v56 }
0x1ca6   :  { %v7824_v62 = vmul.f32 %v10118_v44, %v12822_v37 }
0x1ca8   :  { %v7828_v35 = vsel %vm7785_vm0, %v7824_v62, 0.0 }
0x1ca9   :  { %v7829_v31 = vadd.f32 %v7828_v35, %v7827_v9 }
0x1cab   :  { %v7830_v14 = vrot.slane %v7829_v31, 4 }
0x1cad   :  { %v7831_v36 = vadd.f32 %v7830_v14, %v7829_v31  ;;  %v10120_v2 = vpop.eup %10119 }
0x1cae   :  { %v10122_v37 = vpop.eup %10121  ;;  %v7707_v16 = vmul.f32 %v10120_v2, %v12857_v19 }
0x1caf   :  { %v7832_v27 = vrot.slane %v7831_v36, 2  ;;  %v7706_v51 = vmul.f32 %v10122_v37, %v12831_v41  ;;  %v10124_v30 = vpop.eup %10123 }
0x1cb0   :  { %v7710_v24 = vsel %vm7674_vm8, %v7707_v16, 0.0  ;;  %v7708_v60 = vmul.f32 %v10124_v30, %v12835_v46 }
0x1cb1   :  { %v7833_v4 = vadd.f32 %v7832_v27, %v7831_v36  ;;  %v7709_v3 = vsel %vm7674_vm8, %v7706_v51, 0.0 }
0x1cb2   :  { %v7711_v42 = vadd.f32 %v7710_v24, %v7709_v3  ;;  %v7712_v26 = vsel %vm7681_vm10, %v7708_v60, 0.0 }
0x1cb3   :  { %v7834_v8 = vrot.slane %v7833_v4, 1 }
0x1cb4   :  { %v7713_v53 = vadd.f32 %v7712_v26, %v7711_v42 }
0x1cb5   :  { %v7835_v48 = vadd.f32 %v7834_v8, %v7833_v4 }
0x1cb6   :  { %v7714_v0 = vrot.slane %v7713_v53, 4 }
0x1cb7   :  { %7837 = vrot.lane.b32.xlu0 %v7835_v48, %s10712_s25 }
0x1cb8   :  { %v7715_v40 = vadd.f32 %v7714_v0, %v7713_v53 }
0x1cba   :  { %v7716_v38 = vrot.slane %v7715_v40, 2 }
0x1cbc   :  { %v7717_v55 = vadd.f32 %v7716_v38, %v7715_v40 }
0x1cbe   :  { %v7718_v28 = vrot.slane %v7717_v55, 1 }
0x1cc0   :  { %v7719_v54 = vadd.f32 %v7718_v28, %v7717_v55 }
0x1d29   :  { %v7838_v19 = vpop.permute.xlu0 %7837 }
0x1d2a   :  { %v7840_v61 = vadd.f32 %v7838_v19, %v7719_v54 }
0x1d2c   :  { %v8014_v41 = vmul.f32 0.025, %v7840_v61 }
0x1d2e   :  { %v8015_v18 = vadd.f32 1e-07, %v8014_v41 }
0x1d30   :  { %10125 = vlog2.f32 %v8015_v18 }
0x1d3a   :  { %v10126_v17 = vpop.eup %10125 }
0x1d3b   :  { %v8017_v10 = vmul.f32 0.6931472, %v10126_v17 }
0x1d3d   :  { %v8018_v46 = vmul.f32 %v8017_v10, %v8014_v41 }
0x1d3f   :  { %v8020_v57 = vsel %vm8019_vm1, %v8018_v46, 0.0 }
0x1d40   :  { %8021 = vadd.xlane.f32.xlu1 %v8020_v57 }
0x1d41   :  { %10580 = shalt.err (!%p10577_p10)
}
0x1d42   :  { %s10581_s6 = scalar_lea.hbm %s10918_s21, 512 }
0x1d43   :  { %p10582_p11 = scmp.ne.s32.totalorder %s10918_s21, %s10581_s6  ;;  %p10585_p12 = scmp.lt.u32.totalorder %s10581_s6, %s10918_s21 }
0x1d45   :  { %p10587_p13 = pnand %p10585_p12, %p10582_p11 }
0x1d47   :  { %10590 = shalt.err (!%p10587_p13)
}
0x1d48   :  { %8039 = dma.vmem_to_hbm [thread:$0]  %s8034_s7, 512, %s10918_s21, [#allocation6], %s10682_s18, %s10682_s18, %s10683_s22   ;;  %v8467_v32 = vld [vmem:[#allocation34] ss:$0 sm:$0xff]  ;;  %vm8012_vm7 = vcmask 125952   ;;  %vm8026_vm8 = vcmask 0  }
0x1d49   :  { %s10714_s21 = smov [#allocation37]  }
0x1d4a   :  { %s8048_s18 = sshll.u32 %s10714_s21, 4  ;;  %s8049_s18 = int_to_ptr.vmem [resolvable:$true] %s8048_s18 }
0x1d4b   :  { %s10591_s22 = scalar_lea.vmem %s8049_s18, 16  ;;  %s10595_s0 = scalar_lea.vmem %s8049_s18, 32 }
0x1d4c   :  { %p10592_p0 = scmp.ne.s32.totalorder %s8049_s18, %s10591_s22  ;;  %p10596_p1 = scmp.lt.s32.totalorder %s8049_s18, %s8049_s18 }
0x1d4d   :  { %p10597_p2 = scmp.lt.s32.totalorder %s10595_s0, %s10591_s22 }
0x1d4f   :  { %p10598_p3 = por %p10597_p2, %p10596_p1 }
0x1d51   :  { %p10599_p4 = pnand %p10598_p3, %p10592_p0 }
0x1d5a   :  { %v7996_v12 = vpop.f32.mrb[96].mxu0 }
0x1d5b   :  { %v7997_v50 = vadd.f32 %v8467_v32, %v7996_v12  ;;  %v9158_v45 = vpop.f32.mrb[97].mxu0 }
0x1d5d   :  { %8010 = vst.msk [vmem:[%s10923_s5] sm:$0xff] %vm1826_vm9, %v7997_v50 }
0x1d62   :  { %v8001_v29 = vpop.f32.mrb[98].mxu0 }
0x1d63   :  { %v8002_v63 = vadd.f32 %v8467_v32, %v8001_v29  ;;  %v9161_v1 = vpop.f32.mrb[99].mxu0 }
0x1d65   :  { %8011 = vst.msk [vmem:[%s10923_s5 + $0x8] sm:$0xff] %vm1826_vm9, %v8002_v63 }
0x1d6a   :  { %v8006_v15 = vpop.f32.mrb[100].mxu0 }
0x1d6b   :  { %v8007_v20 = vadd.f32 %v8467_v32, %v8006_v15  ;;  %v9164_v39 = vpop.f32.mrb[101].mxu0 }
0x1d6d   :  { %8013 = vst.msk [vmem:[%s10923_s5 + $0x10] sm:$0xf] %vm8012_vm7, %v8007_v20 }
0x1dcd   :  { %v8022_v5 = vpop.xlane.xlu1 %8021 }
0x1dce   :  { %v8023_v11 = vsub.f32 0.0, %v8022_v5 }
0x1dd0   :  { %v8024_v34 = vmul.f32 1.442695, %v8023_v11 }
0x1dd2   :  { %10127 = vpow2.f32 %v8024_v34 }
0x1ddc   :  { %v10128_v58 = vpop.eup %10127 }
0x1ddd   :  { %8027 = vst.msk [vmem:[#allocation37] sm:$0x1] %vm8026_vm8, %v10128_v58 }
0x1dde   :  { %10602 = shalt.err (!%p10599_p4)
}
0x1ddf   :  { %s10603_s5 = scalar_lea.hbm %s10928_s17, 16 }
0x1de0   :  { %p10604_p5 = scmp.ne.s32.totalorder %s10928_s17, %s10603_s5  ;;  %p10607_p6 = scmp.lt.u32.totalorder %s10603_s5, %s10928_s17 }
0x1de2   :  { %p10609_p7 = pnand %p10607_p6, %p10604_p5 }
0x1de4   :  { %10612 = shalt.err (!%p10609_p7)
}
0x1de5   :  { %8051 = dma.vmem_to_hbm [thread:$0]  %s8049_s18, 16, %s10928_s17, [#allocation38]  }
0x1de6   :  { %10635 = dma.done.wait [#allocation6], 512  }
0x1de7   :  { %10636 = vsyncadd [#allocation6], 4294966784 }
0x1de8   :  { %10637 = dma.done.wait [#allocation38], 16  }
0x1de9   :  { %10638 = vsyncadd [#allocation38], 4294967280 }
0x1dea   :  { %8060 = vsyncpa [#allocation5], 1 }
0x1deb   :  { %8061 = vsyncpa [#allocation8], 1 }
0x1dec   :  { %8062 = vsyncpa [#allocation11], 1 }
0x1ded   :  { %8063 = vsyncpa [#allocation14], 1 }
0x1dee   :  { %8064 = vsyncpa [#allocation17], 1 }
0x1def   :  { %8065 = vsyncpa [#allocation20], 1 }
0x1df0   :  { %8066 = vsyncpa [#allocation23], 1 }
0x1df1   :  { %8067 = vsyncpa [#allocation26], 1 }
0x1df2   :  { %8068 = vsyncpa [#allocation29], 1 }
0x1df3   :  { %8069 = vsyncpa [#allocation32], 1 }
0x1df4   :  { %8070 = vsyncpa [#allocation35], 1 }
0x1df5   :  { %8071 = vsyncpa [#allocation6], 1 }
0x1df6   :  { %8072 = vsyncpa [#allocation38], 1 }

</bundles_post_ra>
